<compile_context>
chip_gen: v7x
topology: tpu7x:2x2x1
jax: 0.10.0
libtpu: 0.0.40
codegen_flags: <defaults>
</compile_context>

<pallas_src>
import functools

import jax
import jax.numpy as jnp
import numpy as np
from jax import lax
from jax.experimental import pallas as pl
from jax.experimental.pallas import tpu as pltpu

# ------------------------- model hyper-params (small demo) --------------------
VISION_DIM = 16                       # params.vision_embedding_dim
PROPRIO_DIM = 4                       # params.proprioception_dim
IN_DIM = VISION_DIM + PROPRIO_DIM     # 20
LATENT_DIM = 8                        # params.latent_dim
LAYER_SIZE = 128                      # 2048 in the original; 128 keeps each gate
                                      # slice exactly one 128-lane vreg wide
EPSILON = 1e-4

BATCH = 2
SEQ = 8
SUBLANES = 8                          # f32 sublane count -> pad batch to this


# ------------------------------- Pallas kernel ---------------------------------
def _plan_recognition_kernel(x_ref,                                    # (T*Bp, D)
                             wih1_ref, whh1f_ref, whh1b_ref, b1_ref,   # layer 1
                             wih2f_ref, whh2f_ref, b2f_ref,            # layer 2 fwd
                             wih2b_ref, whh2b_ref, b2b_ref,            # layer 2 bwd
                             wmu_ref, bmu_ref, wsig_ref, bsig_ref,     # heads
                             mu_ref, sig_ref,                          # (Bp, L) each
                             gates1_scr, gates2_scr, out1_scr,         # VMEM scratch
                             *, T, Bp, H):
    f32 = jnp.float32
    G = 4 * H                                   # one direction's gate width

    def cell(gx, h, c, whh_ref):
        """One LSTM cell. gx already holds x@W_ih + (b_ih + b_hh). Gates [i,f,g,o]."""
        gates = gx + jnp.dot(h, whh_ref[...], preferred_element_type=f32)
        i_g = jax.nn.sigmoid(gates[:, 0 * H:1 * H])
        f_g = jax.nn.sigmoid(gates[:, 1 * H:2 * H])
        g_g = jnp.tanh(gates[:, 2 * H:3 * H])
        o_g = jax.nn.sigmoid(gates[:, 3 * H:4 * H])
        c_new = f_g * c + i_g * g_g
        h_new = o_g * jnp.tanh(c_new)
        return h_new, c_new

    zeros = jnp.zeros((Bp, H), f32)

    # ---- layer 1: hoisted input projection (fwd | bwd gates in ONE matmul) ----
    gates1_scr[...] = (jnp.dot(x_ref[...], wih1_ref[...],
                               preferred_element_type=f32) + b1_ref[...])

    # Interleaved fwd/bwd recurrence: two independent dependency chains per
    # iteration so EUP/MXU latency of one chain hides behind the other.
    hf, cf = zeros, zeros
    hb, cb = zeros, zeros
    for t in range(T):
        tb = T - 1 - t
        hf, cf = cell(gates1_scr[t * Bp:(t + 1) * Bp, 0:G], hf, cf, whh1f_ref)
        hb, cb = cell(gates1_scr[tb * Bp:(tb + 1) * Bp, G:2 * G], hb, cb, whh1b_ref)
        out1_scr[t * Bp:(t + 1) * Bp, 0:H] = hf
        out1_scr[tb * Bp:(tb + 1) * Bp, H:2 * H] = hb

    # ---- layer 2 backward direction: output at t=T-1 is its FIRST step from a
    # zero state -> one (Bp, 2H)x(2H, 4H) projection and one cell. Done early so
    # it is fully independent of the forward chain below.
    last1 = out1_scr[(T - 1) * Bp:T * Bp, :]
    g2b = (jnp.dot(last1, wih2b_ref[...], preferred_element_type=f32)
           + b2b_ref[...])
    h2_bwd_last, _ = cell(g2b, zeros, zeros, whh2b_ref)

    # ---- layer 2 forward direction: hoisted projection over full layer-1 output
    gates2_scr[...] = (jnp.dot(out1_scr[...], wih2f_ref[...],
                               preferred_element_type=f32) + b2f_ref[...])
    hf, cf = zeros, zeros
    for t in range(T):
        hf, cf = cell(gates2_scr[t * Bp:(t + 1) * Bp, :], hf, cf, whh2f_ref)
    h2_fwd_last = hf

    feat = jnp.concatenate([h2_fwd_last, h2_bwd_last], axis=-1)       # (Bp, 2H)

    # heads: epsilon already folded into bsig by the wrapper.
    mu_ref[...] = (jnp.dot(feat, wmu_ref[...], preferred_element_type=f32)
                   + bmu_ref[...])
    sig_pre = (jnp.dot(feat, wsig_ref[...], preferred_element_type=f32)
               + bsig_ref[...])
    # numerically-stable softplus (Mosaic-safe, EUP-friendly)
    sig_ref[...] = (jnp.maximum(sig_pre, 0.0)
                    + jnp.log(1.0 + jnp.exp(-jnp.abs(sig_pre))))


# --------------------------------- wrapper --------------------------------------
def plan_recognition_pallas(x, params):
    """x: (B, T, IN_DIM) float32. Returns (mu, sigma), each (B, LATENT_DIM)."""
    H, L = LAYER_SIZE, LATENT_DIM
    B, T, D = x.shape
    Bp = ((B + SUBLANES - 1) // SUBLANES) * SUBLANES   # pad batch to full sublanes

    # time-major, batch-padded, flattened to (T*Bp, D) so the layer-1 projection
    # is one lane-dense matmul.
    x_tm = jnp.transpose(x.astype(jnp.float32), (1, 0, 2))            # (T, B, D)
    x_tm = jnp.pad(x_tm, ((0, 0), (0, Bp - B), (0, 0)))
    x_flat = x_tm.reshape(T * Bp, D)

    p = params
    # Pre-transpose weights so the kernel computes `activations @ W`; stack the
    # layer-1 fwd|bwd gate blocks along lanes; fuse the two PyTorch biases.
    wih1 = jnp.concatenate([p["w_ih1_f"].T, p["w_ih1_b"].T], axis=1)          # (D, 8H)
    b1 = jnp.concatenate([p["b_ih1_f"] + p["b_hh1_f"],
                          p["b_ih1_b"] + p["b_hh1_b"]])[None, :]              # (1, 8H)
    whh1f = p["w_hh1_f"].T                                                    # (H, 4H)
    whh1b = p["w_hh1_b"].T
    wih2f = p["w_ih2_f"].T                                                    # (2H, 4H)
    b2f = (p["b_ih2_f"] + p["b_hh2_f"])[None, :]                              # (1, 4H)
    whh2f = p["w_hh2_f"].T                                                    # (H, 4H)
    wih2b = p["w_ih2_b"].T                                                    # (2H, 4H)
    b2b = (p["b_ih2_b"] + p["b_hh2_b"])[None, :]
    whh2b = p["w_hh2_b"].T
    wmu = p["w_mu"].T                                                         # (2H, L)
    bmu = p["b_mu"][None, :]
    wsig = p["w_sigma"].T                                                     # (2H, L)
    # fold the +epsilon of softplus((x+eps)W^T+b): (x+eps)@W.T = x@W.T + eps*W.sum(1)
    bsig = (p["b_sigma"] + EPSILON * p["w_sigma"].sum(axis=1))[None, :]

    kernel = functools.partial(_plan_recognition_kernel, T=T, Bp=Bp, H=H)

    mu_p, sig_p = pl.pallas_call(
        kernel,
        out_shape=(jax.ShapeDtypeStruct((Bp, L), jnp.float32),
                   jax.ShapeDtypeStruct((Bp, L), jnp.float32)),
        scratch_shapes=[
            pltpu.VMEM((T * Bp, 8 * H), jnp.float32),   # layer-1 gate pre-acts
            pltpu.VMEM((T * Bp, 4 * H), jnp.float32),   # layer-2 fwd gate pre-acts
            pltpu.VMEM((T * Bp, 2 * H), jnp.float32),   # layer-1 bidirectional output
        ],
        compiler_params=pltpu.CompilerParams(vmem_limit_bytes=32 * 1024 * 1024),
    )(x_flat, wih1, whh1f, whh1b, b1,
      wih2f, whh2f, b2f, wih2b, whh2b, b2b,
      wmu, bmu, wsig, bsig)

    return mu_p[:B], sig_p[:B]


# ------------------------------ pure-JAX reference -------------------------------
def _lstm_dir_ref(x, w_ih, w_hh, b_ih, b_hh, H):
    B = x.shape[0]

    def step(carry, x_t):
        h, c = carry
        gates = x_t @ w_ih.T + b_ih + h @ w_hh.T + b_hh
        i = jax.nn.sigmoid(gates[:, 0 * H:1 * H])
        f = jax.nn.sigmoid(gates[:, 1 * H:2 * H])
        g = jnp.tanh(gates[:, 2 * H:3 * H])
        o = jax.nn.sigmoid(gates[:, 3 * H:4 * H])
        c_new = f * c + i * g
        h_new = o * jnp.tanh(c_new)
        return (h_new, c_new), h_new

    h0 = jnp.zeros((B, H), jnp.float32)
    c0 = jnp.zeros((B, H), jnp.float32)
    _, hs = lax.scan(step, (h0, c0), jnp.transpose(x, (1, 0, 2)))
    return jnp.transpose(hs, (1, 0, 2))


def _bilstm_ref(x, p, layer, H):
    fwd = _lstm_dir_ref(x, p[f"w_ih{layer}_f"], p[f"w_hh{layer}_f"],
                        p[f"b_ih{layer}_f"], p[f"b_hh{layer}_f"], H)
    bwd = _lstm_dir_ref(x[:, ::-1, :], p[f"w_ih{layer}_b"], p[f"w_hh{layer}_b"],
                        p[f"b_ih{layer}_b"], p[f"b_hh{layer}_b"], H)[:, ::-1, :]
    return jnp.concatenate([fwd, bwd], axis=-1)


def plan_recognition_ref(x, p):
    h = _bilstm_ref(x, p, 1, LAYER_SIZE)
    h = _bilstm_ref(h, p, 2, LAYER_SIZE)
    last = h[:, -1, :]
    mu = last @ p["w_mu"].T + p["b_mu"]
    sigma = jax.nn.softplus((last + EPSILON) @ p["w_sigma"].T + p["b_sigma"])
    return mu, sigma


# --------------------------------- param init ------------------------------------
def init_params(key):
    H, L, D = LAYER_SIZE, LATENT_DIM, IN_DIM
    bound = 1.0 / np.sqrt(H)
    ks = jax.random.split(key, 20)
    u = lambda k, shape: jax.random.uniform(k, shape, jnp.float32, -bound, bound)
    return {
        "w_ih1_f": u(ks[0], (4 * H, D)),      "w_hh1_f": u(ks[1], (4 * H, H)),
        "b_ih1_f": u(ks[2], (4 * H,)),        "b_hh1_f": u(ks[3], (4 * H,)),
        "w_ih1_b": u(ks[4], (4 * H, D)),      "w_hh1_b": u(ks[5], (4 * H, H)),
        "b_ih1_b": u(ks[6], (4 * H,)),        "b_hh1_b": u(ks[7], (4 * H,)),
        "w_ih2_f": u(ks[8], (4 * H, 2 * H)),  "w_hh2_f": u(ks[9], (4 * H, H)),
        "b_ih2_f": u(ks[10], (4 * H,)),       "b_hh2_f": u(ks[11], (4 * H,)),
        "w_ih2_b": u(ks[12], (4 * H, 2 * H)), "w_hh2_b": u(ks[13], (4 * H, H)),
        "b_ih2_b": u(ks[14], (4 * H,)),       "b_hh2_b": u(ks[15], (4 * H,)),
        "w_mu": u(ks[16], (L, 2 * H)),        "b_mu": u(ks[17], (L,)),
        "w_sigma": u(ks[18], (L, 2 * H)),     "b_sigma": u(ks[19], (L,)),
    }


# ------------------------------------ main ----------------------------------------
if __name__ == "__main__":
    key = jax.random.PRNGKey(0)
    k_p, k_x = jax.random.split(key)

    params = init_params(k_p)
    x = jax.random.normal(k_x, (BATCH, SEQ, IN_DIM), jnp.float32)

    mu, sigma = plan_recognition_pallas(x, params)
    mu = jax.block_until_ready(mu)
    sigma = jax.block_until_ready(sigma)

    mu_ref, sigma_ref = plan_recognition_ref(x, params)
    np.testing.assert_allclose(np.asarray(mu), np.asarray(mu_ref),
                               rtol=1e-4, atol=1e-4)
    np.testing.assert_allclose(np.asarray(sigma), np.asarray(sigma_ref),
                               rtol=1e-4, atol=1e-4)
    assert mu.shape == (BATCH, LATENT_DIM) and sigma.shape == (BATCH, LATENT_DIM)

    print("KERNEL_OK")
</pallas_src>

<mosaic_0001>
module attributes {stable_mosaic.version = 11 : i64} {
  func.func @_plan_recognition_kernel(%arg0: memref<64x20xf32, #tpu.memory_space<vmem>>, %arg1: memref<20x1024xf32, #tpu.memory_space<vmem>>, %arg2: memref<128x512xf32, #tpu.memory_space<vmem>>, %arg3: memref<128x512xf32, #tpu.memory_space<vmem>>, %arg4: memref<1x1024xf32, #tpu.memory_space<vmem>>, %arg5: memref<256x512xf32, #tpu.memory_space<vmem>>, %arg6: memref<128x512xf32, #tpu.memory_space<vmem>>, %arg7: memref<1x512xf32, #tpu.memory_space<vmem>>, %arg8: memref<256x512xf32, #tpu.memory_space<vmem>>, %arg9: memref<128x512xf32, #tpu.memory_space<vmem>>, %arg10: memref<1x512xf32, #tpu.memory_space<vmem>>, %arg11: memref<256x8xf32, #tpu.memory_space<vmem>>, %arg12: memref<1x8xf32, #tpu.memory_space<vmem>>, %arg13: memref<256x8xf32, #tpu.memory_space<vmem>>, %arg14: memref<1x8xf32, #tpu.memory_space<vmem>>, %arg15: memref<8x8xf32, #tpu.memory_space<vmem>>, %arg16: memref<8x8xf32, #tpu.memory_space<vmem>>, %arg17: memref<64x1024xf32, #tpu.memory_space<vmem>>, %arg18: memref<64x512xf32, #tpu.memory_space<vmem>>, %arg19: memref<64x256xf32, #tpu.memory_space<vmem>>) attributes {dimension_semantics = [], scalar_prefetch = 0 : i64, scratch_operands = 3 : i64, tpu.core_type = #tpu.core_type<tc>} {
    %cst = arith.constant 0.000000e+00 : f32
    %0 = vector.broadcast %cst : f32 to vector<8x128xf32>
    %c0 = arith.constant 0 : index
    %c0_0 = arith.constant 0 : index
    %1 = vector.load %arg0[%c0, %c0_0] : memref<64x20xf32, #tpu.memory_space<vmem>>, vector<64x20xf32>
    %c0_1 = arith.constant 0 : index
    %c0_2 = arith.constant 0 : index
    %2 = vector.load %arg1[%c0_1, %c0_2] : memref<20x1024xf32, #tpu.memory_space<vmem>>, vector<20x1024xf32>
    %cst_3 = arith.constant dense<0.000000e+00> : vector<64x1024xf32>
    %3 = tpu.matmul %1, %2, %cst_3 {dimension_numbers = #tpu.dot_dimension_numbers<[1], [0], [0], [1], [0, 0, 1, 1], [], []>} : vector<64x20xf32>, vector<20x1024xf32>, vector<64x1024xf32> -> vector<64x1024xf32>
    %c0_4 = arith.constant 0 : index
    %c0_5 = arith.constant 0 : index
    %4 = vector.load %arg4[%c0_4, %c0_5] : memref<1x1024xf32, #tpu.memory_space<vmem>>, vector<1x1024xf32>
    %5 = vector.broadcast %4 : vector<1x1024xf32> to vector<64x1024xf32>
    %6 = arith.addf %3, %5 : vector<64x1024xf32>
    %c0_6 = arith.constant 0 : index
    %c0_7 = arith.constant 0 : index
    %7 = vector.load %arg17[%c0_6, %c0_7] : memref<64x1024xf32, #tpu.memory_space<vmem>>, vector<64x1024xf32>
    tpu.vector_store %arg17[%c0_6, %c0_7], %6 {strides = array<i32>} : memref<64x1024xf32, #tpu.memory_space<vmem>>, vector<64x1024xf32>,
    %c0_8 = arith.constant 0 : index
    %c0_9 = arith.constant 0 : index
    %8 = vector.load %arg17[%c0_8, %c0_9] : memref<64x1024xf32, #tpu.memory_space<vmem>>, vector<8x512xf32>
    %c0_10 = arith.constant 0 : index
    %c0_11 = arith.constant 0 : index
    %9 = vector.load %arg2[%c0_10, %c0_11] : memref<128x512xf32, #tpu.memory_space<vmem>>, vector<128x512xf32>
    %cst_12 = arith.constant dense<0.000000e+00> : vector<8x512xf32>
    %10 = tpu.matmul %0, %9, %cst_12 {dimension_numbers = #tpu.dot_dimension_numbers<[1], [0], [0], [1], [0, 0, 1, 1], [], []>} : vector<8x128xf32>, vector<128x512xf32>, vector<8x512xf32> -> vector<8x512xf32>
    %11 = arith.addf %8, %10 : vector<8x512xf32>
    %12 = vector.extract_strided_slice %11 {offsets = [0, 0], sizes = [8, 128], strides = [1, 1]} : vector<8x512xf32> to vector<8x128xf32>
    %13 = arith.negf %12 : vector<8x128xf32>
    %14 = math.exp %13 : vector<8x128xf32>
    %cst_13 = arith.constant 1.000000e+00 : f32
    %15 = vector.broadcast %cst_13 : f32 to vector<8x128xf32>
    %16 = arith.addf %15, %14 : vector<8x128xf32>
    %17 = arith.divf %15, %16 : vector<8x128xf32>
    %18 = vector.extract_strided_slice %11 {offsets = [0, 128], sizes = [8, 128], strides = [1, 1]} : vector<8x512xf32> to vector<8x128xf32>
    %19 = arith.negf %18 : vector<8x128xf32>
    %20 = math.exp %19 : vector<8x128xf32>
    %cst_14 = arith.constant 1.000000e+00 : f32
    %21 = vector.broadcast %cst_14 : f32 to vector<8x128xf32>
    %22 = arith.addf %21, %20 : vector<8x128xf32>
    %23 = arith.divf %21, %22 : vector<8x128xf32>
    %24 = vector.extract_strided_slice %11 {offsets = [0, 256], sizes = [8, 128], strides = [1, 1]} : vector<8x512xf32> to vector<8x128xf32>
    %25 = math.tanh %24 : vector<8x128xf32>
    %26 = vector.extract_strided_slice %11 {offsets = [0, 384], sizes = [8, 128], strides = [1, 1]} : vector<8x512xf32> to vector<8x128xf32>
    %27 = arith.negf %26 : vector<8x128xf32>
    %28 = math.exp %27 : vector<8x128xf32>
    %cst_15 = arith.constant 1.000000e+00 : f32
    %29 = vector.broadcast %cst_15 : f32 to vector<8x128xf32>
    %30 = arith.addf %29, %28 : vector<8x128xf32>
    %31 = arith.divf %29, %30 : vector<8x128xf32>
    %32 = arith.mulf %23, %0 : vector<8x128xf32>
    %33 = arith.mulf %17, %25 : vector<8x128xf32>
    %34 = arith.addf %32, %33 : vector<8x128xf32>
    %35 = math.tanh %34 : vector<8x128xf32>
    %36 = arith.mulf %31, %35 : vector<8x128xf32>
    %c56 = arith.constant 56 : index
    %c512 = arith.constant 512 : index
    %37 = vector.load %arg17[%c56, %c512] : memref<64x1024xf32, #tpu.memory_space<vmem>>, vector<8x512xf32>
    %c0_16 = arith.constant 0 : index
    %c0_17 = arith.constant 0 : index
    %38 = vector.load %arg3[%c0_16, %c0_17] : memref<128x512xf32, #tpu.memory_space<vmem>>, vector<128x512xf32>
    %cst_18 = arith.constant dense<0.000000e+00> : vector<8x512xf32>
    %39 = tpu.matmul %0, %38, %cst_18 {dimension_numbers = #tpu.dot_dimension_numbers<[1], [0], [0], [1], [0, 0, 1, 1], [], []>} : vector<8x128xf32>, vector<128x512xf32>, vector<8x512xf32> -> vector<8x512xf32>
    %40 = arith.addf %37, %39 : vector<8x512xf32>
    %41 = vector.extract_strided_slice %40 {offsets = [0, 0], sizes = [8, 128], strides = [1, 1]} : vector<8x512xf32> to vector<8x128xf32>
    %42 = arith.negf %41 : vector<8x128xf32>
    %43 = math.exp %42 : vector<8x128xf32>
    %cst_19 = arith.constant 1.000000e+00 : f32
    %44 = vector.broadcast %cst_19 : f32 to vector<8x128xf32>
    %45 = arith.addf %44, %43 : vector<8x128xf32>
    %46 = arith.divf %44, %45 : vector<8x128xf32>
    %47 = vector.extract_strided_slice %40 {offsets = [0, 128], sizes = [8, 128], strides = [1, 1]} : vector<8x512xf32> to vector<8x128xf32>
    %48 = arith.negf %47 : vector<8x128xf32>
    %49 = math.exp %48 : vector<8x128xf32>
    %cst_20 = arith.constant 1.000000e+00 : f32
    %50 = vector.broadcast %cst_20 : f32 to vector<8x128xf32>
    %51 = arith.addf %50, %49 : vector<8x128xf32>
    %52 = arith.divf %50, %51 : vector<8x128xf32>
    %53 = vector.extract_strided_slice %40 {offsets = [0, 256], sizes = [8, 128], strides = [1, 1]} : vector<8x512xf32> to vector<8x128xf32>
    %54 = math.tanh %53 : vector<8x128xf32>
    %55 = vector.extract_strided_slice %40 {offsets = [0, 384], sizes = [8, 128], strides = [1, 1]} : vector<8x512xf32> to vector<8x128xf32>
    %56 = arith.negf %55 : vector<8x128xf32>
    %57 = math.exp %56 : vector<8x128xf32>
    %cst_21 = arith.constant 1.000000e+00 : f32
    %58 = vector.broadcast %cst_21 : f32 to vector<8x128xf32>
    %59 = arith.addf %58, %57 : vector<8x128xf32>
    %60 = arith.divf %58, %59 : vector<8x128xf32>
    %61 = arith.mulf %52, %0 : vector<8x128xf32>
    %62 = arith.mulf %46, %54 : vector<8x128xf32>
    %63 = arith.addf %61, %62 : vector<8x128xf32>
    %64 = math.tanh %63 : vector<8x128xf32>
    %65 = arith.mulf %60, %64 : vector<8x128xf32>
    %c0_22 = arith.constant 0 : index
    %c0_23 = arith.constant 0 : index
    %66 = vector.load %arg19[%c0_22, %c0_23] : memref<64x256xf32, #tpu.memory_space<vmem>>, vector<8x128xf32>
    tpu.vector_store %arg19[%c0_22, %c0_23], %36 {strides = array<i32>} : memref<64x256xf32, #tpu.memory_space<vmem>>, vector<8x128xf32>,
    %c56_24 = arith.constant 56 : index
    %c128 = arith.constant 128 : index
    %67 = vector.load %arg19[%c56_24, %c128] : memref<64x256xf32, #tpu.memory_space<vmem>>, vector<8x128xf32>
    tpu.vector_store %arg19[%c56_24, %c128], %65 {strides = array<i32>} : memref<64x256xf32, #tpu.memory_space<vmem>>, vector<8x128xf32>,
    %c8 = arith.constant 8 : index
    %c0_25 = arith.constant 0 : index
    %68 = vector.load %arg17[%c8, %c0_25] : memref<64x1024xf32, #tpu.memory_space<vmem>>, vector<8x512xf32>
    %c0_26 = arith.constant 0 : index
    %c0_27 = arith.constant 0 : index
    %69 = vector.load %arg2[%c0_26, %c0_27] : memref<128x512xf32, #tpu.memory_space<vmem>>, vector<128x512xf32>
    %cst_28 = arith.constant dense<0.000000e+00> : vector<8x512xf32>
    %70 = tpu.matmul %36, %69, %cst_28 {dimension_numbers = #tpu.dot_dimension_numbers<[1], [0], [0], [1], [0, 0, 1, 1], [], []>} : vector<8x128xf32>, vector<128x512xf32>, vector<8x512xf32> -> vector<8x512xf32>
    %71 = arith.addf %68, %70 : vector<8x512xf32>
    %72 = vector.extract_strided_slice %71 {offsets = [0, 0], sizes = [8, 128], strides = [1, 1]} : vector<8x512xf32> to vector<8x128xf32>
    %73 = arith.negf %72 : vector<8x128xf32>
    %74 = math.exp %73 : vector<8x128xf32>
    %cst_29 = arith.constant 1.000000e+00 : f32
    %75 = vector.broadcast %cst_29 : f32 to vector<8x128xf32>
    %76 = arith.addf %75, %74 : vector<8x128xf32>
    %77 = arith.divf %75, %76 : vector<8x128xf32>
    %78 = vector.extract_strided_slice %71 {offsets = [0, 128], sizes = [8, 128], strides = [1, 1]} : vector<8x512xf32> to vector<8x128xf32>
    %79 = arith.negf %78 : vector<8x128xf32>
    %80 = math.exp %79 : vector<8x128xf32>
    %cst_30 = arith.constant 1.000000e+00 : f32
    %81 = vector.broadcast %cst_30 : f32 to vector<8x128xf32>
    %82 = arith.addf %81, %80 : vector<8x128xf32>
    %83 = arith.divf %81, %82 : vector<8x128xf32>
    %84 = vector.extract_strided_slice %71 {offsets = [0, 256], sizes = [8, 128], strides = [1, 1]} : vector<8x512xf32> to vector<8x128xf32>
    %85 = math.tanh %84 : vector<8x128xf32>
    %86 = vector.extract_strided_slice %71 {offsets = [0, 384], sizes = [8, 128], strides = [1, 1]} : vector<8x512xf32> to vector<8x128xf32>
    %87 = arith.negf %86 : vector<8x128xf32>
    %88 = math.exp %87 : vector<8x128xf32>
    %cst_31 = arith.constant 1.000000e+00 : f32
    %89 = vector.broadcast %cst_31 : f32 to vector<8x128xf32>
    %90 = arith.addf %89, %88 : vector<8x128xf32>
    %91 = arith.divf %89, %90 : vector<8x128xf32>
    %92 = arith.mulf %83, %34 : vector<8x128xf32>
    %93 = arith.mulf %77, %85 : vector<8x128xf32>
    %94 = arith.addf %92, %93 : vector<8x128xf32>
    %95 = math.tanh %94 : vector<8x128xf32>
    %96 = arith.mulf %91, %95 : vector<8x128xf32>
    %c48 = arith.constant 48 : index
    %c512_32 = arith.constant 512 : index
    %97 = vector.load %arg17[%c48, %c512_32] : memref<64x1024xf32, #tpu.memory_space<vmem>>, vector<8x512xf32>
    %c0_33 = arith.constant 0 : index
    %c0_34 = arith.constant 0 : index
    %98 = vector.load %arg3[%c0_33, %c0_34] : memref<128x512xf32, #tpu.memory_space<vmem>>, vector<128x512xf32>
    %cst_35 = arith.constant dense<0.000000e+00> : vector<8x512xf32>
    %99 = tpu.matmul %65, %98, %cst_35 {dimension_numbers = #tpu.dot_dimension_numbers<[1], [0], [0], [1], [0, 0, 1, 1], [], []>} : vector<8x128xf32>, vector<128x512xf32>, vector<8x512xf32> -> vector<8x512xf32>
    %100 = arith.addf %97, %99 : vector<8x512xf32>
    %101 = vector.extract_strided_slice %100 {offsets = [0, 0], sizes = [8, 128], strides = [1, 1]} : vector<8x512xf32> to vector<8x128xf32>
    %102 = arith.negf %101 : vector<8x128xf32>
    %103 = math.exp %102 : vector<8x128xf32>
    %cst_36 = arith.constant 1.000000e+00 : f32
    %104 = vector.broadcast %cst_36 : f32 to vector<8x128xf32>
    %105 = arith.addf %104, %103 : vector<8x128xf32>
    %106 = arith.divf %104, %105 : vector<8x128xf32>
    %107 = vector.extract_strided_slice %100 {offsets = [0, 128], sizes = [8, 128], strides = [1, 1]} : vector<8x512xf32> to vector<8x128xf32>
    %108 = arith.negf %107 : vector<8x128xf32>
    %109 = math.exp %108 : vector<8x128xf32>
    %cst_37 = arith.constant 1.000000e+00 : f32
    %110 = vector.broadcast %cst_37 : f32 to vector<8x128xf32>
    %111 = arith.addf %110, %109 : vector<8x128xf32>
    %112 = arith.divf %110, %111 : vector<8x128xf32>
    %113 = vector.extract_strided_slice %100 {offsets = [0, 256], sizes = [8, 128], strides = [1, 1]} : vector<8x512xf32> to vector<8x128xf32>
    %114 = math.tanh %113 : vector<8x128xf32>
    %115 = vector.extract_strided_slice %100 {offsets = [0, 384], sizes = [8, 128], strides = [1, 1]} : vector<8x512xf32> to vector<8x128xf32>
    %116 = arith.negf %115 : vector<8x128xf32>
    %117 = math.exp %116 : vector<8x128xf32>
    %cst_38 = arith.constant 1.000000e+00 : f32
    %118 = vector.broadcast %cst_38 : f32 to vector<8x128xf32>
    %119 = arith.addf %118, %117 : vector<8x128xf32>
    %120 = arith.divf %118, %119 : vector<8x128xf32>
    %121 = arith.mulf %112, %63 : vector<8x128xf32>
    %122 = arith.mulf %106, %114 : vector<8x128xf32>
    %123 = arith.addf %121, %122 : vector<8x128xf32>
    %124 = math.tanh %123 : vector<8x128xf32>
    %125 = arith.mulf %120, %124 : vector<8x128xf32>
    %c8_39 = arith.constant 8 : index
    %c0_40 = arith.constant 0 : index
    %126 = vector.load %arg19[%c8_39, %c0_40] : memref<64x256xf32, #tpu.memory_space<vmem>>, vector<8x128xf32>
    tpu.vector_store %arg19[%c8_39, %c0_40], %96 {strides = array<i32>} : memref<64x256xf32, #tpu.memory_space<vmem>>, vector<8x128xf32>,
    %c48_41 = arith.constant 48 : index
    %c128_42 = arith.constant 128 : index
    %127 = vector.load %arg19[%c48_41, %c128_42] : memref<64x256xf32, #tpu.memory_space<vmem>>, vector<8x128xf32>
    tpu.vector_store %arg19[%c48_41, %c128_42], %125 {strides = array<i32>} : memref<64x256xf32, #tpu.memory_space<vmem>>, vector<8x128xf32>,
    %c16 = arith.constant 16 : index
    %c0_43 = arith.constant 0 : index
    %128 = vector.load %arg17[%c16, %c0_43] : memref<64x1024xf32, #tpu.memory_space<vmem>>, vector<8x512xf32>
    %c0_44 = arith.constant 0 : index
    %c0_45 = arith.constant 0 : index
    %129 = vector.load %arg2[%c0_44, %c0_45] : memref<128x512xf32, #tpu.memory_space<vmem>>, vector<128x512xf32>
    %cst_46 = arith.constant dense<0.000000e+00> : vector<8x512xf32>
    %130 = tpu.matmul %96, %129, %cst_46 {dimension_numbers = #tpu.dot_dimension_numbers<[1], [0], [0], [1], [0, 0, 1, 1], [], []>} : vector<8x128xf32>, vector<128x512xf32>, vector<8x512xf32> -> vector<8x512xf32>
    %131 = arith.addf %128, %130 : vector<8x512xf32>
    %132 = vector.extract_strided_slice %131 {offsets = [0, 0], sizes = [8, 128], strides = [1, 1]} : vector<8x512xf32> to vector<8x128xf32>
    %133 = arith.negf %132 : vector<8x128xf32>
    %134 = math.exp %133 : vector<8x128xf32>
    %cst_47 = arith.constant 1.000000e+00 : f32
    %135 = vector.broadcast %cst_47 : f32 to vector<8x128xf32>
    %136 = arith.addf %135, %134 : vector<8x128xf32>
    %137 = arith.divf %135, %136 : vector<8x128xf32>
    %138 = vector.extract_strided_slice %131 {offsets = [0, 128], sizes = [8, 128], strides = [1, 1]} : vector<8x512xf32> to vector<8x128xf32>
    %139 = arith.negf %138 : vector<8x128xf32>
    %140 = math.exp %139 : vector<8x128xf32>
    %cst_48 = arith.constant 1.000000e+00 : f32
    %141 = vector.broadcast %cst_48 : f32 to vector<8x128xf32>
    %142 = arith.addf %141, %140 : vector<8x128xf32>
    %143 = arith.divf %141, %142 : vector<8x128xf32>
    %144 = vector.extract_strided_slice %131 {offsets = [0, 256], sizes = [8, 128], strides = [1, 1]} : vector<8x512xf32> to vector<8x128xf32>
    %145 = math.tanh %144 : vector<8x128xf32>
    %146 = vector.extract_strided_slice %131 {offsets = [0, 384], sizes = [8, 128], strides = [1, 1]} : vector<8x512xf32> to vector<8x128xf32>
    %147 = arith.negf %146 : vector<8x128xf32>
    %148 = math.exp %147 : vector<8x128xf32>
    %cst_49 = arith.constant 1.000000e+00 : f32
    %149 = vector.broadcast %cst_49 : f32 to vector<8x128xf32>
    %150 = arith.addf %149, %148 : vector<8x128xf32>
    %151 = arith.divf %149, %150 : vector<8x128xf32>
    %152 = arith.mulf %143, %94 : vector<8x128xf32>
    %153 = arith.mulf %137, %145 : vector<8x128xf32>
    %154 = arith.addf %152, %153 : vector<8x128xf32>
    %155 = math.tanh %154 : vector<8x128xf32>
    %156 = arith.mulf %151, %155 : vector<8x128xf32>
    %c40 = arith.constant 40 : index
    %c512_50 = arith.constant 512 : index
    %157 = vector.load %arg17[%c40, %c512_50] : memref<64x1024xf32, #tpu.memory_space<vmem>>, vector<8x512xf32>
    %c0_51 = arith.constant 0 : index
    %c0_52 = arith.constant 0 : index
    %158 = vector.load %arg3[%c0_51, %c0_52] : memref<128x512xf32, #tpu.memory_space<vmem>>, vector<128x512xf32>
    %cst_53 = arith.constant dense<0.000000e+00> : vector<8x512xf32>
    %159 = tpu.matmul %125, %158, %cst_53 {dimension_numbers = #tpu.dot_dimension_numbers<[1], [0], [0], [1], [0, 0, 1, 1], [], []>} : vector<8x128xf32>, vector<128x512xf32>, vector<8x512xf32> -> vector<8x512xf32>
    %160 = arith.addf %157, %159 : vector<8x512xf32>
    %161 = vector.extract_strided_slice %160 {offsets = [0, 0], sizes = [8, 128], strides = [1, 1]} : vector<8x512xf32> to vector<8x128xf32>
    %162 = arith.negf %161 : vector<8x128xf32>
    %163 = math.exp %162 : vector<8x128xf32>
    %cst_54 = arith.constant 1.000000e+00 : f32
    %164 = vector.broadcast %cst_54 : f32 to vector<8x128xf32>
    %165 = arith.addf %164, %163 : vector<8x128xf32>
    %166 = arith.divf %164, %165 : vector<8x128xf32>
    %167 = vector.extract_strided_slice %160 {offsets = [0, 128], sizes = [8, 128], strides = [1, 1]} : vector<8x512xf32> to vector<8x128xf32>
    %168 = arith.negf %167 : vector<8x128xf32>
    %169 = math.exp %168 : vector<8x128xf32>
    %cst_55 = arith.constant 1.000000e+00 : f32
    %170 = vector.broadcast %cst_55 : f32 to vector<8x128xf32>
    %171 = arith.addf %170, %169 : vector<8x128xf32>
    %172 = arith.divf %170, %171 : vector<8x128xf32>
    %173 = vector.extract_strided_slice %160 {offsets = [0, 256], sizes = [8, 128], strides = [1, 1]} : vector<8x512xf32> to vector<8x128xf32>
    %174 = math.tanh %173 : vector<8x128xf32>
    %175 = vector.extract_strided_slice %160 {offsets = [0, 384], sizes = [8, 128], strides = [1, 1]} : vector<8x512xf32> to vector<8x128xf32>
    %176 = arith.negf %175 : vector<8x128xf32>
    %177 = math.exp %176 : vector<8x128xf32>
    %cst_56 = arith.constant 1.000000e+00 : f32
    %178 = vector.broadcast %cst_56 : f32 to vector<8x128xf32>
    %179 = arith.addf %178, %177 : vector<8x128xf32>
    %180 = arith.divf %178, %179 : vector<8x128xf32>
    %181 = arith.mulf %172, %123 : vector<8x128xf32>
    %182 = arith.mulf %166, %174 : vector<8x128xf32>
    %183 = arith.addf %181, %182 : vector<8x128xf32>
    %184 = math.tanh %183 : vector<8x128xf32>
    %185 = arith.mulf %180, %184 : vector<8x128xf32>
    %c16_57 = arith.constant 16 : index
    %c0_58 = arith.constant 0 : index
    %186 = vector.load %arg19[%c16_57, %c0_58] : memref<64x256xf32, #tpu.memory_space<vmem>>, vector<8x128xf32>
    tpu.vector_store %arg19[%c16_57, %c0_58], %156 {strides = array<i32>} : memref<64x256xf32, #tpu.memory_space<vmem>>, vector<8x128xf32>,
    %c40_59 = arith.constant 40 : index
    %c128_60 = arith.constant 128 : index
    %187 = vector.load %arg19[%c40_59, %c128_60] : memref<64x256xf32, #tpu.memory_space<vmem>>, vector<8x128xf32>
    tpu.vector_store %arg19[%c40_59, %c128_60], %185 {strides = array<i32>} : memref<64x256xf32, #tpu.memory_space<vmem>>, vector<8x128xf32>,
    %c24 = arith.constant 24 : index
    %c0_61 = arith.constant 0 : index
    %188 = vector.load %arg17[%c24, %c0_61] : memref<64x1024xf32, #tpu.memory_space<vmem>>, vector<8x512xf32>
    %c0_62 = arith.constant 0 : index
    %c0_63 = arith.constant 0 : index
    %189 = vector.load %arg2[%c0_62, %c0_63] : memref<128x512xf32, #tpu.memory_space<vmem>>, vector<128x512xf32>
    %cst_64 = arith.constant dense<0.000000e+00> : vector<8x512xf32>
    %190 = tpu.matmul %156, %189, %cst_64 {dimension_numbers = #tpu.dot_dimension_numbers<[1], [0], [0], [1], [0, 0, 1, 1], [], []>} : vector<8x128xf32>, vector<128x512xf32>, vector<8x512xf32> -> vector<8x512xf32>
    %191 = arith.addf %188, %190 : vector<8x512xf32>
    %192 = vector.extract_strided_slice %191 {offsets = [0, 0], sizes = [8, 128], strides = [1, 1]} : vector<8x512xf32> to vector<8x128xf32>
    %193 = arith.negf %192 : vector<8x128xf32>
    %194 = math.exp %193 : vector<8x128xf32>
    %cst_65 = arith.constant 1.000000e+00 : f32
    %195 = vector.broadcast %cst_65 : f32 to vector<8x128xf32>
    %196 = arith.addf %195, %194 : vector<8x128xf32>
    %197 = arith.divf %195, %196 : vector<8x128xf32>
    %198 = vector.extract_strided_slice %191 {offsets = [0, 128], sizes = [8, 128], strides = [1, 1]} : vector<8x512xf32> to vector<8x128xf32>
    %199 = arith.negf %198 : vector<8x128xf32>
    %200 = math.exp %199 : vector<8x128xf32>
    %cst_66 = arith.constant 1.000000e+00 : f32
    %201 = vector.broadcast %cst_66 : f32 to vector<8x128xf32>
    %202 = arith.addf %201, %200 : vector<8x128xf32>
    %203 = arith.divf %201, %202 : vector<8x128xf32>
    %204 = vector.extract_strided_slice %191 {offsets = [0, 256], sizes = [8, 128], strides = [1, 1]} : vector<8x512xf32> to vector<8x128xf32>
    %205 = math.tanh %204 : vector<8x128xf32>
    %206 = vector.extract_strided_slice %191 {offsets = [0, 384], sizes = [8, 128], strides = [1, 1]} : vector<8x512xf32> to vector<8x128xf32>
    %207 = arith.negf %206 : vector<8x128xf32>
    %208 = math.exp %207 : vector<8x128xf32>
    %cst_67 = arith.constant 1.000000e+00 : f32
    %209 = vector.broadcast %cst_67 : f32 to vector<8x128xf32>
    %210 = arith.addf %209, %208 : vector<8x128xf32>
    %211 = arith.divf %209, %210 : vector<8x128xf32>
    %212 = arith.mulf %203, %154 : vector<8x128xf32>
    %213 = arith.mulf %197, %205 : vector<8x128xf32>
    %214 = arith.addf %212, %213 : vector<8x128xf32>
    %215 = math.tanh %214 : vector<8x128xf32>
    %216 = arith.mulf %211, %215 : vector<8x128xf32>
    %c32 = arith.constant 32 : index
    %c512_68 = arith.constant 512 : index
    %217 = vector.load %arg17[%c32, %c512_68] : memref<64x1024xf32, #tpu.memory_space<vmem>>, vector<8x512xf32>
    %c0_69 = arith.constant 0 : index
    %c0_70 = arith.constant 0 : index
    %218 = vector.load %arg3[%c0_69, %c0_70] : memref<128x512xf32, #tpu.memory_space<vmem>>, vector<128x512xf32>
    %cst_71 = arith.constant dense<0.000000e+00> : vector<8x512xf32>
    %219 = tpu.matmul %185, %218, %cst_71 {dimension_numbers = #tpu.dot_dimension_numbers<[1], [0], [0], [1], [0, 0, 1, 1], [], []>} : vector<8x128xf32>, vector<128x512xf32>, vector<8x512xf32> -> vector<8x512xf32>
    %220 = arith.addf %217, %219 : vector<8x512xf32>
    %221 = vector.extract_strided_slice %220 {offsets = [0, 0], sizes = [8, 128], strides = [1, 1]} : vector<8x512xf32> to vector<8x128xf32>
    %222 = arith.negf %221 : vector<8x128xf32>
    %223 = math.exp %222 : vector<8x128xf32>
    %cst_72 = arith.constant 1.000000e+00 : f32
    %224 = vector.broadcast %cst_72 : f32 to vector<8x128xf32>
    %225 = arith.addf %224, %223 : vector<8x128xf32>
    %226 = arith.divf %224, %225 : vector<8x128xf32>
    %227 = vector.extract_strided_slice %220 {offsets = [0, 128], sizes = [8, 128], strides = [1, 1]} : vector<8x512xf32> to vector<8x128xf32>
    %228 = arith.negf %227 : vector<8x128xf32>
    %229 = math.exp %228 : vector<8x128xf32>
    %cst_73 = arith.constant 1.000000e+00 : f32
    %230 = vector.broadcast %cst_73 : f32 to vector<8x128xf32>
    %231 = arith.addf %230, %229 : vector<8x128xf32>
    %232 = arith.divf %230, %231 : vector<8x128xf32>
    %233 = vector.extract_strided_slice %220 {offsets = [0, 256], sizes = [8, 128], strides = [1, 1]} : vector<8x512xf32> to vector<8x128xf32>
    %234 = math.tanh %233 : vector<8x128xf32>
    %235 = vector.extract_strided_slice %220 {offsets = [0, 384], sizes = [8, 128], strides = [1, 1]} : vector<8x512xf32> to vector<8x128xf32>
    %236 = arith.negf %235 : vector<8x128xf32>
    %237 = math.exp %236 : vector<8x128xf32>
    %cst_74 = arith.constant 1.000000e+00 : f32
    %238 = vector.broadcast %cst_74 : f32 to vector<8x128xf32>
    %239 = arith.addf %238, %237 : vector<8x128xf32>
    %240 = arith.divf %238, %239 : vector<8x128xf32>
    %241 = arith.mulf %232, %183 : vector<8x128xf32>
    %242 = arith.mulf %226, %234 : vector<8x128xf32>
    %243 = arith.addf %241, %242 : vector<8x128xf32>
    %244 = math.tanh %243 : vector<8x128xf32>
    %245 = arith.mulf %240, %244 : vector<8x128xf32>
    %c24_75 = arith.constant 24 : index
    %c0_76 = arith.constant 0 : index
    %246 = vector.load %arg19[%c24_75, %c0_76] : memref<64x256xf32, #tpu.memory_space<vmem>>, vector<8x128xf32>
    tpu.vector_store %arg19[%c24_75, %c0_76], %216 {strides = array<i32>} : memref<64x256xf32, #tpu.memory_space<vmem>>, vector<8x128xf32>,
    %c32_77 = arith.constant 32 : index
    %c128_78 = arith.constant 128 : index
    %247 = vector.load %arg19[%c32_77, %c128_78] : memref<64x256xf32, #tpu.memory_space<vmem>>, vector<8x128xf32>
    tpu.vector_store %arg19[%c32_77, %c128_78], %245 {strides = array<i32>} : memref<64x256xf32, #tpu.memory_space<vmem>>, vector<8x128xf32>,
    %c32_79 = arith.constant 32 : index
    %c0_80 = arith.constant 0 : index
    %248 = vector.load %arg17[%c32_79, %c0_80] : memref<64x1024xf32, #tpu.memory_space<vmem>>, vector<8x512xf32>
    %c0_81 = arith.constant 0 : index
    %c0_82 = arith.constant 0 : index
    %249 = vector.load %arg2[%c0_81, %c0_82] : memref<128x512xf32, #tpu.memory_space<vmem>>, vector<128x512xf32>
    %cst_83 = arith.constant dense<0.000000e+00> : vector<8x512xf32>
    %250 = tpu.matmul %216, %249, %cst_83 {dimension_numbers = #tpu.dot_dimension_numbers<[1], [0], [0], [1], [0, 0, 1, 1], [], []>} : vector<8x128xf32>, vector<128x512xf32>, vector<8x512xf32> -> vector<8x512xf32>
    %251 = arith.addf %248, %250 : vector<8x512xf32>
    %252 = vector.extract_strided_slice %251 {offsets = [0, 0], sizes = [8, 128], strides = [1, 1]} : vector<8x512xf32> to vector<8x128xf32>
    %253 = arith.negf %252 : vector<8x128xf32>
    %254 = math.exp %253 : vector<8x128xf32>
    %cst_84 = arith.constant 1.000000e+00 : f32
    %255 = vector.broadcast %cst_84 : f32 to vector<8x128xf32>
    %256 = arith.addf %255, %254 : vector<8x128xf32>
    %257 = arith.divf %255, %256 : vector<8x128xf32>
    %258 = vector.extract_strided_slice %251 {offsets = [0, 128], sizes = [8, 128], strides = [1, 1]} : vector<8x512xf32> to vector<8x128xf32>
    %259 = arith.negf %258 : vector<8x128xf32>
    %260 = math.exp %259 : vector<8x128xf32>
    %cst_85 = arith.constant 1.000000e+00 : f32
    %261 = vector.broadcast %cst_85 : f32 to vector<8x128xf32>
    %262 = arith.addf %261, %260 : vector<8x128xf32>
    %263 = arith.divf %261, %262 : vector<8x128xf32>
    %264 = vector.extract_strided_slice %251 {offsets = [0, 256], sizes = [8, 128], strides = [1, 1]} : vector<8x512xf32> to vector<8x128xf32>
    %265 = math.tanh %264 : vector<8x128xf32>
    %266 = vector.extract_strided_slice %251 {offsets = [0, 384], sizes = [8, 128], strides = [1, 1]} : vector<8x512xf32> to vector<8x128xf32>
    %267 = arith.negf %266 : vector<8x128xf32>
    %268 = math.exp %267 : vector<8x128xf32>
    %cst_86 = arith.constant 1.000000e+00 : f32
    %269 = vector.broadcast %cst_86 : f32 to vector<8x128xf32>
    %270 = arith.addf %269, %268 : vector<8x128xf32>
    %271 = arith.divf %269, %270 : vector<8x128xf32>
    %272 = arith.mulf %263, %214 : vector<8x128xf32>
    %273 = arith.mulf %257, %265 : vector<8x128xf32>
    %274 = arith.addf %272, %273 : vector<8x128xf32>
    %275 = math.tanh %274 : vector<8x128xf32>
    %276 = arith.mulf %271, %275 : vector<8x128xf32>
    %c24_87 = arith.constant 24 : index
    %c512_88 = arith.constant 512 : index
    %277 = vector.load %arg17[%c24_87, %c512_88] : memref<64x1024xf32, #tpu.memory_space<vmem>>, vector<8x512xf32>
    %c0_89 = arith.constant 0 : index
    %c0_90 = arith.constant 0 : index
    %278 = vector.load %arg3[%c0_89, %c0_90] : memref<128x512xf32, #tpu.memory_space<vmem>>, vector<128x512xf32>
    %cst_91 = arith.constant dense<0.000000e+00> : vector<8x512xf32>
    %279 = tpu.matmul %245, %278, %cst_91 {dimension_numbers = #tpu.dot_dimension_numbers<[1], [0], [0], [1], [0, 0, 1, 1], [], []>} : vector<8x128xf32>, vector<128x512xf32>, vector<8x512xf32> -> vector<8x512xf32>
    %280 = arith.addf %277, %279 : vector<8x512xf32>
    %281 = vector.extract_strided_slice %280 {offsets = [0, 0], sizes = [8, 128], strides = [1, 1]} : vector<8x512xf32> to vector<8x128xf32>
    %282 = arith.negf %281 : vector<8x128xf32>
    %283 = math.exp %282 : vector<8x128xf32>
    %cst_92 = arith.constant 1.000000e+00 : f32
    %284 = vector.broadcast %cst_92 : f32 to vector<8x128xf32>
    %285 = arith.addf %284, %283 : vector<8x128xf32>
    %286 = arith.divf %284, %285 : vector<8x128xf32>
    %287 = vector.extract_strided_slice %280 {offsets = [0, 128], sizes = [8, 128], strides = [1, 1]} : vector<8x512xf32> to vector<8x128xf32>
    %288 = arith.negf %287 : vector<8x128xf32>
    %289 = math.exp %288 : vector<8x128xf32>
    %cst_93 = arith.constant 1.000000e+00 : f32
    %290 = vector.broadcast %cst_93 : f32 to vector<8x128xf32>
    %291 = arith.addf %290, %289 : vector<8x128xf32>
    %292 = arith.divf %290, %291 : vector<8x128xf32>
    %293 = vector.extract_strided_slice %280 {offsets = [0, 256], sizes = [8, 128], strides = [1, 1]} : vector<8x512xf32> to vector<8x128xf32>
    %294 = math.tanh %293 : vector<8x128xf32>
    %295 = vector.extract_strided_slice %280 {offsets = [0, 384], sizes = [8, 128], strides = [1, 1]} : vector<8x512xf32> to vector<8x128xf32>
    %296 = arith.negf %295 : vector<8x128xf32>
    %297 = math.exp %296 : vector<8x128xf32>
    %cst_94 = arith.constant 1.000000e+00 : f32
    %298 = vector.broadcast %cst_94 : f32 to vector<8x128xf32>
    %299 = arith.addf %298, %297 : vector<8x128xf32>
    %300 = arith.divf %298, %299 : vector<8x128xf32>
    %301 = arith.mulf %292, %243 : vector<8x128xf32>
    %302 = arith.mulf %286, %294 : vector<8x128xf32>
    %303 = arith.addf %301, %302 : vector<8x128xf32>
    %304 = math.tanh %303 : vector<8x128xf32>
    %305 = arith.mulf %300, %304 : vector<8x128xf32>
    %c32_95 = arith.constant 32 : index
    %c0_96 = arith.constant 0 : index
    %306 = vector.load %arg19[%c32_95, %c0_96] : memref<64x256xf32, #tpu.memory_space<vmem>>, vector<8x128xf32>
    tpu.vector_store %arg19[%c32_95, %c0_96], %276 {strides = array<i32>} : memref<64x256xf32, #tpu.memory_space<vmem>>, vector<8x128xf32>,
    %c24_97 = arith.constant 24 : index
    %c128_98 = arith.constant 128 : index
    %307 = vector.load %arg19[%c24_97, %c128_98] : memref<64x256xf32, #tpu.memory_space<vmem>>, vector<8x128xf32>
    tpu.vector_store %arg19[%c24_97, %c128_98], %305 {strides = array<i32>} : memref<64x256xf32, #tpu.memory_space<vmem>>, vector<8x128xf32>,
    %c40_99 = arith.constant 40 : index
    %c0_100 = arith.constant 0 : index
    %308 = vector.load %arg17[%c40_99, %c0_100] : memref<64x1024xf32, #tpu.memory_space<vmem>>, vector<8x512xf32>
    %c0_101 = arith.constant 0 : index
    %c0_102 = arith.constant 0 : index
    %309 = vector.load %arg2[%c0_101, %c0_102] : memref<128x512xf32, #tpu.memory_space<vmem>>, vector<128x512xf32>
    %cst_103 = arith.constant dense<0.000000e+00> : vector<8x512xf32>
    %310 = tpu.matmul %276, %309, %cst_103 {dimension_numbers = #tpu.dot_dimension_numbers<[1], [0], [0], [1], [0, 0, 1, 1], [], []>} : vector<8x128xf32>, vector<128x512xf32>, vector<8x512xf32> -> vector<8x512xf32>
    %311 = arith.addf %308, %310 : vector<8x512xf32>
    %312 = vector.extract_strided_slice %311 {offsets = [0, 0], sizes = [8, 128], strides = [1, 1]} : vector<8x512xf32> to vector<8x128xf32>
    %313 = arith.negf %312 : vector<8x128xf32>
    %314 = math.exp %313 : vector<8x128xf32>
    %cst_104 = arith.constant 1.000000e+00 : f32
    %315 = vector.broadcast %cst_104 : f32 to vector<8x128xf32>
    %316 = arith.addf %315, %314 : vector<8x128xf32>
    %317 = arith.divf %315, %316 : vector<8x128xf32>
    %318 = vector.extract_strided_slice %311 {offsets = [0, 128], sizes = [8, 128], strides = [1, 1]} : vector<8x512xf32> to vector<8x128xf32>
    %319 = arith.negf %318 : vector<8x128xf32>
    %320 = math.exp %319 : vector<8x128xf32>
    %cst_105 = arith.constant 1.000000e+00 : f32
    %321 = vector.broadcast %cst_105 : f32 to vector<8x128xf32>
    %322 = arith.addf %321, %320 : vector<8x128xf32>
    %323 = arith.divf %321, %322 : vector<8x128xf32>
    %324 = vector.extract_strided_slice %311 {offsets = [0, 256], sizes = [8, 128], strides = [1, 1]} : vector<8x512xf32> to vector<8x128xf32>
    %325 = math.tanh %324 : vector<8x128xf32>
    %326 = vector.extract_strided_slice %311 {offsets = [0, 384], sizes = [8, 128], strides = [1, 1]} : vector<8x512xf32> to vector<8x128xf32>
    %327 = arith.negf %326 : vector<8x128xf32>
    %328 = math.exp %327 : vector<8x128xf32>
    %cst_106 = arith.constant 1.000000e+00 : f32
    %329 = vector.broadcast %cst_106 : f32 to vector<8x128xf32>
    %330 = arith.addf %329, %328 : vector<8x128xf32>
    %331 = arith.divf %329, %330 : vector<8x128xf32>
    %332 = arith.mulf %323, %274 : vector<8x128xf32>
    %333 = arith.mulf %317, %325 : vector<8x128xf32>
    %334 = arith.addf %332, %333 : vector<8x128xf32>
    %335 = math.tanh %334 : vector<8x128xf32>
    %336 = arith.mulf %331, %335 : vector<8x128xf32>
    %c16_107 = arith.constant 16 : index
    %c512_108 = arith.constant 512 : index
    %337 = vector.load %arg17[%c16_107, %c512_108] : memref<64x1024xf32, #tpu.memory_space<vmem>>, vector<8x512xf32>
    %c0_109 = arith.constant 0 : index
    %c0_110 = arith.constant 0 : index
    %338 = vector.load %arg3[%c0_109, %c0_110] : memref<128x512xf32, #tpu.memory_space<vmem>>, vector<128x512xf32>
    %cst_111 = arith.constant dense<0.000000e+00> : vector<8x512xf32>
    %339 = tpu.matmul %305, %338, %cst_111 {dimension_numbers = #tpu.dot_dimension_numbers<[1], [0], [0], [1], [0, 0, 1, 1], [], []>} : vector<8x128xf32>, vector<128x512xf32>, vector<8x512xf32> -> vector<8x512xf32>
    %340 = arith.addf %337, %339 : vector<8x512xf32>
    %341 = vector.extract_strided_slice %340 {offsets = [0, 0], sizes = [8, 128], strides = [1, 1]} : vector<8x512xf32> to vector<8x128xf32>
    %342 = arith.negf %341 : vector<8x128xf32>
    %343 = math.exp %342 : vector<8x128xf32>
    %cst_112 = arith.constant 1.000000e+00 : f32
    %344 = vector.broadcast %cst_112 : f32 to vector<8x128xf32>
    %345 = arith.addf %344, %343 : vector<8x128xf32>
    %346 = arith.divf %344, %345 : vector<8x128xf32>
    %347 = vector.extract_strided_slice %340 {offsets = [0, 128], sizes = [8, 128], strides = [1, 1]} : vector<8x512xf32> to vector<8x128xf32>
    %348 = arith.negf %347 : vector<8x128xf32>
    %349 = math.exp %348 : vector<8x128xf32>
    %cst_113 = arith.constant 1.000000e+00 : f32
    %350 = vector.broadcast %cst_113 : f32 to vector<8x128xf32>
    %351 = arith.addf %350, %349 : vector<8x128xf32>
    %352 = arith.divf %350, %351 : vector<8x128xf32>
    %353 = vector.extract_strided_slice %340 {offsets = [0, 256], sizes = [8, 128], strides = [1, 1]} : vector<8x512xf32> to vector<8x128xf32>
    %354 = math.tanh %353 : vector<8x128xf32>
    %355 = vector.extract_strided_slice %340 {offsets = [0, 384], sizes = [8, 128], strides = [1, 1]} : vector<8x512xf32> to vector<8x128xf32>
    %356 = arith.negf %355 : vector<8x128xf32>
    %357 = math.exp %356 : vector<8x128xf32>
    %cst_114 = arith.constant 1.000000e+00 : f32
    %358 = vector.broadcast %cst_114 : f32 to vector<8x128xf32>
    %359 = arith.addf %358, %357 : vector<8x128xf32>
    %360 = arith.divf %358, %359 : vector<8x128xf32>
    %361 = arith.mulf %352, %303 : vector<8x128xf32>
    %362 = arith.mulf %346, %354 : vector<8x128xf32>
    %363 = arith.addf %361, %362 : vector<8x128xf32>
    %364 = math.tanh %363 : vector<8x128xf32>
    %365 = arith.mulf %360, %364 : vector<8x128xf32>
    %c40_115 = arith.constant 40 : index
    %c0_116 = arith.constant 0 : index
    %366 = vector.load %arg19[%c40_115, %c0_116] : memref<64x256xf32, #tpu.memory_space<vmem>>, vector<8x128xf32>
    tpu.vector_store %arg19[%c40_115, %c0_116], %336 {strides = array<i32>} : memref<64x256xf32, #tpu.memory_space<vmem>>, vector<8x128xf32>,
    %c16_117 = arith.constant 16 : index
    %c128_118 = arith.constant 128 : index
    %367 = vector.load %arg19[%c16_117, %c128_118] : memref<64x256xf32, #tpu.memory_space<vmem>>, vector<8x128xf32>
    tpu.vector_store %arg19[%c16_117, %c128_118], %365 {strides = array<i32>} : memref<64x256xf32, #tpu.memory_space<vmem>>, vector<8x128xf32>,
    %c48_119 = arith.constant 48 : index
    %c0_120 = arith.constant 0 : index
    %368 = vector.load %arg17[%c48_119, %c0_120] : memref<64x1024xf32, #tpu.memory_space<vmem>>, vector<8x512xf32>
    %c0_121 = arith.constant 0 : index
    %c0_122 = arith.constant 0 : index
    %369 = vector.load %arg2[%c0_121, %c0_122] : memref<128x512xf32, #tpu.memory_space<vmem>>, vector<128x512xf32>
    %cst_123 = arith.constant dense<0.000000e+00> : vector<8x512xf32>
    %370 = tpu.matmul %336, %369, %cst_123 {dimension_numbers = #tpu.dot_dimension_numbers<[1], [0], [0], [1], [0, 0, 1, 1], [], []>} : vector<8x128xf32>, vector<128x512xf32>, vector<8x512xf32> -> vector<8x512xf32>
    %371 = arith.addf %368, %370 : vector<8x512xf32>
    %372 = vector.extract_strided_slice %371 {offsets = [0, 0], sizes = [8, 128], strides = [1, 1]} : vector<8x512xf32> to vector<8x128xf32>
    %373 = arith.negf %372 : vector<8x128xf32>
    %374 = math.exp %373 : vector<8x128xf32>
    %cst_124 = arith.constant 1.000000e+00 : f32
    %375 = vector.broadcast %cst_124 : f32 to vector<8x128xf32>
    %376 = arith.addf %375, %374 : vector<8x128xf32>
    %377 = arith.divf %375, %376 : vector<8x128xf32>
    %378 = vector.extract_strided_slice %371 {offsets = [0, 128], sizes = [8, 128], strides = [1, 1]} : vector<8x512xf32> to vector<8x128xf32>
    %379 = arith.negf %378 : vector<8x128xf32>
    %380 = math.exp %379 : vector<8x128xf32>
    %cst_125 = arith.constant 1.000000e+00 : f32
    %381 = vector.broadcast %cst_125 : f32 to vector<8x128xf32>
    %382 = arith.addf %381, %380 : vector<8x128xf32>
    %383 = arith.divf %381, %382 : vector<8x128xf32>
    %384 = vector.extract_strided_slice %371 {offsets = [0, 256], sizes = [8, 128], strides = [1, 1]} : vector<8x512xf32> to vector<8x128xf32>
    %385 = math.tanh %384 : vector<8x128xf32>
    %386 = vector.extract_strided_slice %371 {offsets = [0, 384], sizes = [8, 128], strides = [1, 1]} : vector<8x512xf32> to vector<8x128xf32>
    %387 = arith.negf %386 : vector<8x128xf32>
    %388 = math.exp %387 : vector<8x128xf32>
    %cst_126 = arith.constant 1.000000e+00 : f32
    %389 = vector.broadcast %cst_126 : f32 to vector<8x128xf32>
    %390 = arith.addf %389, %388 : vector<8x128xf32>
    %391 = arith.divf %389, %390 : vector<8x128xf32>
    %392 = arith.mulf %383, %334 : vector<8x128xf32>
    %393 = arith.mulf %377, %385 : vector<8x128xf32>
    %394 = arith.addf %392, %393 : vector<8x128xf32>
    %395 = math.tanh %394 : vector<8x128xf32>
    %396 = arith.mulf %391, %395 : vector<8x128xf32>
    %c8_127 = arith.constant 8 : index
    %c512_128 = arith.constant 512 : index
    %397 = vector.load %arg17[%c8_127, %c512_128] : memref<64x1024xf32, #tpu.memory_space<vmem>>, vector<8x512xf32>
    %c0_129 = arith.constant 0 : index
    %c0_130 = arith.constant 0 : index
    %398 = vector.load %arg3[%c0_129, %c0_130] : memref<128x512xf32, #tpu.memory_space<vmem>>, vector<128x512xf32>
    %cst_131 = arith.constant dense<0.000000e+00> : vector<8x512xf32>
    %399 = tpu.matmul %365, %398, %cst_131 {dimension_numbers = #tpu.dot_dimension_numbers<[1], [0], [0], [1], [0, 0, 1, 1], [], []>} : vector<8x128xf32>, vector<128x512xf32>, vector<8x512xf32> -> vector<8x512xf32>
    %400 = arith.addf %397, %399 : vector<8x512xf32>
    %401 = vector.extract_strided_slice %400 {offsets = [0, 0], sizes = [8, 128], strides = [1, 1]} : vector<8x512xf32> to vector<8x128xf32>
    %402 = arith.negf %401 : vector<8x128xf32>
    %403 = math.exp %402 : vector<8x128xf32>
    %cst_132 = arith.constant 1.000000e+00 : f32
    %404 = vector.broadcast %cst_132 : f32 to vector<8x128xf32>
    %405 = arith.addf %404, %403 : vector<8x128xf32>
    %406 = arith.divf %404, %405 : vector<8x128xf32>
    %407 = vector.extract_strided_slice %400 {offsets = [0, 128], sizes = [8, 128], strides = [1, 1]} : vector<8x512xf32> to vector<8x128xf32>
    %408 = arith.negf %407 : vector<8x128xf32>
    %409 = math.exp %408 : vector<8x128xf32>
    %cst_133 = arith.constant 1.000000e+00 : f32
    %410 = vector.broadcast %cst_133 : f32 to vector<8x128xf32>
    %411 = arith.addf %410, %409 : vector<8x128xf32>
    %412 = arith.divf %410, %411 : vector<8x128xf32>
    %413 = vector.extract_strided_slice %400 {offsets = [0, 256], sizes = [8, 128], strides = [1, 1]} : vector<8x512xf32> to vector<8x128xf32>
    %414 = math.tanh %413 : vector<8x128xf32>
    %415 = vector.extract_strided_slice %400 {offsets = [0, 384], sizes = [8, 128], strides = [1, 1]} : vector<8x512xf32> to vector<8x128xf32>
    %416 = arith.negf %415 : vector<8x128xf32>
    %417 = math.exp %416 : vector<8x128xf32>
    %cst_134 = arith.constant 1.000000e+00 : f32
    %418 = vector.broadcast %cst_134 : f32 to vector<8x128xf32>
    %419 = arith.addf %418, %417 : vector<8x128xf32>
    %420 = arith.divf %418, %419 : vector<8x128xf32>
    %421 = arith.mulf %412, %363 : vector<8x128xf32>
    %422 = arith.mulf %406, %414 : vector<8x128xf32>
    %423 = arith.addf %421, %422 : vector<8x128xf32>
    %424 = math.tanh %423 : vector<8x128xf32>
    %425 = arith.mulf %420, %424 : vector<8x128xf32>
    %c48_135 = arith.constant 48 : index
    %c0_136 = arith.constant 0 : index
    %426 = vector.load %arg19[%c48_135, %c0_136] : memref<64x256xf32, #tpu.memory_space<vmem>>, vector<8x128xf32>
    tpu.vector_store %arg19[%c48_135, %c0_136], %396 {strides = array<i32>} : memref<64x256xf32, #tpu.memory_space<vmem>>, vector<8x128xf32>,
    %c8_137 = arith.constant 8 : index
    %c128_138 = arith.constant 128 : index
    %427 = vector.load %arg19[%c8_137, %c128_138] : memref<64x256xf32, #tpu.memory_space<vmem>>, vector<8x128xf32>
    tpu.vector_store %arg19[%c8_137, %c128_138], %425 {strides = array<i32>} : memref<64x256xf32, #tpu.memory_space<vmem>>, vector<8x128xf32>,
    %c56_139 = arith.constant 56 : index
    %c0_140 = arith.constant 0 : index
    %428 = vector.load %arg17[%c56_139, %c0_140] : memref<64x1024xf32, #tpu.memory_space<vmem>>, vector<8x512xf32>
    %c0_141 = arith.constant 0 : index
    %c0_142 = arith.constant 0 : index
    %429 = vector.load %arg2[%c0_141, %c0_142] : memref<128x512xf32, #tpu.memory_space<vmem>>, vector<128x512xf32>
    %cst_143 = arith.constant dense<0.000000e+00> : vector<8x512xf32>
    %430 = tpu.matmul %396, %429, %cst_143 {dimension_numbers = #tpu.dot_dimension_numbers<[1], [0], [0], [1], [0, 0, 1, 1], [], []>} : vector<8x128xf32>, vector<128x512xf32>, vector<8x512xf32> -> vector<8x512xf32>
    %431 = arith.addf %428, %430 : vector<8x512xf32>
    %432 = vector.extract_strided_slice %431 {offsets = [0, 0], sizes = [8, 128], strides = [1, 1]} : vector<8x512xf32> to vector<8x128xf32>
    %433 = arith.negf %432 : vector<8x128xf32>
    %434 = math.exp %433 : vector<8x128xf32>
    %cst_144 = arith.constant 1.000000e+00 : f32
    %435 = vector.broadcast %cst_144 : f32 to vector<8x128xf32>
    %436 = arith.addf %435, %434 : vector<8x128xf32>
    %437 = arith.divf %435, %436 : vector<8x128xf32>
    %438 = vector.extract_strided_slice %431 {offsets = [0, 128], sizes = [8, 128], strides = [1, 1]} : vector<8x512xf32> to vector<8x128xf32>
    %439 = arith.negf %438 : vector<8x128xf32>
    %440 = math.exp %439 : vector<8x128xf32>
    %cst_145 = arith.constant 1.000000e+00 : f32
    %441 = vector.broadcast %cst_145 : f32 to vector<8x128xf32>
    %442 = arith.addf %441, %440 : vector<8x128xf32>
    %443 = arith.divf %441, %442 : vector<8x128xf32>
    %444 = vector.extract_strided_slice %431 {offsets = [0, 256], sizes = [8, 128], strides = [1, 1]} : vector<8x512xf32> to vector<8x128xf32>
    %445 = math.tanh %444 : vector<8x128xf32>
    %446 = vector.extract_strided_slice %431 {offsets = [0, 384], sizes = [8, 128], strides = [1, 1]} : vector<8x512xf32> to vector<8x128xf32>
    %447 = arith.negf %446 : vector<8x128xf32>
    %448 = math.exp %447 : vector<8x128xf32>
    %cst_146 = arith.constant 1.000000e+00 : f32
    %449 = vector.broadcast %cst_146 : f32 to vector<8x128xf32>
    %450 = arith.addf %449, %448 : vector<8x128xf32>
    %451 = arith.divf %449, %450 : vector<8x128xf32>
    %452 = arith.mulf %443, %394 : vector<8x128xf32>
    %453 = arith.mulf %437, %445 : vector<8x128xf32>
    %454 = arith.addf %452, %453 : vector<8x128xf32>
    %455 = math.tanh %454 : vector<8x128xf32>
    %456 = arith.mulf %451, %455 : vector<8x128xf32>
    %c0_147 = arith.constant 0 : index
    %c512_148 = arith.constant 512 : index
    %457 = vector.load %arg17[%c0_147, %c512_148] : memref<64x1024xf32, #tpu.memory_space<vmem>>, vector<8x512xf32>
    %c0_149 = arith.constant 0 : index
    %c0_150 = arith.constant 0 : index
    %458 = vector.load %arg3[%c0_149, %c0_150] : memref<128x512xf32, #tpu.memory_space<vmem>>, vector<128x512xf32>
    %cst_151 = arith.constant dense<0.000000e+00> : vector<8x512xf32>
    %459 = tpu.matmul %425, %458, %cst_151 {dimension_numbers = #tpu.dot_dimension_numbers<[1], [0], [0], [1], [0, 0, 1, 1], [], []>} : vector<8x128xf32>, vector<128x512xf32>, vector<8x512xf32> -> vector<8x512xf32>
    %460 = arith.addf %457, %459 : vector<8x512xf32>
    %461 = vector.extract_strided_slice %460 {offsets = [0, 0], sizes = [8, 128], strides = [1, 1]} : vector<8x512xf32> to vector<8x128xf32>
    %462 = arith.negf %461 : vector<8x128xf32>
    %463 = math.exp %462 : vector<8x128xf32>
    %cst_152 = arith.constant 1.000000e+00 : f32
    %464 = vector.broadcast %cst_152 : f32 to vector<8x128xf32>
    %465 = arith.addf %464, %463 : vector<8x128xf32>
    %466 = arith.divf %464, %465 : vector<8x128xf32>
    %467 = vector.extract_strided_slice %460 {offsets = [0, 128], sizes = [8, 128], strides = [1, 1]} : vector<8x512xf32> to vector<8x128xf32>
    %468 = arith.negf %467 : vector<8x128xf32>
    %469 = math.exp %468 : vector<8x128xf32>
    %cst_153 = arith.constant 1.000000e+00 : f32
    %470 = vector.broadcast %cst_153 : f32 to vector<8x128xf32>
    %471 = arith.addf %470, %469 : vector<8x128xf32>
    %472 = arith.divf %470, %471 : vector<8x128xf32>
    %473 = vector.extract_strided_slice %460 {offsets = [0, 256], sizes = [8, 128], strides = [1, 1]} : vector<8x512xf32> to vector<8x128xf32>
    %474 = math.tanh %473 : vector<8x128xf32>
    %475 = vector.extract_strided_slice %460 {offsets = [0, 384], sizes = [8, 128], strides = [1, 1]} : vector<8x512xf32> to vector<8x128xf32>
    %476 = arith.negf %475 : vector<8x128xf32>
    %477 = math.exp %476 : vector<8x128xf32>
    %cst_154 = arith.constant 1.000000e+00 : f32
    %478 = vector.broadcast %cst_154 : f32 to vector<8x128xf32>
    %479 = arith.addf %478, %477 : vector<8x128xf32>
    %480 = arith.divf %478, %479 : vector<8x128xf32>
    %481 = arith.mulf %472, %423 : vector<8x128xf32>
    %482 = arith.mulf %466, %474 : vector<8x128xf32>
    %483 = arith.addf %481, %482 : vector<8x128xf32>
    %484 = math.tanh %483 : vector<8x128xf32>
    %485 = arith.mulf %480, %484 : vector<8x128xf32>
    %c56_155 = arith.constant 56 : index
    %c0_156 = arith.constant 0 : index
    %486 = vector.load %arg19[%c56_155, %c0_156] : memref<64x256xf32, #tpu.memory_space<vmem>>, vector<8x128xf32>
    tpu.vector_store %arg19[%c56_155, %c0_156], %456 {strides = array<i32>} : memref<64x256xf32, #tpu.memory_space<vmem>>, vector<8x128xf32>,
    %c0_157 = arith.constant 0 : index
    %c128_158 = arith.constant 128 : index
    %487 = vector.load %arg19[%c0_157, %c128_158] : memref<64x256xf32, #tpu.memory_space<vmem>>, vector<8x128xf32>
    tpu.vector_store %arg19[%c0_157, %c128_158], %485 {strides = array<i32>} : memref<64x256xf32, #tpu.memory_space<vmem>>, vector<8x128xf32>,
    %c56_159 = arith.constant 56 : index
    %c0_160 = arith.constant 0 : index
    %488 = vector.load %arg19[%c56_159, %c0_160] : memref<64x256xf32, #tpu.memory_space<vmem>>, vector<8x256xf32>
    %c0_161 = arith.constant 0 : index
    %c0_162 = arith.constant 0 : index
    %489 = vector.load %arg8[%c0_161, %c0_162] : memref<256x512xf32, #tpu.memory_space<vmem>>, vector<256x512xf32>
    %cst_163 = arith.constant dense<0.000000e+00> : vector<8x512xf32>
    %490 = tpu.matmul %488, %489, %cst_163 {dimension_numbers = #tpu.dot_dimension_numbers<[1], [0], [0], [1], [0, 0, 1, 1], [], []>} : vector<8x256xf32>, vector<256x512xf32>, vector<8x512xf32> -> vector<8x512xf32>
    %c0_164 = arith.constant 0 : index
    %c0_165 = arith.constant 0 : index
    %491 = vector.load %arg10[%c0_164, %c0_165] : memref<1x512xf32, #tpu.memory_space<vmem>>, vector<1x512xf32>
    %492 = vector.broadcast %491 : vector<1x512xf32> to vector<8x512xf32>
    %493 = arith.addf %490, %492 : vector<8x512xf32>
    %c0_166 = arith.constant 0 : index
    %c0_167 = arith.constant 0 : index
    %494 = vector.load %arg9[%c0_166, %c0_167] : memref<128x512xf32, #tpu.memory_space<vmem>>, vector<128x512xf32>
    %cst_168 = arith.constant dense<0.000000e+00> : vector<8x512xf32>
    %495 = tpu.matmul %0, %494, %cst_168 {dimension_numbers = #tpu.dot_dimension_numbers<[1], [0], [0], [1], [0, 0, 1, 1], [], []>} : vector<8x128xf32>, vector<128x512xf32>, vector<8x512xf32> -> vector<8x512xf32>
    %496 = arith.addf %493, %495 : vector<8x512xf32>
    %497 = vector.extract_strided_slice %496 {offsets = [0, 0], sizes = [8, 128], strides = [1, 1]} : vector<8x512xf32> to vector<8x128xf32>
    %498 = arith.negf %497 : vector<8x128xf32>
    %499 = math.exp %498 : vector<8x128xf32>
    %cst_169 = arith.constant 1.000000e+00 : f32
    %500 = vector.broadcast %cst_169 : f32 to vector<8x128xf32>
    %501 = arith.addf %500, %499 : vector<8x128xf32>
    %502 = arith.divf %500, %501 : vector<8x128xf32>
    %503 = vector.extract_strided_slice %496 {offsets = [0, 128], sizes = [8, 128], strides = [1, 1]} : vector<8x512xf32> to vector<8x128xf32>
    %504 = arith.negf %503 : vector<8x128xf32>
    %505 = math.exp %504 : vector<8x128xf32>
    %cst_170 = arith.constant 1.000000e+00 : f32
    %506 = vector.broadcast %cst_170 : f32 to vector<8x128xf32>
    %507 = arith.addf %506, %505 : vector<8x128xf32>
    %508 = arith.divf %506, %507 : vector<8x128xf32>
    %509 = vector.extract_strided_slice %496 {offsets = [0, 256], sizes = [8, 128], strides = [1, 1]} : vector<8x512xf32> to vector<8x128xf32>
    %510 = math.tanh %509 : vector<8x128xf32>
    %511 = vector.extract_strided_slice %496 {offsets = [0, 384], sizes = [8, 128], strides = [1, 1]} : vector<8x512xf32> to vector<8x128xf32>
    %512 = arith.negf %511 : vector<8x128xf32>
    %513 = math.exp %512 : vector<8x128xf32>
    %cst_171 = arith.constant 1.000000e+00 : f32
    %514 = vector.broadcast %cst_171 : f32 to vector<8x128xf32>
    %515 = arith.addf %514, %513 : vector<8x128xf32>
    %516 = arith.divf %514, %515 : vector<8x128xf32>
    %517 = arith.mulf %508, %0 : vector<8x128xf32>
    %518 = arith.mulf %502, %510 : vector<8x128xf32>
    %519 = arith.addf %517, %518 : vector<8x128xf32>
    %520 = math.tanh %519 : vector<8x128xf32>
    %521 = arith.mulf %516, %520 : vector<8x128xf32>
    %c0_172 = arith.constant 0 : index
    %c0_173 = arith.constant 0 : index
    %522 = vector.load %arg19[%c0_172, %c0_173] : memref<64x256xf32, #tpu.memory_space<vmem>>, vector<64x256xf32>
    %c0_174 = arith.constant 0 : index
    %c0_175 = arith.constant 0 : index
    %523 = vector.load %arg5[%c0_174, %c0_175] : memref<256x512xf32, #tpu.memory_space<vmem>>, vector<256x512xf32>
    %cst_176 = arith.constant dense<0.000000e+00> : vector<64x512xf32>
    %524 = tpu.matmul %522, %523, %cst_176 {dimension_numbers = #tpu.dot_dimension_numbers<[1], [0], [0], [1], [0, 0, 1, 1], [], []>} : vector<64x256xf32>, vector<256x512xf32>, vector<64x512xf32> -> vector<64x512xf32>
    %c0_177 = arith.constant 0 : index
    %c0_178 = arith.constant 0 : index
    %525 = vector.load %arg7[%c0_177, %c0_178] : memref<1x512xf32, #tpu.memory_space<vmem>>, vector<1x512xf32>
    %526 = vector.broadcast %525 : vector<1x512xf32> to vector<64x512xf32>
    %527 = arith.addf %524, %526 : vector<64x512xf32>
    %c0_179 = arith.constant 0 : index
    %c0_180 = arith.constant 0 : index
    %528 = vector.load %arg18[%c0_179, %c0_180] : memref<64x512xf32, #tpu.memory_space<vmem>>, vector<64x512xf32>
    tpu.vector_store %arg18[%c0_179, %c0_180], %527 {strides = array<i32>} : memref<64x512xf32, #tpu.memory_space<vmem>>, vector<64x512xf32>,
    %c0_181 = arith.constant 0 : index
    %c0_182 = arith.constant 0 : index
    %529 = vector.load %arg18[%c0_181, %c0_182] : memref<64x512xf32, #tpu.memory_space<vmem>>, vector<8x512xf32>
    %c0_183 = arith.constant 0 : index
    %c0_184 = arith.constant 0 : index
    %530 = vector.load %arg6[%c0_183, %c0_184] : memref<128x512xf32, #tpu.memory_space<vmem>>, vector<128x512xf32>
    %cst_185 = arith.constant dense<0.000000e+00> : vector<8x512xf32>
    %531 = tpu.matmul %0, %530, %cst_185 {dimension_numbers = #tpu.dot_dimension_numbers<[1], [0], [0], [1], [0, 0, 1, 1], [], []>} : vector<8x128xf32>, vector<128x512xf32>, vector<8x512xf32> -> vector<8x512xf32>
    %532 = arith.addf %529, %531 : vector<8x512xf32>
    %533 = vector.extract_strided_slice %532 {offsets = [0, 0], sizes = [8, 128], strides = [1, 1]} : vector<8x512xf32> to vector<8x128xf32>
    %534 = arith.negf %533 : vector<8x128xf32>
    %535 = math.exp %534 : vector<8x128xf32>
    %cst_186 = arith.constant 1.000000e+00 : f32
    %536 = vector.broadcast %cst_186 : f32 to vector<8x128xf32>
    %537 = arith.addf %536, %535 : vector<8x128xf32>
    %538 = arith.divf %536, %537 : vector<8x128xf32>
    %539 = vector.extract_strided_slice %532 {offsets = [0, 128], sizes = [8, 128], strides = [1, 1]} : vector<8x512xf32> to vector<8x128xf32>
    %540 = arith.negf %539 : vector<8x128xf32>
    %541 = math.exp %540 : vector<8x128xf32>
    %cst_187 = arith.constant 1.000000e+00 : f32
    %542 = vector.broadcast %cst_187 : f32 to vector<8x128xf32>
    %543 = arith.addf %542, %541 : vector<8x128xf32>
    %544 = arith.divf %542, %543 : vector<8x128xf32>
    %545 = vector.extract_strided_slice %532 {offsets = [0, 256], sizes = [8, 128], strides = [1, 1]} : vector<8x512xf32> to vector<8x128xf32>
    %546 = math.tanh %545 : vector<8x128xf32>
    %547 = vector.extract_strided_slice %532 {offsets = [0, 384], sizes = [8, 128], strides = [1, 1]} : vector<8x512xf32> to vector<8x128xf32>
    %548 = arith.negf %547 : vector<8x128xf32>
    %549 = math.exp %548 : vector<8x128xf32>
    %cst_188 = arith.constant 1.000000e+00 : f32
    %550 = vector.broadcast %cst_188 : f32 to vector<8x128xf32>
    %551 = arith.addf %550, %549 : vector<8x128xf32>
    %552 = arith.divf %550, %551 : vector<8x128xf32>
    %553 = arith.mulf %544, %0 : vector<8x128xf32>
    %554 = arith.mulf %538, %546 : vector<8x128xf32>
    %555 = arith.addf %553, %554 : vector<8x128xf32>
    %556 = math.tanh %555 : vector<8x128xf32>
    %557 = arith.mulf %552, %556 : vector<8x128xf32>
    %c8_189 = arith.constant 8 : index
    %c0_190 = arith.constant 0 : index
    %558 = vector.load %arg18[%c8_189, %c0_190] : memref<64x512xf32, #tpu.memory_space<vmem>>, vector<8x512xf32>
    %c0_191 = arith.constant 0 : index
    %c0_192 = arith.constant 0 : index
    %559 = vector.load %arg6[%c0_191, %c0_192] : memref<128x512xf32, #tpu.memory_space<vmem>>, vector<128x512xf32>
    %cst_193 = arith.constant dense<0.000000e+00> : vector<8x512xf32>
    %560 = tpu.matmul %557, %559, %cst_193 {dimension_numbers = #tpu.dot_dimension_numbers<[1], [0], [0], [1], [0, 0, 1, 1], [], []>} : vector<8x128xf32>, vector<128x512xf32>, vector<8x512xf32> -> vector<8x512xf32>
    %561 = arith.addf %558, %560 : vector<8x512xf32>
    %562 = vector.extract_strided_slice %561 {offsets = [0, 0], sizes = [8, 128], strides = [1, 1]} : vector<8x512xf32> to vector<8x128xf32>
    %563 = arith.negf %562 : vector<8x128xf32>
    %564 = math.exp %563 : vector<8x128xf32>
    %cst_194 = arith.constant 1.000000e+00 : f32
    %565 = vector.broadcast %cst_194 : f32 to vector<8x128xf32>
    %566 = arith.addf %565, %564 : vector<8x128xf32>
    %567 = arith.divf %565, %566 : vector<8x128xf32>
    %568 = vector.extract_strided_slice %561 {offsets = [0, 128], sizes = [8, 128], strides = [1, 1]} : vector<8x512xf32> to vector<8x128xf32>
    %569 = arith.negf %568 : vector<8x128xf32>
    %570 = math.exp %569 : vector<8x128xf32>
    %cst_195 = arith.constant 1.000000e+00 : f32
    %571 = vector.broadcast %cst_195 : f32 to vector<8x128xf32>
    %572 = arith.addf %571, %570 : vector<8x128xf32>
    %573 = arith.divf %571, %572 : vector<8x128xf32>
    %574 = vector.extract_strided_slice %561 {offsets = [0, 256], sizes = [8, 128], strides = [1, 1]} : vector<8x512xf32> to vector<8x128xf32>
    %575 = math.tanh %574 : vector<8x128xf32>
    %576 = vector.extract_strided_slice %561 {offsets = [0, 384], sizes = [8, 128], strides = [1, 1]} : vector<8x512xf32> to vector<8x128xf32>
    %577 = arith.negf %576 : vector<8x128xf32>
    %578 = math.exp %577 : vector<8x128xf32>
    %cst_196 = arith.constant 1.000000e+00 : f32
    %579 = vector.broadcast %cst_196 : f32 to vector<8x128xf32>
    %580 = arith.addf %579, %578 : vector<8x128xf32>
    %581 = arith.divf %579, %580 : vector<8x128xf32>
    %582 = arith.mulf %573, %555 : vector<8x128xf32>
    %583 = arith.mulf %567, %575 : vector<8x128xf32>
    %584 = arith.addf %582, %583 : vector<8x128xf32>
    %585 = math.tanh %584 : vector<8x128xf32>
    %586 = arith.mulf %581, %585 : vector<8x128xf32>
    %c16_197 = arith.constant 16 : index
    %c0_198 = arith.constant 0 : index
    %587 = vector.load %arg18[%c16_197, %c0_198] : memref<64x512xf32, #tpu.memory_space<vmem>>, vector<8x512xf32>
    %c0_199 = arith.constant 0 : index
    %c0_200 = arith.constant 0 : index
    %588 = vector.load %arg6[%c0_199, %c0_200] : memref<128x512xf32, #tpu.memory_space<vmem>>, vector<128x512xf32>
    %cst_201 = arith.constant dense<0.000000e+00> : vector<8x512xf32>
    %589 = tpu.matmul %586, %588, %cst_201 {dimension_numbers = #tpu.dot_dimension_numbers<[1], [0], [0], [1], [0, 0, 1, 1], [], []>} : vector<8x128xf32>, vector<128x512xf32>, vector<8x512xf32> -> vector<8x512xf32>
    %590 = arith.addf %587, %589 : vector<8x512xf32>
    %591 = vector.extract_strided_slice %590 {offsets = [0, 0], sizes = [8, 128], strides = [1, 1]} : vector<8x512xf32> to vector<8x128xf32>
    %592 = arith.negf %591 : vector<8x128xf32>
    %593 = math.exp %592 : vector<8x128xf32>
    %cst_202 = arith.constant 1.000000e+00 : f32
    %594 = vector.broadcast %cst_202 : f32 to vector<8x128xf32>
    %595 = arith.addf %594, %593 : vector<8x128xf32>
    %596 = arith.divf %594, %595 : vector<8x128xf32>
    %597 = vector.extract_strided_slice %590 {offsets = [0, 128], sizes = [8, 128], strides = [1, 1]} : vector<8x512xf32> to vector<8x128xf32>
    %598 = arith.negf %597 : vector<8x128xf32>
    %599 = math.exp %598 : vector<8x128xf32>
    %cst_203 = arith.constant 1.000000e+00 : f32
    %600 = vector.broadcast %cst_203 : f32 to vector<8x128xf32>
    %601 = arith.addf %600, %599 : vector<8x128xf32>
    %602 = arith.divf %600, %601 : vector<8x128xf32>
    %603 = vector.extract_strided_slice %590 {offsets = [0, 256], sizes = [8, 128], strides = [1, 1]} : vector<8x512xf32> to vector<8x128xf32>
    %604 = math.tanh %603 : vector<8x128xf32>
    %605 = vector.extract_strided_slice %590 {offsets = [0, 384], sizes = [8, 128], strides = [1, 1]} : vector<8x512xf32> to vector<8x128xf32>
    %606 = arith.negf %605 : vector<8x128xf32>
    %607 = math.exp %606 : vector<8x128xf32>
    %cst_204 = arith.constant 1.000000e+00 : f32
    %608 = vector.broadcast %cst_204 : f32 to vector<8x128xf32>
    %609 = arith.addf %608, %607 : vector<8x128xf32>
    %610 = arith.divf %608, %609 : vector<8x128xf32>
    %611 = arith.mulf %602, %584 : vector<8x128xf32>
    %612 = arith.mulf %596, %604 : vector<8x128xf32>
    %613 = arith.addf %611, %612 : vector<8x128xf32>
    %614 = math.tanh %613 : vector<8x128xf32>
    %615 = arith.mulf %610, %614 : vector<8x128xf32>
    %c24_205 = arith.constant 24 : index
    %c0_206 = arith.constant 0 : index
    %616 = vector.load %arg18[%c24_205, %c0_206] : memref<64x512xf32, #tpu.memory_space<vmem>>, vector<8x512xf32>
    %c0_207 = arith.constant 0 : index
    %c0_208 = arith.constant 0 : index
    %617 = vector.load %arg6[%c0_207, %c0_208] : memref<128x512xf32, #tpu.memory_space<vmem>>, vector<128x512xf32>
    %cst_209 = arith.constant dense<0.000000e+00> : vector<8x512xf32>
    %618 = tpu.matmul %615, %617, %cst_209 {dimension_numbers = #tpu.dot_dimension_numbers<[1], [0], [0], [1], [0, 0, 1, 1], [], []>} : vector<8x128xf32>, vector<128x512xf32>, vector<8x512xf32> -> vector<8x512xf32>
    %619 = arith.addf %616, %618 : vector<8x512xf32>
    %620 = vector.extract_strided_slice %619 {offsets = [0, 0], sizes = [8, 128], strides = [1, 1]} : vector<8x512xf32> to vector<8x128xf32>
    %621 = arith.negf %620 : vector<8x128xf32>
    %622 = math.exp %621 : vector<8x128xf32>
    %cst_210 = arith.constant 1.000000e+00 : f32
    %623 = vector.broadcast %cst_210 : f32 to vector<8x128xf32>
    %624 = arith.addf %623, %622 : vector<8x128xf32>
    %625 = arith.divf %623, %624 : vector<8x128xf32>
    %626 = vector.extract_strided_slice %619 {offsets = [0, 128], sizes = [8, 128], strides = [1, 1]} : vector<8x512xf32> to vector<8x128xf32>
    %627 = arith.negf %626 : vector<8x128xf32>
    %628 = math.exp %627 : vector<8x128xf32>
    %cst_211 = arith.constant 1.000000e+00 : f32
    %629 = vector.broadcast %cst_211 : f32 to vector<8x128xf32>
    %630 = arith.addf %629, %628 : vector<8x128xf32>
    %631 = arith.divf %629, %630 : vector<8x128xf32>
    %632 = vector.extract_strided_slice %619 {offsets = [0, 256], sizes = [8, 128], strides = [1, 1]} : vector<8x512xf32> to vector<8x128xf32>
    %633 = math.tanh %632 : vector<8x128xf32>
    %634 = vector.extract_strided_slice %619 {offsets = [0, 384], sizes = [8, 128], strides = [1, 1]} : vector<8x512xf32> to vector<8x128xf32>
    %635 = arith.negf %634 : vector<8x128xf32>
    %636 = math.exp %635 : vector<8x128xf32>
    %cst_212 = arith.constant 1.000000e+00 : f32
    %637 = vector.broadcast %cst_212 : f32 to vector<8x128xf32>
    %638 = arith.addf %637, %636 : vector<8x128xf32>
    %639 = arith.divf %637, %638 : vector<8x128xf32>
    %640 = arith.mulf %631, %613 : vector<8x128xf32>
    %641 = arith.mulf %625, %633 : vector<8x128xf32>
    %642 = arith.addf %640, %641 : vector<8x128xf32>
    %643 = math.tanh %642 : vector<8x128xf32>
    %644 = arith.mulf %639, %643 : vector<8x128xf32>
    %c32_213 = arith.constant 32 : index
    %c0_214 = arith.constant 0 : index
    %645 = vector.load %arg18[%c32_213, %c0_214] : memref<64x512xf32, #tpu.memory_space<vmem>>, vector<8x512xf32>
    %c0_215 = arith.constant 0 : index
    %c0_216 = arith.constant 0 : index
    %646 = vector.load %arg6[%c0_215, %c0_216] : memref<128x512xf32, #tpu.memory_space<vmem>>, vector<128x512xf32>
    %cst_217 = arith.constant dense<0.000000e+00> : vector<8x512xf32>
    %647 = tpu.matmul %644, %646, %cst_217 {dimension_numbers = #tpu.dot_dimension_numbers<[1], [0], [0], [1], [0, 0, 1, 1], [], []>} : vector<8x128xf32>, vector<128x512xf32>, vector<8x512xf32> -> vector<8x512xf32>
    %648 = arith.addf %645, %647 : vector<8x512xf32>
    %649 = vector.extract_strided_slice %648 {offsets = [0, 0], sizes = [8, 128], strides = [1, 1]} : vector<8x512xf32> to vector<8x128xf32>
    %650 = arith.negf %649 : vector<8x128xf32>
    %651 = math.exp %650 : vector<8x128xf32>
    %cst_218 = arith.constant 1.000000e+00 : f32
    %652 = vector.broadcast %cst_218 : f32 to vector<8x128xf32>
    %653 = arith.addf %652, %651 : vector<8x128xf32>
    %654 = arith.divf %652, %653 : vector<8x128xf32>
    %655 = vector.extract_strided_slice %648 {offsets = [0, 128], sizes = [8, 128], strides = [1, 1]} : vector<8x512xf32> to vector<8x128xf32>
    %656 = arith.negf %655 : vector<8x128xf32>
    %657 = math.exp %656 : vector<8x128xf32>
    %cst_219 = arith.constant 1.000000e+00 : f32
    %658 = vector.broadcast %cst_219 : f32 to vector<8x128xf32>
    %659 = arith.addf %658, %657 : vector<8x128xf32>
    %660 = arith.divf %658, %659 : vector<8x128xf32>
    %661 = vector.extract_strided_slice %648 {offsets = [0, 256], sizes = [8, 128], strides = [1, 1]} : vector<8x512xf32> to vector<8x128xf32>
    %662 = math.tanh %661 : vector<8x128xf32>
    %663 = vector.extract_strided_slice %648 {offsets = [0, 384], sizes = [8, 128], strides = [1, 1]} : vector<8x512xf32> to vector<8x128xf32>
    %664 = arith.negf %663 : vector<8x128xf32>
    %665 = math.exp %664 : vector<8x128xf32>
    %cst_220 = arith.constant 1.000000e+00 : f32
    %666 = vector.broadcast %cst_220 : f32 to vector<8x128xf32>
    %667 = arith.addf %666, %665 : vector<8x128xf32>
    %668 = arith.divf %666, %667 : vector<8x128xf32>
    %669 = arith.mulf %660, %642 : vector<8x128xf32>
    %670 = arith.mulf %654, %662 : vector<8x128xf32>
    %671 = arith.addf %669, %670 : vector<8x128xf32>
    %672 = math.tanh %671 : vector<8x128xf32>
    %673 = arith.mulf %668, %672 : vector<8x128xf32>
    %c40_221 = arith.constant 40 : index
    %c0_222 = arith.constant 0 : index
    %674 = vector.load %arg18[%c40_221, %c0_222] : memref<64x512xf32, #tpu.memory_space<vmem>>, vector<8x512xf32>
    %c0_223 = arith.constant 0 : index
    %c0_224 = arith.constant 0 : index
    %675 = vector.load %arg6[%c0_223, %c0_224] : memref<128x512xf32, #tpu.memory_space<vmem>>, vector<128x512xf32>
    %cst_225 = arith.constant dense<0.000000e+00> : vector<8x512xf32>
    %676 = tpu.matmul %673, %675, %cst_225 {dimension_numbers = #tpu.dot_dimension_numbers<[1], [0], [0], [1], [0, 0, 1, 1], [], []>} : vector<8x128xf32>, vector<128x512xf32>, vector<8x512xf32> -> vector<8x512xf32>
    %677 = arith.addf %674, %676 : vector<8x512xf32>
    %678 = vector.extract_strided_slice %677 {offsets = [0, 0], sizes = [8, 128], strides = [1, 1]} : vector<8x512xf32> to vector<8x128xf32>
    %679 = arith.negf %678 : vector<8x128xf32>
    %680 = math.exp %679 : vector<8x128xf32>
    %cst_226 = arith.constant 1.000000e+00 : f32
    %681 = vector.broadcast %cst_226 : f32 to vector<8x128xf32>
    %682 = arith.addf %681, %680 : vector<8x128xf32>
    %683 = arith.divf %681, %682 : vector<8x128xf32>
    %684 = vector.extract_strided_slice %677 {offsets = [0, 128], sizes = [8, 128], strides = [1, 1]} : vector<8x512xf32> to vector<8x128xf32>
    %685 = arith.negf %684 : vector<8x128xf32>
    %686 = math.exp %685 : vector<8x128xf32>
    %cst_227 = arith.constant 1.000000e+00 : f32
    %687 = vector.broadcast %cst_227 : f32 to vector<8x128xf32>
    %688 = arith.addf %687, %686 : vector<8x128xf32>
    %689 = arith.divf %687, %688 : vector<8x128xf32>
    %690 = vector.extract_strided_slice %677 {offsets = [0, 256], sizes = [8, 128], strides = [1, 1]} : vector<8x512xf32> to vector<8x128xf32>
    %691 = math.tanh %690 : vector<8x128xf32>
    %692 = vector.extract_strided_slice %677 {offsets = [0, 384], sizes = [8, 128], strides = [1, 1]} : vector<8x512xf32> to vector<8x128xf32>
    %693 = arith.negf %692 : vector<8x128xf32>
    %694 = math.exp %693 : vector<8x128xf32>
    %cst_228 = arith.constant 1.000000e+00 : f32
    %695 = vector.broadcast %cst_228 : f32 to vector<8x128xf32>
    %696 = arith.addf %695, %694 : vector<8x128xf32>
    %697 = arith.divf %695, %696 : vector<8x128xf32>
    %698 = arith.mulf %689, %671 : vector<8x128xf32>
    %699 = arith.mulf %683, %691 : vector<8x128xf32>
    %700 = arith.addf %698, %699 : vector<8x128xf32>
    %701 = math.tanh %700 : vector<8x128xf32>
    %702 = arith.mulf %697, %701 : vector<8x128xf32>
    %c48_229 = arith.constant 48 : index
    %c0_230 = arith.constant 0 : index
    %703 = vector.load %arg18[%c48_229, %c0_230] : memref<64x512xf32, #tpu.memory_space<vmem>>, vector<8x512xf32>
    %c0_231 = arith.constant 0 : index
    %c0_232 = arith.constant 0 : index
    %704 = vector.load %arg6[%c0_231, %c0_232] : memref<128x512xf32, #tpu.memory_space<vmem>>, vector<128x512xf32>
    %cst_233 = arith.constant dense<0.000000e+00> : vector<8x512xf32>
    %705 = tpu.matmul %702, %704, %cst_233 {dimension_numbers = #tpu.dot_dimension_numbers<[1], [0], [0], [1], [0, 0, 1, 1], [], []>} : vector<8x128xf32>, vector<128x512xf32>, vector<8x512xf32> -> vector<8x512xf32>
    %706 = arith.addf %703, %705 : vector<8x512xf32>
    %707 = vector.extract_strided_slice %706 {offsets = [0, 0], sizes = [8, 128], strides = [1, 1]} : vector<8x512xf32> to vector<8x128xf32>
    %708 = arith.negf %707 : vector<8x128xf32>
    %709 = math.exp %708 : vector<8x128xf32>
    %cst_234 = arith.constant 1.000000e+00 : f32
    %710 = vector.broadcast %cst_234 : f32 to vector<8x128xf32>
    %711 = arith.addf %710, %709 : vector<8x128xf32>
    %712 = arith.divf %710, %711 : vector<8x128xf32>
    %713 = vector.extract_strided_slice %706 {offsets = [0, 128], sizes = [8, 128], strides = [1, 1]} : vector<8x512xf32> to vector<8x128xf32>
    %714 = arith.negf %713 : vector<8x128xf32>
    %715 = math.exp %714 : vector<8x128xf32>
    %cst_235 = arith.constant 1.000000e+00 : f32
    %716 = vector.broadcast %cst_235 : f32 to vector<8x128xf32>
    %717 = arith.addf %716, %715 : vector<8x128xf32>
    %718 = arith.divf %716, %717 : vector<8x128xf32>
    %719 = vector.extract_strided_slice %706 {offsets = [0, 256], sizes = [8, 128], strides = [1, 1]} : vector<8x512xf32> to vector<8x128xf32>
    %720 = math.tanh %719 : vector<8x128xf32>
    %721 = vector.extract_strided_slice %706 {offsets = [0, 384], sizes = [8, 128], strides = [1, 1]} : vector<8x512xf32> to vector<8x128xf32>
    %722 = arith.negf %721 : vector<8x128xf32>
    %723 = math.exp %722 : vector<8x128xf32>
    %cst_236 = arith.constant 1.000000e+00 : f32
    %724 = vector.broadcast %cst_236 : f32 to vector<8x128xf32>
    %725 = arith.addf %724, %723 : vector<8x128xf32>
    %726 = arith.divf %724, %725 : vector<8x128xf32>
    %727 = arith.mulf %718, %700 : vector<8x128xf32>
    %728 = arith.mulf %712, %720 : vector<8x128xf32>
    %729 = arith.addf %727, %728 : vector<8x128xf32>
    %730 = math.tanh %729 : vector<8x128xf32>
    %731 = arith.mulf %726, %730 : vector<8x128xf32>
    %c56_237 = arith.constant 56 : index
    %c0_238 = arith.constant 0 : index
    %732 = vector.load %arg18[%c56_237, %c0_238] : memref<64x512xf32, #tpu.memory_space<vmem>>, vector<8x512xf32>
    %c0_239 = arith.constant 0 : index
    %c0_240 = arith.constant 0 : index
    %733 = vector.load %arg6[%c0_239, %c0_240] : memref<128x512xf32, #tpu.memory_space<vmem>>, vector<128x512xf32>
    %cst_241 = arith.constant dense<0.000000e+00> : vector<8x512xf32>
    %734 = tpu.matmul %731, %733, %cst_241 {dimension_numbers = #tpu.dot_dimension_numbers<[1], [0], [0], [1], [0, 0, 1, 1], [], []>} : vector<8x128xf32>, vector<128x512xf32>, vector<8x512xf32> -> vector<8x512xf32>
    %735 = arith.addf %732, %734 : vector<8x512xf32>
    %736 = vector.extract_strided_slice %735 {offsets = [0, 0], sizes = [8, 128], strides = [1, 1]} : vector<8x512xf32> to vector<8x128xf32>
    %737 = arith.negf %736 : vector<8x128xf32>
    %738 = math.exp %737 : vector<8x128xf32>
    %cst_242 = arith.constant 1.000000e+00 : f32
    %739 = vector.broadcast %cst_242 : f32 to vector<8x128xf32>
    %740 = arith.addf %739, %738 : vector<8x128xf32>
    %741 = arith.divf %739, %740 : vector<8x128xf32>
    %742 = vector.extract_strided_slice %735 {offsets = [0, 128], sizes = [8, 128], strides = [1, 1]} : vector<8x512xf32> to vector<8x128xf32>
    %743 = arith.negf %742 : vector<8x128xf32>
    %744 = math.exp %743 : vector<8x128xf32>
    %cst_243 = arith.constant 1.000000e+00 : f32
    %745 = vector.broadcast %cst_243 : f32 to vector<8x128xf32>
    %746 = arith.addf %745, %744 : vector<8x128xf32>
    %747 = arith.divf %745, %746 : vector<8x128xf32>
    %748 = vector.extract_strided_slice %735 {offsets = [0, 256], sizes = [8, 128], strides = [1, 1]} : vector<8x512xf32> to vector<8x128xf32>
    %749 = math.tanh %748 : vector<8x128xf32>
    %750 = vector.extract_strided_slice %735 {offsets = [0, 384], sizes = [8, 128], strides = [1, 1]} : vector<8x512xf32> to vector<8x128xf32>
    %751 = arith.negf %750 : vector<8x128xf32>
    %752 = math.exp %751 : vector<8x128xf32>
    %cst_244 = arith.constant 1.000000e+00 : f32
    %753 = vector.broadcast %cst_244 : f32 to vector<8x128xf32>
    %754 = arith.addf %753, %752 : vector<8x128xf32>
    %755 = arith.divf %753, %754 : vector<8x128xf32>
    %756 = arith.mulf %747, %729 : vector<8x128xf32>
    %757 = arith.mulf %741, %749 : vector<8x128xf32>
    %758 = arith.addf %756, %757 : vector<8x128xf32>
    %759 = math.tanh %758 : vector<8x128xf32>
    %760 = arith.mulf %755, %759 : vector<8x128xf32>
    %761 = tpu.concatenate %760, %521 in 1 : vector<8x128xf32>, vector<8x128xf32> -> vector<8x256xf32>
    %c0_245 = arith.constant 0 : index
    %c0_246 = arith.constant 0 : index
    %762 = vector.load %arg11[%c0_245, %c0_246] : memref<256x8xf32, #tpu.memory_space<vmem>>, vector<256x8xf32>
    %cst_247 = arith.constant dense<0.000000e+00> : vector<8x8xf32>
    %763 = tpu.matmul %761, %762, %cst_247 {dimension_numbers = #tpu.dot_dimension_numbers<[1], [0], [0], [1], [0, 0, 1, 1], [], []>} : vector<8x256xf32>, vector<256x8xf32>, vector<8x8xf32> -> vector<8x8xf32>
    %c0_248 = arith.constant 0 : index
    %c0_249 = arith.constant 0 : index
    %764 = vector.load %arg12[%c0_248, %c0_249] : memref<1x8xf32, #tpu.memory_space<vmem>>, vector<1x8xf32>
    %765 = vector.broadcast %764 : vector<1x8xf32> to vector<8x8xf32>
    %766 = arith.addf %763, %765 : vector<8x8xf32>
    %c0_250 = arith.constant 0 : index
    %c0_251 = arith.constant 0 : index
    %767 = vector.load %arg15[%c0_250, %c0_251] : memref<8x8xf32, #tpu.memory_space<vmem>>, vector<8x8xf32>
    tpu.vector_store %arg15[%c0_250, %c0_251], %766 {strides = array<i32>} : memref<8x8xf32, #tpu.memory_space<vmem>>, vector<8x8xf32>,
    %c0_252 = arith.constant 0 : index
    %c0_253 = arith.constant 0 : index
    %768 = vector.load %arg13[%c0_252, %c0_253] : memref<256x8xf32, #tpu.memory_space<vmem>>, vector<256x8xf32>
    %cst_254 = arith.constant dense<0.000000e+00> : vector<8x8xf32>
    %769 = tpu.matmul %761, %768, %cst_254 {dimension_numbers = #tpu.dot_dimension_numbers<[1], [0], [0], [1], [0, 0, 1, 1], [], []>} : vector<8x256xf32>, vector<256x8xf32>, vector<8x8xf32> -> vector<8x8xf32>
    %c0_255 = arith.constant 0 : index
    %c0_256 = arith.constant 0 : index
    %770 = vector.load %arg14[%c0_255, %c0_256] : memref<1x8xf32, #tpu.memory_space<vmem>>, vector<1x8xf32>
    %771 = vector.broadcast %770 : vector<1x8xf32> to vector<8x8xf32>
    %772 = arith.addf %769, %771 : vector<8x8xf32>
    %cst_257 = arith.constant 0.000000e+00 : f32
    %773 = vector.broadcast %cst_257 : f32 to vector<8x8xf32>
    %774 = arith.maximumf %772, %773 : vector<8x8xf32>
    %775 = math.absf %772 : vector<8x8xf32>
    %cst_258 = arith.constant 0.000000e+00 : f32
    %776 = vector.broadcast %cst_258 : f32 to vector<8x8xf32>
    %777 = arith.subf %776, %775 : vector<8x8xf32>
    %778 = math.exp %777 : vector<8x8xf32>
    %cst_259 = arith.constant 1.000000e+00 : f32
    %779 = vector.broadcast %cst_259 : f32 to vector<8x8xf32>
    %780 = arith.addf %779, %778 : vector<8x8xf32>
    %781 = math.log %780 : vector<8x8xf32>
    %782 = arith.addf %774, %781 : vector<8x8xf32>
    %c0_260 = arith.constant 0 : index
    %c0_261 = arith.constant 0 : index
    %783 = vector.load %arg16[%c0_260, %c0_261] : memref<8x8xf32, #tpu.memory_space<vmem>>, vector<8x8xf32>
    tpu.vector_store %arg16[%c0_260, %c0_261], %782 {strides = array<i32>} : memref<8x8xf32, #tpu.memory_space<vmem>>, vector<8x8xf32>,
    return
  }
}

</mosaic_0001>

<bundles_post_ra>
// kernel: tpu_custom_call.1
= control target key start
LH: loop header
LB: loop body
LE: loop exit
PB: predicated region body
PF: predicated region fallthrough
CT: control target
= control target key end

     0   :  { %s13248_s0 = inlined_call_operand.vmem [shape: f32[64,20], index: 0, kind: input, shape index: {}]   ;;  %s13249_s1 = inlined_call_operand.hbm [shape: f32[20,1024], index: 1, kind: input, shape index: {}]   ;;  %s13250_s2 = inlined_call_operand.vmem [shape: f32[128,512], index: 2, kind: input, shape index: {}]   ;;  %s13251_s3 = inlined_call_operand.hbm [shape: f32[128,512], index: 3, kind: input, shape index: {}]   ;;  %s13252_s4 = inlined_call_operand.vmem [shape: f32[1,1024], index: 4, kind: input, shape index: {}]   ;;  %s13253_s5 = inlined_call_operand.hbm [shape: f32[256,512], index: 5, kind: input, shape index: {}]   ;;  %s13254_s6 = inlined_call_operand.hbm [shape: f32[128,512], index: 6, kind: input, shape index: {}]   ;;  %s13255_s7 = inlined_call_operand.vmem [shape: f32[1,512], index: 7, kind: input, shape index: {}]   ;;  %s13256_s8 = inlined_call_operand.hbm [shape: f32[256,512], index: 8, kind: input, shape index: {}]   ;;  %s13257_s9 = inlined_call_operand.hbm [shape: f32[128,512], index: 9, kind: input, shape index: {}]   ;;  %s13258_s10 = inlined_call_operand.vmem [shape: f32[1,512], index: 10, kind: input, shape index: {}]   ;;  %s13259_s11 = inlined_call_operand.vmem [shape: f32[256,8], index: 11, kind: input, shape index: {}]   ;;  %s13260_s12 = inlined_call_operand.vmem [shape: f32[1,8], index: 12, kind: input, shape index: {}]   ;;  %s13261_s13 = inlined_call_operand.vmem [shape: f32[256,8], index: 13, kind: input, shape index: {}]   ;;  %s13262_s14 = inlined_call_operand.vmem [shape: f32[1,8], index: 14, kind: input, shape index: {}]   ;;  %s13263_s15 = inlined_call_operand.hbm [shape: f32[8,8], index: 15, kind: output, shape index: {0}]   ;;  %s13264_s16 = inlined_call_operand.hbm [shape: f32[8,8], index: 16, kind: output, shape index: {1}]  }
   0x1   :  { %13378 = sst [smem:[#allocation61_spill]] %s13248_s0 }
   0x2   :  { %13379 = sst [smem:[#allocation62_spill]] %s13264_s16 }
   0x3   :  { %22 = vsyncpa [#allocation6], 0 }
   0x4   :  { %23 = vsyncpa [#allocation9], 0 }
   0x5   :  { %24 = vsyncpa [#allocation12], 0 }
   0x6   :  { %25 = vsyncpa [#allocation15], 0 }
   0x7   :  { %26 = vsyncpa [#allocation7], 0 }
   0x8   :  { %27 = vsyncpa [#allocation18], 0  ;;  %s10196_s21 = smov [#allocation8]   ;;  %s10008_s25 = scalar_lea.hbm %s13251_s3, 8192 }
   0x9   :  { %s49_s22 = sshll.u32 %s10196_s21, 4  ;;  %p10009_p0 = scmp.ne.s32.totalorder %s13251_s3, %s10008_s25  ;;  %s50_s22 = int_to_ptr.vmem [resolvable:$true] %s49_s22 }
   0xa   :  { %p10012_p1 = scmp.lt.u32.totalorder %s10008_s25, %s13251_s3 }
   0xc   :  { %p10014_p2 = pnand %p10012_p1, %p10009_p0 }
   0xe   :  { %10017 = shalt.err (!%p10014_p2)
}
   0xf   :  { %s10018_s30 = scalar_lea.vmem %s50_s22, 8192  ;;  %p10023_p4 = scmp.lt.s32.totalorder %s50_s22, %s50_s22 }
  0x10   :  { %p10019_p3 = scmp.ne.s32.totalorder %s50_s22, %s10018_s30  ;;  %p10024_p5 = scmp.lt.s32.totalorder %s10018_s30, %s10018_s30 }
  0x12   :  { %p10025_p6 = por %p10024_p5, %p10023_p4 }
  0x14   :  { %p10026_p7 = pnand %p10025_p6, %p10019_p3 }
  0x16   :  { %10029 = shalt.err (!%p10026_p7)
}
  0x17   :  { %s10197_s0 = smov 512   ;;  %s10198_s17 = smov 32  }
  0x18   :  { %55 = dma.hbm_to_vmem [thread:$0]  %s13251_s3, 8192, %s50_s22, [#allocation9], %s10197_s0, %s10197_s0, %s10198_s17  }
  0x19   :  { %s10199_s20 = smov [#allocation11]   ;;  %s10200_s23 = smov [#allocation5]  }
  0x1a   :  { %s75_s21 = sshll.u32 %s10199_s20, 4  ;;  %s35_s24 = sshll.u32 %s10200_s23, 4  ;;  %s76_s21 = int_to_ptr.vmem [resolvable:$true] %s75_s21  ;;  %s36_s24 = int_to_ptr.vmem [resolvable:$true] %s35_s24 }
  0x1b   :  { %s10030_s27 = scalar_lea.hbm %s13254_s6, 8192 }
  0x1c   :  { %p10031_p8 = scmp.ne.s32.totalorder %s13254_s6, %s10030_s27  ;;  %p10034_p9 = scmp.lt.u32.totalorder %s10030_s27, %s13254_s6 }
  0x1e   :  { %p10036_p10 = pnand %p10034_p9, %p10031_p8 }
  0x20   :  { %10039 = shalt.err (!%p10036_p10)
}
  0x21   :  { %s10040_s3 = scalar_lea.vmem %s76_s21, 8192  ;;  %p10045_p12 = scmp.lt.s32.totalorder %s76_s21, %s76_s21 }
  0x22   :  { %p10041_p11 = scmp.ne.s32.totalorder %s76_s21, %s10040_s3  ;;  %p10046_p13 = scmp.lt.s32.totalorder %s10040_s3, %s10040_s3 }
  0x24   :  { %p10047_p0 = por %p10046_p13, %p10045_p12 }
  0x26   :  { %p10048_p1 = pnand %p10047_p0, %p10041_p11 }
  0x28   :  { %10051 = shalt.err (!%p10048_p1)
}
  0x29   :  { %81 = dma.hbm_to_vmem [thread:$0]  %s13254_s6, 8192, %s76_s21, [#allocation12], %s10197_s0, %s10197_s0, %s10198_s17  }
  0x2a   :  { %s10052_s20 = scalar_lea.hbm %s13249_s1, 3072 }
  0x2b   :  { %p10053_p2 = scmp.ne.s32.totalorder %s13249_s1, %s10052_s20  ;;  %p10056_p3 = scmp.lt.u32.totalorder %s10052_s20, %s13249_s1 }
  0x2d   :  { %p10058_p4 = pnand %p10056_p3, %p10053_p2 }
  0x2f   :  { %10061 = shalt.err (!%p10058_p4)
}
  0x30   :  { %s10062_s28 = scalar_lea.vmem %s36_s24, 3072  ;;  %p10067_p6 = scmp.lt.s32.totalorder %s36_s24, %s36_s24 }
  0x31   :  { %p10063_p5 = scmp.ne.s32.totalorder %s36_s24, %s10062_s28  ;;  %p10068_p7 = scmp.lt.s32.totalorder %s10062_s28, %s10062_s28 }
  0x33   :  { %p10069_p8 = por %p10068_p7, %p10067_p6 }
  0x35   :  { %p10070_p9 = pnand %p10069_p8, %p10063_p5 }
  0x37   :  { %10073 = shalt.err (!%p10070_p9)
}
  0x38   :  { %s10201_s6 = smov 1024   ;;  %s10202_s21 = smov 64  }
  0x39   :  { %41 = dma.hbm_to_vmem [thread:$0]  %s13249_s1, 3072, %s36_s24, [#allocation6], %s10201_s6, %s10201_s6, %s10202_s21  }
  0x3a   :  { %s10203_s3 = smov [#allocation10]   ;;  %s10204_s18 = smov [#allocation13]  }
  0x3b   :  { %s63_s22 = sshll.u32 %s10203_s3, 4  ;;  %s89_s19 = sshll.u32 %s10204_s18, 4  ;;  %s64_s22 = int_to_ptr.vmem [resolvable:$true] %s63_s22  ;;  %s90_s19 = int_to_ptr.vmem [resolvable:$true] %s89_s19 }
  0x3c   :  { %s10074_s23 = scalar_lea.hbm %s13253_s5, 16384 }
  0x3d   :  { %p10075_p10 = scmp.ne.s32.totalorder %s13253_s5, %s10074_s23  ;;  %p10078_p11 = scmp.lt.u32.totalorder %s10074_s23, %s13253_s5 }
  0x3f   :  { %p10080_p12 = pnand %p10078_p11, %p10075_p10 }
  0x41   :  { %10083 = shalt.err (!%p10080_p12)
}
  0x42   :  { %s10084_s1 = scalar_lea.vmem %s64_s22, 16384  ;;  %p10089_p0 = scmp.lt.s32.totalorder %s64_s22, %s64_s22 }
  0x43   :  { %p10085_p13 = scmp.ne.s32.totalorder %s64_s22, %s10084_s1  ;;  %p10090_p1 = scmp.lt.s32.totalorder %s10084_s1, %s10084_s1 }
  0x45   :  { %p10091_p2 = por %p10090_p1, %p10089_p0 }
  0x47   :  { %p10092_p3 = pnand %p10091_p2, %p10085_p13 }
  0x49   :  { %10095 = shalt.err (!%p10092_p3)
}
  0x4a   :  { %69 = dma.hbm_to_vmem [thread:$0]  %s13253_s5, 16384, %s64_s22, [#allocation9], %s10197_s0, %s10197_s0, %s10198_s17  }
  0x4b   :  { %s10096_s30 = scalar_lea.hbm %s13256_s8, 16384 }
  0x4c   :  { %p10097_p4 = scmp.ne.s32.totalorder %s13256_s8, %s10096_s30  ;;  %p10100_p5 = scmp.lt.u32.totalorder %s10096_s30, %s13256_s8 }
  0x4e   :  { %p10102_p6 = pnand %p10100_p5, %p10097_p4 }
  0x50   :  { %10105 = shalt.err (!%p10102_p6)
}
  0x51   :  { %s10106_s23 = scalar_lea.vmem %s90_s19, 16384  ;;  %p10111_p8 = scmp.lt.s32.totalorder %s90_s19, %s90_s19 }
  0x52   :  { %p10107_p7 = scmp.ne.s32.totalorder %s90_s19, %s10106_s23  ;;  %p10112_p9 = scmp.lt.s32.totalorder %s10106_s23, %s10106_s23 }
  0x54   :  { %p10113_p10 = por %p10112_p9, %p10111_p8 }
  0x56   :  { %p10114_p11 = pnand %p10113_p10, %p10107_p7 }
  0x58   :  { %10117 = shalt.err (!%p10114_p11)
}
  0x59   :  { %95 = dma.hbm_to_vmem [thread:$0]  %s13256_s8, 16384, %s90_s19, [#allocation12], %s10197_s0, %s10197_s0, %s10198_s17  }
  0x5a   :  { %s10205_s25 = smov [#allocation14]   ;;  %s10118_s1 = scalar_lea.hbm %s13257_s9, 8192 }
  0x5b   :  { %s101_s26 = sshll.u32 %s10205_s25, 4  ;;  %p10119_p12 = scmp.ne.s32.totalorder %s13257_s9, %s10118_s1  ;;  %s102_s26 = int_to_ptr.vmem [resolvable:$true] %s101_s26 }
  0x5c   :  { %p10122_p13 = scmp.lt.u32.totalorder %s10118_s1, %s13257_s9 }
  0x5e   :  { %p10124_p0 = pnand %p10122_p13, %p10119_p12 }
  0x60   :  { %10127 = shalt.err (!%p10124_p0)
}
  0x61   :  { %s10128_s30 = scalar_lea.vmem %s102_s26, 8192  ;;  %p10133_p2 = scmp.lt.s32.totalorder %s102_s26, %s102_s26 }
  0x62   :  { %p10129_p1 = scmp.ne.s32.totalorder %s102_s26, %s10128_s30  ;;  %p10134_p3 = scmp.lt.s32.totalorder %s10128_s30, %s10128_s30 }
  0x64   :  { %p10135_p4 = por %p10134_p3, %p10133_p2 }
  0x66   :  { %p10136_p5 = pnand %p10135_p4, %p10129_p1 }
  0x68   :  { %10139 = shalt.err (!%p10136_p5)
}
  0x69   :  { %107 = dma.hbm_to_vmem [thread:$0]  %s13257_s9, 8192, %s102_s26, [#allocation15], %s10197_s0, %s10197_s0, %s10198_s17  }
  0x6a   :  { %10184 = dma.done.wait [#allocation6], 3072  }
  0x6b   :  { %10185 = vsyncadd [#allocation6], 4294964224 }
  0x6c   :  { %10186 = dma.done.wait [#allocation9], 24576  }
  0x6d   :  { %10187 = vsyncadd [#allocation9], 4294942720 }
  0x6e   :  { %10188 = dma.done.wait [#allocation12], 24576  }
  0x6f   :  { %10189 = vsyncadd [#allocation12], 4294942720 }
  0x70   :  { %10190 = dma.done.wait [#allocation15], 8192  }
  0x71   :  { %10191 = vsyncadd [#allocation15], 4294959104  ;;  %v13267_v0 = vmov 0.0   ;;  %v145_v1 = vld [vmem:[#allocation5 + $0x8] sm:$0xff]  ;;  %v147_v3 = vld [vmem:[#allocation5 + $0x18] sm:$0xff]  ;;  %vm235_vm0 = vcmask 1043456  }
  0x72   :  { %324 = vmatprep.mubr.f32.mxu0 %v13267_v0  ;;  %437 = vmatprep.mubr.f32.mxu1 %v13267_v0  ;;  %v153_v2 = vld [vmem:[#allocation5 + $0x48] sm:$0xff]  ;;  %v155_v5 = vld [vmem:[#allocation5 + $0x58] sm:$0xff]  ;;  %v144_v6 = vld [vmem:[#allocation5] sm:$0xff]  ;;  %s13380_s17 = sld [smem:[#allocation61_spill]]  ;;  %vm210_vm1 = vcmask 162816   ;;  %vm7115_vm2 = vcmask 64512  }
  0x73   :  { %v7455_v4 = vpack.c.bf16 %v153_v2, %v145_v1  ;;  %v152_v7 = vld [vmem:[#allocation5 + $0x40] sm:$0xff]  ;;  %v7459_v8 = vpack.c.bf16 %v155_v5, %v147_v3  ;;  %v146_v10 = vld [vmem:[#allocation5 + $0x10] sm:$0xff]  ;;  %v161_v12 = vld [vmem:[#allocation5 + $0x88] sm:$0xf] }
  0x74   :  { %v7457_v9 = vpack.c.bf16 %v152_v7, %v144_v6  ;;  %v154_v11 = vld [vmem:[#allocation5 + $0x50] sm:$0xff]  ;;  %v163_v14 = vld [vmem:[#allocation5 + $0x98] sm:$0xf]  ;;  %v149_v15 = vld [vmem:[#allocation5 + $0x28] sm:$0xff] }
  0x75   :  { %7456 = vmatprep.subr.bf16.mxu0 %v7455_v4  ;;  %v7461_v13 = vpack.c.bf16 %v154_v11, %v146_v10  ;;  %7460 = vmatprep.subr.bf16.mxu1 %v7459_v8  ;;  %v157_v16 = vld [vmem:[#allocation5 + $0x68] sm:$0xff]  ;;  %v160_v17 = vld [vmem:[#allocation5 + $0x80] sm:$0xf]  ;;  %v162_v20 = vld [vmem:[#allocation5 + $0x90] sm:$0xf] }
  0x76   :  { %7458 = vmatpush1.bf16.msra.mxu0 %v7457_v9  ;;  %v148_v18 = vld [vmem:[#allocation5 + $0x20] sm:$0xff]  ;;  %v7463_v22 = vpack.c.bf16 %v157_v16, %v149_v15  ;;  %v151_v23 = vld [vmem:[#allocation5 + $0x38] sm:$0xff]  ;;  %v150_v27 = vld [vmem:[#allocation5 + $0x30] sm:$0xff] }
  0x77   :  { %7462 = vmatpush1.bf16.msra.mxu1 %v7461_v13  ;;  %7268 = vmatprep.subr.msk.mxu0 %vm235_vm0, %v161_v12  ;;  %v156_v19 = vld [vmem:[#allocation5 + $0x60] sm:$0xff]  ;;  %v159_v25 = vld [vmem:[#allocation5 + $0x78] sm:$0xff]  ;;  %v158_v28 = vld [vmem:[#allocation5 + $0x70] sm:$0xff] }
  0x78   :  { %7278 = vmatprep.subr.msk.mxu1 %vm235_vm0, %v163_v14  ;;  %v10388_v21 = vld [vmem:[%s13380_s17] sm:$0xff]  ;;  %v7465_v24 = vpack.c.bf16 %v156_v19, %v148_v18  ;;  %v7467_v26 = vpack.c.bf16 %v159_v25, %v151_v23  ;;  %v10399_v29 = vld [vmem:[%s13380_s17 + $0x8] sm:$0xff]  ;;  %v7469_v32 = vpack.c.bf16 %v158_v28, %v150_v27  ;;  %v167_v35 = vld [vmem:[#allocation5 + $0xb8] sm:$0xf] }
  0x79   :  { %v165_v30 = vld [vmem:[#allocation5 + $0xa8] sm:$0xf]  ;;  %v164_v34 = vld [vmem:[#allocation5 + $0xa0] sm:$0xf]  ;;  %v783_v37 = vld [vmem:[%s13250_s2 + $0x18] sm:$0xff] }
  0x7a   :  { %7269 = vmatpush1.msk.msra.mxu0 %vm235_vm0, %v160_v17  ;;  %v781_v31 = vld [vmem:[%s13250_s2 + $0x8] sm:$0xff]  ;;  %v787_v38 = vld [vmem:[%s13250_s2 + $0x38] sm:$0xff]  ;;  %v10426_v39 = vld [vmem:[%s13380_s17 + $0x10] sm:$0xff] }
  0x7b   :  { %7279 = vmatpush1.msk.msra.mxu1 %vm235_vm0, %v162_v20  ;;  %7270 = vmatmul.mubr.msk.f32.vlgmr.msra.gmra.mrb[0].mxu0 %vm210_vm1, %v10388_v21  ;;  %v785_v33 = vld [vmem:[%s13250_s2 + $0x28] sm:$0xff]  ;;  %v166_v40 = vld [vmem:[#allocation5 + $0xb0] sm:$0xf]  ;;  %v10431_v41 = vpack.c.bf16 %v787_v38, %v783_v37  ;;  %v10442_v42 = vld [vmem:[%s13380_s17 + $0x18] sm:$0xff] }
  0x7c   :  { %7280 = vmatmul.mubr.msk.f32.vlgmr.msra.gmra.mrb[0].mxu1 %vm210_vm1, %v10388_v21  ;;  %7464 = vmatprep.subr.bf16.mxu0 %v7463_v22  ;;  %v10412_v36 = vpack.c.bf16 %v785_v33, %v781_v31  ;;  %v10455_v43 = vld [vmem:[%s13380_s17 + $0x20] sm:$0xff]  ;;  %v10466_v44 = vld [vmem:[%s13380_s17 + $0x28] sm:$0xff]  ;;  %v10477_v45 = vld [vmem:[%s13380_s17 + $0x30] sm:$0xff] }
  0x7d   :  { %7466 = vmatpush1.bf16.msra.mxu0 %v7465_v24  ;;  %330 = vmatprep.mubr.f32.mxu0 %v13267_v0  ;;  %v10488_v46 = vld [vmem:[%s13380_s17 + $0x38] sm:$0xff]  ;;  %v780_v47 = vld [vmem:[%s13250_s2] sm:$0xff]  ;;  %v782_v49 = vld [vmem:[%s13250_s2 + $0x10] sm:$0xff] }
  0x7e   :  { %443 = vmatprep.mubr.f32.mxu1 %v13267_v0  ;;  %7468 = vmatprep.subr.bf16.mxu1 %v7467_v26  ;;  %v784_v48 = vld [vmem:[%s13250_s2 + $0x20] sm:$0xff]  ;;  %v786_v50 = vld [vmem:[%s13250_s2 + $0x30] sm:$0xff]  ;;  %v789_v51 = vld [vmem:[%s13250_s2 + $0x48] sm:$0xff] }
  0x7f   :  { %7271 = vmatmul.mubr.msk.f32.gmra.mrb[2].mxu0 %vm210_vm1, %v10399_v29  ;;  %7288 = vmatprep.subr.msk.mxu0 %vm235_vm0, %v165_v30  ;;  %v793_v52 = vld [vmem:[%s13250_s2 + $0x68] sm:$0xff]  ;;  %v10514_v53 = vpack.c.bf16 %v784_v48, %v780_v47  ;;  %v791_v54 = vld [vmem:[%s13250_s2 + $0x58] sm:$0xff]  ;;  %v10523_v56 = vpack.c.bf16 %v786_v50, %v782_v49  ;;  %v788_v57 = vld [vmem:[%s13250_s2 + $0x40] sm:$0xff] }
  0x80   :  { %7281 = vmatmul.mubr.msk.f32.gmra.mrb[2].mxu1 %vm210_vm1, %v10399_v29  ;;  %336 = vmatprep.mubr.f32.mxu0 %v13267_v0  ;;  %v795_v55 = vld [vmem:[%s13250_s2 + $0x78] sm:$0xff]  ;;  %v792_v58 = vld [vmem:[%s13250_s2 + $0x60] sm:$0xff]  ;;  %v10531_v59 = vpack.c.bf16 %v793_v52, %v789_v51  ;;  %v790_v60 = vld [vmem:[%s13250_s2 + $0x50] sm:$0xff] }
  0x81   :  { %449 = vmatprep.mubr.f32.mxu1 %v13267_v0  ;;  %7470 = vmatpush1.bf16.msra.mxu1 %v7469_v32  ;;  %v794_v61 = vld [vmem:[%s13250_s2 + $0x70] sm:$0xff]  ;;  %v10541_v62 = vpack.c.bf16 %v795_v55, %v791_v54  ;;  %v797_v63 = vld [vmem:[%s13250_s2 + $0x88] sm:$0xff]  ;;  %v10552_v2 = vpack.c.bf16 %v792_v58, %v788_v57  ;;  %v799_v3 = vld [vmem:[%s13250_s2 + $0x98] sm:$0xff] }
  0x82   :  { %7289 = vmatpush1.msk.msra.mxu0 %vm235_vm0, %v164_v34  ;;  %7298 = vmatprep.subr.msk.mxu1 %vm235_vm0, %v167_v35  ;;  %v801_v1 = vld [vmem:[%s13250_s2 + $0xa8] sm:$0xff]  ;;  %v803_v4 = vld [vmem:[%s13250_s2 + $0xb8] sm:$0xff]  ;;  %v10562_v5 = vpack.c.bf16 %v794_v61, %v790_v60  ;;  %v796_v6 = vld [vmem:[%s13250_s2 + $0x80] sm:$0xff] }
  0x83   :  { %7272 = vmatmul.mubr.msk.f32.gmra.mrb[4].mxu0 %vm210_vm1, %v10426_v39  ;;  %7472 = vmatprep.subr.bf16.mxu0 %v10412_v36  ;;  %v800_v7 = vld [vmem:[%s13250_s2 + $0xa0] sm:$0xff]  ;;  %v10572_v8 = vpack.c.bf16 %v801_v1, %v797_v63  ;;  %v798_v9 = vld [vmem:[%s13250_s2 + $0x90] sm:$0xff]  ;;  %v10583_v11 = vpack.c.bf16 %v803_v4, %v799_v3  ;;  %v805_v12 = vld [vmem:[%s13250_s2 + $0xc8] sm:$0xff] }
  0x84   :  { %7282 = vmatmul.mubr.msk.f32.gmra.mrb[4].mxu1 %vm210_vm1, %v10426_v39  ;;  %342 = vmatprep.mubr.f32.mxu0 %v13267_v0  ;;  %v802_v10 = vld [vmem:[%s13250_s2 + $0xb0] sm:$0xff]  ;;  %v809_v13 = vld [vmem:[%s13250_s2 + $0xe8] sm:$0xff]  ;;  %v10594_v14 = vpack.c.bf16 %v800_v7, %v796_v6  ;;  %v807_v15 = vld [vmem:[%s13250_s2 + $0xd8] sm:$0xff] }
  0x85   :  { %455 = vmatprep.mubr.f32.mxu1 %v13267_v0  ;;  %7299 = vmatpush1.msk.msra.mxu1 %vm235_vm0, %v166_v40  ;;  %v811_v16 = vld [vmem:[%s13250_s2 + $0xf8] sm:$0xff]  ;;  %v10604_v17 = vpack.c.bf16 %v802_v10, %v798_v9  ;;  %v804_v18 = vld [vmem:[%s13250_s2 + $0xc0] sm:$0xff]  ;;  %v10614_v20 = vpack.c.bf16 %v809_v13, %v805_v12  ;;  %v810_v22 = vld [vmem:[%s13250_s2 + $0xf0] sm:$0xff] }
  0x86   :  { %7504 = vmatprep.subr.bf16.mxu1 %v10431_v41  ;;  %v808_v19 = vld [vmem:[%s13250_s2 + $0xe0] sm:$0xff]  ;;  %v10625_v23 = vpack.c.bf16 %v811_v16, %v807_v15  ;;  %v813_v24 = vld [vmem:[%s13250_s2 + $0x108] sm:$0xff]  ;;  %v815_v27 = vld [vmem:[%s13250_s2 + $0x118] sm:$0xff] }
  0x87   :  { %7273 = vmatmul.mubr.msk.f32.gmra.mrb[6].mxu0 %vm210_vm1, %v10442_v42  ;;  %v817_v25 = vld [vmem:[%s13250_s2 + $0x128] sm:$0xff]  ;;  %v10636_v26 = vpack.c.bf16 %v808_v19, %v804_v18  ;;  %v819_v28 = vld [vmem:[%s13250_s2 + $0x138] sm:$0xff]  ;;  %v812_v30 = vld [vmem:[%s13250_s2 + $0x100] sm:$0xff] }
  0x88   :  { %7283 = vmatmul.mubr.msk.f32.gmra.mrb[6].mxu1 %vm210_vm1, %v10442_v42  ;;  %348 = vmatprep.mubr.f32.mxu0 %v13267_v0  ;;  %v816_v31 = vld [vmem:[%s13250_s2 + $0x120] sm:$0xff]  ;;  %v10656_v32 = vpack.c.bf16 %v817_v25, %v813_v24  ;;  %v814_v33 = vld [vmem:[%s13250_s2 + $0x110] sm:$0xff]  ;;  %v10667_v35 = vpack.c.bf16 %v819_v28, %v815_v27  ;;  %v821_v37 = vld [vmem:[%s13250_s2 + $0x148] sm:$0xff] }
  0x89   :  { %461 = vmatprep.mubr.f32.mxu1 %v13267_v0  ;;  %v818_v34 = vld [vmem:[%s13250_s2 + $0x130] sm:$0xff]  ;;  %v825_v38 = vld [vmem:[%s13250_s2 + $0x168] sm:$0xff]  ;;  %v823_v40 = vld [vmem:[%s13250_s2 + $0x158] sm:$0xff] }
  0x8a   :  { %v827_v47 = vld [vmem:[%s13250_s2 + $0x178] sm:$0xff]  ;;  %v10688_v48 = vpack.c.bf16 %v818_v34, %v814_v33  ;;  %v824_v49 = vld [vmem:[%s13250_s2 + $0x160] sm:$0xff]  ;;  %v10698_v50 = vpack.c.bf16 %v825_v38, %v821_v37  ;;  %v822_v51 = vld [vmem:[%s13250_s2 + $0x150] sm:$0xff] }
  0x8b   :  { %7274 = vmatmul.mubr.msk.f32.gmra.mrb[8].mxu0 %vm210_vm1, %v10455_v43  ;;  %v826_v52 = vld [vmem:[%s13250_s2 + $0x170] sm:$0xff]  ;;  %v10709_v54 = vpack.c.bf16 %v827_v47, %v823_v40  ;;  %v829_v55 = vld [vmem:[%s13250_s2 + $0x188] sm:$0xff]  ;;  %v831_v60 = vld [vmem:[%s13250_s2 + $0x198] sm:$0xff] }
  0x8c   :  { %7284 = vmatmul.mubr.msk.f32.gmra.mrb[8].mxu1 %vm210_vm1, %v10455_v43  ;;  %354 = vmatprep.mubr.f32.mxu0 %v13267_v0  ;;  %v833_v57 = vld [vmem:[%s13250_s2 + $0x1a8] sm:$0xff]  ;;  %v835_v61 = vld [vmem:[%s13250_s2 + $0x1b8] sm:$0xff]  ;;  %v10730_v63 = vpack.c.bf16 %v826_v52, %v822_v51  ;;  %v832_v1 = vld [vmem:[%s13250_s2 + $0x1a0] sm:$0xff] }
  0x8d   :  { %467 = vmatprep.mubr.f32.mxu1 %v13267_v0  ;;  %v10740_v3 = vpack.c.bf16 %v833_v57, %v829_v55  ;;  %v830_v4 = vld [vmem:[%s13250_s2 + $0x190] sm:$0xff]  ;;  %v10751_v7 = vpack.c.bf16 %v835_v61, %v831_v60  ;;  %v837_v9 = vld [vmem:[%s13250_s2 + $0x1c8] sm:$0xff]  ;;  %v839_v13 = vld [vmem:[%s13250_s2 + $0x1d8] sm:$0xff] }
  0x8e   :  { %v834_v6 = vld [vmem:[%s13250_s2 + $0x1b0] sm:$0xff]  ;;  %v841_v10 = vld [vmem:[%s13250_s2 + $0x1e8] sm:$0xff]  ;;  %v843_v15 = vld [vmem:[%s13250_s2 + $0x1f8] sm:$0xff] }
  0x8f   :  { %7275 = vmatmul.mubr.msk.f32.gmra.mrb[10].mxu0 %vm210_vm1, %v10466_v44  ;;  %v10772_v16 = vpack.c.bf16 %v834_v6, %v830_v4  ;;  %v840_v18 = vld [vmem:[%s13250_s2 + $0x1e0] sm:$0xff]  ;;  %v10782_v19 = vpack.c.bf16 %v841_v10, %v837_v9  ;;  %v10793_v24 = vpack.c.bf16 %v843_v15, %v839_v13  ;;  %v1019_v25 = vld [vmem:[#allocation8 + $0x8] sm:$0xff]  ;;  %v1020_v38 = vld [vmem:[#allocation8 + $0x10] sm:$0xff] }
  0x90   :  { %7285 = vmatmul.mubr.msk.f32.gmra.mrb[10].mxu1 %vm210_vm1, %v10466_v44  ;;  %360 = vmatprep.mubr.f32.mxu0 %v13267_v0  ;;  %v1023_v27 = vld [vmem:[#allocation8 + $0x28] sm:$0xff]  ;;  %v1018_v34 = vld [vmem:[#allocation8] sm:$0xff]  ;;  %v1024_v40 = vld [vmem:[#allocation8 + $0x30] sm:$0xff] }
  0x91   :  { %473 = vmatprep.mubr.f32.mxu1 %v13267_v0  ;;  %v1022_v37 = vld [vmem:[#allocation8 + $0x20] sm:$0xff]  ;;  %v1027_v47 = vld [vmem:[#allocation8 + $0x48] sm:$0xff]  ;;  %v1029_v51 = vld [vmem:[#allocation8 + $0x58] sm:$0xff]  ;;  %v10820_v57 = vpack.c.bf16 %v1024_v40, %v1020_v38 }
  0x92   :  { %v1033_v52 = vld [vmem:[#allocation8 + $0x78] sm:$0xff]  ;;  %v10816_v55 = vpack.c.bf16 %v1022_v37, %v1018_v34  ;;  %v1026_v61 = vld [vmem:[#allocation8 + $0x40] sm:$0xff]  ;;  %v1032_v4 = vld [vmem:[#allocation8 + $0x70] sm:$0xff] }
  0x93   :  { %7276 = vmatmul.mubr.msk.f32.gmra.mrb[12].mxu0 %vm210_vm1, %v10477_v45  ;;  %v1035_v6 = vld [vmem:[#allocation8 + $0x88] sm:$0xff]  ;;  %v1037_v10 = vld [vmem:[#allocation8 + $0x98] sm:$0xff] }
  0x94   :  { %7286 = vmatmul.mubr.msk.f32.gmra.mrb[12].mxu1 %vm210_vm1, %v10477_v45  ;;  %366 = vmatprep.mubr.f32.mxu0 %v13267_v0  ;;  %v1039_v9 = vld [vmem:[#allocation8 + $0xa8] sm:$0xff]  ;;  %v1041_v13 = vld [vmem:[#allocation8 + $0xb8] sm:$0xff] }
  0x95   :  { %479 = vmatprep.mubr.f32.mxu1 %v13267_v0  ;;  %v1047_v34 = vld [vmem:[#allocation8 + $0xe8] sm:$0xff]  ;;  %v1045_v37 = vld [vmem:[#allocation8 + $0xd8] sm:$0xff] }
  0x96   :  { %v1049_v38 = vld [vmem:[#allocation8 + $0xf8] sm:$0xff] }
  0x97   :  { %7277 = vmatmul.mubr.msk.f32.gmra.mrb[14].mxu0 %vm210_vm1, %v10488_v46 }
  0x98   :  { %7287 = vmatmul.mubr.msk.f32.gmra.mrb[14].mxu1 %vm210_vm1, %v10488_v46  ;;  %550 = vmatprep.mubr.f32.mxu0 %v13267_v0 }
  0x99   :  { %663 = vmatprep.mubr.f32.mxu1 %v13267_v0 }
  0x9b   :  { %7290 = vmatmul.mubr.msk.f32.vlgmr.msra.gmra.mrb[16].mxu0 %vm210_vm1, %v10388_v21 }
  0x9c   :  { %7300 = vmatmul.mubr.msk.f32.vlgmr.msra.gmra.mrb[16].mxu1 %vm210_vm1, %v10388_v21  ;;  %7474 = vmatpush1.bf16.msra.mxu0 %v10514_v53  ;;  %v806_v21 = vld [vmem:[%s13250_s2 + $0xd0] sm:$0xff] }
  0x9d   :  { %7506 = vmatpush1.bf16.msra.mxu1 %v10523_v56  ;;  %556 = vmatprep.mubr.f32.mxu0 %v13267_v0 }
  0x9e   :  { %669 = vmatprep.mubr.f32.mxu1 %v13267_v0  ;;  %7476 = vmatprep.subr.bf16.mxu0 %v10531_v59 }
  0x9f   :  { %7508 = vmatprep.subr.bf16.mxu1 %v10541_v62  ;;  %7291 = vmatmul.mubr.msk.f32.gmra.mrb[18].mxu0 %vm210_vm1, %v10399_v29 }
  0xa0   :  { %7301 = vmatmul.mubr.msk.f32.gmra.mrb[18].mxu1 %vm210_vm1, %v10399_v29  ;;  %7478 = vmatpush1.bf16.msra.mxu0 %v10552_v2  ;;  %v10646_v29 = vpack.c.bf16 %v810_v22, %v806_v21  ;;  %v838_v21 = vld [vmem:[%s13250_s2 + $0x1d0] sm:$0xff] }
  0xa1   :  { %7510 = vmatpush1.bf16.msra.mxu1 %v10562_v5  ;;  %562 = vmatprep.mubr.f32.mxu0 %v13267_v0  ;;  %v842_v22 = vld [vmem:[%s13250_s2 + $0x1f0] sm:$0xff] }
  0xa2   :  { %675 = vmatprep.mubr.f32.mxu1 %v13267_v0  ;;  %7480 = vmatprep.subr.bf16.mxu0 %v10572_v8  ;;  %v10802_v33 = vpack.c.bf16 %v842_v22, %v838_v21  ;;  %v1034_v21 = vld [vmem:[#allocation8 + $0x80] sm:$0xff] }
  0xa3   :  { %7512 = vmatprep.subr.bf16.mxu1 %v10583_v11  ;;  %7292 = vmatmul.mubr.msk.f32.gmra.mrb[20].mxu0 %vm210_vm1, %v10426_v39  ;;  %v1038_v22 = vld [vmem:[#allocation8 + $0xa0] sm:$0xff] }
  0xa4   :  { %7302 = vmatmul.mubr.msk.f32.gmra.mrb[20].mxu1 %vm210_vm1, %v10426_v39  ;;  %7482 = vmatpush1.bf16.msra.mxu0 %v10594_v14  ;;  %v10678_v39 = vpack.c.bf16 %v816_v31, %v812_v30  ;;  %v1021_v30 = vld [vmem:[#allocation8 + $0x18] sm:$0xff]  ;;  %v10846_v40 = vpack.c.bf16 %v1038_v22, %v1034_v21 }
  0xa5   :  { %7514 = vmatpush1.bf16.msra.mxu1 %v10604_v17  ;;  %568 = vmatprep.mubr.f32.mxu0 %v13267_v0  ;;  %v1025_v31 = vld [vmem:[#allocation8 + $0x38] sm:$0xff] }
  0xa6   :  { %681 = vmatprep.mubr.f32.mxu1 %v13267_v0  ;;  %7484 = vmatprep.subr.bf16.mxu0 %v10614_v20 }
  0xa7   :  { %7516 = vmatprep.subr.bf16.mxu1 %v10625_v23  ;;  %7293 = vmatmul.mubr.msk.f32.gmra.mrb[22].mxu0 %vm210_vm1, %v10442_v42 }
  0xa8   :  { %7303 = vmatmul.mubr.msk.f32.gmra.mrb[22].mxu1 %vm210_vm1, %v10442_v42  ;;  %7486 = vmatpush1.bf16.msra.mxu0 %v10636_v26  ;;  %v820_v42 = vld [vmem:[%s13250_s2 + $0x140] sm:$0xff] }
  0xa9   :  { %7518 = vmatpush1.bf16.msra.mxu1 %v10646_v29  ;;  %574 = vmatprep.mubr.f32.mxu0 %v13267_v0  ;;  %v10720_v58 = vpack.c.bf16 %v824_v49, %v820_v42  ;;  %v1031_v42 = vld [vmem:[#allocation8 + $0x68] sm:$0xff]  ;;  %v10811_v49 = vpack.c.bf16 %v1025_v31, %v1021_v30  ;;  %v1040_v30 = vld [vmem:[#allocation8 + $0xb0] sm:$0xff] }
  0xaa   :  { %687 = vmatprep.mubr.f32.mxu1 %v13267_v0  ;;  %7488 = vmatprep.subr.bf16.mxu0 %v10656_v32  ;;  %v10822_v60 = vpack.c.bf16 %v1031_v42, %v1027_v47  ;;  %v1043_v31 = vld [vmem:[#allocation8 + $0xc8] sm:$0xff] }
  0xab   :  { %7520 = vmatprep.subr.bf16.mxu1 %v10667_v35  ;;  %7294 = vmatmul.mubr.msk.f32.gmra.mrb[24].mxu0 %vm210_vm1, %v10455_v43  ;;  %v10852_v42 = vpack.c.bf16 %v1047_v34, %v1043_v31  ;;  %v1052_v31 = vld [vmem:[#allocation8 + $0x110] sm:$0xff] }
  0xac   :  { %7304 = vmatmul.mubr.msk.f32.gmra.mrb[24].mxu1 %vm210_vm1, %v10455_v43  ;;  %7490 = vmatpush1.bf16.msra.mxu0 %v10678_v39  ;;  %v828_v43 = vld [vmem:[%s13250_s2 + $0x180] sm:$0xff] }
  0xad   :  { %7522 = vmatpush1.bf16.msra.mxu1 %v10688_v48  ;;  %580 = vmatprep.mubr.f32.mxu0 %v13267_v0  ;;  %v10762_v12 = vpack.c.bf16 %v832_v1, %v828_v43  ;;  %v1030_v43 = vld [vmem:[#allocation8 + $0x60] sm:$0xff]  ;;  %v1028_v1 = vld [vmem:[#allocation8 + $0x50] sm:$0xff]  ;;  %13382 = vst [vmem:[#allocation26_spill] sm:$0xff] %v10852_v42 }
  0xae   :  { %693 = vmatprep.mubr.f32.mxu1 %v13267_v0  ;;  %7492 = vmatprep.subr.bf16.mxu0 %v10698_v50  ;;  %v10832_v15 = vpack.c.bf16 %v1030_v43, %v1026_v61  ;;  %v1044_v61 = vld [vmem:[#allocation8 + $0xd0] sm:$0xff]  ;;  %v10855_v43 = vpack.c.bf16 %v1049_v38, %v1045_v37  ;;  %v1059_v38 = vld [vmem:[#allocation8 + $0x148] sm:$0xff] }
  0xaf   :  { %7524 = vmatprep.subr.bf16.mxu1 %v10709_v54  ;;  %7295 = vmatmul.mubr.msk.f32.gmra.mrb[26].mxu0 %vm210_vm1, %v10466_v44  ;;  %v1056_v37 = vld [vmem:[#allocation8 + $0x130] sm:$0xff] }
  0xb0   :  { %7305 = vmatmul.mubr.msk.f32.gmra.mrb[26].mxu1 %vm210_vm1, %v10466_v44  ;;  %7494 = vmatpush1.bf16.msra.mxu0 %v10720_v58  ;;  %v836_v44 = vld [vmem:[%s13250_s2 + $0x1c0] sm:$0xff]  ;;  %13383 = vst [vmem:[#allocation27_spill] sm:$0xff] %v10855_v43 }
  0xb1   :  { %7526 = vmatpush1.bf16.msra.mxu1 %v10730_v63  ;;  %586 = vmatprep.mubr.f32.mxu0 %v13267_v0  ;;  %v10798_v28 = vpack.c.bf16 %v840_v18, %v836_v44  ;;  %v10836_v44 = vpack.c.bf16 %v1032_v4, %v1028_v1  ;;  %v10838_v18 = vpack.c.bf16 %v1039_v9, %v1035_v6  ;;  %v1048_v1 = vld [vmem:[#allocation8 + $0xf0] sm:$0xff]  ;;  %v1051_v4 = vld [vmem:[#allocation8 + $0x108] sm:$0xff]  ;;  %v1053_v9 = vld [vmem:[#allocation8 + $0x118] sm:$0xff] }
  0xb2   :  { %699 = vmatprep.mubr.f32.mxu1 %v13267_v0  ;;  %7496 = vmatprep.subr.bf16.mxu0 %v10740_v3  ;;  %v1055_v6 = vld [vmem:[#allocation8 + $0x128] sm:$0xff]  ;;  %v10862_v21 = vpack.c.bf16 %v1048_v1, %v1044_v61  ;;  %v10874_v61 = vpack.c.bf16 %v1056_v37, %v1052_v31  ;;  %v1066_v37 = vld [vmem:[#allocation8 + $0x180] sm:$0xff] }
  0xb3   :  { %7528 = vmatprep.subr.bf16.mxu1 %v10751_v7  ;;  %7296 = vmatmul.mubr.msk.f32.gmra.mrb[28].mxu0 %vm210_vm1, %v10477_v45  ;;  %v10864_v22 = vpack.c.bf16 %v1055_v6, %v1051_v4  ;;  %v1058_v4 = vld [vmem:[#allocation8 + $0x140] sm:$0xff] }
  0xb4   :  { %7306 = vmatmul.mubr.msk.f32.gmra.mrb[28].mxu1 %vm210_vm1, %v10477_v45  ;;  %7498 = vmatpush1.bf16.msra.mxu0 %v10762_v12  ;;  %v10806_v45 = vpack.c.bf16 %v1023_v27, %v1019_v25  ;;  %v1036_v25 = vld [vmem:[#allocation8 + $0x90] sm:$0xff]  ;;  %v10841_v27 = vpack.c.bf16 %v1041_v13, %v1037_v10  ;;  %v1057_v10 = vld [vmem:[#allocation8 + $0x138] sm:$0xff]  ;;  %13385 = vst [vmem:[#allocation29_spill] sm:$0xff] %v10862_v21  ;;  %13389 = vst [vmem:[#allocation33_spill] sm:$0xff] %v10874_v61 }
  0xb5   :  { %7530 = vmatpush1.bf16.msra.mxu1 %v10772_v16  ;;  %592 = vmatprep.mubr.f32.mxu0 %v13267_v0  ;;  %v10850_v47 = vpack.c.bf16 %v1040_v30, %v1036_v25  ;;  %13386 = vst [vmem:[#allocation30_spill] sm:$0xff] %v10864_v22  ;;  %v1050_v25 = vld [vmem:[#allocation8 + $0x100] sm:$0xff]  ;;  %v10867_v34 = vpack.c.bf16 %v1057_v10, %v1053_v9  ;;  %v1060_v9 = vld [vmem:[#allocation8 + $0x150] sm:$0xff] }
  0xb6   :  { %705 = vmatprep.mubr.f32.mxu1 %v13267_v0  ;;  %7500 = vmatprep.subr.bf16.mxu0 %v10782_v19  ;;  %v1054_v30 = vld [vmem:[#allocation8 + $0x120] sm:$0xff] }
  0xb7   :  { %7532 = vmatprep.subr.bf16.mxu1 %v10793_v24  ;;  %7297 = vmatmul.mubr.msk.f32.gmra.mrb[30].mxu0 %vm210_vm1, %v10488_v46  ;;  %13381 = vst [vmem:[#allocation25_spill] sm:$0xff] %v10850_v47  ;;  %13387 = vst [vmem:[#allocation31_spill] sm:$0xff] %v10867_v34  ;;  %v1062_v6 = vld [vmem:[#allocation8 + $0x160] sm:$0xff] }
  0xb8   :  { %7307 = vmatmul.mubr.msk.f32.gmra.mrb[30].mxu1 %vm210_vm1, %v10488_v46  ;;  %7502 = vmatpush1.bf16.msra.mxu0 %v10798_v28  ;;  %v10826_v46 = vpack.c.bf16 %v1033_v52, %v1029_v51  ;;  %v1042_v51 = vld [vmem:[#allocation8 + $0xc0] sm:$0xff] }
  0xb9   :  { %7534 = vmatpush1.bf16.msra.mxu1 %v10802_v33  ;;  %908 = vmatprep.mubr.f32.mxu0 %v13267_v0  ;;  %v1046_v52 = vld [vmem:[#allocation8 + $0xe0] sm:$0xff] }
  0xba   :  { %979 = vmatprep.mubr.f32.mxu1 %v13267_v0  ;;  %7536 = vmatprep.subr.bf16.mxu0 %v10806_v45  ;;  %v10858_v13 = vpack.c.bf16 %v1046_v52, %v1042_v51  ;;  %v1061_v51 = vld [vmem:[#allocation8 + $0x158] sm:$0xff] }
  0xbb   :  { %7568 = vmatprep.subr.bf16.mxu1 %v10811_v49  ;;  %909 = vmatmul.mubr.f32.vlgmr.msra.gmra.mrb[0].mxu0 %v13267_v0  ;;  %v1065_v52 = vld [vmem:[#allocation8 + $0x178] sm:$0xff] }
  0xbc   :  { %980 = vmatmul.mubr.f32.vlgmr.msra.gmra.mrb[0].mxu1 %v13267_v0  ;;  %7538 = vmatpush1.bf16.msra.mxu0 %v10816_v55  ;;  %13384 = vst [vmem:[#allocation28_spill] sm:$0xff] %v10858_v13  ;;  %v10879_v10 = vpack.c.bf16 %v1065_v52, %v1061_v51  ;;  %v1068_v51 = vld [vmem:[#allocation8 + $0x190] sm:$0xff] }
  0xbd   :  { %7570 = vmatpush1.bf16.msra.mxu1 %v10820_v57  ;;  %7540 = vmatprep.subr.bf16.mxu0 %v10822_v60 }
  0xbe   :  { %7572 = vmatprep.subr.bf16.mxu1 %v10826_v46  ;;  %1146 = vmatprep.mubr.f32.mxu0 %v13267_v0  ;;  %13390 = vst [vmem:[#allocation34_spill] sm:$0xff] %v10879_v10 }
  0xbf   :  { %1217 = vmatprep.mubr.f32.mxu1 %v13267_v0  ;;  %v1063_v0 = vld [vmem:[#allocation8 + $0x168] sm:$0xff] }
  0xc0   :  { %7542 = vmatpush1.bf16.msra.mxu0 %v10832_v15  ;;  %v10876_v1 = vpack.c.bf16 %v1063_v0, %v1059_v38  ;;  %v1070_v38 = vld [vmem:[#allocation8 + $0x1a0] sm:$0xff] }
  0xc1   :  { %7574 = vmatpush1.bf16.msra.mxu1 %v10836_v44  ;;  %7544 = vmatprep.subr.bf16.mxu0 %v10838_v18 }
  0xc2   :  { %7576 = vmatprep.subr.bf16.mxu1 %v10841_v27 }
  0xc4   :  { %7546 = vmatpush1.bf16.msra.mxu0 %v10846_v40 }
  0xc5   :  { %7578 = vmatpush1.bf16.msra.mxu1 %v10850_v47  ;;  %7548 = vmatprep.subr.bf16.mxu0 %v10852_v42  ;;  %v10870_v47 = vpack.c.bf16 %v1054_v30, %v1050_v25  ;;  %v1067_v42 = vld [vmem:[#allocation8 + $0x188] sm:$0xff]  ;;  %v1069_v25 = vld [vmem:[#allocation8 + $0x198] sm:$0xff] }
  0xc6   :  { %7580 = vmatprep.subr.bf16.mxu1 %v10855_v43  ;;  %v1064_v43 = vld [vmem:[#allocation8 + $0x170] sm:$0xff]  ;;  %v1073_v30 = vld [vmem:[#allocation8 + $0x1b8] sm:$0xff] }
  0xc7   :  { %13388 = vst [vmem:[#allocation32_spill] sm:$0xff] %v10870_v47  ;;  %v10886_v0 = vpack.c.bf16 %v1064_v43, %v1060_v9  ;;  %v10891_v52 = vpack.c.bf16 %v1073_v30, %v1069_v25  ;;  %v1078_v9 = vld [vmem:[#allocation8 + $0x1e0] sm:$0xff]  ;;  %v1076_v30 = vld [vmem:[#allocation8 + $0x1d0] sm:$0xff] }
  0xc8   :  { %7550 = vmatpush1.bf16.msra.mxu0 %v10858_v13  ;;  %v1071_v13 = vld [vmem:[#allocation8 + $0x1a8] sm:$0xff] }
  0xc9   :  { %7582 = vmatpush1.bf16.msra.mxu1 %v10862_v21  ;;  %7552 = vmatprep.subr.bf16.mxu0 %v10864_v22  ;;  %v10882_v21 = vpack.c.bf16 %v1062_v6, %v1058_v4  ;;  %v10888_v31 = vpack.c.bf16 %v1071_v13, %v1067_v42  ;;  %v1075_v22 = vld [vmem:[#allocation8 + $0x1c8] sm:$0xff]  ;;  %v1077_v4 = vld [vmem:[#allocation8 + $0x1d8] sm:$0xff]  ;;  %v1074_v13 = vld [vmem:[#allocation8 + $0x1c0] sm:$0xff] }
  0xca   :  { %7584 = vmatprep.subr.bf16.mxu1 %v10867_v34  ;;  %v1072_v34 = vld [vmem:[#allocation8 + $0x1b0] sm:$0xff]  ;;  %v1081_v6 = vld [vmem:[#allocation8 + $0x1f8] sm:$0xff] }
  0xcb   :  { %v10898_v42 = vpack.c.bf16 %v1072_v34, %v1068_v51  ;;  %v10903_v25 = vpack.c.bf16 %v1081_v6, %v1077_v4 }
  0xcc   :  { %7554 = vmatpush1.bf16.msra.mxu0 %v10870_v47  ;;  %v1079_v47 = vld [vmem:[#allocation8 + $0x1e8] sm:$0xff] }
  0xcd   :  { %7586 = vmatpush1.bf16.msra.mxu1 %v10874_v61  ;;  %7556 = vmatprep.subr.bf16.mxu0 %v10876_v1  ;;  %v10894_v61 = vpack.c.bf16 %v1070_v38, %v1066_v37  ;;  %v10900_v43 = vpack.c.bf16 %v1079_v47, %v1075_v22  ;;  %v10906_v37 = vpack.c.bf16 %v1078_v9, %v1074_v13  ;;  %v13391_v47 = vmov 0.0  }
  0xce   :  { %7588 = vmatprep.subr.bf16.mxu1 %v10879_v10  ;;  %v1080_v10 = vld [vmem:[#allocation8 + $0x1f0] sm:$0xff] }
  0xcf   :  { %v10910_v34 = vpack.c.bf16 %v1080_v10, %v1076_v30 }
  0xd0   :  { %7558 = vmatpush1.bf16.msra.mxu0 %v10882_v21 }
  0xd1   :  { %7590 = vmatpush1.bf16.msra.mxu1 %v10886_v0  ;;  %7560 = vmatprep.subr.bf16.mxu0 %v10888_v31 }
  0xd2   :  { %7592 = vmatprep.subr.bf16.mxu1 %v10891_v52 }
  0xd4   :  { %7562 = vmatpush1.bf16.msra.mxu0 %v10894_v61 }
  0xd5   :  { %7594 = vmatpush1.bf16.msra.mxu1 %v10898_v42  ;;  %7564 = vmatprep.subr.bf16.mxu0 %v10900_v43 }
  0xd6   :  { %7596 = vmatprep.subr.bf16.mxu1 %v10903_v25 }
  0xd8   :  { %7566 = vmatpush1.bf16.msra.mxu0 %v10906_v37 }
  0xd9   :  { %7598 = vmatpush1.bf16.msra.mxu1 %v10910_v34  ;;  %7600 = vmatprep.subr.bf16.mxu0 %v10412_v36  ;;  %v170_v36 = vlaneseq }
  0xda   :  { %7632 = vmatprep.subr.bf16.mxu1 %v10431_v41 }
  0xdb   :  { %1147 = vmatmul.mubr.f32.vlgmr.msra.gmra.mrb[30].mxu0 %v13391_v47  ;;  %v171_v41 = vshrl.u32 %v170_v36, 7 }
  0xdc   :  { %1218 = vmatmul.mubr.f32.vlgmr.msra.gmra.mrb[30].mxu1 %v13391_v47  ;;  %7602 = vmatpush1.bf16.msra.mxu0 %v10514_v53 }
  0xdd   :  { %7634 = vmatpush1.bf16.msra.mxu1 %v10523_v56  ;;  %7604 = vmatprep.subr.bf16.mxu0 %v10531_v59  ;;  %v10953_v53 = vsub.s32 0, %v171_v41  ;;  %v168_v56 = vld [vmem:[%s13252_s4] sm:$0xff]  ;;  %v10958_v59 = vsub.s32 1, %v171_v41  ;;  %v200_v6 = vsub.s32 7, %v171_v41 }
  0xde   :  { %7636 = vmatprep.subr.bf16.mxu1 %v10541_v62  ;;  %1386 = vmatprep.mubr.f32.mxu0 %v13391_v47 }
  0xdf   :  { %1457 = vmatprep.mubr.f32.mxu1 %v13391_v47  ;;  %13392 = vst [vmem:[#allocation35_spill] sm:$0xff] %v10953_v53  ;;  %13393 = vst [vmem:[#allocation36_spill] sm:$0xff] %v10958_v59  ;;  %v10961_v62 = vrot.slane %v168_v56, %v10953_v53 }
  0xe0   :  { %7606 = vmatpush1.bf16.msra.mxu0 %v10552_v2  ;;  %v10964_v2 = vrot.slane %v168_v56, %v10958_v59 }
  0xe1   :  { %7638 = vmatpush1.bf16.msra.mxu1 %v10562_v5  ;;  %7608 = vmatprep.subr.bf16.mxu0 %v10572_v8  ;;  %v10966_v8 = vsub.s32 3, %v171_v41 }
  0xe2   :  { %7640 = vmatprep.subr.bf16.mxu1 %v10583_v11  ;;  %13394 = vst [vmem:[#allocation37_spill] sm:$0xff] %v10964_v2 }
  0xe3   :  { %13395 = vst [vmem:[#allocation38_spill] sm:$0xff] %v10966_v8 }
  0xe4   :  { %7610 = vmatpush1.bf16.msra.mxu0 %v10594_v14 }
  0xe5   :  { %7642 = vmatpush1.bf16.msra.mxu1 %v10604_v17  ;;  %7612 = vmatprep.subr.bf16.mxu0 %v10614_v20 }
  0xe6   :  { %7644 = vmatprep.subr.bf16.mxu1 %v10625_v23 }
  0xe8   :  { %7614 = vmatpush1.bf16.msra.mxu0 %v10636_v26 }
  0xe9   :  { %7646 = vmatpush1.bf16.msra.mxu1 %v10646_v29  ;;  %7616 = vmatprep.subr.bf16.mxu0 %v10656_v32  ;;  %v10971_v32 = vrot.slane %v168_v56, %v10966_v8 }
  0xea   :  { %7648 = vmatprep.subr.bf16.mxu1 %v10667_v35  ;;  %v10973_v35 = vsub.s32 2, %v171_v41 }
  0xeb   :  { %13396 = vst [vmem:[#allocation39_spill] sm:$0xff] %v10971_v32 }
  0xec   :  { %7618 = vmatpush1.bf16.msra.mxu0 %v10678_v39  ;;  %13397 = vst [vmem:[#allocation40_spill] sm:$0xff] %v10973_v35 }
  0xed   :  { %7650 = vmatpush1.bf16.msra.mxu1 %v10688_v48  ;;  %7620 = vmatprep.subr.bf16.mxu0 %v10698_v50  ;;  %v10977_v48 = vrot.slane %v168_v56, %v10973_v35 }
  0xee   :  { %7652 = vmatprep.subr.bf16.mxu1 %v10709_v54 }
  0xef   :  { %13398 = vst [vmem:[#allocation41_spill] sm:$0xff] %v10977_v48 }
  0xf0   :  { %7622 = vmatpush1.bf16.msra.mxu0 %v10720_v58 }
  0xf1   :  { %7654 = vmatpush1.bf16.msra.mxu1 %v10730_v63  ;;  %7624 = vmatprep.subr.bf16.mxu0 %v10740_v3 }
  0xf2   :  { %7656 = vmatprep.subr.bf16.mxu1 %v10751_v7 }
  0xf4   :  { %7626 = vmatpush1.bf16.msra.mxu0 %v10762_v12  ;;  %v188_v12 = vsub.s32 4, %v171_v41 }
  0xf5   :  { %7658 = vmatpush1.bf16.msra.mxu1 %v10772_v16  ;;  %7628 = vmatprep.subr.bf16.mxu0 %v10782_v19  ;;  %v192_v19 = vsub.s32 5, %v171_v41 }
  0xf6   :  { %7660 = vmatprep.subr.bf16.mxu1 %v10793_v24  ;;  %v10980_v22 = vrot.slane %v168_v56, %v188_v12 }
  0xf7   :  { %v10982_v38 = vrot.slane %v168_v56, %v192_v19 }
  0xf8   :  { %7630 = vmatpush1.bf16.msra.mxu0 %v10798_v28  ;;  %13399 = vst [vmem:[#allocation42_spill] sm:$0xff] %v10980_v22 }
  0xf9   :  { %7662 = vmatpush1.bf16.msra.mxu1 %v10802_v33  ;;  %7664 = vmatprep.subr.bf16.mxu0 %v10806_v45  ;;  %13400 = vst [vmem:[#allocation43_spill] sm:$0xff] %v10982_v38 }
  0xfa   :  { %7696 = vmatprep.subr.bf16.mxu1 %v10811_v49 }
 0x18e   :  { %v910_v5 = vpop.f32.mrb[0].mxu0 }
 0x18f   :  { %v9391_v11 = vadd.f32 %v910_v5, %v10961_v62  ;;  %v981_v14 = vpop.f32.mrb[0].mxu1  ;;  %v912_v17 = vpop.f32.mrb[1].mxu0 }
 0x190   :  { %v9392_v20 = vadd.f32 %v912_v17, %v10964_v2  ;;  %v983_v23 = vpop.f32.mrb[1].mxu1  ;;  %v9407_v54 = vadd.f32 %v981_v14, %v10977_v48  ;;  %v10989_v17 = vrot.slane %v168_v56, %v200_v6  ;;  %v1742_v6 = vld [vmem:[%s13250_s2 + $0x30] sm:$0xff] }
 0x191   :  { %v7308_v26 = vmul.f32 -1.442695, %v9391_v11  ;;  %v9408_v39 = vadd.f32 %v983_v23, %v10971_v32 }
 0x192   :  { %v7309_v29 = vmul.f32 -1.442695, %v9392_v20  ;;  %13401 = vst [vmem:[#allocation44_spill] sm:$0xff] %v10989_v17  ;;  %v196_v20 = vsub.s32 6, %v171_v41 }
 0x193   :  { %9604 = vpow2.f32 %v7308_v26  ;;  %v7310_v50 = vmul.f32 -1.442695, %v9408_v39 }
 0x194   :  { %9606 = vpow2.f32 %v7309_v29  ;;  %v10992_v26 = vrot.slane %v168_v56, %v196_v20  ;;  %v1748_v20 = vld [vmem:[%s13250_s2 + $0x60] sm:$0xff] }
 0x195   :  { %9608 = vpow2.f32 %v7310_v50 }
 0x196   :  { %9610 = vtanh.f32 %v9407_v54 }
 0x19d   :  { %v9605_v58 = vpop.eup %9604 }
 0x19e   :  { %v9607_v63 = vpop.eup %9606  ;;  %v993_v3 = vadd.f32 1.0, %v9605_v58 }
 0x19f   :  { %v999_v7 = vadd.f32 1.0, %v9607_v63  ;;  %v9609_v16 = vpop.eup %9608 }
 0x1a0   :  { %9612 = vrcp.f32 %v993_v3  ;;  %v9611_v24 = vpop.eup %9610  ;;  %v1006_v49 = vadd.f32 1.0, %v9609_v16  ;;  %v13406_v16 = vld [vmem:[#allocation28_spill] sm:$0xff] }
 0x1a1   :  { %9614 = vrcp.f32 %v999_v7 }
 0x1a2   :  { %9616 = vrcp.f32 %v1006_v49  ;;  %v13412_v49 = vld [vmem:[#allocation34_spill] sm:$0xff] }
 0x1aa   :  { %v9613_v28 = vpop.eup %9612 }
 0x1ab   :  { %v9615_v33 = vpop.eup %9614  ;;  %v1010_v45 = vmul.f32 %v9613_v28, %v9611_v24  ;;  %v13408_v24 = vld [vmem:[#allocation30_spill] sm:$0xff] }
 0x1ac   :  { %v1009_v10 = vmul.f32 0.0, %v9615_v33  ;;  %v9617_v29 = vpop.eup %9616  ;;  %v13410_v33 = vld [vmem:[#allocation32_spill] sm:$0xff] }
 0x1ae   :  { %v10984_v51 = vadd.f32 %v1010_v45, %v1009_v10  ;;  %v1148_v4 = vpop.f32.mrb[30].mxu0  ;;  %v13411_v45 = vld [vmem:[#allocation33_spill] sm:$0xff] }
 0x1af   :  { %v9437_v13 = vadd.f32 %v1148_v4, %v10980_v22  ;;  %v1219_v9 = vpop.f32.mrb[30].mxu1  ;;  %v1150_v30 = vpop.f32.mrb[31].mxu0  ;;  %v1738_v4 = vld [vmem:[%s13250_s2 + $0x10] sm:$0xff] }
 0x1b0   :  { %9618 = vtanh.f32 %v10984_v51  ;;  %v9438_v36 = vadd.f32 %v1150_v30, %v10982_v38  ;;  %v1221_v5 = vpop.f32.mrb[31].mxu1  ;;  %v9453_v54 = vadd.f32 %v1219_v9, %v10992_v26  ;;  %v1745_v9 = vld [vmem:[%s13250_s2 + $0x48] sm:$0xff] }
 0x1b1   :  { %v7311_v11 = vmul.f32 -1.442695, %v9437_v13  ;;  %v9454_v23 = vadd.f32 %v1221_v5, %v10989_v17  ;;  %v11071_v13 = vpack.c.bf16 %v1742_v6, %v1738_v4  ;;  %v1749_v30 = vld [vmem:[%s13250_s2 + $0x68] sm:$0xff]  ;;  %v1768_v4 = vld [vmem:[%s13250_s2 + $0x100] sm:$0xff] }
 0x1b2   :  { %v7312_v14 = vmul.f32 -1.442695, %v9438_v36  ;;  %v1747_v36 = vld [vmem:[%s13250_s2 + $0x58] sm:$0xff]  ;;  %v11085_v5 = vpack.c.bf16 %v1749_v30, %v1745_v9  ;;  %v1772_v6 = vld [vmem:[%s13250_s2 + $0x120] sm:$0xff] }
 0x1b3   :  { %9620 = vpow2.f32 %v7311_v11  ;;  %v7313_v50 = vmul.f32 -1.442695, %v9454_v23  ;;  %v1751_v11 = vld [vmem:[%s13250_s2 + $0x78] sm:$0xff]  ;;  %v11206_v30 = vpack.c.bf16 %v1772_v6, %v1768_v4  ;;  %v1793_v6 = vld [vmem:[%s13250_s2 + $0x1c8] sm:$0xff] }
 0x1b4   :  { %9622 = vpow2.f32 %v7312_v14  ;;  %v1744_v14 = vld [vmem:[%s13250_s2 + $0x40] sm:$0xff]  ;;  %v11096_v23 = vpack.c.bf16 %v1751_v11, %v1747_v36  ;;  %v1770_v36 = vld [vmem:[%s13250_s2 + $0x110] sm:$0xff] }
 0x1b5   :  { %9624 = vpow2.f32 %v7313_v50  ;;  %v1750_v50 = vld [vmem:[%s13250_s2 + $0x70] sm:$0xff] }
 0x1b6   :  { %9626 = vtanh.f32 %v9453_v54  ;;  %v1774_v11 = vld [vmem:[%s13250_s2 + $0x130] sm:$0xff] }
 0x1ba   :  { %v9619_v39 = vpop.eup %9618 }
 0x1bb   :  { %v10995_v58 = vmul.f32 %v9619_v39, %v9617_v29  ;;  %v11098_v29 = vpack.c.bf16 %v1748_v20, %v1744_v14  ;;  %v1746_v39 = vld [vmem:[%s13250_s2 + $0x50] sm:$0xff]  ;;  %v11215_v14 = vpack.c.bf16 %v1774_v11, %v1770_v36  ;;  %v1777_v20 = vld [vmem:[%s13250_s2 + $0x148] sm:$0xff]  ;;  %v1795_v11 = vld [vmem:[%s13250_s2 + $0x1d8] sm:$0xff] }
 0x1bc   :  { %v11107_v54 = vpack.c.bf16 %v1750_v50, %v1746_v39  ;;  %v1781_v39 = vld [vmem:[%s13250_s2 + $0x168] sm:$0xff]  ;;  %v1779_v50 = vld [vmem:[%s13250_s2 + $0x158] sm:$0xff] }
 0x1bd   :  { %13402 = vst [vmem:[#allocation45_spill] sm:$0xff] %v10995_v58  ;;  %v9621_v63 = vpop.eup %9620  ;;  %1387 = vmatmul.mubr.f32.vlgmr.msra.gmra.mrb[2].mxu0 %v10995_v58  ;;  %1458 = vmatmul.mubr.f32.vlgmr.msra.gmra.mrb[2].mxu1 %v10995_v58  ;;  %v1797_v36 = vld [vmem:[%s13250_s2 + $0x1e8] sm:$0xff] }
 0x1be   :  { %v9623_v3 = vpop.eup %9622  ;;  %v1231_v7 = vadd.f32 1.0, %v9621_v63  ;;  %7666 = vmatpush1.bf16.msra.mxu0 %v10816_v55  ;;  %7698 = vmatpush1.bf16.msra.mxu1 %v10820_v57  ;;  %v13403_v55 = vld [vmem:[#allocation25_spill] sm:$0xff]  ;;  %v13404_v57 = vld [vmem:[#allocation26_spill] sm:$0xff]  ;;  %v1753_v63 = vld [vmem:[%s13250_s2 + $0x88] sm:$0xff] }
 0x1bf   :  { %v1237_v41 = vadd.f32 1.0, %v9623_v3  ;;  %7668 = vmatprep.subr.bf16.mxu0 %v10822_v60  ;;  %7700 = vmatprep.subr.bf16.mxu1 %v10826_v46  ;;  %v13405_v60 = vld [vmem:[#allocation27_spill] sm:$0xff]  ;;  %v9625_v46 = vpop.eup %9624  ;;  %v1757_v3 = vld [vmem:[%s13250_s2 + $0xa8] sm:$0xff] }
 0x1c0   :  { %9628 = vrcp.f32 %v1231_v7  ;;  %1624 = vmatprep.mubr.f32.mxu0 %v13391_v47  ;;  %1695 = vmatprep.mubr.f32.mxu1 %v13391_v47  ;;  %v9627_v56 = vpop.eup %9626  ;;  %v1755_v7 = vld [vmem:[%s13250_s2 + $0x98] sm:$0xff] }
 0x1c1   :  { %9630 = vrcp.f32 %v1237_v41  ;;  %v11121_v41 = vpack.c.bf16 %v1757_v3, %v1753_v63  ;;  %v11229_v63 = vpack.c.bf16 %v1781_v39, %v1777_v20  ;;  %v1783_v3 = vld [vmem:[%s13250_s2 + $0x178] sm:$0xff]  ;;  %v11301_v20 = vpack.c.bf16 %v1797_v36, %v1793_v6 }
 0x1c2   :  { %7670 = vmatpush1.bf16.msra.mxu0 %v10832_v15  ;;  %7702 = vmatpush1.bf16.msra.mxu1 %v10836_v44  ;;  %v13407_v15 = vld [vmem:[#allocation29_spill] sm:$0xff]  ;;  %v1799_v39 = vld [vmem:[%s13250_s2 + $0x1f8] sm:$0xff] }
 0x1c3   :  { %7672 = vmatprep.subr.bf16.mxu0 %v10838_v18  ;;  %7704 = vmatprep.subr.bf16.mxu1 %v10841_v27  ;;  %v1244_v18 = vadd.f32 1.0, %v9625_v46  ;;  %v13409_v27 = vld [vmem:[#allocation31_spill] sm:$0xff] }
 0x1c5   :  { %9632 = vrcp.f32 %v1244_v18  ;;  %v1763_v18 = vld [vmem:[%s13250_s2 + $0xd8] sm:$0xff] }
 0x1c6   :  { %7674 = vmatpush1.bf16.msra.mxu0 %v10846_v40  ;;  %7706 = vmatpush1.bf16.msra.mxu1 %v13403_v55  ;;  %v1759_v55 = vld [vmem:[%s13250_s2 + $0xb8] sm:$0xff] }
 0x1c7   :  { %7676 = vmatprep.subr.bf16.mxu0 %v13404_v57  ;;  %7708 = vmatprep.subr.bf16.mxu1 %v13405_v60  ;;  %v1752_v57 = vld [vmem:[%s13250_s2 + $0x80] sm:$0xff]  ;;  %v11132_v46 = vpack.c.bf16 %v1759_v55, %v1755_v7 }
 0x1c8   :  { %v1756_v60 = vld [vmem:[%s13250_s2 + $0xa0] sm:$0xff] }
 0x1c9   :  { %v1776_v7 = vld [vmem:[%s13250_s2 + $0x140] sm:$0xff] }
 0x1ca   :  { %v9629_v12 = vpop.eup %9628  ;;  %7678 = vmatpush1.bf16.msra.mxu0 %v13406_v16  ;;  %7710 = vmatpush1.bf16.msra.mxu1 %v13407_v15  ;;  %v1758_v16 = vld [vmem:[%s13250_s2 + $0xb0] sm:$0xff]  ;;  %v1780_v55 = vld [vmem:[%s13250_s2 + $0x160] sm:$0xff] }
 0x1cb   :  { %v9631_v44 = vpop.eup %9630  ;;  %v1248_v19 = vmul.f32 %v9629_v12, %v9627_v56  ;;  %7680 = vmatprep.subr.bf16.mxu0 %v13408_v24  ;;  %7712 = vmatprep.subr.bf16.mxu1 %v13409_v27  ;;  %v11134_v56 = vpack.c.bf16 %v1756_v60, %v1752_v57  ;;  %v1754_v12 = vld [vmem:[%s13250_s2 + $0x90] sm:$0xff]  ;;  %v1767_v27 = vld [vmem:[%s13250_s2 + $0xf8] sm:$0xff]  ;;  %v11240_v57 = vpack.c.bf16 %v1783_v3, %v1779_v50  ;;  %v1792_v50 = vld [vmem:[%s13250_s2 + $0x1c0] sm:$0xff] }
 0x1cc   :  { %v1247_v40 = vmul.f32 0.0, %v9631_v44  ;;  %v11143_v15 = vpack.c.bf16 %v1758_v16, %v1754_v12  ;;  %v1761_v44 = vld [vmem:[%s13250_s2 + $0xc8] sm:$0xff]  ;;  %v11242_v60 = vpack.c.bf16 %v1780_v55, %v1776_v7  ;;  %v1778_v12 = vld [vmem:[%s13250_s2 + $0x150] sm:$0xff]  ;;  %v1796_v3 = vld [vmem:[%s13250_s2 + $0x1e0] sm:$0xff]  ;;  %v11312_v7 = vpack.c.bf16 %v1799_v39, %v1795_v11 }
 0x1cd   :  { %v1782_v16 = vld [vmem:[%s13250_s2 + $0x170] sm:$0xff]  ;;  %v11314_v55 = vpack.c.bf16 %v1796_v3, %v1792_v50 }
 0x1ce   :  { %v11017_v28 = vadd.f32 %v1248_v19, %v1247_v40  ;;  %7682 = vmatpush1.bf16.msra.mxu0 %v13410_v33  ;;  %7714 = vmatpush1.bf16.msra.mxu1 %v13411_v45  ;;  %v1765_v19 = vld [vmem:[%s13250_s2 + $0xe8] sm:$0xff]  ;;  %v1760_v40 = vld [vmem:[%s13250_s2 + $0xc0] sm:$0xff]  ;;  %v11168_v45 = vpack.c.bf16 %v1767_v27, %v1763_v18  ;;  %v1787_v27 = vld [vmem:[%s13250_s2 + $0x198] sm:$0xff] }
 0x1cf   :  { %7684 = vmatprep.subr.bf16.mxu0 %v10876_v1  ;;  %7716 = vmatprep.subr.bf16.mxu1 %v13412_v49  ;;  %v9633_v1 = vpop.eup %9632  ;;  %v11157_v24 = vpack.c.bf16 %v1765_v19, %v1761_v44  ;;  %v1764_v33 = vld [vmem:[%s13250_s2 + $0xe0] sm:$0xff]  ;;  %v11251_v44 = vpack.c.bf16 %v1782_v16, %v1778_v12  ;;  %v1785_v19 = vld [vmem:[%s13250_s2 + $0x188] sm:$0xff]  ;;  %v1794_v12 = vld [vmem:[%s13250_s2 + $0x1d0] sm:$0xff] }
 0x1d0   :  { %9634 = vtanh.f32 %v11017_v28  ;;  %v11170_v49 = vpack.c.bf16 %v1764_v33, %v1760_v40  ;;  %v1789_v18 = vld [vmem:[%s13250_s2 + $0x1a8] sm:$0xff]  ;;  %v1791_v33 = vld [vmem:[%s13250_s2 + $0x1b8] sm:$0xff]  ;;  %v1798_v16 = vld [vmem:[%s13250_s2 + $0x1f0] sm:$0xff] }
 0x1d1   :  { %v11265_v40 = vpack.c.bf16 %v1789_v18, %v1785_v19  ;;  %v11323_v19 = vpack.c.bf16 %v1798_v16, %v1794_v12  ;;  %v1975_v18 = vld [vmem:[#allocation8 + $0x8] sm:$0xff] }
 0x1d2   :  { %7686 = vmatpush1.bf16.msra.mxu0 %v10882_v21  ;;  %7718 = vmatpush1.bf16.msra.mxu1 %v10886_v0  ;;  %v1741_v0 = vld [vmem:[%s13250_s2 + $0x28] sm:$0xff] }
 0x1d3   :  { %7688 = vmatprep.subr.bf16.mxu0 %v10888_v31  ;;  %7720 = vmatprep.subr.bf16.mxu1 %v10891_v52  ;;  %v1739_v31 = vld [vmem:[%s13250_s2 + $0x18] sm:$0xff] }
 0x1d6   :  { %7690 = vmatpush1.bf16.msra.mxu0 %v10894_v61  ;;  %7722 = vmatpush1.bf16.msra.mxu1 %v10898_v42  ;;  %v1737_v61 = vld [vmem:[%s13250_s2 + $0x8] sm:$0xff]  ;;  %v1743_v42 = vld [vmem:[%s13250_s2 + $0x38] sm:$0xff] }
 0x1d7   :  { %7692 = vmatprep.subr.bf16.mxu0 %v10900_v43  ;;  %7724 = vmatprep.subr.bf16.mxu1 %v10903_v25  ;;  %v11049_v52 = vpack.c.bf16 %v1741_v0, %v1737_v61  ;;  %v1736_v43 = vld [vmem:[%s13250_s2] sm:$0xff]  ;;  %v1769_v0 = vld [vmem:[%s13250_s2 + $0x108] sm:$0xff] }
 0x1d8   :  { %v1740_v25 = vld [vmem:[%s13250_s2 + $0x20] sm:$0xff] }
 0x1da   :  { %v9635_v10 = vpop.eup %9634  ;;  %7694 = vmatpush1.bf16.msra.mxu0 %v10906_v37  ;;  %7726 = vmatpush1.bf16.msra.mxu1 %v10910_v34  ;;  %v11060_v37 = vpack.c.bf16 %v1743_v42, %v1739_v31  ;;  %v11062_v34 = vpack.c.bf16 %v1740_v25, %v1736_v43  ;;  %v1773_v31 = vld [vmem:[%s13250_s2 + $0x128] sm:$0xff]  ;;  %v1771_v42 = vld [vmem:[%s13250_s2 + $0x118] sm:$0xff] }
 0x1db   :  { %v11034_v21 = vmul.f32 %v9635_v10, %v9633_v1  ;;  %7728 = vmatprep.subr.bf16.mxu0 %v11049_v52  ;;  %v1762_v1 = vld [vmem:[%s13250_s2 + $0xd0] sm:$0xff]  ;;  %v11193_v43 = vpack.c.bf16 %v1773_v31, %v1769_v0  ;;  %v1775_v25 = vld [vmem:[%s13250_s2 + $0x138] sm:$0xff]  ;;  %v11276_v0 = vpack.c.bf16 %v1791_v33, %v1787_v27  ;;  %v1979_v27 = vld [vmem:[#allocation8 + $0x28] sm:$0xff] }
 0x1dc   :  { %7760 = vmatprep.subr.bf16.mxu1 %v11060_v37  ;;  %v1766_v10 = vld [vmem:[%s13250_s2 + $0xf0] sm:$0xff]  ;;  %v11204_v9 = vpack.c.bf16 %v1775_v25, %v1771_v42  ;;  %v1977_v33 = vld [vmem:[#allocation8 + $0x18] sm:$0xff] }
 0x1dd   :  { %13413 = vst [vmem:[#allocation25_spill] sm:$0xff] %v11034_v21  ;;  %1625 = vmatmul.mubr.f32.vlgmr.msra.gmra.mrb[28].mxu0 %v11034_v21  ;;  %1696 = vmatmul.mubr.f32.vlgmr.msra.gmra.mrb[28].mxu1 %v11034_v21  ;;  %v11179_v61 = vpack.c.bf16 %v1766_v10, %v1762_v1  ;;  %v1784_v1 = vld [vmem:[%s13250_s2 + $0x180] sm:$0xff]  ;;  %v1786_v42 = vld [vmem:[%s13250_s2 + $0x190] sm:$0xff] }
 0x1de   :  { %1864 = vmatprep.mubr.f32.mxu0 %v13391_v47  ;;  %1935 = vmatprep.mubr.f32.mxu1 %v13391_v47  ;;  %v1788_v10 = vld [vmem:[%s13250_s2 + $0x1a0] sm:$0xff]  ;;  %v1790_v25 = vld [vmem:[%s13250_s2 + $0x1b0] sm:$0xff] }
 0x1df   :  { %7730 = vmatpush1.bf16.msra.mxu0 %v11062_v34  ;;  %7762 = vmatpush1.bf16.msra.mxu1 %v11071_v13  ;;  %v11278_v31 = vpack.c.bf16 %v1788_v10, %v1784_v1  ;;  %v11287_v4 = vpack.c.bf16 %v1790_v25, %v1786_v42  ;;  %v11328_v1 = vpack.c.bf16 %v1979_v27, %v1975_v18  ;;  %v1981_v10 = vld [vmem:[#allocation8 + $0x38] sm:$0xff] }
 0x1e0   :  { %7732 = vmatprep.subr.bf16.mxu0 %v11085_v5  ;;  %7764 = vmatprep.subr.bf16.mxu1 %v11096_v23  ;;  %v11330_v42 = vpack.c.bf16 %v1981_v10, %v1977_v33 }
 0x1e3   :  { %7734 = vmatpush1.bf16.msra.mxu0 %v11098_v29  ;;  %7766 = vmatpush1.bf16.msra.mxu1 %v11107_v54 }
 0x1e4   :  { %7736 = vmatprep.subr.bf16.mxu0 %v11121_v41  ;;  %7768 = vmatprep.subr.bf16.mxu1 %v11132_v46 }
 0x1e7   :  { %7738 = vmatpush1.bf16.msra.mxu0 %v11134_v56  ;;  %7770 = vmatpush1.bf16.msra.mxu1 %v11143_v15 }
 0x1e8   :  { %7740 = vmatprep.subr.bf16.mxu0 %v11157_v24  ;;  %7772 = vmatprep.subr.bf16.mxu1 %v11168_v45 }
 0x1eb   :  { %7742 = vmatpush1.bf16.msra.mxu0 %v11170_v49  ;;  %7774 = vmatpush1.bf16.msra.mxu1 %v11179_v61 }
 0x1ec   :  { %7744 = vmatprep.subr.bf16.mxu0 %v11193_v43  ;;  %7776 = vmatprep.subr.bf16.mxu1 %v11204_v9 }
 0x1ef   :  { %7746 = vmatpush1.bf16.msra.mxu0 %v11206_v30  ;;  %7778 = vmatpush1.bf16.msra.mxu1 %v11215_v14 }
 0x1f0   :  { %7748 = vmatprep.subr.bf16.mxu0 %v11229_v63  ;;  %7780 = vmatprep.subr.bf16.mxu1 %v11240_v57 }
 0x1f3   :  { %7750 = vmatpush1.bf16.msra.mxu0 %v11242_v60  ;;  %7782 = vmatpush1.bf16.msra.mxu1 %v11251_v44 }
 0x1f4   :  { %7752 = vmatprep.subr.bf16.mxu0 %v11265_v40  ;;  %7784 = vmatprep.subr.bf16.mxu1 %v11276_v0 }
 0x1f7   :  { %7754 = vmatpush1.bf16.msra.mxu0 %v11278_v31  ;;  %7786 = vmatpush1.bf16.msra.mxu1 %v11287_v4 }
 0x1f8   :  { %7756 = vmatprep.subr.bf16.mxu0 %v11301_v20  ;;  %7788 = vmatprep.subr.bf16.mxu1 %v11312_v7 }
 0x1fb   :  { %7758 = vmatpush1.bf16.msra.mxu0 %v11314_v55  ;;  %7790 = vmatpush1.bf16.msra.mxu1 %v11323_v19 }
 0x1fc   :  { %7792 = vmatprep.subr.bf16.mxu0 %v11328_v1  ;;  %7824 = vmatprep.subr.bf16.mxu1 %v11330_v42 }
 0x290   :  { %v1388_v25 = vpop.f32.mrb[2].mxu0  ;;  %v1459_v6 = vpop.f32.mrb[2].mxu1 }
 0x291   :  { %v9393_v36 = vadd.f32 %v1388_v25, %v10961_v62  ;;  %v1390_v11 = vpop.f32.mrb[3].mxu0  ;;  %v1461_v39 = vpop.f32.mrb[3].mxu1  ;;  %v9409_v27 = vadd.f32 %v1459_v6, %v10977_v48  ;;  %v1991_v48 = vld [vmem:[#allocation8 + $0x88] sm:$0xff] }
 0x292   :  { %v9394_v50 = vadd.f32 %v1390_v11, %v10964_v2  ;;  %v9410_v16 = vadd.f32 %v1461_v39, %v10971_v32  ;;  %v1995_v32 = vld [vmem:[#allocation8 + $0xa8] sm:$0xff]  ;;  %v1993_v2 = vld [vmem:[#allocation8 + $0x98] sm:$0xff] }
 0x293   :  { %v7314_v3 = vmul.f32 -1.442695, %v9393_v36 }
 0x294   :  { %v7315_v12 = vmul.f32 -1.442695, %v9394_v50  ;;  %v7316_v18 = vmul.f32 -1.442695, %v9410_v16 }
 0x295   :  { %9636 = vpow2.f32 %v7314_v3 }
 0x296   :  { %9638 = vpow2.f32 %v7315_v12 }
 0x297   :  { %9640 = vpow2.f32 %v7316_v18 }
 0x298   :  { %9642 = vtanh.f32 %v9409_v27 }
 0x29f   :  { %v9637_v33 = vpop.eup %9636 }
 0x2a0   :  { %v9639_v10 = vpop.eup %9638  ;;  %v1471_v35 = vadd.f32 1.0, %v9637_v33 }
 0x2a1   :  { %v1477_v8 = vadd.f32 1.0, %v9639_v10  ;;  %v9641_v25 = vpop.eup %9640 }
 0x2a2   :  { %9644 = vrcp.f32 %v1471_v35  ;;  %v9643_v59 = vpop.eup %9642  ;;  %v1484_v3 = vadd.f32 1.0, %v9641_v25  ;;  %v1978_v25 = vld [vmem:[#allocation8 + $0x20] sm:$0xff] }
 0x2a3   :  { %9646 = vrcp.f32 %v1477_v8 }
 0x2a4   :  { %9648 = vrcp.f32 %v1484_v3  ;;  %v1987_v3 = vld [vmem:[#allocation8 + $0x68] sm:$0xff] }
 0x2ac   :  { %v9645_v11 = vpop.eup %9644 }
 0x2ad   :  { %v9647_v36 = vpop.eup %9646  ;;  %v1488_v50 = vmul.f32 %v9645_v11, %v9643_v59  ;;  %v1976_v11 = vld [vmem:[#allocation8 + $0x10] sm:$0xff] }
 0x2ae   :  { %v1487_v12 = vmul.f32 %v9647_v36, %v10984_v51  ;;  %v1974_v51 = vld [vmem:[#allocation8] sm:$0xff]  ;;  %v1980_v36 = vld [vmem:[#allocation8 + $0x30] sm:$0xff]  ;;  %v9649_v53 = vpop.eup %9648 }
 0x2b0   :  { %v11339_v39 = vadd.f32 %v1488_v50, %v1487_v12  ;;  %v1626_v16 = vpop.f32.mrb[28].mxu0  ;;  %v1697_v6 = vpop.f32.mrb[28].mxu1  ;;  %v1983_v50 = vld [vmem:[#allocation8 + $0x48] sm:$0xff]  ;;  %v1985_v12 = vld [vmem:[#allocation8 + $0x58] sm:$0xff] }
 0x2b1   :  { %v9435_v33 = vadd.f32 %v1626_v16, %v10980_v22  ;;  %v1628_v18 = vpop.f32.mrb[29].mxu0  ;;  %v1699_v27 = vpop.f32.mrb[29].mxu1  ;;  %v1989_v16 = vld [vmem:[#allocation8 + $0x78] sm:$0xff]  ;;  %v1984_v22 = vld [vmem:[#allocation8 + $0x50] sm:$0xff] }
 0x2b2   :  { %13414 = vst [vmem:[#allocation26_spill] sm:$0xff] %v11339_v39  ;;  %v9436_v35 = vadd.f32 %v1628_v18, %v10982_v38  ;;  %9650 = vtanh.f32 %v11339_v39  ;;  %v9452_v59 = vadd.f32 %v1699_v27, %v10989_v17  ;;  %v11345_v18 = vpack.c.bf16 %v1978_v25, %v1974_v51  ;;  %v1988_v39 = vld [vmem:[#allocation8 + $0x70] sm:$0xff] }
 0x2b3   :  { %v7317_v8 = vmul.f32 -1.442695, %v9435_v33  ;;  %v11347_v38 = vpack.c.bf16 %v1980_v36, %v1976_v11  ;;  %v1982_v33 = vld [vmem:[#allocation8 + $0x40] sm:$0xff]  ;;  %v11354_v17 = vpack.c.bf16 %v1989_v16, %v1985_v12  ;;  %v1996_v16 = vld [vmem:[#allocation8 + $0xb0] sm:$0xff] }
 0x2b4   :  { %v7318_v10 = vmul.f32 -1.442695, %v9436_v35  ;;  %v7319_v21 = vmul.f32 -1.442695, %v9452_v59  ;;  %13415 = vst [vmem:[#allocation27_spill] sm:$0xff] %v11345_v18  ;;  %v1986_v35 = vld [vmem:[#allocation8 + $0x60] sm:$0xff] }
 0x2b5   :  { %9652 = vpow2.f32 %v7317_v8  ;;  %13416 = vst [vmem:[#allocation28_spill] sm:$0xff] %v11347_v38  ;;  %v9451_v8 = vadd.f32 %v1697_v6, %v10992_v26  ;;  %13419 = vst [vmem:[#allocation31_spill] sm:$0xff] %v11354_v17  ;;  %v1997_v59 = vld [vmem:[#allocation8 + $0xb8] sm:$0xff]  ;;  %v1990_v6 = vld [vmem:[#allocation8 + $0x80] sm:$0xff] }
 0x2b6   :  { %9654 = vpow2.f32 %v7318_v10  ;;  %v11352_v10 = vpack.c.bf16 %v1987_v3, %v1983_v50  ;;  %v1994_v36 = vld [vmem:[#allocation8 + $0xa0] sm:$0xff]  ;;  %v11366_v3 = vpack.c.bf16 %v1995_v32, %v1991_v48  ;;  %v11368_v12 = vpack.c.bf16 %v1997_v59, %v1993_v2 }
 0x2b7   :  { %9656 = vpow2.f32 %v7319_v21  ;;  %v1992_v21 = vld [vmem:[#allocation8 + $0x90] sm:$0xff]  ;;  %v11374_v32 = vpack.c.bf16 %v1994_v36, %v1990_v6  ;;  %v1998_v48 = vld [vmem:[#allocation8 + $0xc0] sm:$0xff] }
 0x2b8   :  { %13418 = vst [vmem:[#allocation30_spill] sm:$0xff] %v11352_v10  ;;  %9658 = vtanh.f32 %v9451_v8  ;;  %13422 = vst [vmem:[#allocation34_spill] sm:$0xff] %v11366_v3  ;;  %v11376_v2 = vpack.c.bf16 %v1996_v16, %v1992_v21  ;;  %v2006_v21 = vld [vmem:[#allocation8 + $0x100] sm:$0xff] }
 0x2b9   :  { %13423 = vst [vmem:[#allocation46_spill] sm:$0xff] %v11368_v12  ;;  %13424 = vst [vmem:[#allocation47_spill] sm:$0xff] %v11374_v32  ;;  %v2010_v16 = vld [vmem:[#allocation8 + $0x120] sm:$0xff] }
 0x2ba   :  { %13425 = vst [vmem:[#allocation48_spill] sm:$0xff] %v11376_v2 }
 0x2bc   :  { %v9651_v58 = vpop.eup %9650 }
 0x2bd   :  { %v11350_v27 = vmul.f32 %v9651_v58, %v9649_v53  ;;  %v11360_v53 = vpack.c.bf16 %v1986_v35, %v1982_v33  ;;  %v11362_v58 = vpack.c.bf16 %v1988_v39, %v1984_v22  ;;  %v2003_v33 = vld [vmem:[#allocation8 + $0xe8] sm:$0xff]  ;;  %v2001_v35 = vld [vmem:[#allocation8 + $0xd8] sm:$0xff]  ;;  %v2002_v39 = vld [vmem:[#allocation8 + $0xe0] sm:$0xff] }
 0x2be   :  { %v2005_v22 = vld [vmem:[#allocation8 + $0xf8] sm:$0xff]  ;;  %v11386_v6 = vpack.c.bf16 %v2002_v39, %v1998_v48 }
 0x2bf   :  { %13417 = vst [vmem:[#allocation29_spill] sm:$0xff] %v11350_v27  ;;  %v9653_v51 = vpop.eup %9652  ;;  %1865 = vmatmul.mubr.f32.vlgmr.msra.gmra.mrb[4].mxu0 %v11350_v27  ;;  %1936 = vmatmul.mubr.f32.vlgmr.msra.gmra.mrb[4].mxu1 %v11350_v27  ;;  %13420 = vst [vmem:[#allocation32_spill] sm:$0xff] %v11360_v53  ;;  %v11382_v59 = vpack.c.bf16 %v2005_v22, %v2001_v35  ;;  %v2011_v27 = vld [vmem:[#allocation8 + $0x128] sm:$0xff]  ;;  %v2008_v35 = vld [vmem:[#allocation8 + $0x110] sm:$0xff] }
 0x2c0   :  { %v9655_v25 = vpop.eup %9654  ;;  %v1709_v11 = vadd.f32 1.0, %v9653_v51  ;;  %7794 = vmatpush1.bf16.msra.mxu0 %v11345_v18  ;;  %7826 = vmatpush1.bf16.msra.mxu1 %v11347_v38  ;;  %13421 = vst [vmem:[#allocation33_spill] sm:$0xff] %v11362_v58  ;;  %v1999_v51 = vld [vmem:[#allocation8 + $0xc8] sm:$0xff]  ;;  %13428 = vst [vmem:[#allocation51_spill] sm:$0xff] %v11386_v6  ;;  %v2012_v22 = vld [vmem:[#allocation8 + $0x130] sm:$0xff] }
 0x2c1   :  { %v1715_v50 = vadd.f32 1.0, %v9655_v25  ;;  %7796 = vmatprep.subr.bf16.mxu0 %v11352_v10  ;;  %7828 = vmatprep.subr.bf16.mxu1 %v11354_v17  ;;  %v11380_v8 = vpack.c.bf16 %v2003_v33, %v1999_v51  ;;  %13427 = vst [vmem:[#allocation50_spill] sm:$0xff] %v11382_v59  ;;  %v2000_v25 = vld [vmem:[#allocation8 + $0xd0] sm:$0xff]  ;;  %v2021_v48 = vld [vmem:[#allocation8 + $0x178] sm:$0xff] }
 0x2c2   :  { %9660 = vrcp.f32 %v1709_v11  ;;  %2102 = vmatprep.mubr.f32.mxu0 %v13391_v47  ;;  %2173 = vmatprep.mubr.f32.mxu1 %v13391_v47  ;;  %v2004_v11 = vld [vmem:[#allocation8 + $0xf0] sm:$0xff] }
 0x2c3   :  { %9662 = vrcp.f32 %v1715_v50  ;;  %13426 = vst [vmem:[#allocation49_spill] sm:$0xff] %v11380_v8  ;;  %v2007_v50 = vld [vmem:[#allocation8 + $0x108] sm:$0xff]  ;;  %v11388_v36 = vpack.c.bf16 %v2004_v11, %v2000_v25  ;;  %v11398_v11 = vpack.c.bf16 %v2010_v16, %v2006_v21  ;;  %v2020_v38 = vld [vmem:[#allocation8 + $0x170] sm:$0xff] }
 0x2c4   :  { %7798 = vmatpush1.bf16.msra.mxu0 %v11360_v53  ;;  %7830 = vmatpush1.bf16.msra.mxu1 %v11362_v58  ;;  %v2009_v53 = vld [vmem:[#allocation8 + $0x118] sm:$0xff]  ;;  %v11392_v51 = vpack.c.bf16 %v2011_v27, %v2007_v50  ;;  %v2014_v27 = vld [vmem:[#allocation8 + $0x140] sm:$0xff]  ;;  %v2027_v16 = vld [vmem:[#allocation8 + $0x1a8] sm:$0xff] }
 0x2c5   :  { %7800 = vmatprep.subr.bf16.mxu0 %v11366_v3  ;;  %7832 = vmatprep.subr.bf16.mxu1 %v11368_v12  ;;  %v2013_v58 = vld [vmem:[#allocation8 + $0x138] sm:$0xff]  ;;  %13429 = vst [vmem:[#allocation52_spill] sm:$0xff] %v11388_v36  ;;  %v2015_v12 = vld [vmem:[#allocation8 + $0x148] sm:$0xff] }
 0x2c6   :  { %v11394_v33 = vpack.c.bf16 %v2013_v58, %v2009_v53  ;;  %v2019_v3 = vld [vmem:[#allocation8 + $0x168] sm:$0xff]  ;;  %v2018_v53 = vld [vmem:[#allocation8 + $0x160] sm:$0xff] }
 0x2c7   :  { %v11404_v17 = vpack.c.bf16 %v2019_v3, %v2015_v12  ;;  %v2022_v12 = vld [vmem:[#allocation8 + $0x180] sm:$0xff] }
 0x2c8   :  { %7802 = vmatpush1.bf16.msra.mxu0 %v11374_v32  ;;  %7834 = vmatpush1.bf16.msra.mxu1 %v11376_v2  ;;  %v9657_v32 = vpop.eup %9656  ;;  %v2017_v2 = vld [vmem:[#allocation8 + $0x158] sm:$0xff] }
 0x2c9   :  { %7804 = vmatprep.subr.bf16.mxu0 %v11380_v8  ;;  %7836 = vmatprep.subr.bf16.mxu1 %v11382_v59  ;;  %v9659_v39 = vpop.eup %9658  ;;  %v11400_v59 = vpack.c.bf16 %v2012_v22, %v2008_v35  ;;  %v1722_v8 = vadd.f32 1.0, %v9657_v32  ;;  %v11406_v10 = vpack.c.bf16 %v2021_v48, %v2017_v2  ;;  %v2025_v35 = vld [vmem:[#allocation8 + $0x198] sm:$0xff]  ;;  %v11413_v32 = vpack.c.bf16 %v2018_v53, %v2014_v27  ;;  %v2026_v2 = vld [vmem:[#allocation8 + $0x1a0] sm:$0xff] }
 0x2ca   :  { %v2029_v22 = vld [vmem:[#allocation8 + $0x1b8] sm:$0xff] }
 0x2cb   :  { %9664 = vrcp.f32 %v1722_v8  ;;  %v11421_v48 = vpack.c.bf16 %v2029_v22, %v2025_v35  ;;  %v2037_v27 = vld [vmem:[#allocation8 + $0x1f8] sm:$0xff]  ;;  %v2032_v35 = vld [vmem:[#allocation8 + $0x1d0] sm:$0xff] }
 0x2cc   :  { %v9661_v25 = vpop.eup %9660  ;;  %7806 = vmatpush1.bf16.msra.mxu0 %v11386_v6  ;;  %7838 = vmatpush1.bf16.msra.mxu1 %v11388_v36  ;;  %v2016_v6 = vld [vmem:[#allocation8 + $0x150] sm:$0xff]  ;;  %v2023_v36 = vld [vmem:[#allocation8 + $0x188] sm:$0xff] }
 0x2cd   :  { %v9663_v58 = vpop.eup %9662  ;;  %v1726_v50 = vmul.f32 %v9661_v25, %v9659_v39  ;;  %7808 = vmatprep.subr.bf16.mxu0 %v11392_v51  ;;  %7840 = vmatprep.subr.bf16.mxu1 %v11394_v33  ;;  %v11415_v3 = vpack.c.bf16 %v2020_v38, %v2016_v6  ;;  %v2024_v39 = vld [vmem:[#allocation8 + $0x190] sm:$0xff]  ;;  %v11426_v38 = vpack.c.bf16 %v2026_v2, %v2022_v12  ;;  %v2030_v6 = vld [vmem:[#allocation8 + $0x1c0] sm:$0xff] }
 0x2ce   :  { %v1725_v21 = vmul.f32 %v9663_v58, %v11017_v28  ;;  %v11419_v28 = vpack.c.bf16 %v2027_v16, %v2023_v36  ;;  %v2028_v25 = vld [vmem:[#allocation8 + $0x1b0] sm:$0xff]  ;;  %v2031_v58 = vld [vmem:[#allocation8 + $0x1c8] sm:$0xff]  ;;  %v2034_v16 = vld [vmem:[#allocation8 + $0x1e0] sm:$0xff] }
 0x2cf   :  { %v11428_v8 = vpack.c.bf16 %v2028_v25, %v2024_v39  ;;  %v2036_v22 = vld [vmem:[#allocation8 + $0x1f0] sm:$0xff]  ;;  %v11438_v12 = vpack.c.bf16 %v2034_v16, %v2030_v6  ;;  %v13437_v6 = vld [vmem:[#allocation44_spill] sm:$0xff] }
 0x2d0   :  { %v11409_v18 = vadd.f32 %v1726_v50, %v1725_v21  ;;  %7810 = vmatpush1.bf16.msra.mxu0 %v11398_v11  ;;  %7842 = vmatpush1.bf16.msra.mxu1 %v11400_v59  ;;  %v2035_v50 = vld [vmem:[#allocation8 + $0x1e8] sm:$0xff]  ;;  %v2033_v21 = vld [vmem:[#allocation8 + $0x1d8] sm:$0xff]  ;;  %v11440_v2 = vpack.c.bf16 %v2036_v22, %v2032_v35 }
 0x2d1   :  { %7812 = vmatprep.subr.bf16.mxu0 %v11404_v17  ;;  %7844 = vmatprep.subr.bf16.mxu1 %v11406_v10  ;;  %v11432_v36 = vpack.c.bf16 %v2035_v50, %v2031_v58  ;;  %v11434_v53 = vpack.c.bf16 %v2037_v27, %v2033_v21 }
 0x2d2   :  { %9666 = vtanh.f32 %v11409_v18 }
 0x2d4   :  { %7814 = vmatpush1.bf16.msra.mxu0 %v11413_v32  ;;  %7846 = vmatpush1.bf16.msra.mxu1 %v11415_v3 }
 0x2d5   :  { %7816 = vmatprep.subr.bf16.mxu0 %v11419_v28  ;;  %7848 = vmatprep.subr.bf16.mxu1 %v11421_v48  ;;  %v9665_v39 = vpop.eup %9664 }
 0x2d8   :  { %7818 = vmatpush1.bf16.msra.mxu0 %v11426_v38  ;;  %7850 = vmatpush1.bf16.msra.mxu1 %v11428_v8 }
 0x2d9   :  { %7820 = vmatprep.subr.bf16.mxu0 %v11432_v36  ;;  %7852 = vmatprep.subr.bf16.mxu1 %v11434_v53 }
 0x2dc   :  { %v9667_v25 = vpop.eup %9666  ;;  %7822 = vmatpush1.bf16.msra.mxu0 %v11438_v12  ;;  %7854 = vmatpush1.bf16.msra.mxu1 %v11440_v2 }
 0x2dd   :  { %v11446_v58 = vmul.f32 %v9667_v25, %v9665_v39  ;;  %7856 = vmatprep.subr.bf16.mxu0 %v11049_v52  ;;  %7888 = vmatprep.subr.bf16.mxu1 %v11060_v37 }
 0x2df   :  { %13430 = vst [vmem:[#allocation53_spill] sm:$0xff] %v11446_v58  ;;  %2103 = vmatmul.mubr.f32.vlgmr.msra.gmra.mrb[26].mxu0 %v11446_v58  ;;  %2174 = vmatmul.mubr.f32.vlgmr.msra.gmra.mrb[26].mxu1 %v11446_v58 }
 0x2e0   :  { %7858 = vmatpush1.bf16.msra.mxu0 %v11062_v34  ;;  %7890 = vmatpush1.bf16.msra.mxu1 %v11071_v13 }
 0x2e1   :  { %7860 = vmatprep.subr.bf16.mxu0 %v11085_v5  ;;  %7892 = vmatprep.subr.bf16.mxu1 %v11096_v23  ;;  %v13431_v23 = vld [vmem:[#allocation37_spill] sm:$0xff] }
 0x2e2   :  { %2342 = vmatprep.mubr.f32.mxu0 %v13391_v47  ;;  %2413 = vmatprep.mubr.f32.mxu1 %v13391_v47 }
 0x2e4   :  { %7862 = vmatpush1.bf16.msra.mxu0 %v11098_v29  ;;  %7894 = vmatpush1.bf16.msra.mxu1 %v11107_v54 }
 0x2e5   :  { %7864 = vmatprep.subr.bf16.mxu0 %v11121_v41  ;;  %7896 = vmatprep.subr.bf16.mxu1 %v11132_v46  ;;  %v13432_v46 = vld [vmem:[#allocation39_spill] sm:$0xff] }
 0x2e8   :  { %7866 = vmatpush1.bf16.msra.mxu0 %v11134_v56  ;;  %7898 = vmatpush1.bf16.msra.mxu1 %v11143_v15 }
 0x2e9   :  { %7868 = vmatprep.subr.bf16.mxu0 %v11157_v24  ;;  %7900 = vmatprep.subr.bf16.mxu1 %v11168_v45  ;;  %v13433_v24 = vld [vmem:[#allocation41_spill] sm:$0xff] }
 0x2ec   :  { %7870 = vmatpush1.bf16.msra.mxu0 %v11170_v49  ;;  %7902 = vmatpush1.bf16.msra.mxu1 %v11179_v61 }
 0x2ed   :  { %7872 = vmatprep.subr.bf16.mxu0 %v11193_v43  ;;  %7904 = vmatprep.subr.bf16.mxu1 %v11204_v9 }
 0x2f0   :  { %7874 = vmatpush1.bf16.msra.mxu0 %v11206_v30  ;;  %7906 = vmatpush1.bf16.msra.mxu1 %v11215_v14 }
 0x2f1   :  { %7876 = vmatprep.subr.bf16.mxu0 %v11229_v63  ;;  %7908 = vmatprep.subr.bf16.mxu1 %v11240_v57 }
 0x2f4   :  { %7878 = vmatpush1.bf16.msra.mxu0 %v11242_v60  ;;  %7910 = vmatpush1.bf16.msra.mxu1 %v11251_v44 }
 0x2f5   :  { %7880 = vmatprep.subr.bf16.mxu0 %v11265_v40  ;;  %7912 = vmatprep.subr.bf16.mxu1 %v11276_v0  ;;  %v13434_v40 = vld [vmem:[#allocation26_spill] sm:$0xff] }
 0x2f8   :  { %7882 = vmatpush1.bf16.msra.mxu0 %v11278_v31  ;;  %7914 = vmatpush1.bf16.msra.mxu1 %v11287_v4 }
 0x2f9   :  { %7884 = vmatprep.subr.bf16.mxu0 %v11301_v20  ;;  %7916 = vmatprep.subr.bf16.mxu1 %v11312_v7  ;;  %v13435_v7 = vld [vmem:[#allocation42_spill] sm:$0xff] }
 0x2fc   :  { %7886 = vmatpush1.bf16.msra.mxu0 %v11314_v55  ;;  %7918 = vmatpush1.bf16.msra.mxu1 %v11323_v19 }
 0x2fd   :  { %7920 = vmatprep.subr.bf16.mxu0 %v11328_v1  ;;  %7952 = vmatprep.subr.bf16.mxu1 %v11330_v42  ;;  %v13436_v42 = vld [vmem:[#allocation43_spill] sm:$0xff] }
 0x392   :  { %v1866_v52 = vpop.f32.mrb[4].mxu0  ;;  %v1937_v37 = vpop.f32.mrb[4].mxu1 }
 0x393   :  { %v9395_v34 = vadd.f32 %v1866_v52, %v10961_v62  ;;  %v1868_v13 = vpop.f32.mrb[5].mxu0  ;;  %v1939_v5 = vpop.f32.mrb[5].mxu1  ;;  %v9411_v45 = vadd.f32 %v1937_v37, %v13433_v24 }
 0x394   :  { %v9396_v29 = vadd.f32 %v1868_v13, %v13431_v23  ;;  %v9412_v56 = vadd.f32 %v1939_v5, %v13432_v46  ;;  %v13439_v5 = vld [vmem:[#allocation27_spill] sm:$0xff] }
 0x395   :  { %v7320_v54 = vmul.f32 -1.442695, %v9395_v34 }
 0x396   :  { %v7321_v41 = vmul.f32 -1.442695, %v9396_v29  ;;  %v7322_v15 = vmul.f32 -1.442695, %v9412_v56  ;;  %v13440_v29 = vld [vmem:[#allocation28_spill] sm:$0xff]  ;;  %v13442_v56 = vld [vmem:[#allocation31_spill] sm:$0xff] }
 0x397   :  { %9668 = vpow2.f32 %v7320_v54 }
 0x398   :  { %9670 = vpow2.f32 %v7321_v41  ;;  %v13441_v41 = vld [vmem:[#allocation30_spill] sm:$0xff] }
 0x399   :  { %9672 = vpow2.f32 %v7322_v15  ;;  %v13443_v15 = vld [vmem:[#allocation32_spill] sm:$0xff] }
 0x39a   :  { %9674 = vtanh.f32 %v9411_v45  ;;  %v13444_v45 = vld [vmem:[#allocation33_spill] sm:$0xff] }
 0x3a1   :  { %v9669_v49 = vpop.eup %9668 }
 0x3a2   :  { %v9671_v61 = vpop.eup %9670  ;;  %v1949_v43 = vadd.f32 1.0, %v9669_v49  ;;  %v13445_v49 = vld [vmem:[#allocation34_spill] sm:$0xff] }
 0x3a3   :  { %v1955_v9 = vadd.f32 1.0, %v9671_v61  ;;  %v9673_v30 = vpop.eup %9672  ;;  %v13446_v61 = vld [vmem:[#allocation46_spill] sm:$0xff] }
 0x3a4   :  { %9676 = vrcp.f32 %v1949_v43  ;;  %v9675_v14 = vpop.eup %9674  ;;  %v1962_v44 = vadd.f32 1.0, %v9673_v30  ;;  %v13447_v43 = vld [vmem:[#allocation47_spill] sm:$0xff]  ;;  %v13449_v30 = vld [vmem:[#allocation49_spill] sm:$0xff] }
 0x3a5   :  { %9678 = vrcp.f32 %v1955_v9  ;;  %v13448_v9 = vld [vmem:[#allocation48_spill] sm:$0xff] }
 0x3a6   :  { %9680 = vrcp.f32 %v1962_v44  ;;  %v13451_v44 = vld [vmem:[#allocation51_spill] sm:$0xff] }
 0x3ae   :  { %v9677_v63 = vpop.eup %9676 }
 0x3af   :  { %v9679_v57 = vpop.eup %9678  ;;  %v1966_v60 = vmul.f32 %v9677_v63, %v9675_v14  ;;  %v13450_v14 = vld [vmem:[#allocation50_spill] sm:$0xff] }
 0x3b0   :  { %v1965_v0 = vmul.f32 %v9679_v57, %v13434_v40  ;;  %v9681_v35 = vpop.eup %9680  ;;  %v13452_v40 = vld [vmem:[#allocation52_spill] sm:$0xff] }
 0x3b2   :  { %v11491_v31 = vadd.f32 %v1966_v60, %v1965_v0  ;;  %v2104_v4 = vpop.f32.mrb[26].mxu0  ;;  %v2175_v20 = vpop.f32.mrb[26].mxu1 }
 0x3b3   :  { %v9433_v55 = vadd.f32 %v2104_v4, %v13435_v7  ;;  %v2106_v19 = vpop.f32.mrb[27].mxu0  ;;  %v2177_v1 = vpop.f32.mrb[27].mxu1  ;;  %v9449_v25 = vadd.f32 %v2175_v20, %v10992_v26 }
 0x3b4   :  { %v9434_v50 = vadd.f32 %v2106_v19, %v13436_v42  ;;  %9682 = vtanh.f32 %v11491_v31  ;;  %v9450_v16 = vadd.f32 %v2177_v1, %v13437_v6  ;;  %v2703_v1 = vld [vmem:[%s13250_s2 + $0x58] sm:$0xff] }
 0x3b5   :  { %v7323_v21 = vmul.f32 -1.442695, %v9433_v55 }
 0x3b6   :  { %v7324_v27 = vmul.f32 -1.442695, %v9434_v50  ;;  %v7325_v39 = vmul.f32 -1.442695, %v9450_v16  ;;  %v2704_v16 = vld [vmem:[%s13250_s2 + $0x60] sm:$0xff] }
 0x3b7   :  { %9684 = vpow2.f32 %v7323_v21  ;;  %v2707_v21 = vld [vmem:[%s13250_s2 + $0x78] sm:$0xff] }
 0x3b8   :  { %9686 = vpow2.f32 %v7324_v27  ;;  %v2700_v27 = vld [vmem:[%s13250_s2 + $0x40] sm:$0xff] }
 0x3b9   :  { %9688 = vpow2.f32 %v7325_v39  ;;  %v2702_v39 = vld [vmem:[%s13250_s2 + $0x50] sm:$0xff] }
 0x3ba   :  { %9690 = vtanh.f32 %v9449_v25  ;;  %v2706_v25 = vld [vmem:[%s13250_s2 + $0x70] sm:$0xff] }
 0x3be   :  { %v9683_v22 = vpop.eup %9682 }
 0x3bf   :  { %v11498_v52 = vmul.f32 %v9683_v22, %v9681_v35  ;;  %v11600_v35 = vpack.c.bf16 %v2707_v21, %v2703_v1  ;;  %v11602_v22 = vpack.c.bf16 %v2704_v16, %v2700_v27  ;;  %v2733_v1 = vld [vmem:[%s13250_s2 + $0x148] sm:$0xff]  ;;  %v2735_v27 = vld [vmem:[%s13250_s2 + $0x158] sm:$0xff] }
 0x3c0   :  { %v2737_v21 = vld [vmem:[%s13250_s2 + $0x168] sm:$0xff] }
 0x3c1   :  { %13438 = vst [vmem:[#allocation26_spill] sm:$0xff] %v11498_v52  ;;  %v9685_v37 = vpop.eup %9684  ;;  %2343 = vmatmul.mubr.f32.vlgmr.msra.gmra.mrb[6].mxu0 %v11498_v52  ;;  %2414 = vmatmul.mubr.f32.vlgmr.msra.gmra.mrb[6].mxu1 %v11498_v52  ;;  %v11733_v16 = vpack.c.bf16 %v2737_v21, %v2733_v1  ;;  %v2752_v1 = vld [vmem:[%s13250_s2 + $0x1e0] sm:$0xff] }
 0x3c2   :  { %v9687_v34 = vpop.eup %9686  ;;  %v2187_v13 = vadd.f32 1.0, %v9685_v37  ;;  %7922 = vmatpush1.bf16.msra.mxu0 %v13439_v5  ;;  %7954 = vmatpush1.bf16.msra.mxu1 %v13440_v29  ;;  %v11611_v37 = vpack.c.bf16 %v2706_v25, %v2702_v39  ;;  %v2711_v5 = vld [vmem:[%s13250_s2 + $0x98] sm:$0xff]  ;;  %v2732_v25 = vld [vmem:[%s13250_s2 + $0x140] sm:$0xff] }
 0x3c3   :  { %v2193_v54 = vadd.f32 1.0, %v9687_v34  ;;  %7924 = vmatprep.subr.bf16.mxu0 %v13441_v41  ;;  %7956 = vmatprep.subr.bf16.mxu1 %v13442_v56  ;;  %v9689_v63 = vpop.eup %9688  ;;  %v2709_v34 = vld [vmem:[%s13250_s2 + $0x88] sm:$0xff]  ;;  %v2708_v41 = vld [vmem:[%s13250_s2 + $0x80] sm:$0xff]  ;;  %v2739_v39 = vld [vmem:[%s13250_s2 + $0x178] sm:$0xff] }
 0x3c4   :  { %9692 = vrcp.f32 %v2187_v13  ;;  %2580 = vmatprep.mubr.f32.mxu0 %v13391_v47  ;;  %2651 = vmatprep.mubr.f32.mxu1 %v13391_v47  ;;  %v9691_v57 = vpop.eup %9690  ;;  %v2200_v20 = vadd.f32 1.0, %v9689_v63  ;;  %v2713_v13 = vld [vmem:[%s13250_s2 + $0xa8] sm:$0xff]  ;;  %v2712_v56 = vld [vmem:[%s13250_s2 + $0xa0] sm:$0xff] }
 0x3c5   :  { %9694 = vrcp.f32 %v2193_v54  ;;  %v11625_v29 = vpack.c.bf16 %v2713_v13, %v2709_v34  ;;  %v2715_v54 = vld [vmem:[%s13250_s2 + $0xb8] sm:$0xff]  ;;  %v2736_v34 = vld [vmem:[%s13250_s2 + $0x160] sm:$0xff]  ;;  %v11744_v13 = vpack.c.bf16 %v2739_v39, %v2735_v27  ;;  %v2750_v39 = vld [vmem:[%s13250_s2 + $0x1d0] sm:$0xff] }
 0x3c6   :  { %7926 = vmatpush1.bf16.msra.mxu0 %v13443_v15  ;;  %7958 = vmatpush1.bf16.msra.mxu1 %v13444_v45  ;;  %9696 = vrcp.f32 %v2200_v20  ;;  %v11636_v15 = vpack.c.bf16 %v2715_v54, %v2711_v5  ;;  %v11638_v45 = vpack.c.bf16 %v2712_v56, %v2708_v41  ;;  %v2722_v20 = vld [vmem:[%s13250_s2 + $0xf0] sm:$0xff]  ;;  %v11746_v5 = vpack.c.bf16 %v2736_v34, %v2732_v25 }
 0x3c7   :  { %7928 = vmatprep.subr.bf16.mxu0 %v13445_v49  ;;  %7960 = vmatprep.subr.bf16.mxu1 %v13446_v61  ;;  %v2710_v49 = vld [vmem:[%s13250_s2 + $0x90] sm:$0xff] }
 0x3c8   :  { %v2714_v61 = vld [vmem:[%s13250_s2 + $0xb0] sm:$0xff] }
 0x3c9   :  { %v2734_v54 = vld [vmem:[%s13250_s2 + $0x150] sm:$0xff] }
 0x3ca   :  { %7930 = vmatpush1.bf16.msra.mxu0 %v13447_v43  ;;  %7962 = vmatpush1.bf16.msra.mxu1 %v13448_v9  ;;  %v11647_v43 = vpack.c.bf16 %v2714_v61, %v2710_v49  ;;  %v2717_v9 = vld [vmem:[%s13250_s2 + $0xc8] sm:$0xff]  ;;  %v2738_v41 = vld [vmem:[%s13250_s2 + $0x170] sm:$0xff] }
 0x3cb   :  { %7932 = vmatprep.subr.bf16.mxu0 %v13449_v30  ;;  %7964 = vmatprep.subr.bf16.mxu1 %v13450_v14  ;;  %v2721_v30 = vld [vmem:[%s13250_s2 + $0xe8] sm:$0xff]  ;;  %v2719_v14 = vld [vmem:[%s13250_s2 + $0xd8] sm:$0xff]  ;;  %v11755_v56 = vpack.c.bf16 %v2738_v41, %v2734_v54  ;;  %v2754_v25 = vld [vmem:[%s13250_s2 + $0x1f0] sm:$0xff] }
 0x3cc   :  { %v11661_v63 = vpack.c.bf16 %v2721_v30, %v2717_v9  ;;  %v2741_v49 = vld [vmem:[%s13250_s2 + $0x188] sm:$0xff]  ;;  %v2743_v9 = vld [vmem:[%s13250_s2 + $0x198] sm:$0xff]  ;;  %v11827_v34 = vpack.c.bf16 %v2754_v25, %v2750_v39 }
 0x3cd   :  { %v2745_v61 = vld [vmem:[%s13250_s2 + $0x1a8] sm:$0xff] }
 0x3ce   :  { %v9693_v60 = vpop.eup %9692  ;;  %7934 = vmatpush1.bf16.msra.mxu0 %v13451_v44  ;;  %7966 = vmatpush1.bf16.msra.mxu1 %v13452_v40  ;;  %v2720_v44 = vld [vmem:[%s13250_s2 + $0xe0] sm:$0xff]  ;;  %v11769_v30 = vpack.c.bf16 %v2745_v61, %v2741_v49  ;;  %v2931_v54 = vld [vmem:[#allocation8 + $0x8] sm:$0xff]  ;;  %v2933_v49 = vld [vmem:[#allocation8 + $0x18] sm:$0xff] }
 0x3cf   :  { %v9695_v0 = vpop.eup %9694  ;;  %v2204_v4 = vmul.f32 %v9693_v60, %v9691_v57  ;;  %7936 = vmatprep.subr.bf16.mxu0 %v11392_v51  ;;  %7968 = vmatprep.subr.bf16.mxu1 %v11394_v33  ;;  %v2697_v51 = vld [vmem:[%s13250_s2 + $0x28] sm:$0xff]  ;;  %v2695_v33 = vld [vmem:[%s13250_s2 + $0x18] sm:$0xff]  ;;  %v2716_v60 = vld [vmem:[%s13250_s2 + $0xc0] sm:$0xff] }
 0x3d0   :  { %v2203_v55 = vmul.f32 %v9695_v0, %v11409_v18  ;;  %v2723_v57 = vld [vmem:[%s13250_s2 + $0xf8] sm:$0xff]  ;;  %v11674_v0 = vpack.c.bf16 %v2720_v44, %v2716_v60  ;;  %v2744_v60 = vld [vmem:[%s13250_s2 + $0x1a0] sm:$0xff]  ;;  %v2935_v41 = vld [vmem:[#allocation8 + $0x28] sm:$0xff] }
 0x3d1   :  { %v11672_v40 = vpack.c.bf16 %v2723_v57, %v2719_v14  ;;  %v2747_v14 = vld [vmem:[%s13250_s2 + $0x1b8] sm:$0xff]  ;;  %v2740_v57 = vld [vmem:[%s13250_s2 + $0x180] sm:$0xff]  ;;  %v11832_v61 = vpack.c.bf16 %v2935_v41, %v2931_v54 }
 0x3d2   :  { %v11521_v19 = vadd.f32 %v2204_v4, %v2203_v55  ;;  %7938 = vmatpush1.bf16.msra.mxu0 %v11398_v11  ;;  %7970 = vmatpush1.bf16.msra.mxu1 %v11400_v59  ;;  %v2693_v59 = vld [vmem:[%s13250_s2 + $0x8] sm:$0xff]  ;;  %v2718_v4 = vld [vmem:[%s13250_s2 + $0xd0] sm:$0xff]  ;;  %v11780_v44 = vpack.c.bf16 %v2747_v14, %v2743_v9  ;;  %v2937_v9 = vld [vmem:[#allocation8 + $0x38] sm:$0xff] }
 0x3d3   :  { %7940 = vmatprep.subr.bf16.mxu0 %v11404_v17  ;;  %7972 = vmatprep.subr.bf16.mxu1 %v11406_v10  ;;  %v9697_v17 = vpop.eup %9696  ;;  %v11553_v11 = vpack.c.bf16 %v2697_v51, %v2693_v59  ;;  %v11683_v55 = vpack.c.bf16 %v2722_v20, %v2718_v4  ;;  %v2727_v59 = vld [vmem:[%s13250_s2 + $0x118] sm:$0xff]  ;;  %v11782_v4 = vpack.c.bf16 %v2744_v60, %v2740_v57  ;;  %v2742_v20 = vld [vmem:[%s13250_s2 + $0x190] sm:$0xff] }
 0x3d4   :  { %9698 = vtanh.f32 %v11521_v19  ;;  %v11834_v14 = vpack.c.bf16 %v2937_v9, %v2933_v49 }
 0x3d6   :  { %7942 = vmatpush1.bf16.msra.mxu0 %v11413_v32  ;;  %7974 = vmatpush1.bf16.msra.mxu1 %v11415_v3  ;;  %v2699_v32 = vld [vmem:[%s13250_s2 + $0x38] sm:$0xff]  ;;  %v2692_v3 = vld [vmem:[%s13250_s2] sm:$0xff] }
 0x3d7   :  { %7944 = vmatprep.subr.bf16.mxu0 %v11419_v28  ;;  %7976 = vmatprep.subr.bf16.mxu1 %v11421_v48  ;;  %v2696_v28 = vld [vmem:[%s13250_s2 + $0x20] sm:$0xff]  ;;  %v11564_v48 = vpack.c.bf16 %v2699_v32, %v2695_v33  ;;  %v2731_v33 = vld [vmem:[%s13250_s2 + $0x138] sm:$0xff] }
 0x3d8   :  { %v2724_v32 = vld [vmem:[%s13250_s2 + $0x100] sm:$0xff] }
 0x3da   :  { %7946 = vmatpush1.bf16.msra.mxu0 %v11426_v38  ;;  %7978 = vmatpush1.bf16.msra.mxu1 %v11428_v8  ;;  %v11566_v38 = vpack.c.bf16 %v2696_v28, %v2692_v3  ;;  %v2694_v8 = vld [vmem:[%s13250_s2 + $0x10] sm:$0xff]  ;;  %v2728_v3 = vld [vmem:[%s13250_s2 + $0x120] sm:$0xff]  ;;  %v11708_v28 = vpack.c.bf16 %v2731_v33, %v2727_v59  ;;  %v2749_v59 = vld [vmem:[%s13250_s2 + $0x1c8] sm:$0xff] }
 0x3db   :  { %7948 = vmatprep.subr.bf16.mxu0 %v11432_v36  ;;  %7980 = vmatprep.subr.bf16.mxu1 %v11434_v53  ;;  %v2698_v36 = vld [vmem:[%s13250_s2 + $0x30] sm:$0xff]  ;;  %v2753_v33 = vld [vmem:[%s13250_s2 + $0x1e8] sm:$0xff] }
 0x3dc   :  { %v11575_v53 = vpack.c.bf16 %v2698_v36, %v2694_v8  ;;  %v11710_v8 = vpack.c.bf16 %v2728_v3, %v2724_v32  ;;  %v2726_v36 = vld [vmem:[%s13250_s2 + $0x110] sm:$0xff]  ;;  %v2751_v32 = vld [vmem:[%s13250_s2 + $0x1d8] sm:$0xff]  ;;  %v11805_v3 = vpack.c.bf16 %v2753_v33, %v2749_v59 }
 0x3de   :  { %v9699_v18 = vpop.eup %9698  ;;  %7950 = vmatpush1.bf16.msra.mxu0 %v11438_v12  ;;  %7982 = vmatpush1.bf16.msra.mxu1 %v11440_v2  ;;  %v2701_v12 = vld [vmem:[%s13250_s2 + $0x48] sm:$0xff] }
 0x3df   :  { %v11538_v10 = vmul.f32 %v9699_v18, %v9697_v17  ;;  %7984 = vmatprep.subr.bf16.mxu0 %v11553_v11  ;;  %8016 = vmatprep.subr.bf16.mxu1 %v11564_v48  ;;  %v2705_v2 = vld [vmem:[%s13250_s2 + $0x68] sm:$0xff] }
 0x3e0   :  { %v11589_v50 = vpack.c.bf16 %v2705_v2, %v2701_v12  ;;  %v2725_v17 = vld [vmem:[%s13250_s2 + $0x108] sm:$0xff]  ;;  %v2730_v12 = vld [vmem:[%s13250_s2 + $0x130] sm:$0xff] }
 0x3e1   :  { %13453 = vst [vmem:[#allocation27_spill] sm:$0xff] %v11538_v10  ;;  %2581 = vmatmul.mubr.f32.vlgmr.msra.gmra.mrb[24].mxu0 %v11538_v10  ;;  %2652 = vmatmul.mubr.f32.vlgmr.msra.gmra.mrb[24].mxu1 %v11538_v10  ;;  %v2729_v18 = vld [vmem:[%s13250_s2 + $0x128] sm:$0xff]  ;;  %v11719_v2 = vpack.c.bf16 %v2730_v12, %v2726_v36  ;;  %v2755_v36 = vld [vmem:[%s13250_s2 + $0x1f8] sm:$0xff]  ;;  %v2748_v12 = vld [vmem:[%s13250_s2 + $0x1c0] sm:$0xff] }
 0x3e2   :  { %2820 = vmatprep.mubr.f32.mxu0 %v13391_v47  ;;  %2891 = vmatprep.mubr.f32.mxu1 %v13391_v47  ;;  %v11697_v51 = vpack.c.bf16 %v2729_v18, %v2725_v17  ;;  %v2746_v17 = vld [vmem:[%s13250_s2 + $0x1b0] sm:$0xff]  ;;  %v11816_v21 = vpack.c.bf16 %v2755_v36, %v2751_v32  ;;  %v11818_v27 = vpack.c.bf16 %v2752_v1, %v2748_v12 }
 0x3e3   :  { %7986 = vmatpush1.bf16.msra.mxu0 %v11566_v38  ;;  %8018 = vmatpush1.bf16.msra.mxu1 %v11575_v53  ;;  %v11791_v18 = vpack.c.bf16 %v2746_v17, %v2742_v20 }
 0x3e4   :  { %7988 = vmatprep.subr.bf16.mxu0 %v11589_v50  ;;  %8020 = vmatprep.subr.bf16.mxu1 %v11600_v35 }
 0x3e7   :  { %7990 = vmatpush1.bf16.msra.mxu0 %v11602_v22  ;;  %8022 = vmatpush1.bf16.msra.mxu1 %v11611_v37 }
 0x3e8   :  { %7992 = vmatprep.subr.bf16.mxu0 %v11625_v29  ;;  %8024 = vmatprep.subr.bf16.mxu1 %v11636_v15 }
 0x3eb   :  { %7994 = vmatpush1.bf16.msra.mxu0 %v11638_v45  ;;  %8026 = vmatpush1.bf16.msra.mxu1 %v11647_v43 }
 0x3ec   :  { %7996 = vmatprep.subr.bf16.mxu0 %v11661_v63  ;;  %8028 = vmatprep.subr.bf16.mxu1 %v11672_v40 }
 0x3ef   :  { %7998 = vmatpush1.bf16.msra.mxu0 %v11674_v0  ;;  %8030 = vmatpush1.bf16.msra.mxu1 %v11683_v55 }
 0x3f0   :  { %8000 = vmatprep.subr.bf16.mxu0 %v11697_v51  ;;  %8032 = vmatprep.subr.bf16.mxu1 %v11708_v28 }
 0x3f3   :  { %8002 = vmatpush1.bf16.msra.mxu0 %v11710_v8  ;;  %8034 = vmatpush1.bf16.msra.mxu1 %v11719_v2 }
 0x3f4   :  { %8004 = vmatprep.subr.bf16.mxu0 %v11733_v16  ;;  %8036 = vmatprep.subr.bf16.mxu1 %v11744_v13 }
 0x3f7   :  { %8006 = vmatpush1.bf16.msra.mxu0 %v11746_v5  ;;  %8038 = vmatpush1.bf16.msra.mxu1 %v11755_v56 }
 0x3f8   :  { %8008 = vmatprep.subr.bf16.mxu0 %v11769_v30  ;;  %8040 = vmatprep.subr.bf16.mxu1 %v11780_v44 }
 0x3fb   :  { %8010 = vmatpush1.bf16.msra.mxu0 %v11782_v4  ;;  %8042 = vmatpush1.bf16.msra.mxu1 %v11791_v18 }
 0x3fc   :  { %8012 = vmatprep.subr.bf16.mxu0 %v11805_v3  ;;  %8044 = vmatprep.subr.bf16.mxu1 %v11816_v21 }
 0x3ff   :  { %8014 = vmatpush1.bf16.msra.mxu0 %v11818_v27  ;;  %8046 = vmatpush1.bf16.msra.mxu1 %v11827_v34 }
 0x400   :  { %8048 = vmatprep.subr.bf16.mxu0 %v11832_v61  ;;  %8080 = vmatprep.subr.bf16.mxu1 %v11834_v14 }
 0x494   :  { %v2344_v57 = vpop.f32.mrb[6].mxu0  ;;  %v2415_v60 = vpop.f32.mrb[6].mxu1 }
 0x495   :  { %v9397_v20 = vadd.f32 %v2344_v57, %v10961_v62  ;;  %v2346_v17 = vpop.f32.mrb[7].mxu0  ;;  %v2417_v59 = vpop.f32.mrb[7].mxu1  ;;  %v9413_v39 = vadd.f32 %v2415_v60, %v13433_v24  ;;  %v2947_v24 = vld [vmem:[#allocation8 + $0x88] sm:$0xff] }
 0x496   :  { %v9398_v33 = vadd.f32 %v2346_v17, %v13431_v23  ;;  %v9414_v12 = vadd.f32 %v2417_v59, %v13432_v46  ;;  %v2951_v46 = vld [vmem:[#allocation8 + $0xa8] sm:$0xff]  ;;  %v2949_v23 = vld [vmem:[#allocation8 + $0x98] sm:$0xff] }
 0x497   :  { %v7326_v32 = vmul.f32 -1.442695, %v9397_v20 }
 0x498   :  { %v7327_v36 = vmul.f32 -1.442695, %v9398_v33  ;;  %v7328_v1 = vmul.f32 -1.442695, %v9414_v12 }
 0x499   :  { %9700 = vpow2.f32 %v7326_v32 }
 0x49a   :  { %9702 = vpow2.f32 %v7327_v36 }
 0x49b   :  { %9704 = vpow2.f32 %v7328_v1 }
 0x49c   :  { %9706 = vtanh.f32 %v9413_v39 }
 0x4a3   :  { %v9701_v25 = vpop.eup %9700 }
 0x4a4   :  { %v9703_v54 = vpop.eup %9702  ;;  %v2427_v41 = vadd.f32 1.0, %v9701_v25 }
 0x4a5   :  { %v2433_v49 = vadd.f32 1.0, %v9703_v54  ;;  %v9705_v9 = vpop.eup %9704 }
 0x4a6   :  { %9708 = vrcp.f32 %v2427_v41  ;;  %v9707_v57 = vpop.eup %9706  ;;  %v2440_v32 = vadd.f32 1.0, %v9705_v9 }
 0x4a7   :  { %9710 = vrcp.f32 %v2433_v49 }
 0x4a8   :  { %9712 = vrcp.f32 %v2440_v32  ;;  %v2943_v32 = vld [vmem:[#allocation8 + $0x68] sm:$0xff] }
 0x4b0   :  { %v9709_v17 = vpop.eup %9708 }
 0x4b1   :  { %v9711_v20 = vpop.eup %9710  ;;  %v2444_v33 = vmul.f32 %v9709_v17, %v9707_v57  ;;  %v2934_v57 = vld [vmem:[#allocation8 + $0x20] sm:$0xff]  ;;  %v2932_v17 = vld [vmem:[#allocation8 + $0x10] sm:$0xff] }
 0x4b2   :  { %v2443_v36 = vmul.f32 %v9711_v20, %v11491_v31  ;;  %v2930_v31 = vld [vmem:[#allocation8] sm:$0xff]  ;;  %v2936_v20 = vld [vmem:[#allocation8 + $0x30] sm:$0xff]  ;;  %v9713_v58 = vpop.eup %9712 }
 0x4b4   :  { %v11843_v59 = vadd.f32 %v2444_v33, %v2443_v36  ;;  %v2582_v12 = vpop.f32.mrb[24].mxu0  ;;  %v2653_v60 = vpop.f32.mrb[24].mxu1  ;;  %v2939_v33 = vld [vmem:[#allocation8 + $0x48] sm:$0xff]  ;;  %v2941_v36 = vld [vmem:[#allocation8 + $0x58] sm:$0xff] }
 0x4b5   :  { %v9431_v25 = vadd.f32 %v2582_v12, %v13435_v7  ;;  %v2584_v1 = vpop.f32.mrb[25].mxu0  ;;  %v2655_v39 = vpop.f32.mrb[25].mxu1  ;;  %v2945_v12 = vld [vmem:[#allocation8 + $0x78] sm:$0xff]  ;;  %v2940_v7 = vld [vmem:[#allocation8 + $0x50] sm:$0xff] }
 0x4b6   :  { %13454 = vst [vmem:[#allocation28_spill] sm:$0xff] %v11843_v59  ;;  %v9432_v54 = vadd.f32 %v2584_v1, %v13436_v42  ;;  %9714 = vtanh.f32 %v11843_v59  ;;  %v9448_v9 = vadd.f32 %v2655_v39, %v13437_v6  ;;  %v11849_v1 = vpack.c.bf16 %v2934_v57, %v2930_v31  ;;  %v2944_v59 = vld [vmem:[#allocation8 + $0x70] sm:$0xff] }
 0x4b7   :  { %v7329_v41 = vmul.f32 -1.442695, %v9431_v25  ;;  %v11851_v42 = vpack.c.bf16 %v2936_v20, %v2932_v17  ;;  %v2938_v25 = vld [vmem:[#allocation8 + $0x40] sm:$0xff]  ;;  %v11858_v6 = vpack.c.bf16 %v2945_v12, %v2941_v36  ;;  %v2952_v12 = vld [vmem:[#allocation8 + $0xb0] sm:$0xff] }
 0x4b8   :  { %v7330_v49 = vmul.f32 -1.442695, %v9432_v54  ;;  %v7331_v52 = vmul.f32 -1.442695, %v9448_v9  ;;  %13455 = vst [vmem:[#allocation30_spill] sm:$0xff] %v11849_v1  ;;  %v2942_v54 = vld [vmem:[#allocation8 + $0x60] sm:$0xff] }
 0x4b9   :  { %9716 = vpow2.f32 %v7329_v41  ;;  %13456 = vst [vmem:[#allocation31_spill] sm:$0xff] %v11851_v42  ;;  %v9447_v41 = vadd.f32 %v2653_v60, %v10992_v26  ;;  %13459 = vst [vmem:[#allocation34_spill] sm:$0xff] %v11858_v6  ;;  %v2953_v9 = vld [vmem:[#allocation8 + $0xb8] sm:$0xff]  ;;  %v2946_v60 = vld [vmem:[#allocation8 + $0x80] sm:$0xff] }
 0x4ba   :  { %9718 = vpow2.f32 %v7330_v49  ;;  %v11856_v49 = vpack.c.bf16 %v2943_v32, %v2939_v33  ;;  %v2950_v20 = vld [vmem:[#allocation8 + $0xa0] sm:$0xff]  ;;  %v11870_v32 = vpack.c.bf16 %v2951_v46, %v2947_v24  ;;  %v11872_v36 = vpack.c.bf16 %v2953_v9, %v2949_v23 }
 0x4bb   :  { %9720 = vpow2.f32 %v7331_v52  ;;  %v2948_v52 = vld [vmem:[#allocation8 + $0x90] sm:$0xff]  ;;  %v11878_v46 = vpack.c.bf16 %v2950_v20, %v2946_v60  ;;  %v2954_v24 = vld [vmem:[#allocation8 + $0xc0] sm:$0xff] }
 0x4bc   :  { %13458 = vst [vmem:[#allocation33_spill] sm:$0xff] %v11856_v49  ;;  %9722 = vtanh.f32 %v9447_v41  ;;  %13462 = vst [vmem:[#allocation48_spill] sm:$0xff] %v11870_v32  ;;  %v11880_v23 = vpack.c.bf16 %v2952_v12, %v2948_v52  ;;  %v2962_v52 = vld [vmem:[#allocation8 + $0x100] sm:$0xff] }
 0x4bd   :  { %13463 = vst [vmem:[#allocation49_spill] sm:$0xff] %v11872_v36  ;;  %13464 = vst [vmem:[#allocation50_spill] sm:$0xff] %v11878_v46  ;;  %v2966_v12 = vld [vmem:[#allocation8 + $0x120] sm:$0xff] }
 0x4be   :  { %13465 = vst [vmem:[#allocation51_spill] sm:$0xff] %v11880_v23 }
 0x4c0   :  { %v9715_v10 = vpop.eup %9714 }
 0x4c1   :  { %v11854_v39 = vmul.f32 %v9715_v10, %v9713_v58  ;;  %v11864_v58 = vpack.c.bf16 %v2942_v54, %v2938_v25  ;;  %v11866_v10 = vpack.c.bf16 %v2944_v59, %v2940_v7  ;;  %v2959_v25 = vld [vmem:[#allocation8 + $0xe8] sm:$0xff]  ;;  %v2957_v54 = vld [vmem:[#allocation8 + $0xd8] sm:$0xff]  ;;  %v2958_v59 = vld [vmem:[#allocation8 + $0xe0] sm:$0xff] }
 0x4c2   :  { %v2961_v7 = vld [vmem:[#allocation8 + $0xf8] sm:$0xff]  ;;  %v11890_v60 = vpack.c.bf16 %v2958_v59, %v2954_v24 }
 0x4c3   :  { %13457 = vst [vmem:[#allocation32_spill] sm:$0xff] %v11854_v39  ;;  %v9717_v31 = vpop.eup %9716  ;;  %2821 = vmatmul.mubr.f32.vlgmr.msra.gmra.mrb[8].mxu0 %v11854_v39  ;;  %2892 = vmatmul.mubr.f32.vlgmr.msra.gmra.mrb[8].mxu1 %v11854_v39  ;;  %13460 = vst [vmem:[#allocation46_spill] sm:$0xff] %v11864_v58  ;;  %v11886_v9 = vpack.c.bf16 %v2961_v7, %v2957_v54  ;;  %v2967_v39 = vld [vmem:[#allocation8 + $0x128] sm:$0xff]  ;;  %v2964_v54 = vld [vmem:[#allocation8 + $0x110] sm:$0xff] }
 0x4c4   :  { %v9719_v57 = vpop.eup %9718  ;;  %v2665_v17 = vadd.f32 1.0, %v9717_v31  ;;  %8050 = vmatpush1.bf16.msra.mxu0 %v11849_v1  ;;  %8082 = vmatpush1.bf16.msra.mxu1 %v11851_v42  ;;  %13461 = vst [vmem:[#allocation47_spill] sm:$0xff] %v11866_v10  ;;  %v2955_v31 = vld [vmem:[#allocation8 + $0xc8] sm:$0xff]  ;;  %13468 = vst [vmem:[#allocation55_spill] sm:$0xff] %v11890_v60  ;;  %v2968_v7 = vld [vmem:[#allocation8 + $0x130] sm:$0xff] }
 0x4c5   :  { %v2671_v33 = vadd.f32 1.0, %v9719_v57  ;;  %8052 = vmatprep.subr.bf16.mxu0 %v11856_v49  ;;  %8084 = vmatprep.subr.bf16.mxu1 %v11858_v6  ;;  %v11884_v41 = vpack.c.bf16 %v2959_v25, %v2955_v31  ;;  %13467 = vst [vmem:[#allocation54_spill] sm:$0xff] %v11886_v9  ;;  %v2956_v57 = vld [vmem:[#allocation8 + $0xd0] sm:$0xff]  ;;  %v2977_v24 = vld [vmem:[#allocation8 + $0x178] sm:$0xff] }
 0x4c6   :  { %9724 = vrcp.f32 %v2665_v17  ;;  %3058 = vmatprep.mubr.f32.mxu0 %v13391_v47  ;;  %3129 = vmatprep.mubr.f32.mxu1 %v13391_v47  ;;  %v2960_v17 = vld [vmem:[#allocation8 + $0xf0] sm:$0xff] }
 0x4c7   :  { %9726 = vrcp.f32 %v2671_v33  ;;  %13466 = vst [vmem:[#allocation52_spill] sm:$0xff] %v11884_v41  ;;  %v2963_v33 = vld [vmem:[#allocation8 + $0x108] sm:$0xff]  ;;  %v11892_v20 = vpack.c.bf16 %v2960_v17, %v2956_v57  ;;  %v11902_v17 = vpack.c.bf16 %v2966_v12, %v2962_v52  ;;  %v2976_v42 = vld [vmem:[#allocation8 + $0x170] sm:$0xff] }
 0x4c8   :  { %8054 = vmatpush1.bf16.msra.mxu0 %v11864_v58  ;;  %8086 = vmatpush1.bf16.msra.mxu1 %v11866_v10  ;;  %v2965_v58 = vld [vmem:[#allocation8 + $0x118] sm:$0xff]  ;;  %v11896_v31 = vpack.c.bf16 %v2967_v39, %v2963_v33  ;;  %v2970_v39 = vld [vmem:[#allocation8 + $0x140] sm:$0xff]  ;;  %v2983_v12 = vld [vmem:[#allocation8 + $0x1a8] sm:$0xff] }
 0x4c9   :  { %8056 = vmatprep.subr.bf16.mxu0 %v11870_v32  ;;  %8088 = vmatprep.subr.bf16.mxu1 %v11872_v36  ;;  %v2969_v10 = vld [vmem:[#allocation8 + $0x138] sm:$0xff]  ;;  %13469 = vst [vmem:[#allocation56_spill] sm:$0xff] %v11892_v20  ;;  %v2971_v36 = vld [vmem:[#allocation8 + $0x148] sm:$0xff] }
 0x4ca   :  { %v11898_v25 = vpack.c.bf16 %v2969_v10, %v2965_v58  ;;  %v2975_v32 = vld [vmem:[#allocation8 + $0x168] sm:$0xff]  ;;  %v2974_v58 = vld [vmem:[#allocation8 + $0x160] sm:$0xff] }
 0x4cb   :  { %v11908_v6 = vpack.c.bf16 %v2975_v32, %v2971_v36  ;;  %v2978_v36 = vld [vmem:[#allocation8 + $0x180] sm:$0xff] }
 0x4cc   :  { %8058 = vmatpush1.bf16.msra.mxu0 %v11878_v46  ;;  %8090 = vmatpush1.bf16.msra.mxu1 %v11880_v23  ;;  %v9721_v46 = vpop.eup %9720  ;;  %v2973_v23 = vld [vmem:[#allocation8 + $0x158] sm:$0xff] }
 0x4cd   :  { %8060 = vmatprep.subr.bf16.mxu0 %v11884_v41  ;;  %8092 = vmatprep.subr.bf16.mxu1 %v11886_v9  ;;  %v9723_v59 = vpop.eup %9722  ;;  %v11904_v9 = vpack.c.bf16 %v2968_v7, %v2964_v54  ;;  %v2678_v41 = vadd.f32 1.0, %v9721_v46  ;;  %v11910_v49 = vpack.c.bf16 %v2977_v24, %v2973_v23  ;;  %v2981_v54 = vld [vmem:[#allocation8 + $0x198] sm:$0xff]  ;;  %v11917_v46 = vpack.c.bf16 %v2974_v58, %v2970_v39  ;;  %v2982_v23 = vld [vmem:[#allocation8 + $0x1a0] sm:$0xff] }
 0x4ce   :  { %v2985_v7 = vld [vmem:[#allocation8 + $0x1b8] sm:$0xff] }
 0x4cf   :  { %9728 = vrcp.f32 %v2678_v41  ;;  %v11925_v24 = vpack.c.bf16 %v2985_v7, %v2981_v54  ;;  %v2993_v39 = vld [vmem:[#allocation8 + $0x1f8] sm:$0xff]  ;;  %v2988_v54 = vld [vmem:[#allocation8 + $0x1d0] sm:$0xff] }
 0x4d0   :  { %v9725_v57 = vpop.eup %9724  ;;  %8062 = vmatpush1.bf16.msra.mxu0 %v11890_v60  ;;  %8094 = vmatpush1.bf16.msra.mxu1 %v11892_v20  ;;  %v2972_v60 = vld [vmem:[#allocation8 + $0x150] sm:$0xff]  ;;  %v2979_v20 = vld [vmem:[#allocation8 + $0x188] sm:$0xff] }
 0x4d1   :  { %v9727_v10 = vpop.eup %9726  ;;  %v2682_v33 = vmul.f32 %v9725_v57, %v9723_v59  ;;  %8064 = vmatprep.subr.bf16.mxu0 %v11896_v31  ;;  %8096 = vmatprep.subr.bf16.mxu1 %v11898_v25  ;;  %v11919_v32 = vpack.c.bf16 %v2976_v42, %v2972_v60  ;;  %v2980_v59 = vld [vmem:[#allocation8 + $0x190] sm:$0xff]  ;;  %v11930_v42 = vpack.c.bf16 %v2982_v23, %v2978_v36  ;;  %v2986_v60 = vld [vmem:[#allocation8 + $0x1c0] sm:$0xff] }
 0x4d2   :  { %v2681_v52 = vmul.f32 %v9727_v10, %v11521_v19  ;;  %v11923_v19 = vpack.c.bf16 %v2983_v12, %v2979_v20  ;;  %v2984_v57 = vld [vmem:[#allocation8 + $0x1b0] sm:$0xff]  ;;  %v2987_v10 = vld [vmem:[#allocation8 + $0x1c8] sm:$0xff]  ;;  %v2990_v12 = vld [vmem:[#allocation8 + $0x1e0] sm:$0xff] }
 0x4d3   :  { %v11932_v41 = vpack.c.bf16 %v2984_v57, %v2980_v59  ;;  %v2992_v7 = vld [vmem:[#allocation8 + $0x1f0] sm:$0xff]  ;;  %v11942_v36 = vpack.c.bf16 %v2990_v12, %v2986_v60  ;;  %v13477_v60 = vld [vmem:[#allocation44_spill] sm:$0xff] }
 0x4d4   :  { %v11913_v1 = vadd.f32 %v2682_v33, %v2681_v52  ;;  %8066 = vmatpush1.bf16.msra.mxu0 %v11902_v17  ;;  %8098 = vmatpush1.bf16.msra.mxu1 %v11904_v9  ;;  %v2991_v33 = vld [vmem:[#allocation8 + $0x1e8] sm:$0xff]  ;;  %v2989_v52 = vld [vmem:[#allocation8 + $0x1d8] sm:$0xff]  ;;  %v11944_v23 = vpack.c.bf16 %v2992_v7, %v2988_v54 }
 0x4d5   :  { %8068 = vmatprep.subr.bf16.mxu0 %v11908_v6  ;;  %8100 = vmatprep.subr.bf16.mxu1 %v11910_v49  ;;  %v11936_v20 = vpack.c.bf16 %v2991_v33, %v2987_v10  ;;  %v11938_v58 = vpack.c.bf16 %v2993_v39, %v2989_v52 }
 0x4d6   :  { %9730 = vtanh.f32 %v11913_v1 }
 0x4d8   :  { %8070 = vmatpush1.bf16.msra.mxu0 %v11917_v46  ;;  %8102 = vmatpush1.bf16.msra.mxu1 %v11919_v32 }
 0x4d9   :  { %8072 = vmatprep.subr.bf16.mxu0 %v11923_v19  ;;  %8104 = vmatprep.subr.bf16.mxu1 %v11925_v24  ;;  %v9729_v59 = vpop.eup %9728 }
 0x4dc   :  { %8074 = vmatpush1.bf16.msra.mxu0 %v11930_v42  ;;  %8106 = vmatpush1.bf16.msra.mxu1 %v11932_v41 }
 0x4dd   :  { %8076 = vmatprep.subr.bf16.mxu0 %v11936_v20  ;;  %8108 = vmatprep.subr.bf16.mxu1 %v11938_v58 }
 0x4e0   :  { %v9731_v57 = vpop.eup %9730  ;;  %8078 = vmatpush1.bf16.msra.mxu0 %v11942_v36  ;;  %8110 = vmatpush1.bf16.msra.mxu1 %v11944_v23 }
 0x4e1   :  { %v11950_v10 = vmul.f32 %v9731_v57, %v9729_v59  ;;  %8112 = vmatprep.subr.bf16.mxu0 %v11553_v11  ;;  %8144 = vmatprep.subr.bf16.mxu1 %v11564_v48 }
 0x4e3   :  { %13470 = vst [vmem:[#allocation57_spill] sm:$0xff] %v11950_v10  ;;  %3059 = vmatmul.mubr.f32.vlgmr.msra.gmra.mrb[22].mxu0 %v11950_v10  ;;  %3130 = vmatmul.mubr.f32.vlgmr.msra.gmra.mrb[22].mxu1 %v11950_v10 }
 0x4e4   :  { %8114 = vmatpush1.bf16.msra.mxu0 %v11566_v38  ;;  %8146 = vmatpush1.bf16.msra.mxu1 %v11575_v53 }
 0x4e5   :  { %8116 = vmatprep.subr.bf16.mxu0 %v11589_v50  ;;  %8148 = vmatprep.subr.bf16.mxu1 %v11600_v35  ;;  %v13471_v35 = vld [vmem:[#allocation37_spill] sm:$0xff] }
 0x4e6   :  { %3298 = vmatprep.mubr.f32.mxu0 %v13391_v47  ;;  %3369 = vmatprep.mubr.f32.mxu1 %v13391_v47 }
 0x4e8   :  { %8118 = vmatpush1.bf16.msra.mxu0 %v11602_v22  ;;  %8150 = vmatpush1.bf16.msra.mxu1 %v11611_v37 }
 0x4e9   :  { %8120 = vmatprep.subr.bf16.mxu0 %v11625_v29  ;;  %8152 = vmatprep.subr.bf16.mxu1 %v11636_v15  ;;  %v13472_v15 = vld [vmem:[#allocation39_spill] sm:$0xff] }
 0x4ec   :  { %8122 = vmatpush1.bf16.msra.mxu0 %v11638_v45  ;;  %8154 = vmatpush1.bf16.msra.mxu1 %v11647_v43 }
 0x4ed   :  { %8124 = vmatprep.subr.bf16.mxu0 %v11661_v63  ;;  %8156 = vmatprep.subr.bf16.mxu1 %v11672_v40  ;;  %v13473_v63 = vld [vmem:[#allocation41_spill] sm:$0xff] }
 0x4f0   :  { %8126 = vmatpush1.bf16.msra.mxu0 %v11674_v0  ;;  %8158 = vmatpush1.bf16.msra.mxu1 %v11683_v55 }
 0x4f1   :  { %8128 = vmatprep.subr.bf16.mxu0 %v11697_v51  ;;  %8160 = vmatprep.subr.bf16.mxu1 %v11708_v28 }
 0x4f4   :  { %8130 = vmatpush1.bf16.msra.mxu0 %v11710_v8  ;;  %8162 = vmatpush1.bf16.msra.mxu1 %v11719_v2 }
 0x4f5   :  { %8132 = vmatprep.subr.bf16.mxu0 %v11733_v16  ;;  %8164 = vmatprep.subr.bf16.mxu1 %v11744_v13 }
 0x4f8   :  { %8134 = vmatpush1.bf16.msra.mxu0 %v11746_v5  ;;  %8166 = vmatpush1.bf16.msra.mxu1 %v11755_v56 }
 0x4f9   :  { %8136 = vmatprep.subr.bf16.mxu0 %v11769_v30  ;;  %8168 = vmatprep.subr.bf16.mxu1 %v11780_v44  ;;  %v13474_v30 = vld [vmem:[#allocation28_spill] sm:$0xff] }
 0x4fc   :  { %8138 = vmatpush1.bf16.msra.mxu0 %v11782_v4  ;;  %8170 = vmatpush1.bf16.msra.mxu1 %v11791_v18 }
 0x4fd   :  { %8140 = vmatprep.subr.bf16.mxu0 %v11805_v3  ;;  %8172 = vmatprep.subr.bf16.mxu1 %v11816_v21  ;;  %v13475_v21 = vld [vmem:[#allocation42_spill] sm:$0xff] }
 0x500   :  { %8142 = vmatpush1.bf16.msra.mxu0 %v11818_v27  ;;  %8174 = vmatpush1.bf16.msra.mxu1 %v11827_v34 }
 0x501   :  { %8176 = vmatprep.subr.bf16.mxu0 %v11832_v61  ;;  %8208 = vmatprep.subr.bf16.mxu1 %v11834_v14  ;;  %v13476_v14 = vld [vmem:[#allocation43_spill] sm:$0xff] }
 0x596   :  { %v2822_v11 = vpop.f32.mrb[8].mxu0  ;;  %v2893_v48 = vpop.f32.mrb[8].mxu1 }
 0x597   :  { %v9399_v38 = vadd.f32 %v2822_v11, %v10961_v62  ;;  %v2824_v53 = vpop.f32.mrb[9].mxu0  ;;  %v2895_v50 = vpop.f32.mrb[9].mxu1  ;;  %v9415_v40 = vadd.f32 %v2893_v48, %v13473_v63 }
 0x598   :  { %v9400_v22 = vadd.f32 %v2824_v53, %v13471_v35  ;;  %v9416_v45 = vadd.f32 %v2895_v50, %v13472_v15  ;;  %v13479_v50 = vld [vmem:[#allocation30_spill] sm:$0xff] }
 0x599   :  { %v7332_v37 = vmul.f32 -1.442695, %v9399_v38 }
 0x59a   :  { %v7333_v29 = vmul.f32 -1.442695, %v9400_v22  ;;  %v7334_v43 = vmul.f32 -1.442695, %v9416_v45  ;;  %v13480_v22 = vld [vmem:[#allocation31_spill] sm:$0xff]  ;;  %v13482_v45 = vld [vmem:[#allocation34_spill] sm:$0xff] }
 0x59b   :  { %9732 = vpow2.f32 %v7332_v37 }
 0x59c   :  { %9734 = vpow2.f32 %v7333_v29  ;;  %v13481_v29 = vld [vmem:[#allocation33_spill] sm:$0xff] }
 0x59d   :  { %9736 = vpow2.f32 %v7334_v43  ;;  %v13483_v43 = vld [vmem:[#allocation46_spill] sm:$0xff] }
 0x59e   :  { %9738 = vtanh.f32 %v9415_v40  ;;  %v13484_v40 = vld [vmem:[#allocation47_spill] sm:$0xff] }
 0x5a5   :  { %v9733_v0 = vpop.eup %9732 }
 0x5a6   :  { %v9735_v55 = vpop.eup %9734  ;;  %v2905_v51 = vadd.f32 1.0, %v9733_v0  ;;  %v13485_v0 = vld [vmem:[#allocation48_spill] sm:$0xff] }
 0x5a7   :  { %v2911_v28 = vadd.f32 1.0, %v9735_v55  ;;  %v9737_v8 = vpop.eup %9736  ;;  %v13486_v55 = vld [vmem:[#allocation49_spill] sm:$0xff] }
 0x5a8   :  { %9740 = vrcp.f32 %v2905_v51  ;;  %v9739_v2 = vpop.eup %9738  ;;  %v2918_v56 = vadd.f32 1.0, %v9737_v8  ;;  %v13487_v51 = vld [vmem:[#allocation50_spill] sm:$0xff]  ;;  %v13489_v8 = vld [vmem:[#allocation52_spill] sm:$0xff] }
 0x5a9   :  { %9742 = vrcp.f32 %v2911_v28  ;;  %v13488_v28 = vld [vmem:[#allocation51_spill] sm:$0xff] }
 0x5aa   :  { %9744 = vrcp.f32 %v2918_v56  ;;  %v13491_v56 = vld [vmem:[#allocation55_spill] sm:$0xff] }
 0x5b2   :  { %v9741_v16 = vpop.eup %9740 }
 0x5b3   :  { %v9743_v13 = vpop.eup %9742  ;;  %v2922_v5 = vmul.f32 %v9741_v16, %v9739_v2  ;;  %v13490_v2 = vld [vmem:[#allocation54_spill] sm:$0xff] }
 0x5b4   :  { %v2921_v44 = vmul.f32 %v9743_v13, %v13474_v30  ;;  %v9745_v54 = vpop.eup %9744  ;;  %v13492_v30 = vld [vmem:[#allocation56_spill] sm:$0xff] }
 0x5b6   :  { %v11995_v4 = vadd.f32 %v2922_v5, %v2921_v44  ;;  %v3060_v18 = vpop.f32.mrb[22].mxu0  ;;  %v3131_v3 = vpop.f32.mrb[22].mxu1 }
 0x5b7   :  { %v9429_v27 = vadd.f32 %v3060_v18, %v13475_v21  ;;  %v3062_v34 = vpop.f32.mrb[23].mxu0  ;;  %v3133_v61 = vpop.f32.mrb[23].mxu1  ;;  %v9445_v57 = vadd.f32 %v3131_v3, %v10992_v26 }
 0x5b8   :  { %v9430_v33 = vadd.f32 %v3062_v34, %v13476_v14  ;;  %9746 = vtanh.f32 %v11995_v4  ;;  %v9446_v12 = vadd.f32 %v3133_v61, %v13477_v60  ;;  %v3659_v61 = vld [vmem:[%s13250_s2 + $0x58] sm:$0xff] }
 0x5b9   :  { %v7335_v52 = vmul.f32 -1.442695, %v9429_v27 }
 0x5ba   :  { %v7336_v39 = vmul.f32 -1.442695, %v9430_v33  ;;  %v7337_v59 = vmul.f32 -1.442695, %v9446_v12  ;;  %v3660_v12 = vld [vmem:[%s13250_s2 + $0x60] sm:$0xff] }
 0x5bb   :  { %9748 = vpow2.f32 %v7335_v52  ;;  %v3663_v52 = vld [vmem:[%s13250_s2 + $0x78] sm:$0xff] }
 0x5bc   :  { %9750 = vpow2.f32 %v7336_v39  ;;  %v3656_v39 = vld [vmem:[%s13250_s2 + $0x40] sm:$0xff] }
 0x5bd   :  { %9752 = vpow2.f32 %v7337_v59  ;;  %v3658_v59 = vld [vmem:[%s13250_s2 + $0x50] sm:$0xff] }
 0x5be   :  { %9754 = vtanh.f32 %v9445_v57  ;;  %v3662_v57 = vld [vmem:[%s13250_s2 + $0x70] sm:$0xff] }
 0x5c2   :  { %v9747_v7 = vpop.eup %9746 }
 0x5c3   :  { %v12002_v11 = vmul.f32 %v9747_v7, %v9745_v54  ;;  %v12104_v54 = vpack.c.bf16 %v3663_v52, %v3659_v61  ;;  %v12106_v7 = vpack.c.bf16 %v3660_v12, %v3656_v39  ;;  %v3689_v61 = vld [vmem:[%s13250_s2 + $0x148] sm:$0xff]  ;;  %v3691_v39 = vld [vmem:[%s13250_s2 + $0x158] sm:$0xff] }
 0x5c4   :  { %v3693_v52 = vld [vmem:[%s13250_s2 + $0x168] sm:$0xff] }
 0x5c5   :  { %13478 = vst [vmem:[#allocation28_spill] sm:$0xff] %v12002_v11  ;;  %v9749_v48 = vpop.eup %9748  ;;  %3299 = vmatmul.mubr.f32.vlgmr.msra.gmra.mrb[10].mxu0 %v12002_v11  ;;  %3370 = vmatmul.mubr.f32.vlgmr.msra.gmra.mrb[10].mxu1 %v12002_v11  ;;  %v12237_v12 = vpack.c.bf16 %v3693_v52, %v3689_v61  ;;  %v3708_v61 = vld [vmem:[%s13250_s2 + $0x1e0] sm:$0xff] }
 0x5c6   :  { %v9751_v38 = vpop.eup %9750  ;;  %v3143_v53 = vadd.f32 1.0, %v9749_v48  ;;  %8178 = vmatpush1.bf16.msra.mxu0 %v13479_v50  ;;  %8210 = vmatpush1.bf16.msra.mxu1 %v13480_v22  ;;  %v12115_v48 = vpack.c.bf16 %v3662_v57, %v3658_v59  ;;  %v3667_v50 = vld [vmem:[%s13250_s2 + $0x98] sm:$0xff]  ;;  %v3688_v57 = vld [vmem:[%s13250_s2 + $0x140] sm:$0xff] }
 0x5c7   :  { %v3149_v37 = vadd.f32 1.0, %v9751_v38  ;;  %8180 = vmatprep.subr.bf16.mxu0 %v13481_v29  ;;  %8212 = vmatprep.subr.bf16.mxu1 %v13482_v45  ;;  %v9753_v16 = vpop.eup %9752  ;;  %v3665_v38 = vld [vmem:[%s13250_s2 + $0x88] sm:$0xff]  ;;  %v3664_v29 = vld [vmem:[%s13250_s2 + $0x80] sm:$0xff]  ;;  %v3695_v59 = vld [vmem:[%s13250_s2 + $0x178] sm:$0xff] }
 0x5c8   :  { %9756 = vrcp.f32 %v3143_v53  ;;  %3536 = vmatprep.mubr.f32.mxu0 %v13391_v47  ;;  %3607 = vmatprep.mubr.f32.mxu1 %v13391_v47  ;;  %v9755_v13 = vpop.eup %9754  ;;  %v3156_v3 = vadd.f32 1.0, %v9753_v16  ;;  %v3669_v53 = vld [vmem:[%s13250_s2 + $0xa8] sm:$0xff]  ;;  %v3668_v45 = vld [vmem:[%s13250_s2 + $0xa0] sm:$0xff] }
 0x5c9   :  { %9758 = vrcp.f32 %v3149_v37  ;;  %v12129_v22 = vpack.c.bf16 %v3669_v53, %v3665_v38  ;;  %v3671_v37 = vld [vmem:[%s13250_s2 + $0xb8] sm:$0xff]  ;;  %v3692_v38 = vld [vmem:[%s13250_s2 + $0x160] sm:$0xff]  ;;  %v12248_v53 = vpack.c.bf16 %v3695_v59, %v3691_v39  ;;  %v3706_v59 = vld [vmem:[%s13250_s2 + $0x1d0] sm:$0xff] }
 0x5ca   :  { %8182 = vmatpush1.bf16.msra.mxu0 %v13483_v43  ;;  %8214 = vmatpush1.bf16.msra.mxu1 %v13484_v40  ;;  %9760 = vrcp.f32 %v3156_v3  ;;  %v12140_v43 = vpack.c.bf16 %v3671_v37, %v3667_v50  ;;  %v12142_v40 = vpack.c.bf16 %v3668_v45, %v3664_v29  ;;  %v3678_v3 = vld [vmem:[%s13250_s2 + $0xf0] sm:$0xff]  ;;  %v12250_v50 = vpack.c.bf16 %v3692_v38, %v3688_v57 }
 0x5cb   :  { %8184 = vmatprep.subr.bf16.mxu0 %v13485_v0  ;;  %8216 = vmatprep.subr.bf16.mxu1 %v13486_v55  ;;  %v3666_v0 = vld [vmem:[%s13250_s2 + $0x90] sm:$0xff] }
 0x5cc   :  { %v3670_v55 = vld [vmem:[%s13250_s2 + $0xb0] sm:$0xff] }
 0x5cd   :  { %v3690_v37 = vld [vmem:[%s13250_s2 + $0x150] sm:$0xff] }
 0x5ce   :  { %8186 = vmatpush1.bf16.msra.mxu0 %v13487_v51  ;;  %8218 = vmatpush1.bf16.msra.mxu1 %v13488_v28  ;;  %v12151_v51 = vpack.c.bf16 %v3670_v55, %v3666_v0  ;;  %v3673_v28 = vld [vmem:[%s13250_s2 + $0xc8] sm:$0xff]  ;;  %v3694_v29 = vld [vmem:[%s13250_s2 + $0x170] sm:$0xff] }
 0x5cf   :  { %8188 = vmatprep.subr.bf16.mxu0 %v13489_v8  ;;  %8220 = vmatprep.subr.bf16.mxu1 %v13490_v2  ;;  %v3677_v8 = vld [vmem:[%s13250_s2 + $0xe8] sm:$0xff]  ;;  %v3675_v2 = vld [vmem:[%s13250_s2 + $0xd8] sm:$0xff]  ;;  %v12259_v45 = vpack.c.bf16 %v3694_v29, %v3690_v37  ;;  %v3710_v57 = vld [vmem:[%s13250_s2 + $0x1f0] sm:$0xff] }
 0x5d0   :  { %v12165_v16 = vpack.c.bf16 %v3677_v8, %v3673_v28  ;;  %v3697_v0 = vld [vmem:[%s13250_s2 + $0x188] sm:$0xff]  ;;  %v3699_v28 = vld [vmem:[%s13250_s2 + $0x198] sm:$0xff]  ;;  %v12331_v38 = vpack.c.bf16 %v3710_v57, %v3706_v59 }
 0x5d1   :  { %v3701_v55 = vld [vmem:[%s13250_s2 + $0x1a8] sm:$0xff] }
 0x5d2   :  { %v9757_v5 = vpop.eup %9756  ;;  %8190 = vmatpush1.bf16.msra.mxu0 %v13491_v56  ;;  %8222 = vmatpush1.bf16.msra.mxu1 %v13492_v30  ;;  %v3676_v56 = vld [vmem:[%s13250_s2 + $0xe0] sm:$0xff]  ;;  %v12273_v8 = vpack.c.bf16 %v3701_v55, %v3697_v0  ;;  %v3887_v37 = vld [vmem:[#allocation8 + $0x8] sm:$0xff]  ;;  %v3889_v0 = vld [vmem:[#allocation8 + $0x18] sm:$0xff] }
 0x5d3   :  { %v9759_v44 = vpop.eup %9758  ;;  %v3160_v18 = vmul.f32 %v9757_v5, %v9755_v13  ;;  %8192 = vmatprep.subr.bf16.mxu0 %v11896_v31  ;;  %8224 = vmatprep.subr.bf16.mxu1 %v11898_v25  ;;  %v3653_v31 = vld [vmem:[%s13250_s2 + $0x28] sm:$0xff]  ;;  %v3651_v25 = vld [vmem:[%s13250_s2 + $0x18] sm:$0xff]  ;;  %v3672_v5 = vld [vmem:[%s13250_s2 + $0xc0] sm:$0xff] }
 0x5d4   :  { %v3159_v27 = vmul.f32 %v9759_v44, %v11913_v1  ;;  %v3679_v13 = vld [vmem:[%s13250_s2 + $0xf8] sm:$0xff]  ;;  %v12178_v44 = vpack.c.bf16 %v3676_v56, %v3672_v5  ;;  %v3700_v5 = vld [vmem:[%s13250_s2 + $0x1a0] sm:$0xff]  ;;  %v3891_v29 = vld [vmem:[#allocation8 + $0x28] sm:$0xff] }
 0x5d5   :  { %v12176_v30 = vpack.c.bf16 %v3679_v13, %v3675_v2  ;;  %v3703_v2 = vld [vmem:[%s13250_s2 + $0x1b8] sm:$0xff]  ;;  %v3696_v13 = vld [vmem:[%s13250_s2 + $0x180] sm:$0xff]  ;;  %v12336_v55 = vpack.c.bf16 %v3891_v29, %v3887_v37 }
 0x5d6   :  { %v12025_v34 = vadd.f32 %v3160_v18, %v3159_v27  ;;  %8194 = vmatpush1.bf16.msra.mxu0 %v11902_v17  ;;  %8226 = vmatpush1.bf16.msra.mxu1 %v11904_v9  ;;  %v3649_v9 = vld [vmem:[%s13250_s2 + $0x8] sm:$0xff]  ;;  %v3674_v18 = vld [vmem:[%s13250_s2 + $0xd0] sm:$0xff]  ;;  %v12284_v56 = vpack.c.bf16 %v3703_v2, %v3699_v28  ;;  %v3893_v28 = vld [vmem:[#allocation8 + $0x38] sm:$0xff] }
 0x5d7   :  { %8196 = vmatprep.subr.bf16.mxu0 %v11908_v6  ;;  %8228 = vmatprep.subr.bf16.mxu1 %v11910_v49  ;;  %v9761_v6 = vpop.eup %9760  ;;  %v12057_v17 = vpack.c.bf16 %v3653_v31, %v3649_v9  ;;  %v12187_v27 = vpack.c.bf16 %v3678_v3, %v3674_v18  ;;  %v3683_v9 = vld [vmem:[%s13250_s2 + $0x118] sm:$0xff]  ;;  %v12286_v18 = vpack.c.bf16 %v3700_v5, %v3696_v13  ;;  %v3698_v3 = vld [vmem:[%s13250_s2 + $0x190] sm:$0xff] }
 0x5d8   :  { %9762 = vtanh.f32 %v12025_v34  ;;  %v12338_v2 = vpack.c.bf16 %v3893_v28, %v3889_v0 }
 0x5da   :  { %8198 = vmatpush1.bf16.msra.mxu0 %v11917_v46  ;;  %8230 = vmatpush1.bf16.msra.mxu1 %v11919_v32  ;;  %v3655_v46 = vld [vmem:[%s13250_s2 + $0x38] sm:$0xff]  ;;  %v3648_v32 = vld [vmem:[%s13250_s2] sm:$0xff] }
 0x5db   :  { %8200 = vmatprep.subr.bf16.mxu0 %v11923_v19  ;;  %8232 = vmatprep.subr.bf16.mxu1 %v11925_v24  ;;  %v3652_v19 = vld [vmem:[%s13250_s2 + $0x20] sm:$0xff]  ;;  %v12068_v24 = vpack.c.bf16 %v3655_v46, %v3651_v25  ;;  %v3687_v25 = vld [vmem:[%s13250_s2 + $0x138] sm:$0xff] }
 0x5dc   :  { %v3680_v46 = vld [vmem:[%s13250_s2 + $0x100] sm:$0xff] }
 0x5de   :  { %8202 = vmatpush1.bf16.msra.mxu0 %v11930_v42  ;;  %8234 = vmatpush1.bf16.msra.mxu1 %v11932_v41  ;;  %v12070_v42 = vpack.c.bf16 %v3652_v19, %v3648_v32  ;;  %v3650_v41 = vld [vmem:[%s13250_s2 + $0x10] sm:$0xff]  ;;  %v3684_v32 = vld [vmem:[%s13250_s2 + $0x120] sm:$0xff]  ;;  %v12212_v19 = vpack.c.bf16 %v3687_v25, %v3683_v9  ;;  %v3705_v9 = vld [vmem:[%s13250_s2 + $0x1c8] sm:$0xff] }
 0x5df   :  { %8204 = vmatprep.subr.bf16.mxu0 %v11936_v20  ;;  %8236 = vmatprep.subr.bf16.mxu1 %v11938_v58  ;;  %v3654_v20 = vld [vmem:[%s13250_s2 + $0x30] sm:$0xff]  ;;  %v3709_v25 = vld [vmem:[%s13250_s2 + $0x1e8] sm:$0xff] }
 0x5e0   :  { %v12079_v58 = vpack.c.bf16 %v3654_v20, %v3650_v41  ;;  %v12214_v41 = vpack.c.bf16 %v3684_v32, %v3680_v46  ;;  %v3682_v20 = vld [vmem:[%s13250_s2 + $0x110] sm:$0xff]  ;;  %v3707_v46 = vld [vmem:[%s13250_s2 + $0x1d8] sm:$0xff]  ;;  %v12309_v32 = vpack.c.bf16 %v3709_v25, %v3705_v9 }
 0x5e2   :  { %v9763_v1 = vpop.eup %9762  ;;  %8206 = vmatpush1.bf16.msra.mxu0 %v11942_v36  ;;  %8238 = vmatpush1.bf16.msra.mxu1 %v11944_v23  ;;  %v3657_v36 = vld [vmem:[%s13250_s2 + $0x48] sm:$0xff] }
 0x5e3   :  { %v12042_v49 = vmul.f32 %v9763_v1, %v9761_v6  ;;  %8240 = vmatprep.subr.bf16.mxu0 %v12057_v17  ;;  %8272 = vmatprep.subr.bf16.mxu1 %v12068_v24  ;;  %v3661_v23 = vld [vmem:[%s13250_s2 + $0x68] sm:$0xff] }
 0x5e4   :  { %v12093_v33 = vpack.c.bf16 %v3661_v23, %v3657_v36  ;;  %v3681_v6 = vld [vmem:[%s13250_s2 + $0x108] sm:$0xff]  ;;  %v3686_v36 = vld [vmem:[%s13250_s2 + $0x130] sm:$0xff] }
 0x5e5   :  { %13493 = vst [vmem:[#allocation30_spill] sm:$0xff] %v12042_v49  ;;  %3537 = vmatmul.mubr.f32.vlgmr.msra.gmra.mrb[20].mxu0 %v12042_v49  ;;  %3608 = vmatmul.mubr.f32.vlgmr.msra.gmra.mrb[20].mxu1 %v12042_v49  ;;  %v3685_v1 = vld [vmem:[%s13250_s2 + $0x128] sm:$0xff]  ;;  %v12223_v23 = vpack.c.bf16 %v3686_v36, %v3682_v20  ;;  %v3711_v20 = vld [vmem:[%s13250_s2 + $0x1f8] sm:$0xff]  ;;  %v3704_v36 = vld [vmem:[%s13250_s2 + $0x1c0] sm:$0xff] }
 0x5e6   :  { %3776 = vmatprep.mubr.f32.mxu0 %v13391_v47  ;;  %3847 = vmatprep.mubr.f32.mxu1 %v13391_v47  ;;  %v12201_v31 = vpack.c.bf16 %v3685_v1, %v3681_v6  ;;  %v3702_v6 = vld [vmem:[%s13250_s2 + $0x1b0] sm:$0xff]  ;;  %v12320_v52 = vpack.c.bf16 %v3711_v20, %v3707_v46  ;;  %v12322_v39 = vpack.c.bf16 %v3708_v61, %v3704_v36 }
 0x5e7   :  { %8242 = vmatpush1.bf16.msra.mxu0 %v12070_v42  ;;  %8274 = vmatpush1.bf16.msra.mxu1 %v12079_v58  ;;  %v12295_v1 = vpack.c.bf16 %v3702_v6, %v3698_v3 }
 0x5e8   :  { %8244 = vmatprep.subr.bf16.mxu0 %v12093_v33  ;;  %8276 = vmatprep.subr.bf16.mxu1 %v12104_v54 }
 0x5eb   :  { %8246 = vmatpush1.bf16.msra.mxu0 %v12106_v7  ;;  %8278 = vmatpush1.bf16.msra.mxu1 %v12115_v48 }
 0x5ec   :  { %8248 = vmatprep.subr.bf16.mxu0 %v12129_v22  ;;  %8280 = vmatprep.subr.bf16.mxu1 %v12140_v43 }
 0x5ef   :  { %8250 = vmatpush1.bf16.msra.mxu0 %v12142_v40  ;;  %8282 = vmatpush1.bf16.msra.mxu1 %v12151_v51 }
 0x5f0   :  { %8252 = vmatprep.subr.bf16.mxu0 %v12165_v16  ;;  %8284 = vmatprep.subr.bf16.mxu1 %v12176_v30 }
 0x5f3   :  { %8254 = vmatpush1.bf16.msra.mxu0 %v12178_v44  ;;  %8286 = vmatpush1.bf16.msra.mxu1 %v12187_v27 }
 0x5f4   :  { %8256 = vmatprep.subr.bf16.mxu0 %v12201_v31  ;;  %8288 = vmatprep.subr.bf16.mxu1 %v12212_v19 }
 0x5f7   :  { %8258 = vmatpush1.bf16.msra.mxu0 %v12214_v41  ;;  %8290 = vmatpush1.bf16.msra.mxu1 %v12223_v23 }
 0x5f8   :  { %8260 = vmatprep.subr.bf16.mxu0 %v12237_v12  ;;  %8292 = vmatprep.subr.bf16.mxu1 %v12248_v53 }
 0x5fb   :  { %8262 = vmatpush1.bf16.msra.mxu0 %v12250_v50  ;;  %8294 = vmatpush1.bf16.msra.mxu1 %v12259_v45 }
 0x5fc   :  { %8264 = vmatprep.subr.bf16.mxu0 %v12273_v8  ;;  %8296 = vmatprep.subr.bf16.mxu1 %v12284_v56 }
 0x5ff   :  { %8266 = vmatpush1.bf16.msra.mxu0 %v12286_v18  ;;  %8298 = vmatpush1.bf16.msra.mxu1 %v12295_v1 }
 0x600   :  { %8268 = vmatprep.subr.bf16.mxu0 %v12309_v32  ;;  %8300 = vmatprep.subr.bf16.mxu1 %v12320_v52 }
 0x603   :  { %8270 = vmatpush1.bf16.msra.mxu0 %v12322_v39  ;;  %8302 = vmatpush1.bf16.msra.mxu1 %v12331_v38 }
 0x604   :  { %8304 = vmatprep.subr.bf16.mxu0 %v12336_v55  ;;  %8336 = vmatprep.subr.bf16.mxu1 %v12338_v2 }
 0x698   :  { %v3300_v13 = vpop.f32.mrb[10].mxu0  ;;  %v3371_v5 = vpop.f32.mrb[10].mxu1 }
 0x699   :  { %v9401_v3 = vadd.f32 %v3300_v13, %v10961_v62  ;;  %v3302_v6 = vpop.f32.mrb[11].mxu0  ;;  %v3373_v9 = vpop.f32.mrb[11].mxu1  ;;  %v9417_v59 = vadd.f32 %v3371_v5, %v13473_v63  ;;  %v3903_v63 = vld [vmem:[#allocation8 + $0x88] sm:$0xff] }
 0x69a   :  { %v9402_v25 = vadd.f32 %v3302_v6, %v13471_v35  ;;  %v9418_v36 = vadd.f32 %v3373_v9, %v13472_v15  ;;  %v3907_v15 = vld [vmem:[#allocation8 + $0xa8] sm:$0xff]  ;;  %v3905_v35 = vld [vmem:[#allocation8 + $0x98] sm:$0xff] }
 0x69b   :  { %v7338_v46 = vmul.f32 -1.442695, %v9401_v3 }
 0x69c   :  { %v7339_v20 = vmul.f32 -1.442695, %v9402_v25  ;;  %v7340_v61 = vmul.f32 -1.442695, %v9418_v36 }
 0x69d   :  { %9764 = vpow2.f32 %v7338_v46 }
 0x69e   :  { %9766 = vpow2.f32 %v7339_v20 }
 0x69f   :  { %9768 = vpow2.f32 %v7340_v61 }
 0x6a0   :  { %9770 = vtanh.f32 %v9417_v59 }
 0x6a7   :  { %v9765_v57 = vpop.eup %9764 }
 0x6a8   :  { %v9767_v37 = vpop.eup %9766  ;;  %v3383_v29 = vadd.f32 1.0, %v9765_v57 }
 0x6a9   :  { %v3389_v0 = vadd.f32 1.0, %v9767_v37  ;;  %v9769_v28 = vpop.eup %9768 }
 0x6aa   :  { %9772 = vrcp.f32 %v3383_v29  ;;  %v9771_v13 = vpop.eup %9770  ;;  %v3396_v46 = vadd.f32 1.0, %v9769_v28 }
 0x6ab   :  { %9774 = vrcp.f32 %v3389_v0 }
 0x6ac   :  { %9776 = vrcp.f32 %v3396_v46  ;;  %v3899_v46 = vld [vmem:[#allocation8 + $0x68] sm:$0xff] }
 0x6b4   :  { %v9773_v6 = vpop.eup %9772 }
 0x6b5   :  { %v9775_v3 = vpop.eup %9774  ;;  %v3400_v25 = vmul.f32 %v9773_v6, %v9771_v13  ;;  %v3890_v13 = vld [vmem:[#allocation8 + $0x20] sm:$0xff]  ;;  %v3888_v6 = vld [vmem:[#allocation8 + $0x10] sm:$0xff] }
 0x6b6   :  { %v3399_v20 = vmul.f32 %v9775_v3, %v11995_v4  ;;  %v3886_v4 = vld [vmem:[#allocation8] sm:$0xff]  ;;  %v3892_v3 = vld [vmem:[#allocation8 + $0x30] sm:$0xff]  ;;  %v9777_v11 = vpop.eup %9776 }
 0x6b8   :  { %v12347_v9 = vadd.f32 %v3400_v25, %v3399_v20  ;;  %v3538_v36 = vpop.f32.mrb[20].mxu0  ;;  %v3609_v5 = vpop.f32.mrb[20].mxu1  ;;  %v3895_v25 = vld [vmem:[#allocation8 + $0x48] sm:$0xff]  ;;  %v3897_v20 = vld [vmem:[#allocation8 + $0x58] sm:$0xff] }
 0x6b9   :  { %v9427_v57 = vadd.f32 %v3538_v36, %v13475_v21  ;;  %v3540_v61 = vpop.f32.mrb[21].mxu0  ;;  %v3611_v59 = vpop.f32.mrb[21].mxu1  ;;  %v3901_v36 = vld [vmem:[#allocation8 + $0x78] sm:$0xff]  ;;  %v3896_v21 = vld [vmem:[#allocation8 + $0x50] sm:$0xff] }
 0x6ba   :  { %13494 = vst [vmem:[#allocation31_spill] sm:$0xff] %v12347_v9  ;;  %v9428_v37 = vadd.f32 %v3540_v61, %v13476_v14  ;;  %9778 = vtanh.f32 %v12347_v9  ;;  %v9444_v28 = vadd.f32 %v3611_v59, %v13477_v60  ;;  %v12353_v61 = vpack.c.bf16 %v3890_v13, %v3886_v4  ;;  %v3900_v9 = vld [vmem:[#allocation8 + $0x70] sm:$0xff] }
 0x6bb   :  { %v7341_v29 = vmul.f32 -1.442695, %v9427_v57  ;;  %v12355_v14 = vpack.c.bf16 %v3892_v3, %v3888_v6  ;;  %v3894_v57 = vld [vmem:[#allocation8 + $0x40] sm:$0xff]  ;;  %v12362_v60 = vpack.c.bf16 %v3901_v36, %v3897_v20  ;;  %v3908_v36 = vld [vmem:[#allocation8 + $0xb0] sm:$0xff] }
 0x6bc   :  { %v7342_v0 = vmul.f32 -1.442695, %v9428_v37  ;;  %v7343_v49 = vmul.f32 -1.442695, %v9444_v28  ;;  %13495 = vst [vmem:[#allocation33_spill] sm:$0xff] %v12353_v61  ;;  %v3898_v37 = vld [vmem:[#allocation8 + $0x60] sm:$0xff] }
 0x6bd   :  { %9780 = vpow2.f32 %v7341_v29  ;;  %13496 = vst [vmem:[#allocation34_spill] sm:$0xff] %v12355_v14  ;;  %v9443_v29 = vadd.f32 %v3609_v5, %v10992_v26  ;;  %13499 = vst [vmem:[#allocation48_spill] sm:$0xff] %v12362_v60  ;;  %v3909_v28 = vld [vmem:[#allocation8 + $0xb8] sm:$0xff]  ;;  %v3902_v5 = vld [vmem:[#allocation8 + $0x80] sm:$0xff] }
 0x6be   :  { %9782 = vpow2.f32 %v7342_v0  ;;  %v12360_v0 = vpack.c.bf16 %v3899_v46, %v3895_v25  ;;  %v3906_v3 = vld [vmem:[#allocation8 + $0xa0] sm:$0xff]  ;;  %v12374_v46 = vpack.c.bf16 %v3907_v15, %v3903_v63  ;;  %v12376_v20 = vpack.c.bf16 %v3909_v28, %v3905_v35 }
 0x6bf   :  { %9784 = vpow2.f32 %v7343_v49  ;;  %v3904_v49 = vld [vmem:[#allocation8 + $0x90] sm:$0xff]  ;;  %v12382_v15 = vpack.c.bf16 %v3906_v3, %v3902_v5  ;;  %v3910_v63 = vld [vmem:[#allocation8 + $0xc0] sm:$0xff] }
 0x6c0   :  { %13498 = vst [vmem:[#allocation47_spill] sm:$0xff] %v12360_v0  ;;  %9786 = vtanh.f32 %v9443_v29  ;;  %13502 = vst [vmem:[#allocation51_spill] sm:$0xff] %v12374_v46  ;;  %v12384_v35 = vpack.c.bf16 %v3908_v36, %v3904_v49  ;;  %v3918_v49 = vld [vmem:[#allocation8 + $0x100] sm:$0xff] }
 0x6c1   :  { %13503 = vst [vmem:[#allocation52_spill] sm:$0xff] %v12376_v20  ;;  %13504 = vst [vmem:[#allocation54_spill] sm:$0xff] %v12382_v15  ;;  %v3922_v36 = vld [vmem:[#allocation8 + $0x120] sm:$0xff] }
 0x6c2   :  { %13505 = vst [vmem:[#allocation55_spill] sm:$0xff] %v12384_v35 }
 0x6c4   :  { %v9779_v10 = vpop.eup %9778 }
 0x6c5   :  { %v12358_v59 = vmul.f32 %v9779_v10, %v9777_v11  ;;  %v12368_v10 = vpack.c.bf16 %v3898_v37, %v3894_v57  ;;  %v12370_v11 = vpack.c.bf16 %v3900_v9, %v3896_v21  ;;  %v3915_v57 = vld [vmem:[#allocation8 + $0xe8] sm:$0xff]  ;;  %v3913_v37 = vld [vmem:[#allocation8 + $0xd8] sm:$0xff]  ;;  %v3914_v9 = vld [vmem:[#allocation8 + $0xe0] sm:$0xff] }
 0x6c6   :  { %v3917_v21 = vld [vmem:[#allocation8 + $0xf8] sm:$0xff]  ;;  %v12394_v5 = vpack.c.bf16 %v3914_v9, %v3910_v63 }
 0x6c7   :  { %13497 = vst [vmem:[#allocation46_spill] sm:$0xff] %v12358_v59  ;;  %v9781_v4 = vpop.eup %9780  ;;  %3777 = vmatmul.mubr.f32.vlgmr.msra.gmra.mrb[12].mxu0 %v12358_v59  ;;  %3848 = vmatmul.mubr.f32.vlgmr.msra.gmra.mrb[12].mxu1 %v12358_v59  ;;  %13500 = vst [vmem:[#allocation49_spill] sm:$0xff] %v12368_v10  ;;  %v12390_v28 = vpack.c.bf16 %v3917_v21, %v3913_v37  ;;  %v3923_v59 = vld [vmem:[#allocation8 + $0x128] sm:$0xff]  ;;  %v3920_v37 = vld [vmem:[#allocation8 + $0x110] sm:$0xff] }
 0x6c8   :  { %v9783_v13 = vpop.eup %9782  ;;  %v3621_v6 = vadd.f32 1.0, %v9781_v4  ;;  %8306 = vmatpush1.bf16.msra.mxu0 %v12353_v61  ;;  %8338 = vmatpush1.bf16.msra.mxu1 %v12355_v14  ;;  %13501 = vst [vmem:[#allocation50_spill] sm:$0xff] %v12370_v11  ;;  %v3911_v4 = vld [vmem:[#allocation8 + $0xc8] sm:$0xff]  ;;  %13508 = vst [vmem:[#allocation59_spill] sm:$0xff] %v12394_v5  ;;  %v3924_v21 = vld [vmem:[#allocation8 + $0x130] sm:$0xff] }
 0x6c9   :  { %v3627_v25 = vadd.f32 1.0, %v9783_v13  ;;  %8308 = vmatprep.subr.bf16.mxu0 %v12360_v0  ;;  %8340 = vmatprep.subr.bf16.mxu1 %v12362_v60  ;;  %v12388_v29 = vpack.c.bf16 %v3915_v57, %v3911_v4  ;;  %13507 = vst [vmem:[#allocation58_spill] sm:$0xff] %v12390_v28  ;;  %v3912_v13 = vld [vmem:[#allocation8 + $0xd0] sm:$0xff]  ;;  %v3933_v63 = vld [vmem:[#allocation8 + $0x178] sm:$0xff] }
 0x6ca   :  { %9788 = vrcp.f32 %v3621_v6  ;;  %4014 = vmatprep.mubr.f32.mxu0 %v13391_v47  ;;  %4085 = vmatprep.mubr.f32.mxu1 %v13391_v47  ;;  %v3916_v6 = vld [vmem:[#allocation8 + $0xf0] sm:$0xff] }
 0x6cb   :  { %9790 = vrcp.f32 %v3627_v25  ;;  %13506 = vst [vmem:[#allocation56_spill] sm:$0xff] %v12388_v29  ;;  %v3919_v25 = vld [vmem:[#allocation8 + $0x108] sm:$0xff]  ;;  %v12396_v3 = vpack.c.bf16 %v3916_v6, %v3912_v13  ;;  %v12406_v6 = vpack.c.bf16 %v3922_v36, %v3918_v49  ;;  %v3932_v14 = vld [vmem:[#allocation8 + $0x170] sm:$0xff] }
 0x6cc   :  { %8310 = vmatpush1.bf16.msra.mxu0 %v12368_v10  ;;  %8342 = vmatpush1.bf16.msra.mxu1 %v12370_v11  ;;  %v3921_v10 = vld [vmem:[#allocation8 + $0x118] sm:$0xff]  ;;  %v12400_v4 = vpack.c.bf16 %v3923_v59, %v3919_v25  ;;  %v3926_v59 = vld [vmem:[#allocation8 + $0x140] sm:$0xff]  ;;  %v3939_v36 = vld [vmem:[#allocation8 + $0x1a8] sm:$0xff] }
 0x6cd   :  { %8312 = vmatprep.subr.bf16.mxu0 %v12374_v46  ;;  %8344 = vmatprep.subr.bf16.mxu1 %v12376_v20  ;;  %v3925_v11 = vld [vmem:[#allocation8 + $0x138] sm:$0xff]  ;;  %13509 = vst [vmem:[#allocation60_spill] sm:$0xff] %v12396_v3  ;;  %v3927_v20 = vld [vmem:[#allocation8 + $0x148] sm:$0xff] }
 0x6ce   :  { %v12402_v57 = vpack.c.bf16 %v3925_v11, %v3921_v10  ;;  %v3931_v46 = vld [vmem:[#allocation8 + $0x168] sm:$0xff]  ;;  %v3930_v10 = vld [vmem:[#allocation8 + $0x160] sm:$0xff] }
 0x6cf   :  { %v12412_v60 = vpack.c.bf16 %v3931_v46, %v3927_v20  ;;  %v3934_v20 = vld [vmem:[#allocation8 + $0x180] sm:$0xff] }
 0x6d0   :  { %8314 = vmatpush1.bf16.msra.mxu0 %v12382_v15  ;;  %8346 = vmatpush1.bf16.msra.mxu1 %v12384_v35  ;;  %v9785_v15 = vpop.eup %9784  ;;  %v3929_v35 = vld [vmem:[#allocation8 + $0x158] sm:$0xff] }
 0x6d1   :  { %8316 = vmatprep.subr.bf16.mxu0 %v12388_v29  ;;  %8348 = vmatprep.subr.bf16.mxu1 %v12390_v28  ;;  %v9787_v9 = vpop.eup %9786  ;;  %v12408_v28 = vpack.c.bf16 %v3924_v21, %v3920_v37  ;;  %v3634_v29 = vadd.f32 1.0, %v9785_v15  ;;  %v12414_v0 = vpack.c.bf16 %v3933_v63, %v3929_v35  ;;  %v3937_v37 = vld [vmem:[#allocation8 + $0x198] sm:$0xff]  ;;  %v12421_v15 = vpack.c.bf16 %v3930_v10, %v3926_v59  ;;  %v3938_v35 = vld [vmem:[#allocation8 + $0x1a0] sm:$0xff] }
 0x6d2   :  { %v3941_v21 = vld [vmem:[#allocation8 + $0x1b8] sm:$0xff] }
 0x6d3   :  { %9792 = vrcp.f32 %v3634_v29  ;;  %v12429_v63 = vpack.c.bf16 %v3941_v21, %v3937_v37  ;;  %v3949_v59 = vld [vmem:[#allocation8 + $0x1f8] sm:$0xff]  ;;  %v3944_v37 = vld [vmem:[#allocation8 + $0x1d0] sm:$0xff] }
 0x6d4   :  { %v9789_v13 = vpop.eup %9788  ;;  %8318 = vmatpush1.bf16.msra.mxu0 %v12394_v5  ;;  %8350 = vmatpush1.bf16.msra.mxu1 %v12396_v3  ;;  %v3928_v5 = vld [vmem:[#allocation8 + $0x150] sm:$0xff]  ;;  %v3935_v3 = vld [vmem:[#allocation8 + $0x188] sm:$0xff] }
 0x6d5   :  { %v9791_v11 = vpop.eup %9790  ;;  %v3638_v25 = vmul.f32 %v9789_v13, %v9787_v9  ;;  %8320 = vmatprep.subr.bf16.mxu0 %v12400_v4  ;;  %8352 = vmatprep.subr.bf16.mxu1 %v12402_v57  ;;  %v12423_v46 = vpack.c.bf16 %v3932_v14, %v3928_v5  ;;  %v3936_v9 = vld [vmem:[#allocation8 + $0x190] sm:$0xff]  ;;  %v12434_v14 = vpack.c.bf16 %v3938_v35, %v3934_v20  ;;  %v3942_v5 = vld [vmem:[#allocation8 + $0x1c0] sm:$0xff] }
 0x6d6   :  { %v3637_v49 = vmul.f32 %v9791_v11, %v12025_v34  ;;  %v12427_v34 = vpack.c.bf16 %v3939_v36, %v3935_v3  ;;  %v3940_v13 = vld [vmem:[#allocation8 + $0x1b0] sm:$0xff]  ;;  %v3943_v11 = vld [vmem:[#allocation8 + $0x1c8] sm:$0xff]  ;;  %v3946_v36 = vld [vmem:[#allocation8 + $0x1e0] sm:$0xff] }
 0x6d7   :  { %v12436_v29 = vpack.c.bf16 %v3940_v13, %v3936_v9  ;;  %v3948_v21 = vld [vmem:[#allocation8 + $0x1f0] sm:$0xff]  ;;  %v12446_v20 = vpack.c.bf16 %v3946_v36, %v3942_v5  ;;  %v13516_v5 = vld [vmem:[#allocation44_spill] sm:$0xff] }
 0x6d8   :  { %v12417_v61 = vadd.f32 %v3638_v25, %v3637_v49  ;;  %8322 = vmatpush1.bf16.msra.mxu0 %v12406_v6  ;;  %8354 = vmatpush1.bf16.msra.mxu1 %v12408_v28  ;;  %v3947_v25 = vld [vmem:[#allocation8 + $0x1e8] sm:$0xff]  ;;  %v3945_v49 = vld [vmem:[#allocation8 + $0x1d8] sm:$0xff]  ;;  %v12448_v35 = vpack.c.bf16 %v3948_v21, %v3944_v37 }
 0x6d9   :  { %8324 = vmatprep.subr.bf16.mxu0 %v12412_v60  ;;  %8356 = vmatprep.subr.bf16.mxu1 %v12414_v0  ;;  %v12440_v3 = vpack.c.bf16 %v3947_v25, %v3943_v11  ;;  %v12442_v10 = vpack.c.bf16 %v3949_v59, %v3945_v49 }
 0x6da   :  { %9794 = vtanh.f32 %v12417_v61 }
 0x6dc   :  { %8326 = vmatpush1.bf16.msra.mxu0 %v12421_v15  ;;  %8358 = vmatpush1.bf16.msra.mxu1 %v12423_v46 }
 0x6dd   :  { %8328 = vmatprep.subr.bf16.mxu0 %v12427_v34  ;;  %8360 = vmatprep.subr.bf16.mxu1 %v12429_v63  ;;  %v9793_v9 = vpop.eup %9792 }
 0x6e0   :  { %8330 = vmatpush1.bf16.msra.mxu0 %v12434_v14  ;;  %8362 = vmatpush1.bf16.msra.mxu1 %v12436_v29 }
 0x6e1   :  { %8332 = vmatprep.subr.bf16.mxu0 %v12440_v3  ;;  %8364 = vmatprep.subr.bf16.mxu1 %v12442_v10 }
 0x6e4   :  { %v9795_v13 = vpop.eup %9794  ;;  %8334 = vmatpush1.bf16.msra.mxu0 %v12446_v20  ;;  %8366 = vmatpush1.bf16.msra.mxu1 %v12448_v35 }
 0x6e5   :  { %v12454_v11 = vmul.f32 %v9795_v13, %v9793_v9  ;;  %8368 = vmatprep.subr.bf16.mxu0 %v12057_v17  ;;  %8400 = vmatprep.subr.bf16.mxu1 %v12068_v24 }
 0x6e7   :  { %4015 = vmatmul.mubr.f32.vlgmr.msra.gmra.mrb[18].mxu0 %v12454_v11  ;;  %4086 = vmatmul.mubr.f32.vlgmr.msra.gmra.mrb[18].mxu1 %v12454_v11 }
 0x6e8   :  { %8370 = vmatpush1.bf16.msra.mxu0 %v12070_v42  ;;  %8402 = vmatpush1.bf16.msra.mxu1 %v12079_v58 }
 0x6e9   :  { %8372 = vmatprep.subr.bf16.mxu0 %v12093_v33  ;;  %8404 = vmatprep.subr.bf16.mxu1 %v12104_v54  ;;  %v13510_v54 = vld [vmem:[#allocation37_spill] sm:$0xff] }
 0x6ea   :  { %4254 = vmatprep.mubr.f32.mxu0 %v13391_v47  ;;  %4325 = vmatprep.mubr.f32.mxu1 %v13391_v47 }
 0x6ec   :  { %8374 = vmatpush1.bf16.msra.mxu0 %v12106_v7  ;;  %8406 = vmatpush1.bf16.msra.mxu1 %v12115_v48 }
 0x6ed   :  { %8376 = vmatprep.subr.bf16.mxu0 %v12129_v22  ;;  %8408 = vmatprep.subr.bf16.mxu1 %v12140_v43  ;;  %v13511_v43 = vld [vmem:[#allocation39_spill] sm:$0xff] }
 0x6f0   :  { %8378 = vmatpush1.bf16.msra.mxu0 %v12142_v40  ;;  %8410 = vmatpush1.bf16.msra.mxu1 %v12151_v51 }
 0x6f1   :  { %8380 = vmatprep.subr.bf16.mxu0 %v12165_v16  ;;  %8412 = vmatprep.subr.bf16.mxu1 %v12176_v30  ;;  %v13512_v16 = vld [vmem:[#allocation41_spill] sm:$0xff] }
 0x6f4   :  { %8382 = vmatpush1.bf16.msra.mxu0 %v12178_v44  ;;  %8414 = vmatpush1.bf16.msra.mxu1 %v12187_v27 }
 0x6f5   :  { %8384 = vmatprep.subr.bf16.mxu0 %v12201_v31  ;;  %8416 = vmatprep.subr.bf16.mxu1 %v12212_v19 }
 0x6f8   :  { %8386 = vmatpush1.bf16.msra.mxu0 %v12214_v41  ;;  %8418 = vmatpush1.bf16.msra.mxu1 %v12223_v23 }
 0x6f9   :  { %8388 = vmatprep.subr.bf16.mxu0 %v12237_v12  ;;  %8420 = vmatprep.subr.bf16.mxu1 %v12248_v53 }
 0x6fc   :  { %8390 = vmatpush1.bf16.msra.mxu0 %v12250_v50  ;;  %8422 = vmatpush1.bf16.msra.mxu1 %v12259_v45 }
 0x6fd   :  { %8392 = vmatprep.subr.bf16.mxu0 %v12273_v8  ;;  %8424 = vmatprep.subr.bf16.mxu1 %v12284_v56  ;;  %v13513_v8 = vld [vmem:[#allocation31_spill] sm:$0xff] }
 0x700   :  { %8394 = vmatpush1.bf16.msra.mxu0 %v12286_v18  ;;  %8426 = vmatpush1.bf16.msra.mxu1 %v12295_v1 }
 0x701   :  { %8396 = vmatprep.subr.bf16.mxu0 %v12309_v32  ;;  %8428 = vmatprep.subr.bf16.mxu1 %v12320_v52  ;;  %v13514_v52 = vld [vmem:[#allocation42_spill] sm:$0xff] }
 0x704   :  { %8398 = vmatpush1.bf16.msra.mxu0 %v12322_v39  ;;  %8430 = vmatpush1.bf16.msra.mxu1 %v12331_v38 }
 0x705   :  { %8432 = vmatprep.subr.bf16.mxu0 %v12336_v55  ;;  %8464 = vmatprep.subr.bf16.mxu1 %v12338_v2  ;;  %v13515_v2 = vld [vmem:[#allocation43_spill] sm:$0xff] }
 0x79a   :  { %v3778_v17 = vpop.f32.mrb[12].mxu0  ;;  %v3849_v24 = vpop.f32.mrb[12].mxu1 }
 0x79b   :  { %v9403_v42 = vadd.f32 %v3778_v17, %v10961_v62  ;;  %v3780_v58 = vpop.f32.mrb[13].mxu0  ;;  %v3851_v33 = vpop.f32.mrb[13].mxu1  ;;  %v9419_v30 = vadd.f32 %v3849_v24, %v13512_v16 }
 0x79c   :  { %v9404_v7 = vadd.f32 %v3780_v58, %v13510_v54  ;;  %v9420_v40 = vadd.f32 %v3851_v33, %v13511_v43  ;;  %v13517_v33 = vld [vmem:[#allocation33_spill] sm:$0xff] }
 0x79d   :  { %v7344_v48 = vmul.f32 -1.442695, %v9403_v42 }
 0x79e   :  { %v7345_v22 = vmul.f32 -1.442695, %v9404_v7  ;;  %v7346_v51 = vmul.f32 -1.442695, %v9420_v40  ;;  %v13518_v7 = vld [vmem:[#allocation34_spill] sm:$0xff]  ;;  %v13520_v40 = vld [vmem:[#allocation48_spill] sm:$0xff] }
 0x79f   :  { %9796 = vpow2.f32 %v7344_v48 }
 0x7a0   :  { %9798 = vpow2.f32 %v7345_v22  ;;  %v13519_v22 = vld [vmem:[#allocation47_spill] sm:$0xff] }
 0x7a1   :  { %9800 = vpow2.f32 %v7346_v51  ;;  %v13521_v51 = vld [vmem:[#allocation49_spill] sm:$0xff] }
 0x7a2   :  { %9802 = vtanh.f32 %v9419_v30  ;;  %v13522_v30 = vld [vmem:[#allocation50_spill] sm:$0xff] }
 0x7a9   :  { %v9797_v44 = vpop.eup %9796 }
 0x7aa   :  { %v9799_v27 = vpop.eup %9798  ;;  %v3861_v31 = vadd.f32 1.0, %v9797_v44  ;;  %v13523_v44 = vld [vmem:[#allocation51_spill] sm:$0xff] }
 0x7ab   :  { %v3867_v19 = vadd.f32 1.0, %v9799_v27  ;;  %v9801_v41 = vpop.eup %9800  ;;  %v13524_v27 = vld [vmem:[#allocation52_spill] sm:$0xff] }
 0x7ac   :  { %9804 = vrcp.f32 %v3861_v31  ;;  %v9803_v23 = vpop.eup %9802  ;;  %v3874_v45 = vadd.f32 1.0, %v9801_v41  ;;  %v13525_v31 = vld [vmem:[#allocation54_spill] sm:$0xff]  ;;  %v13527_v41 = vld [vmem:[#allocation56_spill] sm:$0xff] }
 0x7ad   :  { %9806 = vrcp.f32 %v3867_v19  ;;  %v13526_v19 = vld [vmem:[#allocation55_spill] sm:$0xff] }
 0x7ae   :  { %9808 = vrcp.f32 %v3874_v45  ;;  %v13529_v45 = vld [vmem:[#allocation59_spill] sm:$0xff] }
 0x7b6   :  { %v9805_v12 = vpop.eup %9804 }
 0x7b7   :  { %v9807_v53 = vpop.eup %9806  ;;  %v3878_v50 = vmul.f32 %v9805_v12, %v9803_v23  ;;  %v13528_v23 = vld [vmem:[#allocation58_spill] sm:$0xff] }
 0x7b8   :  { %v3877_v56 = vmul.f32 %v9807_v53, %v13513_v8  ;;  %v9809_v37 = vpop.eup %9808  ;;  %v13530_v8 = vld [vmem:[#allocation60_spill] sm:$0xff] }
 0x7ba   :  { %v12499_v18 = vadd.f32 %v3878_v50, %v3877_v56  ;;  %v4016_v1 = vpop.f32.mrb[18].mxu0  ;;  %v4087_v32 = vpop.f32.mrb[18].mxu1 }
 0x7bb   :  { %v9425_v39 = vadd.f32 %v4016_v1, %v13514_v52  ;;  %v4018_v38 = vpop.f32.mrb[19].mxu0  ;;  %v4089_v55 = vpop.f32.mrb[19].mxu1  ;;  %v9441_v13 = vadd.f32 %v4087_v32, %v10992_v26 }
 0x7bc   :  { %v9426_v25 = vadd.f32 %v4018_v38, %v13515_v2  ;;  %9810 = vtanh.f32 %v12499_v18  ;;  %v9442_v36 = vadd.f32 %v4089_v55, %v13516_v5  ;;  %v4611_v55 = vld [vmem:[#allocation13 + $0x48] sm:$0xff] }
 0x7bd   :  { %v7347_v49 = vmul.f32 -1.442695, %v9425_v39 }
 0x7be   :  { %v7348_v59 = vmul.f32 -1.442695, %v9426_v25  ;;  %v7349_v9 = vmul.f32 -1.442695, %v9442_v36  ;;  %v4615_v25 = vld [vmem:[#allocation13 + $0x68] sm:$0xff] }
 0x7bf   :  { %9812 = vpow2.f32 %v7347_v49  ;;  %v4613_v49 = vld [vmem:[#allocation13 + $0x58] sm:$0xff] }
 0x7c0   :  { %9814 = vpow2.f32 %v7348_v59  ;;  %v4617_v59 = vld [vmem:[#allocation13 + $0x78] sm:$0xff] }
 0x7c1   :  { %9816 = vpow2.f32 %v7349_v9  ;;  %v8563_v9 = vpack.c.bf16 %v4617_v59, %v4613_v49  ;;  %v4643_v49 = vld [vmem:[#allocation13 + $0x148] sm:$0xff] }
 0x7c2   :  { %9818 = vtanh.f32 %v9441_v13  ;;  %v4612_v13 = vld [vmem:[#allocation13 + $0x50] sm:$0xff]  ;;  %v4647_v59 = vld [vmem:[#allocation13 + $0x168] sm:$0xff] }
 0x7c6   :  { %v9811_v21 = vpop.eup %9810 }
 0x7c7   :  { %v12506_v17 = vmul.f32 %v9811_v21, %v9809_v37  ;;  %v4614_v37 = vld [vmem:[#allocation13 + $0x60] sm:$0xff]  ;;  %v8499_v21 = vpack.c.bf16 %v4615_v25, %v4611_v55  ;;  %v4640_v55 = vld [vmem:[#allocation13 + $0x130] sm:$0xff] }
 0x7c9   :  { %v9813_v24 = vpop.eup %9812  ;;  %4255 = vmatmul.mubr.f32.vlgmr.msra.gmra.mrb[14].mxu0 %v12506_v17  ;;  %4326 = vmatmul.mubr.f32.vlgmr.msra.gmra.mrb[14].mxu1 %v12506_v17 }
 0x7ca   :  { %v9815_v42 = vpop.eup %9814  ;;  %v4099_v58 = vadd.f32 1.0, %v9813_v24  ;;  %8434 = vmatpush1.bf16.msra.mxu0 %v13517_v33  ;;  %8466 = vmatpush1.bf16.msra.mxu1 %v13518_v7  ;;  %v4616_v24 = vld [vmem:[#allocation13 + $0x70] sm:$0xff] }
 0x7cb   :  { %v4105_v48 = vadd.f32 1.0, %v9815_v42  ;;  %8436 = vmatprep.subr.bf16.mxu0 %v13519_v22  ;;  %8468 = vmatprep.subr.bf16.mxu1 %v13520_v40  ;;  %v9817_v12 = vpop.eup %9816  ;;  %v4619_v42 = vld [vmem:[#allocation13 + $0x88] sm:$0xff]  ;;  %v13531_v33 = vld [vmem:[#allocation25_spill] sm:$0xff]  ;;  %v4618_v22 = vld [vmem:[#allocation13 + $0x80] sm:$0xff] }
 0x7cc   :  { %9820 = vrcp.f32 %v4099_v58  ;;  %4492 = vmatprep.mubr.f32.mxu0 %v13391_v47  ;;  %4563 = vmatprep.mubr.f32.mxu1 %v13391_v47  ;;  %v9819_v53 = vpop.eup %9818  ;;  %v4112_v32 = vadd.f32 1.0, %v9817_v12  ;;  %v4621_v58 = vld [vmem:[#allocation13 + $0x98] sm:$0xff]  ;;  %v4622_v40 = vld [vmem:[#allocation13 + $0xa0] sm:$0xff] }
 0x7cd   :  { %9822 = vrcp.f32 %v4105_v48  ;;  %v8565_v48 = vpack.c.bf16 %v4616_v24, %v4612_v13  ;;  %v8505_v12 = vpack.c.bf16 %v4622_v40, %v4618_v22  ;;  %v4644_v13 = vld [vmem:[#allocation13 + $0x150] sm:$0xff]  ;;  %v4650_v22 = vld [vmem:[#allocation13 + $0x180] sm:$0xff] }
 0x7ce   :  { %8438 = vmatpush1.bf16.msra.mxu0 %v13521_v51  ;;  %8470 = vmatpush1.bf16.msra.mxu1 %v13522_v30  ;;  %9824 = vrcp.f32 %v4112_v32  ;;  %v4632_v32 = vld [vmem:[#allocation13 + $0xf0] sm:$0xff]  ;;  %v4654_v40 = vld [vmem:[#allocation13 + $0x1a0] sm:$0xff] }
 0x7cf   :  { %8440 = vmatprep.subr.bf16.mxu0 %v13523_v44  ;;  %8472 = vmatprep.subr.bf16.mxu1 %v13524_v27  ;;  %v4620_v44 = vld [vmem:[#allocation13 + $0x90] sm:$0xff] }
 0x7d0   :  { %v4624_v27 = vld [vmem:[#allocation13 + $0xb0] sm:$0xff] }
 0x7d1   :  { %v4648_v24 = vld [vmem:[#allocation13 + $0x170] sm:$0xff] }
 0x7d2   :  { %8442 = vmatpush1.bf16.msra.mxu0 %v13525_v31  ;;  %8474 = vmatpush1.bf16.msra.mxu1 %v13526_v19  ;;  %v4627_v31 = vld [vmem:[#allocation13 + $0xc8] sm:$0xff] }
 0x7d3   :  { %8444 = vmatprep.subr.bf16.mxu0 %v13527_v41  ;;  %8476 = vmatprep.subr.bf16.mxu1 %v13528_v23  ;;  %v4631_v19 = vld [vmem:[#allocation13 + $0xe8] sm:$0xff]  ;;  %v4629_v41 = vld [vmem:[#allocation13 + $0xd8] sm:$0xff] }
 0x7d4   :  { %v4633_v23 = vld [vmem:[#allocation13 + $0xf8] sm:$0xff] }
 0x7d6   :  { %v9821_v50 = vpop.eup %9820  ;;  %8446 = vmatpush1.bf16.msra.mxu0 %v13529_v45  ;;  %8478 = vmatpush1.bf16.msra.mxu1 %v13530_v8  ;;  %v4630_v45 = vld [vmem:[#allocation13 + $0xe0] sm:$0xff]  ;;  %v8507_v8 = vpack.c.bf16 %v4631_v19, %v4627_v31  ;;  %v4659_v19 = vld [vmem:[#allocation13 + $0x1c8] sm:$0xff] }
 0x7d7   :  { %v9823_v56 = vpop.eup %9822  ;;  %v4116_v1 = vmul.f32 %v9821_v50, %v9819_v53  ;;  %8448 = vmatprep.subr.bf16.mxu0 %v12400_v4  ;;  %8480 = vmatprep.subr.bf16.mxu1 %v12402_v57  ;;  %v4607_v4 = vld [vmem:[#allocation13 + $0x28] sm:$0xff]  ;;  %v4605_v57 = vld [vmem:[#allocation13 + $0x18] sm:$0xff]  ;;  %v8569_v53 = vpack.c.bf16 %v4624_v27, %v4620_v44  ;;  %v4626_v50 = vld [vmem:[#allocation13 + $0xc0] sm:$0xff] }
 0x7d8   :  { %v4115_v39 = vmul.f32 %v9823_v56, %v12417_v61  ;;  %v4603_v61 = vld [vmem:[#allocation13 + $0x8] sm:$0xff]  ;;  %v8571_v56 = vpack.c.bf16 %v4633_v23, %v4629_v41  ;;  %v4652_v44 = vld [vmem:[#allocation13 + $0x190] sm:$0xff]  ;;  %v4661_v23 = vld [vmem:[#allocation13 + $0x1d8] sm:$0xff] }
 0x7d9   :  { %v4656_v27 = vld [vmem:[#allocation13 + $0x1b0] sm:$0xff]  ;;  %v4663_v41 = vld [vmem:[#allocation13 + $0x1e8] sm:$0xff] }
 0x7da   :  { %v12529_v38 = vadd.f32 %v4116_v1, %v4115_v39  ;;  %8450 = vmatpush1.bf16.msra.mxu0 %v12406_v6  ;;  %8482 = vmatpush1.bf16.msra.mxu1 %v12408_v28  ;;  %v4609_v6 = vld [vmem:[#allocation13 + $0x38] sm:$0xff]  ;;  %v4602_v28 = vld [vmem:[#allocation13] sm:$0xff]  ;;  %v4628_v1 = vld [vmem:[#allocation13 + $0xd0] sm:$0xff]  ;;  %v8585_v31 = vpack.c.bf16 %v4656_v27, %v4652_v44 }
 0x7db   :  { %8452 = vmatprep.subr.bf16.mxu0 %v12412_v60  ;;  %8484 = vmatprep.subr.bf16.mxu1 %v12414_v0  ;;  %v8495_v60 = vpack.c.bf16 %v4607_v4, %v4603_v61  ;;  %v8559_v0 = vpack.c.bf16 %v4609_v6, %v4605_v57  ;;  %v4635_v39 = vld [vmem:[#allocation13 + $0x108] sm:$0xff]  ;;  %v4637_v4 = vld [vmem:[#allocation13 + $0x118] sm:$0xff]  ;;  %v8509_v6 = vpack.c.bf16 %v4630_v45, %v4626_v50  ;;  %v4658_v50 = vld [vmem:[#allocation13 + $0x1c0] sm:$0xff] }
 0x7dc   :  { %9826 = vtanh.f32 %v12529_v38  ;;  %v4639_v61 = vld [vmem:[#allocation13 + $0x128] sm:$0xff]  ;;  %v4641_v57 = vld [vmem:[#allocation13 + $0x138] sm:$0xff]  ;;  %v4662_v45 = vld [vmem:[#allocation13 + $0x1e0] sm:$0xff] }
 0x7dd   :  { %v4688_v44 = vld [vmem:[#allocation13 + $0x2b0] sm:$0xff] }
 0x7de   :  { %8454 = vmatpush1.bf16.msra.mxu0 %v12421_v15  ;;  %8486 = vmatpush1.bf16.msra.mxu1 %v12423_v46  ;;  %v4606_v15 = vld [vmem:[#allocation13 + $0x20] sm:$0xff]  ;;  %v4604_v46 = vld [vmem:[#allocation13 + $0x10] sm:$0xff] }
 0x7df   :  { %8456 = vmatprep.subr.bf16.mxu0 %v12427_v34  ;;  %8488 = vmatprep.subr.bf16.mxu1 %v12429_v63  ;;  %v4608_v34 = vld [vmem:[#allocation13 + $0x30] sm:$0xff]  ;;  %v9825_v63 = vpop.eup %9824 }
 0x7e2   :  { %8458 = vmatpush1.bf16.msra.mxu0 %v12434_v14  ;;  %8490 = vmatpush1.bf16.msra.mxu1 %v12436_v29  ;;  %v8497_v29 = vpack.c.bf16 %v4606_v15, %v4602_v28  ;;  %v8511_v28 = vpack.c.bf16 %v4639_v61, %v4635_v39  ;;  %v8575_v15 = vpack.c.bf16 %v4641_v57, %v4637_v4  ;;  %v4667_v61 = vld [vmem:[#allocation13 + $0x208] sm:$0xff]  ;;  %v4669_v57 = vld [vmem:[#allocation13 + $0x218] sm:$0xff] }
 0x7e3   :  { %8460 = vmatprep.subr.bf16.mxu0 %v12440_v3  ;;  %8492 = vmatprep.subr.bf16.mxu1 %v12442_v10  ;;  %v8561_v3 = vpack.c.bf16 %v4608_v34, %v4604_v46  ;;  %v4610_v10 = vld [vmem:[#allocation13 + $0x40] sm:$0xff]  ;;  %v4636_v34 = vld [vmem:[#allocation13 + $0x110] sm:$0xff]  ;;  %v4671_v4 = vld [vmem:[#allocation13 + $0x228] sm:$0xff] }
 0x7e4   :  { %v8501_v7 = vpack.c.bf16 %v4614_v37, %v4610_v10  ;;  %v4638_v46 = vld [vmem:[#allocation13 + $0x120] sm:$0xff]  ;;  %v8577_v25 = vpack.c.bf16 %v4640_v55, %v4636_v34  ;;  %v4668_v34 = vld [vmem:[#allocation13 + $0x210] sm:$0xff] }
 0x7e5   :  { %v4642_v10 = vld [vmem:[#allocation13 + $0x140] sm:$0xff]  ;;  %v4672_v55 = vld [vmem:[#allocation13 + $0x230] sm:$0xff] }
 0x7e6   :  { %v9827_v36 = vpop.eup %9826  ;;  %8462 = vmatpush1.bf16.msra.mxu0 %v12446_v20  ;;  %8494 = vmatpush1.bf16.msra.mxu1 %v12448_v35  ;;  %v4623_v20 = vld [vmem:[#allocation13 + $0xa8] sm:$0xff]  ;;  %v4625_v35 = vld [vmem:[#allocation13 + $0xb8] sm:$0xff]  ;;  %v4646_v37 = vld [vmem:[#allocation13 + $0x160] sm:$0xff] }
 0x7e7   :  { %v12546_v14 = vmul.f32 %v9827_v36, %v9825_v63  ;;  %8496 = vmatprep.subr.bf16.mxu0 %v8495_v60  ;;  %8560 = vmatprep.subr.bf16.mxu1 %v8559_v0  ;;  %v8503_v51 = vpack.c.bf16 %v4623_v20, %v4619_v42  ;;  %v8567_v30 = vpack.c.bf16 %v4625_v35, %v4621_v58  ;;  %v4634_v0 = vld [vmem:[#allocation13 + $0x100] sm:$0xff]  ;;  %v4645_v36 = vld [vmem:[#allocation13 + $0x158] sm:$0xff]  ;;  %v4651_v20 = vld [vmem:[#allocation13 + $0x188] sm:$0xff] }
 0x7e8   :  { %v8573_v60 = vpack.c.bf16 %v4632_v32, %v4628_v1  ;;  %v8513_v63 = vpack.c.bf16 %v4638_v46, %v4634_v0  ;;  %v8581_v42 = vpack.c.bf16 %v4648_v24, %v4644_v13  ;;  %v4655_v58 = vld [vmem:[#allocation13 + $0x1a8] sm:$0xff]  ;;  %v4653_v35 = vld [vmem:[#allocation13 + $0x198] sm:$0xff]  ;;  %v4660_v1 = vld [vmem:[#allocation13 + $0x1d0] sm:$0xff] }
 0x7e9   :  { %4493 = vmatmul.mubr.f32.vlgmr.msra.gmra.mrb[16].mxu0 %v12546_v14  ;;  %4564 = vmatmul.mubr.f32.vlgmr.msra.gmra.mrb[16].mxu1 %v12546_v14  ;;  %v4664_v32 = vld [vmem:[#allocation13 + $0x1f0] sm:$0xff]  ;;  %v4666_v0 = vld [vmem:[#allocation13 + $0x200] sm:$0xff] }
 0x7ea   :  { %4816 = vmatprep.mubr.f32.mxu0 %v13531_v33  ;;  %4887 = vmatprep.mubr.f32.mxu1 %v13531_v33  ;;  %v8589_v39 = vpack.c.bf16 %v4664_v32, %v4660_v1  ;;  %v4680_v13 = vld [vmem:[#allocation13 + $0x270] sm:$0xff] }
 0x7eb   :  { %8498 = vmatpush1.bf16.msra.mxu0 %v8497_v29  ;;  %8562 = vmatpush1.bf16.msra.mxu1 %v8561_v3  ;;  %v8515_v29 = vpack.c.bf16 %v4647_v59, %v4643_v49  ;;  %v4649_v3 = vld [vmem:[#allocation13 + $0x178] sm:$0xff]  ;;  %v4679_v49 = vld [vmem:[#allocation13 + $0x268] sm:$0xff]  ;;  %v4696_v1 = vld [vmem:[#allocation13 + $0x2f0] sm:$0xff] }
 0x7ec   :  { %8500 = vmatprep.subr.bf16.mxu0 %v8499_v21  ;;  %8564 = vmatprep.subr.bf16.mxu1 %v8563_v9  ;;  %v8579_v21 = vpack.c.bf16 %v4649_v3, %v4645_v36  ;;  %v8517_v9 = vpack.c.bf16 %v4646_v37, %v4642_v10  ;;  %v4677_v59 = vld [vmem:[#allocation13 + $0x258] sm:$0xff]  ;;  %v4674_v3 = vld [vmem:[#allocation13 + $0x240] sm:$0xff] }
 0x7ed   :  { %v4678_v10 = vld [vmem:[#allocation13 + $0x260] sm:$0xff] }
 0x7ef   :  { %8502 = vmatpush1.bf16.msra.mxu0 %v8501_v7  ;;  %8566 = vmatpush1.bf16.msra.mxu1 %v8565_v48  ;;  %v8519_v7 = vpack.c.bf16 %v4655_v58, %v4651_v20  ;;  %v4657_v48 = vld [vmem:[#allocation13 + $0x1b8] sm:$0xff]  ;;  %v4687_v20 = vld [vmem:[#allocation13 + $0x2a8] sm:$0xff] }
 0x7f0   :  { %8504 = vmatprep.subr.bf16.mxu0 %v8503_v51  ;;  %8568 = vmatprep.subr.bf16.mxu1 %v8567_v30  ;;  %v8583_v51 = vpack.c.bf16 %v4657_v48, %v4653_v35  ;;  %v8521_v30 = vpack.c.bf16 %v4654_v40, %v4650_v22  ;;  %v4685_v58 = vld [vmem:[#allocation13 + $0x298] sm:$0xff]  ;;  %v4682_v48 = vld [vmem:[#allocation13 + $0x280] sm:$0xff] }
 0x7f1   :  { %v4686_v22 = vld [vmem:[#allocation13 + $0x2a0] sm:$0xff] }
 0x7f3   :  { %8506 = vmatpush1.bf16.msra.mxu0 %v8505_v12  ;;  %8570 = vmatpush1.bf16.msra.mxu1 %v8569_v53  ;;  %v8523_v12 = vpack.c.bf16 %v4663_v41, %v4659_v19  ;;  %v4665_v53 = vld [vmem:[#allocation13 + $0x1f8] sm:$0xff]  ;;  %v4695_v19 = vld [vmem:[#allocation13 + $0x2e8] sm:$0xff] }
 0x7f4   :  { %8508 = vmatprep.subr.bf16.mxu0 %v8507_v8  ;;  %8572 = vmatprep.subr.bf16.mxu1 %v8571_v56  ;;  %v8587_v8 = vpack.c.bf16 %v4665_v53, %v4661_v23  ;;  %v8525_v56 = vpack.c.bf16 %v4662_v45, %v4658_v50  ;;  %v4693_v41 = vld [vmem:[#allocation13 + $0x2d8] sm:$0xff]  ;;  %v4690_v53 = vld [vmem:[#allocation13 + $0x2c0] sm:$0xff] }
 0x7f5   :  { %v4694_v50 = vld [vmem:[#allocation13 + $0x2e0] sm:$0xff] }
 0x7f7   :  { %8510 = vmatpush1.bf16.msra.mxu0 %v8509_v6  ;;  %8574 = vmatpush1.bf16.msra.mxu1 %v8573_v60  ;;  %v8527_v6 = vpack.c.bf16 %v4671_v4, %v4667_v61  ;;  %v4673_v60 = vld [vmem:[#allocation13 + $0x238] sm:$0xff]  ;;  %v4703_v61 = vld [vmem:[#allocation13 + $0x328] sm:$0xff] }
 0x7f8   :  { %8512 = vmatprep.subr.bf16.mxu0 %v8511_v28  ;;  %8576 = vmatprep.subr.bf16.mxu1 %v8575_v15  ;;  %v4670_v28 = vld [vmem:[#allocation13 + $0x220] sm:$0xff]  ;;  %v8591_v15 = vpack.c.bf16 %v4673_v60, %v4669_v57  ;;  %v4701_v4 = vld [vmem:[#allocation13 + $0x318] sm:$0xff] }
 0x7f9   :  { %v8529_v46 = vpack.c.bf16 %v4670_v28, %v4666_v0  ;;  %v4698_v60 = vld [vmem:[#allocation13 + $0x300] sm:$0xff] }
 0x7fa   :  { %v4702_v0 = vld [vmem:[#allocation13 + $0x320] sm:$0xff] }
 0x7fb   :  { %8514 = vmatpush1.bf16.msra.mxu0 %v8513_v63  ;;  %8578 = vmatpush1.bf16.msra.mxu1 %v8577_v25  ;;  %v8593_v63 = vpack.c.bf16 %v4672_v55, %v4668_v34  ;;  %v4675_v25 = vld [vmem:[#allocation13 + $0x248] sm:$0xff]  ;;  %v4704_v34 = vld [vmem:[#allocation13 + $0x330] sm:$0xff] }
 0x7fc   :  { %8516 = vmatprep.subr.bf16.mxu0 %v8515_v29  ;;  %8580 = vmatprep.subr.bf16.mxu1 %v8579_v21  ;;  %v8531_v36 = vpack.c.bf16 %v4679_v49, %v4675_v25  ;;  %v4681_v29 = vld [vmem:[#allocation13 + $0x278] sm:$0xff]  ;;  %v8533_v21 = vpack.c.bf16 %v4678_v10, %v4674_v3  ;;  %v4711_v25 = vld [vmem:[#allocation13 + $0x368] sm:$0xff]  ;;  %v4710_v3 = vld [vmem:[#allocation13 + $0x360] sm:$0xff] }
 0x7fd   :  { %v8595_v37 = vpack.c.bf16 %v4681_v29, %v4677_v59  ;;  %v4709_v49 = vld [vmem:[#allocation13 + $0x358] sm:$0xff]  ;;  %v4706_v29 = vld [vmem:[#allocation13 + $0x340] sm:$0xff] }
 0x7ff   :  { %8518 = vmatpush1.bf16.msra.mxu0 %v8517_v9  ;;  %8582 = vmatpush1.bf16.msra.mxu1 %v8581_v42  ;;  %v4676_v9 = vld [vmem:[#allocation13 + $0x250] sm:$0xff]  ;;  %v4683_v42 = vld [vmem:[#allocation13 + $0x288] sm:$0xff] }
 0x800   :  { %8520 = vmatprep.subr.bf16.mxu0 %v8519_v7  ;;  %8584 = vmatprep.subr.bf16.mxu1 %v8583_v51  ;;  %v8597_v24 = vpack.c.bf16 %v4680_v13, %v4676_v9  ;;  %v8535_v35 = vpack.c.bf16 %v4687_v20, %v4683_v42  ;;  %v4689_v7 = vld [vmem:[#allocation13 + $0x2b8] sm:$0xff]  ;;  %v8537_v51 = vpack.c.bf16 %v4686_v22, %v4682_v48  ;;  %v4712_v9 = vld [vmem:[#allocation13 + $0x370] sm:$0xff]  ;;  %v4719_v42 = vld [vmem:[#allocation13 + $0x3a8] sm:$0xff] }
 0x801   :  { %v8599_v40 = vpack.c.bf16 %v4689_v7, %v4685_v58  ;;  %v4717_v20 = vld [vmem:[#allocation13 + $0x398] sm:$0xff]  ;;  %v4714_v7 = vld [vmem:[#allocation13 + $0x380] sm:$0xff] }
 0x802   :  { %v4718_v48 = vld [vmem:[#allocation13 + $0x3a0] sm:$0xff] }
 0x803   :  { %8522 = vmatpush1.bf16.msra.mxu0 %v8521_v30  ;;  %8586 = vmatpush1.bf16.msra.mxu1 %v8585_v31  ;;  %v4684_v30 = vld [vmem:[#allocation13 + $0x290] sm:$0xff]  ;;  %v4691_v31 = vld [vmem:[#allocation13 + $0x2c8] sm:$0xff] }
 0x804   :  { %8524 = vmatprep.subr.bf16.mxu0 %v8523_v12  ;;  %8588 = vmatprep.subr.bf16.mxu1 %v8587_v8  ;;  %v8601_v27 = vpack.c.bf16 %v4688_v44, %v4684_v30  ;;  %v8539_v23 = vpack.c.bf16 %v4695_v19, %v4691_v31  ;;  %v4697_v12 = vld [vmem:[#allocation13 + $0x2f8] sm:$0xff]  ;;  %v8541_v8 = vpack.c.bf16 %v4694_v50, %v4690_v53  ;;  %v4720_v30 = vld [vmem:[#allocation13 + $0x3b0] sm:$0xff]  ;;  %v4727_v31 = vld [vmem:[#allocation13 + $0x3e8] sm:$0xff] }
 0x805   :  { %v8603_v45 = vpack.c.bf16 %v4697_v12, %v4693_v41  ;;  %v4725_v19 = vld [vmem:[#allocation13 + $0x3d8] sm:$0xff]  ;;  %v4722_v12 = vld [vmem:[#allocation13 + $0x3c0] sm:$0xff] }
 0x806   :  { %v4726_v53 = vld [vmem:[#allocation13 + $0x3e0] sm:$0xff] }
 0x807   :  { %8526 = vmatpush1.bf16.msra.mxu0 %v8525_v56  ;;  %8590 = vmatpush1.bf16.msra.mxu1 %v8589_v39  ;;  %v4692_v56 = vld [vmem:[#allocation13 + $0x2d0] sm:$0xff]  ;;  %v4699_v39 = vld [vmem:[#allocation13 + $0x308] sm:$0xff] }
 0x808   :  { %8528 = vmatprep.subr.bf16.mxu0 %v8527_v6  ;;  %8592 = vmatprep.subr.bf16.mxu1 %v8591_v15  ;;  %v8605_v32 = vpack.c.bf16 %v4696_v1, %v4692_v56  ;;  %v8543_v57 = vpack.c.bf16 %v4703_v61, %v4699_v39  ;;  %v4705_v6 = vld [vmem:[#allocation13 + $0x338] sm:$0xff]  ;;  %v8545_v15 = vpack.c.bf16 %v4702_v0, %v4698_v60  ;;  %v4728_v56 = vld [vmem:[#allocation13 + $0x3f0] sm:$0xff]  ;;  %v4899_v39 = vld [vmem:[#allocation14 + $0x28] sm:$0xff] }
 0x809   :  { %v8607_v28 = vpack.c.bf16 %v4705_v6, %v4701_v4  ;;  %v4897_v61 = vld [vmem:[#allocation14 + $0x18] sm:$0xff] }
 0x80b   :  { %8530 = vmatpush1.bf16.msra.mxu0 %v8529_v46  ;;  %8594 = vmatpush1.bf16.msra.mxu1 %v8593_v63  ;;  %v4700_v46 = vld [vmem:[#allocation13 + $0x310] sm:$0xff]  ;;  %v4707_v63 = vld [vmem:[#allocation13 + $0x348] sm:$0xff] }
 0x80c   :  { %8532 = vmatprep.subr.bf16.mxu0 %v8531_v36  ;;  %8596 = vmatprep.subr.bf16.mxu1 %v8595_v37  ;;  %v8609_v55 = vpack.c.bf16 %v4704_v34, %v4700_v46  ;;  %v8547_v59 = vpack.c.bf16 %v4711_v25, %v4707_v63  ;;  %v4713_v36 = vld [vmem:[#allocation13 + $0x378] sm:$0xff]  ;;  %v8549_v37 = vpack.c.bf16 %v4710_v3, %v4706_v29 }
 0x80d   :  { %v8611_v10 = vpack.c.bf16 %v4713_v36, %v4709_v49 }
 0x80f   :  { %8534 = vmatpush1.bf16.msra.mxu0 %v8533_v21  ;;  %8598 = vmatpush1.bf16.msra.mxu1 %v8597_v24  ;;  %v4708_v21 = vld [vmem:[#allocation13 + $0x350] sm:$0xff]  ;;  %v4715_v24 = vld [vmem:[#allocation13 + $0x388] sm:$0xff] }
 0x810   :  { %8536 = vmatprep.subr.bf16.mxu0 %v8535_v35  ;;  %8600 = vmatprep.subr.bf16.mxu1 %v8599_v40  ;;  %v8613_v13 = vpack.c.bf16 %v4712_v9, %v4708_v21  ;;  %v8551_v58 = vpack.c.bf16 %v4719_v42, %v4715_v24  ;;  %v4721_v35 = vld [vmem:[#allocation13 + $0x3b8] sm:$0xff]  ;;  %v8553_v40 = vpack.c.bf16 %v4718_v48, %v4714_v7 }
 0x811   :  { %v8615_v22 = vpack.c.bf16 %v4721_v35, %v4717_v20 }
 0x813   :  { %8538 = vmatpush1.bf16.msra.mxu0 %v8537_v51  ;;  %8602 = vmatpush1.bf16.msra.mxu1 %v8601_v27  ;;  %v4716_v51 = vld [vmem:[#allocation13 + $0x390] sm:$0xff]  ;;  %v4723_v27 = vld [vmem:[#allocation13 + $0x3c8] sm:$0xff] }
 0x814   :  { %8540 = vmatprep.subr.bf16.mxu0 %v8539_v23  ;;  %8604 = vmatprep.subr.bf16.mxu1 %v8603_v45  ;;  %v8617_v44 = vpack.c.bf16 %v4720_v30, %v4716_v51  ;;  %v8555_v41 = vpack.c.bf16 %v4727_v31, %v4723_v27  ;;  %v4729_v23 = vld [vmem:[#allocation13 + $0x3f8] sm:$0xff]  ;;  %v8557_v45 = vpack.c.bf16 %v4726_v53, %v4722_v12  ;;  %v4894_v51 = vld [vmem:[#allocation14] sm:$0xff]  ;;  %v4903_v27 = vld [vmem:[#allocation14 + $0x48] sm:$0xff] }
 0x815   :  { %v8619_v50 = vpack.c.bf16 %v4729_v23, %v4725_v19  ;;  %v4898_v30 = vld [vmem:[#allocation14 + $0x20] sm:$0xff]  ;;  %v4907_v31 = vld [vmem:[#allocation14 + $0x68] sm:$0xff]  ;;  %v4905_v19 = vld [vmem:[#allocation14 + $0x58] sm:$0xff] }
 0x816   :  { %v8625_v53 = vpack.c.bf16 %v4898_v30, %v4894_v51  ;;  %v4928_v30 = vld [vmem:[#allocation14 + $0x110] sm:$0xff] }
 0x817   :  { %8542 = vmatpush1.bf16.msra.mxu0 %v8541_v8  ;;  %8606 = vmatpush1.bf16.msra.mxu1 %v8605_v32  ;;  %v4724_v8 = vld [vmem:[#allocation13 + $0x3d0] sm:$0xff]  ;;  %v4895_v32 = vld [vmem:[#allocation14 + $0x8] sm:$0xff] }
 0x818   :  { %8544 = vmatprep.subr.bf16.mxu0 %v8543_v57  ;;  %8608 = vmatprep.subr.bf16.mxu1 %v8607_v28  ;;  %v8621_v1 = vpack.c.bf16 %v4728_v56, %v4724_v8  ;;  %v8623_v4 = vpack.c.bf16 %v4899_v39, %v4895_v32  ;;  %v4901_v57 = vld [vmem:[#allocation14 + $0x38] sm:$0xff]  ;;  %v4904_v32 = vld [vmem:[#allocation14 + $0x50] sm:$0xff] }
 0x819   :  { %v8655_v6 = vpack.c.bf16 %v4901_v57, %v4897_v61  ;;  %v4908_v39 = vld [vmem:[#allocation14 + $0x70] sm:$0xff]  ;;  %v4911_v61 = vld [vmem:[#allocation14 + $0x88] sm:$0xff]  ;;  %v4913_v57 = vld [vmem:[#allocation14 + $0x98] sm:$0xff] }
 0x81b   :  { %8546 = vmatpush1.bf16.msra.mxu0 %v8545_v15  ;;  %8610 = vmatpush1.bf16.msra.mxu1 %v8609_v55 }
 0x81c   :  { %8548 = vmatprep.subr.bf16.mxu0 %v8547_v59  ;;  %8612 = vmatprep.subr.bf16.mxu1 %v8611_v10 }
 0x81f   :  { %8550 = vmatpush1.bf16.msra.mxu0 %v8549_v37  ;;  %8614 = vmatpush1.bf16.msra.mxu1 %v8613_v13 }
 0x820   :  { %8552 = vmatprep.subr.bf16.mxu0 %v8551_v58  ;;  %8616 = vmatprep.subr.bf16.mxu1 %v8615_v22 }
 0x823   :  { %8554 = vmatpush1.bf16.msra.mxu0 %v8553_v40  ;;  %8618 = vmatpush1.bf16.msra.mxu1 %v8617_v44  ;;  %v4900_v44 = vld [vmem:[#allocation14 + $0x30] sm:$0xff] }
 0x824   :  { %8556 = vmatprep.subr.bf16.mxu0 %v8555_v41  ;;  %8620 = vmatprep.subr.bf16.mxu1 %v8619_v50  ;;  %v4909_v41 = vld [vmem:[#allocation14 + $0x78] sm:$0xff] }
 0x827   :  { %8558 = vmatpush1.bf16.msra.mxu0 %v8557_v45  ;;  %8622 = vmatpush1.bf16.msra.mxu1 %v8621_v1  ;;  %v4906_v45 = vld [vmem:[#allocation14 + $0x60] sm:$0xff]  ;;  %v8659_v1 = vpack.c.bf16 %v4909_v41, %v4905_v19  ;;  %v4937_v19 = vld [vmem:[#allocation14 + $0x158] sm:$0xff] }
 0x828   :  { %8624 = vmatprep.subr.bf16.mxu0 %v8623_v4  ;;  %8656 = vmatprep.subr.bf16.mxu1 %v8655_v6  ;;  %v4915_v4 = vld [vmem:[#allocation14 + $0xa8] sm:$0xff]  ;;  %v4917_v6 = vld [vmem:[#allocation14 + $0xb8] sm:$0xff] }
 0x829   :  { %v4941_v41 = vld [vmem:[#allocation14 + $0x178] sm:$0xff] }
 0x89c   :  { %v4256_v60 = vpop.f32.mrb[14].mxu0  ;;  %v4327_v0 = vpop.f32.mrb[14].mxu1 }
 0x89d   :  { %v9405_v28 = vadd.f32 %v4256_v60, %v10961_v62  ;;  %v4258_v15 = vpop.f32.mrb[15].mxu0  ;;  %v4329_v46 = vpop.f32.mrb[15].mxu1  ;;  %v9421_v59 = vadd.f32 %v4327_v0, %v13512_v16 }
 0x89e   :  { %v9406_v34 = vadd.f32 %v4258_v15, %v13510_v54  ;;  %v9422_v25 = vadd.f32 %v4329_v46, %v13511_v43  ;;  %v8661_v15 = vpack.c.bf16 %v4908_v39, %v4904_v32  ;;  %v4910_v46 = vld [vmem:[#allocation14 + $0x80] sm:$0xff]  ;;  %v8675_v32 = vpack.c.bf16 %v4941_v41, %v4937_v19  ;;  %v4936_v39 = vld [vmem:[#allocation14 + $0x150] sm:$0xff] }
 0x89f   :  { %v7350_v55 = vmul.f32 -1.442695, %v9405_v28 }
 0x8a0   :  { %v7351_v63 = vmul.f32 -1.442695, %v9406_v34  ;;  %v7352_v49 = vmul.f32 -1.442695, %v9422_v25  ;;  %v4914_v34 = vld [vmem:[#allocation14 + $0xa0] sm:$0xff]  ;;  %v8663_v25 = vpack.c.bf16 %v4917_v6, %v4913_v57  ;;  %v4947_v6 = vld [vmem:[#allocation14 + $0x1a8] sm:$0xff] }
 0x8a1   :  { %9828 = vpow2.f32 %v7350_v55 }
 0x8a2   :  { %9830 = vpow2.f32 %v7351_v63  ;;  %v8631_v63 = vpack.c.bf16 %v4915_v4, %v4911_v61  ;;  %v4940_v61 = vld [vmem:[#allocation14 + $0x170] sm:$0xff]  ;;  %v4943_v4 = vld [vmem:[#allocation14 + $0x188] sm:$0xff] }
 0x8a3   :  { %9832 = vpow2.f32 %v7352_v49  ;;  %v4912_v49 = vld [vmem:[#allocation14 + $0x90] sm:$0xff] }
 0x8a4   :  { %9834 = vtanh.f32 %v9421_v59  ;;  %v4916_v59 = vld [vmem:[#allocation14 + $0xb0] sm:$0xff] }
 0x8ab   :  { %v9829_v36 = vpop.eup %9828 }
 0x8ac   :  { %v9831_v29 = vpop.eup %9830  ;;  %v4339_v3 = vadd.f32 1.0, %v9829_v36  ;;  %v4919_v36 = vld [vmem:[#allocation14 + $0xc8] sm:$0xff] }
 0x8ad   :  { %v4345_v10 = vadd.f32 1.0, %v9831_v29  ;;  %v9833_v62 = vpop.eup %9832  ;;  %v4923_v29 = vld [vmem:[#allocation14 + $0xe8] sm:$0xff] }
 0x8ae   :  { %9836 = vrcp.f32 %v4339_v3  ;;  %v9835_v37 = vpop.eup %9834  ;;  %v4352_v13 = vadd.f32 1.0, %v9833_v62  ;;  %v4921_v3 = vld [vmem:[#allocation14 + $0xd8] sm:$0xff]  ;;  %v8633_v62 = vpack.c.bf16 %v4914_v34, %v4910_v46  ;;  %v4946_v46 = vld [vmem:[#allocation14 + $0x1a0] sm:$0xff] }
 0x8af   :  { %9838 = vrcp.f32 %v4345_v10  ;;  %v4925_v10 = vld [vmem:[#allocation14 + $0xf8] sm:$0xff] }
 0x8b0   :  { %9840 = vrcp.f32 %v4352_v13  ;;  %v8667_v13 = vpack.c.bf16 %v4925_v10, %v4921_v3 }
 0x8b8   :  { %v9837_v54 = vpop.eup %9836 }
 0x8b9   :  { %v9839_v21 = vpop.eup %9838  ;;  %v4356_v9 = vmul.f32 %v9837_v54, %v9835_v37  ;;  %v8665_v37 = vpack.c.bf16 %v4916_v59, %v4912_v49  ;;  %v4918_v54 = vld [vmem:[#allocation14 + $0xc0] sm:$0xff]  ;;  %v4948_v49 = vld [vmem:[#allocation14 + $0x1b0] sm:$0xff]  ;;  %v4951_v59 = vld [vmem:[#allocation14 + $0x1c8] sm:$0xff] }
 0x8ba   :  { %v4355_v24 = vmul.f32 %v9839_v21, %v12499_v18  ;;  %v4896_v18 = vld [vmem:[#allocation14 + $0x10] sm:$0xff]  ;;  %v4922_v21 = vld [vmem:[#allocation14 + $0xe0] sm:$0xff] }
 0x8bb   :  { %v8657_v50 = vpack.c.bf16 %v4900_v44, %v4896_v18  ;;  %v4932_v18 = vld [vmem:[#allocation14 + $0x130] sm:$0xff]  ;;  %v4935_v44 = vld [vmem:[#allocation14 + $0x148] sm:$0xff] }
 0x8bc   :  { %v4357_v43 = vadd.f32 %v4356_v9, %v4355_v24  ;;  %v4494_v42 = vpop.f32.mrb[16].mxu0  ;;  %v4565_v20 = vpop.f32.mrb[16].mxu1  ;;  %v8635_v9 = vpack.c.bf16 %v4923_v29, %v4919_v36  ;;  %v4920_v24 = vld [vmem:[#allocation14 + $0xd0] sm:$0xff]  ;;  %v4955_v36 = vld [vmem:[#allocation14 + $0x1e8] sm:$0xff]  ;;  %v4957_v29 = vld [vmem:[#allocation14 + $0x1f8] sm:$0xff] }
 0x8bd   :  { %v9423_v16 = vadd.f32 %v4494_v42, %v13514_v52  ;;  %v4496_v58 = vpop.f32.mrb[17].mxu0  ;;  %v4567_v35 = vpop.f32.mrb[17].mxu1  ;;  %v9439_v8 = vadd.f32 %v4565_v20, %v10992_v26  ;;  %v4927_v42 = vld [vmem:[#allocation14 + $0x108] sm:$0xff] }
 0x8be   :  { %9842 = vtanh.f32 %v4357_v43  ;;  %v9424_v7 = vadd.f32 %v4496_v58, %v13515_v2  ;;  %v9440_v40 = vadd.f32 %v4567_v35, %v13516_v5  ;;  %v9841_v52 = vpop.eup %9840  ;;  %v4902_v2 = vld [vmem:[#allocation14 + $0x40] sm:$0xff]  ;;  %v8627_v5 = vpack.c.bf16 %v4907_v31, %v4903_v27  ;;  %v4924_v43 = vld [vmem:[#allocation14 + $0xf0] sm:$0xff]  ;;  %v4931_v20 = vld [vmem:[#allocation14 + $0x128] sm:$0xff] }
 0x8bf   :  { %v7353_v48 = vmul.f32 -1.442695, %v9423_v16  ;;  %v8629_v26 = vpack.c.bf16 %v4906_v45, %v4902_v2  ;;  %v4929_v16 = vld [vmem:[#allocation14 + $0x118] sm:$0xff]  ;;  %v8637_v35 = vpack.c.bf16 %v4922_v21, %v4918_v54  ;;  %v4939_v31 = vld [vmem:[#allocation14 + $0x168] sm:$0xff]  ;;  %v4938_v2 = vld [vmem:[#allocation14 + $0x160] sm:$0xff]  ;;  %v8651_v54 = vpack.c.bf16 %v4955_v36, %v4951_v59 }
 0x8c0   :  { %v7354_v22 = vmul.f32 -1.442695, %v9424_v7  ;;  %v7355_v12 = vmul.f32 -1.442695, %v9440_v40  ;;  %v4933_v58 = vld [vmem:[#allocation14 + $0x138] sm:$0xff]  ;;  %v8669_v7 = vpack.c.bf16 %v4924_v43, %v4920_v24  ;;  %v8639_v40 = vpack.c.bf16 %v4931_v20, %v4927_v42  ;;  %v5143_v24 = vld [vmem:[#allocation10 + $0x8] sm:$0xff] }
 0x8c1   :  { %9844 = vpow2.f32 %v7353_v48  ;;  %v4926_v48 = vld [vmem:[#allocation14 + $0x100] sm:$0xff]  ;;  %v8671_v51 = vpack.c.bf16 %v4933_v58, %v4929_v16  ;;  %v5147_v43 = vld [vmem:[#allocation10 + $0x28] sm:$0xff]  ;;  %v5145_v42 = vld [vmem:[#allocation10 + $0x18] sm:$0xff] }
 0x8c2   :  { %9846 = vpow2.f32 %v7354_v22  ;;  %v4930_v22 = vld [vmem:[#allocation14 + $0x120] sm:$0xff]  ;;  %v5149_v20 = vld [vmem:[#allocation10 + $0x38] sm:$0xff] }
 0x8c3   :  { %9848 = vpow2.f32 %v7355_v12  ;;  %v8641_v12 = vpack.c.bf16 %v4930_v22, %v4926_v48  ;;  %v5142_v48 = vld [vmem:[#allocation10] sm:$0xff] }
 0x8c4   :  { %9850 = vtanh.f32 %v9439_v8  ;;  %v5146_v22 = vld [vmem:[#allocation10 + $0x20] sm:$0xff] }
 0x8c5   :  { %v8689_v41 = vpack.c.bf16 %v5146_v22, %v5142_v48  ;;  %v5166_v59 = vld [vmem:[#allocation10 + $0xc0] sm:$0xff]  ;;  %v5189_v48 = vld [vmem:[#allocation10 + $0x178] sm:$0xff] }
 0x8c6   :  { %v5170_v36 = vld [vmem:[#allocation10 + $0xe0] sm:$0xff] }
 0x8c8   :  { %v9843_v23 = vpop.eup %9842 }
 0x8c9   :  { %v12561_v56 = vmul.f32 %v9843_v23, %v9841_v52 }
 0x8cb   :  { %v9845_v60 = vpop.eup %9844  ;;  %4817 = vmatmul.mubr.f32.vlgmr.msra.gmra.mrb[32].mxu0 %v12561_v56  ;;  %4888 = vmatmul.mubr.f32.vlgmr.msra.gmra.mrb[32].mxu1 %v12561_v56 }
 0x8cc   :  { %v9847_v0 = vpop.eup %9846  ;;  %v4577_v28 = vadd.f32 1.0, %v9845_v60  ;;  %8626 = vmatpush1.bf16.msra.mxu0 %v8625_v53  ;;  %8658 = vmatpush1.bf16.msra.mxu1 %v8657_v50  ;;  %v8673_v53 = vpack.c.bf16 %v4932_v18, %v4928_v30  ;;  %v4934_v50 = vld [vmem:[#allocation14 + $0x140] sm:$0xff]  ;;  %v4945_v60 = vld [vmem:[#allocation14 + $0x198] sm:$0xff]  ;;  %v5151_v30 = vld [vmem:[#allocation10 + $0x48] sm:$0xff] }
 0x8cd   :  { %v4583_v55 = vadd.f32 1.0, %v9847_v0  ;;  %8628 = vmatprep.subr.bf16.mxu0 %v8627_v5  ;;  %8660 = vmatprep.subr.bf16.mxu1 %v8659_v1  ;;  %v9849_v27 = vpop.eup %9848  ;;  %v8643_v1 = vpack.c.bf16 %v4939_v31, %v4935_v44  ;;  %v4949_v0 = vld [vmem:[#allocation14 + $0x1b8] sm:$0xff]  ;;  %v5155_v44 = vld [vmem:[#allocation10 + $0x68] sm:$0xff] }
 0x8ce   :  { %9852 = vrcp.f32 %v4577_v28  ;;  %5022 = vmatprep.mubr.f32.mxu0 %v13391_v47  ;;  %5093 = vmatprep.mubr.f32.mxu1 %v13391_v47  ;;  %v9851_v52 = vpop.eup %9850  ;;  %v4590_v5 = vadd.f32 1.0, %v9849_v27  ;;  %v8645_v28 = vpack.c.bf16 %v4938_v2, %v4934_v50  ;;  %v5153_v27 = vld [vmem:[#allocation10 + $0x58] sm:$0xff]  ;;  %v5152_v50 = vld [vmem:[#allocation10 + $0x50] sm:$0xff]  ;;  %v8691_v2 = vpack.c.bf16 %v5155_v44, %v5151_v30  ;;  %v5182_v30 = vld [vmem:[#allocation10 + $0x140] sm:$0xff] }
 0x8cf   :  { %9854 = vrcp.f32 %v4583_v55  ;;  %v8647_v55 = vpack.c.bf16 %v4947_v6, %v4943_v4  ;;  %v5157_v31 = vld [vmem:[#allocation10 + $0x78] sm:$0xff]  ;;  %v5158_v6 = vld [vmem:[#allocation10 + $0x80] sm:$0xff]  ;;  %v5184_v44 = vld [vmem:[#allocation10 + $0x150] sm:$0xff] }
 0x8d0   :  { %8630 = vmatpush1.bf16.msra.mxu0 %v8629_v26  ;;  %8662 = vmatpush1.bf16.msra.mxu1 %v8661_v15  ;;  %v8677_v26 = vpack.c.bf16 %v4940_v61, %v4936_v39  ;;  %v4942_v15 = vld [vmem:[#allocation14 + $0x180] sm:$0xff]  ;;  %9856 = vrcp.f32 %v4590_v5  ;;  %v5159_v5 = vld [vmem:[#allocation10 + $0x88] sm:$0xff]  ;;  %v5165_v39 = vld [vmem:[#allocation10 + $0xb8] sm:$0xff] }
 0x8d1   :  { %8632 = vmatprep.subr.bf16.mxu0 %v8631_v63  ;;  %8664 = vmatprep.subr.bf16.mxu1 %v8663_v25  ;;  %v8679_v63 = vpack.c.bf16 %v4949_v0, %v4945_v60  ;;  %v4944_v25 = vld [vmem:[#allocation14 + $0x190] sm:$0xff]  ;;  %v8649_v3 = vpack.c.bf16 %v4946_v46, %v4942_v15  ;;  %v5162_v60 = vld [vmem:[#allocation10 + $0xa0] sm:$0xff]  ;;  %v5167_v15 = vld [vmem:[#allocation10 + $0xc8] sm:$0xff] }
 0x8d2   :  { %v8681_v10 = vpack.c.bf16 %v4948_v49, %v4944_v25  ;;  %v5160_v0 = vld [vmem:[#allocation10 + $0x90] sm:$0xff]  ;;  %v5171_v46 = vld [vmem:[#allocation10 + $0xe8] sm:$0xff] }
 0x8d3   :  { %v8699_v49 = vpack.c.bf16 %v5171_v46, %v5167_v15  ;;  %v5204_v46 = vld [vmem:[#allocation10 + $0x1f0] sm:$0xff] }
 0x8d4   :  { %8634 = vmatpush1.bf16.msra.mxu0 %v8633_v62  ;;  %8666 = vmatpush1.bf16.msra.mxu1 %v8665_v37  ;;  %v4950_v62 = vld [vmem:[#allocation14 + $0x1c0] sm:$0xff] }
 0x8d5   :  { %8636 = vmatprep.subr.bf16.mxu0 %v8635_v9  ;;  %8668 = vmatprep.subr.bf16.mxu1 %v8667_v13  ;;  %v4954_v37 = vld [vmem:[#allocation14 + $0x1e0] sm:$0xff]  ;;  %v4952_v9 = vld [vmem:[#allocation14 + $0x1d0] sm:$0xff] }
 0x8d6   :  { %v4956_v13 = vld [vmem:[#allocation14 + $0x1f0] sm:$0xff]  ;;  %v8653_v16 = vpack.c.bf16 %v4954_v37, %v4950_v62  ;;  %v5179_v62 = vld [vmem:[#allocation10 + $0x128] sm:$0xff]  ;;  %v5177_v37 = vld [vmem:[#allocation10 + $0x118] sm:$0xff] }
 0x8d7   :  { %v8685_v58 = vpack.c.bf16 %v4956_v13, %v4952_v9 }
 0x8d8   :  { %v9853_v23 = vpop.eup %9852  ;;  %8638 = vmatpush1.bf16.msra.mxu0 %v8637_v35  ;;  %8670 = vmatpush1.bf16.msra.mxu1 %v8669_v7  ;;  %v8687_v35 = vpack.c.bf16 %v5147_v43, %v5143_v24  ;;  %v8751_v7 = vpack.c.bf16 %v5149_v20, %v5145_v42  ;;  %v5174_v24 = vld [vmem:[#allocation10 + $0x100] sm:$0xff]  ;;  %v5176_v42 = vld [vmem:[#allocation10 + $0x110] sm:$0xff] }
 0x8d9   :  { %v9855_v45 = vpop.eup %9854  ;;  %v4594_v8 = vmul.f32 %v9853_v23, %v9851_v52  ;;  %8640 = vmatprep.subr.bf16.mxu0 %v8639_v40  ;;  %8672 = vmatprep.subr.bf16.mxu1 %v8671_v51  ;;  %v5144_v40 = vld [vmem:[#allocation10 + $0x10] sm:$0xff]  ;;  %v5178_v43 = vld [vmem:[#allocation10 + $0x120] sm:$0xff] }
 0x8da   :  { %v4593_v57 = vmul.f32 %v9855_v45, %v12529_v38  ;;  %v4953_v38 = vld [vmem:[#allocation14 + $0x1d8] sm:$0xff]  ;;  %v5148_v51 = vld [vmem:[#allocation10 + $0x30] sm:$0xff]  ;;  %v9857_v18 = vpop.eup %9856  ;;  %v8755_v45 = vpack.c.bf16 %v5157_v31, %v5153_v27  ;;  %v8705_v22 = vpack.c.bf16 %v5178_v43, %v5174_v24 }
 0x8db   :  { %v8683_v21 = vpack.c.bf16 %v4957_v29, %v4953_v38  ;;  %v8753_v23 = vpack.c.bf16 %v5148_v51, %v5144_v40  ;;  %v5168_v38 = vld [vmem:[#allocation10 + $0xd0] sm:$0xff] }
 0x8dc   :  { %8642 = vmatpush1.bf16.msra.mxu0 %v8641_v12  ;;  %8674 = vmatpush1.bf16.msra.mxu1 %v8673_v53  ;;  %v4595_v34 = vadd.f32 %v4594_v8, %v4593_v57  ;;  %v5150_v12 = vld [vmem:[#allocation10 + $0x40] sm:$0xff]  ;;  %v5156_v8 = vld [vmem:[#allocation10 + $0x70] sm:$0xff] }
 0x8dd   :  { %8644 = vmatprep.subr.bf16.mxu0 %v8643_v1  ;;  %8676 = vmatprep.subr.bf16.mxu1 %v8675_v32  ;;  %v5154_v53 = vld [vmem:[#allocation10 + $0x60] sm:$0xff]  ;;  %v5163_v1 = vld [vmem:[#allocation10 + $0xa8] sm:$0xff]  ;;  %v5161_v32 = vld [vmem:[#allocation10 + $0x98] sm:$0xff]  ;;  %v8757_v4 = vpack.c.bf16 %v5156_v8, %v5152_v50 }
 0x8de   :  { %9858 = vtanh.f32 %v4595_v34  ;;  %v8693_v61 = vpack.c.bf16 %v5154_v53, %v5150_v12  ;;  %v8695_v57 = vpack.c.bf16 %v5163_v1, %v5159_v5  ;;  %v5169_v34 = vld [vmem:[#allocation10 + $0xd8] sm:$0xff]  ;;  %v5188_v31 = vld [vmem:[#allocation10 + $0x170] sm:$0xff] }
 0x8df   :  { %v8773_v53 = vpack.c.bf16 %v5188_v31, %v5184_v44  ;;  %v5192_v8 = vld [vmem:[#allocation10 + $0x190] sm:$0xff]  ;;  %v5222_v44 = vld [vmem:[#allocation10 + $0x280] sm:$0xff] }
 0x8e0   :  { %8646 = vmatpush1.bf16.msra.mxu0 %v8645_v28  ;;  %8678 = vmatpush1.bf16.msra.mxu1 %v8677_v26  ;;  %v8759_v28 = vpack.c.bf16 %v5165_v39, %v5161_v32  ;;  %v5164_v26 = vld [vmem:[#allocation10 + $0xb0] sm:$0xff]  ;;  %v5199_v32 = vld [vmem:[#allocation10 + $0x1c8] sm:$0xff] }
 0x8e1   :  { %8648 = vmatprep.subr.bf16.mxu0 %v8647_v55  ;;  %8680 = vmatprep.subr.bf16.mxu1 %v8679_v63  ;;  %v5173_v55 = vld [vmem:[#allocation10 + $0xf8] sm:$0xff]  ;;  %v8697_v63 = vpack.c.bf16 %v5162_v60, %v5158_v6  ;;  %v8761_v25 = vpack.c.bf16 %v5164_v26, %v5160_v0  ;;  %v5196_v1 = vld [vmem:[#allocation10 + $0x1b0] sm:$0xff]  ;;  %v5203_v39 = vld [vmem:[#allocation10 + $0x1e8] sm:$0xff] }
 0x8e2   :  { %v8763_v29 = vpack.c.bf16 %v5173_v55, %v5169_v34  ;;  %v8777_v6 = vpack.c.bf16 %v5196_v1, %v5192_v8  ;;  %v8715_v60 = vpack.c.bf16 %v5203_v39, %v5199_v32  ;;  %v5198_v0 = vld [vmem:[#allocation10 + $0x1c0] sm:$0xff]  ;;  %v5200_v26 = vld [vmem:[#allocation10 + $0x1d0] sm:$0xff]  ;;  %v5207_v34 = vld [vmem:[#allocation10 + $0x208] sm:$0xff] }
 0x8e3   :  { %v5211_v55 = vld [vmem:[#allocation10 + $0x228] sm:$0xff]  ;;  %v5224_v31 = vld [vmem:[#allocation10 + $0x290] sm:$0xff]  ;;  %v5230_v8 = vld [vmem:[#allocation10 + $0x2c0] sm:$0xff] }
 0x8e4   :  { %8650 = vmatpush1.bf16.msra.mxu0 %v8649_v3  ;;  %8682 = vmatpush1.bf16.msra.mxu1 %v8681_v10  ;;  %v5172_v3 = vld [vmem:[#allocation10 + $0xf0] sm:$0xff]  ;;  %v5175_v10 = vld [vmem:[#allocation10 + $0x108] sm:$0xff] }
 0x8e5   :  { %8652 = vmatprep.subr.bf16.mxu0 %v8651_v54  ;;  %8684 = vmatprep.subr.bf16.mxu1 %v8683_v21  ;;  %v5181_v54 = vld [vmem:[#allocation10 + $0x138] sm:$0xff]  ;;  %v8701_v21 = vpack.c.bf16 %v5170_v36, %v5166_v59  ;;  %v8765_v9 = vpack.c.bf16 %v5172_v3, %v5168_v38  ;;  %v8703_v13 = vpack.c.bf16 %v5179_v62, %v5175_v10  ;;  %v5206_v38 = vld [vmem:[#allocation10 + $0x200] sm:$0xff]  ;;  %v5208_v3 = vld [vmem:[#allocation10 + $0x210] sm:$0xff] }
 0x8e6   :  { %v8767_v20 = vpack.c.bf16 %v5181_v54, %v5177_v37  ;;  %v8781_v59 = vpack.c.bf16 %v5204_v46, %v5200_v26  ;;  %v8719_v36 = vpack.c.bf16 %v5211_v55, %v5207_v34  ;;  %v5212_v62 = vld [vmem:[#allocation10 + $0x230] sm:$0xff]  ;;  %v5215_v37 = vld [vmem:[#allocation10 + $0x248] sm:$0xff]  ;;  %v5238_v26 = vld [vmem:[#allocation10 + $0x300] sm:$0xff] }
 0x8e7   :  { %v5219_v54 = vld [vmem:[#allocation10 + $0x268] sm:$0xff]  ;;  %v8785_v24 = vpack.c.bf16 %v5212_v62, %v5208_v3  ;;  %v5232_v1 = vld [vmem:[#allocation10 + $0x2d0] sm:$0xff]  ;;  %v5246_v3 = vld [vmem:[#allocation10 + $0x340] sm:$0xff] }
 0x8e8   :  { %v9859_v19 = vpop.eup %9858  ;;  %8654 = vmatpush1.bf16.msra.mxu0 %v8653_v16  ;;  %8686 = vmatpush1.bf16.msra.mxu1 %v8685_v58  ;;  %v5180_v16 = vld [vmem:[#allocation10 + $0x130] sm:$0xff]  ;;  %v5183_v58 = vld [vmem:[#allocation10 + $0x148] sm:$0xff]  ;;  %v8723_v43 = vpack.c.bf16 %v5219_v54, %v5215_v37 }
 0x8e9   :  { %8688 = vmatprep.subr.bf16.mxu0 %v8687_v35  ;;  %8752 = vmatprep.subr.bf16.mxu1 %v8751_v7  ;;  %v4597_v52 = vmul.f32 %v9859_v19, %v9857_v18  ;;  %v5187_v35 = vld [vmem:[#allocation10 + $0x168] sm:$0xff]  ;;  %v5185_v7 = vld [vmem:[#allocation10 + $0x158] sm:$0xff]  ;;  %v8769_v40 = vpack.c.bf16 %v5180_v16, %v5176_v42  ;;  %v5186_v18 = vld [vmem:[#allocation10 + $0x160] sm:$0xff] }
 0x8ea   :  { %v8707_v51 = vpack.c.bf16 %v5187_v35, %v5183_v58  ;;  %v8771_v27 = vpack.c.bf16 %v5189_v48, %v5185_v7  ;;  %v5191_v19 = vld [vmem:[#allocation10 + $0x188] sm:$0xff]  ;;  %v8709_v12 = vpack.c.bf16 %v5186_v18, %v5182_v30  ;;  %v5214_v42 = vld [vmem:[#allocation10 + $0x240] sm:$0xff]  ;;  %v5216_v16 = vld [vmem:[#allocation10 + $0x250] sm:$0xff] }
 0x8eb   :  { %5023 = vmatmul.mubr.f32.vlgmr.msra.gmra.mrb[32].mxu0 %v13391_v47  ;;  %5094 = vmatmul.mubr.f32.vlgmr.msra.gmra.mrb[32].mxu1 %v13391_v47  ;;  %v5220_v35 = vld [vmem:[#allocation10 + $0x270] sm:$0xff]  ;;  %v5223_v7 = vld [vmem:[#allocation10 + $0x288] sm:$0xff] }
 0x8ec   :  { %8690 = vmatpush1.bf16.msra.mxu0 %v8689_v41  ;;  %5356 = vmatprep.mubr.f32.mxu0 %v4597_v52  ;;  %v5195_v41 = vld [vmem:[#allocation10 + $0x1a8] sm:$0xff]  ;;  %v8789_v30 = vpack.c.bf16 %v5220_v35, %v5216_v16  ;;  %v5236_v39 = vld [vmem:[#allocation10 + $0x2f0] sm:$0xff]  ;;  %v5254_v16 = vld [vmem:[#allocation10 + $0x380] sm:$0xff] }
 0x8ed   :  { %8754 = vmatpush1.bf16.msra.mxu1 %v8753_v23  ;;  %5469 = vmatprep.mubr.f32.mxu1 %v4597_v52  ;;  %v5193_v52 = vld [vmem:[#allocation10 + $0x198] sm:$0xff]  ;;  %v8711_v50 = vpack.c.bf16 %v5195_v41, %v5191_v19  ;;  %v5227_v48 = vld [vmem:[#allocation10 + $0x2a8] sm:$0xff]  ;;  %v5228_v41 = vld [vmem:[#allocation10 + $0x2b0] sm:$0xff] }
 0x8ee   :  { %8692 = vmatprep.subr.bf16.mxu0 %v8691_v2  ;;  %8756 = vmatprep.subr.bf16.mxu1 %v8755_v45  ;;  %v5197_v23 = vld [vmem:[#allocation10 + $0x1b8] sm:$0xff]  ;;  %v5190_v2 = vld [vmem:[#allocation10 + $0x180] sm:$0xff]  ;;  %v8727_v18 = vpack.c.bf16 %v5227_v48, %v5223_v7  ;;  %v5240_v46 = vld [vmem:[#allocation10 + $0x310] sm:$0xff] }
 0x8ef   :  { %v5194_v45 = vld [vmem:[#allocation10 + $0x1a0] sm:$0xff]  ;;  %v8775_v5 = vpack.c.bf16 %v5197_v23, %v5193_v52  ;;  %v5231_v52 = vld [vmem:[#allocation10 + $0x2c8] sm:$0xff]  ;;  %v5244_v55 = vld [vmem:[#allocation10 + $0x330] sm:$0xff] }
 0x8f0   :  { %8694 = vmatpush1.bf16.msra.mxu0 %v8693_v61  ;;  %v5201_v61 = vld [vmem:[#allocation10 + $0x1d8] sm:$0xff]  ;;  %v5235_v23 = vld [vmem:[#allocation10 + $0x2e8] sm:$0xff]  ;;  %v5248_v62 = vld [vmem:[#allocation10 + $0x350] sm:$0xff] }
 0x8f1   :  { %8758 = vmatpush1.bf16.msra.mxu1 %v8757_v4  ;;  %8696 = vmatprep.subr.bf16.mxu0 %v8695_v57  ;;  %v5205_v4 = vld [vmem:[#allocation10 + $0x1f8] sm:$0xff]  ;;  %v8713_v57 = vpack.c.bf16 %v5194_v45, %v5190_v2  ;;  %v8793_v2 = vpack.c.bf16 %v5228_v41, %v5224_v31  ;;  %v8731_v45 = vpack.c.bf16 %v5235_v23, %v5231_v52  ;;  %v5252_v54 = vld [vmem:[#allocation10 + $0x370] sm:$0xff]  ;;  %v5262_v31 = vld [vmem:[#allocation10 + $0x3c0] sm:$0xff] }
 0x8f2   :  { %8760 = vmatprep.subr.bf16.mxu1 %v8759_v28  ;;  %v5202_v28 = vld [vmem:[#allocation10 + $0x1e0] sm:$0xff]  ;;  %v8779_v15 = vpack.c.bf16 %v5205_v4, %v5201_v61  ;;  %v5239_v61 = vld [vmem:[#allocation10 + $0x308] sm:$0xff]  ;;  %v5256_v35 = vld [vmem:[#allocation10 + $0x390] sm:$0xff] }
 0x8f3   :  { %v5243_v4 = vld [vmem:[#allocation10 + $0x328] sm:$0xff]  ;;  %v5260_v48 = vld [vmem:[#allocation10 + $0x3b0] sm:$0xff] }
 0x8f4   :  { %8698 = vmatpush1.bf16.msra.mxu0 %v8697_v63  ;;  %v5209_v63 = vld [vmem:[#allocation10 + $0x218] sm:$0xff]  ;;  %v5264_v41 = vld [vmem:[#allocation10 + $0x3d0] sm:$0xff] }
 0x8f5   :  { %8762 = vmatpush1.bf16.msra.mxu1 %v8761_v25  ;;  %8700 = vmatprep.subr.bf16.mxu0 %v8699_v49  ;;  %v5213_v25 = vld [vmem:[#allocation10 + $0x238] sm:$0xff]  ;;  %v8717_v49 = vpack.c.bf16 %v5202_v28, %v5198_v0  ;;  %v8797_v0 = vpack.c.bf16 %v5236_v39, %v5232_v1  ;;  %v8735_v28 = vpack.c.bf16 %v5243_v4, %v5239_v61  ;;  %v5268_v23 = vld [vmem:[#allocation10 + $0x3f0] sm:$0xff]  ;;  %v5558_v39 = vld [vmem:[#allocation11 + $0x20] sm:$0xff] }
 0x8f6   :  { %8764 = vmatprep.subr.bf16.mxu1 %v8763_v29  ;;  %v5210_v29 = vld [vmem:[#allocation10 + $0x220] sm:$0xff]  ;;  %v8783_v10 = vpack.c.bf16 %v5213_v25, %v5209_v63  ;;  %v5247_v63 = vld [vmem:[#allocation10 + $0x348] sm:$0xff]  ;;  %v5556_v61 = vld [vmem:[#allocation11 + $0x10] sm:$0xff] }
 0x8f7   :  { %v5251_v25 = vld [vmem:[#allocation10 + $0x368] sm:$0xff]  ;;  %v5560_v4 = vld [vmem:[#allocation11 + $0x30] sm:$0xff] }
 0x8f8   :  { %8702 = vmatpush1.bf16.msra.mxu0 %v8701_v21  ;;  %v5217_v21 = vld [vmem:[#allocation10 + $0x258] sm:$0xff] }
 0x8f9   :  { %8766 = vmatpush1.bf16.msra.mxu1 %v8765_v9  ;;  %8704 = vmatprep.subr.bf16.mxu0 %v8703_v13  ;;  %v5221_v9 = vld [vmem:[#allocation10 + $0x278] sm:$0xff]  ;;  %v8721_v13 = vpack.c.bf16 %v5210_v29, %v5206_v38  ;;  %v8801_v38 = vpack.c.bf16 %v5244_v55, %v5240_v46  ;;  %v8739_v29 = vpack.c.bf16 %v5251_v25, %v5247_v63  ;;  %v5562_v46 = vld [vmem:[#allocation11 + $0x40] sm:$0xff]  ;;  %v5564_v55 = vld [vmem:[#allocation11 + $0x50] sm:$0xff] }
 0x8fa   :  { %8768 = vmatprep.subr.bf16.mxu1 %v8767_v20  ;;  %v5218_v20 = vld [vmem:[#allocation10 + $0x260] sm:$0xff]  ;;  %v8787_v58 = vpack.c.bf16 %v5221_v9, %v5217_v21  ;;  %v5255_v21 = vld [vmem:[#allocation10 + $0x388] sm:$0xff]  ;;  %v13532_v63 = vld [vmem:[#allocation45_spill] sm:$0xff] }
 0x8fb   :  { %v5259_v9 = vld [vmem:[#allocation10 + $0x3a8] sm:$0xff] }
 0x8fc   :  { %8706 = vmatpush1.bf16.msra.mxu0 %v8705_v22  ;;  %v5225_v22 = vld [vmem:[#allocation10 + $0x298] sm:$0xff] }
 0x8fd   :  { %8770 = vmatpush1.bf16.msra.mxu1 %v8769_v40  ;;  %8708 = vmatprep.subr.bf16.mxu0 %v8707_v51  ;;  %v5229_v40 = vld [vmem:[#allocation10 + $0x2b8] sm:$0xff]  ;;  %v8725_v51 = vpack.c.bf16 %v5218_v20, %v5214_v42  ;;  %v8805_v42 = vpack.c.bf16 %v5252_v54, %v5248_v62  ;;  %v8743_v20 = vpack.c.bf16 %v5259_v9, %v5255_v21  ;;  %v5574_v54 = vld [vmem:[#allocation11 + $0xa0] sm:$0xff]  ;;  %v5572_v21 = vld [vmem:[#allocation11 + $0x90] sm:$0xff] }
 0x8fe   :  { %8772 = vmatprep.subr.bf16.mxu1 %v8771_v27  ;;  %v5226_v27 = vld [vmem:[#allocation10 + $0x2a0] sm:$0xff]  ;;  %v8791_v19 = vpack.c.bf16 %v5229_v40, %v5225_v22  ;;  %v5263_v22 = vld [vmem:[#allocation10 + $0x3c8] sm:$0xff]  ;;  %v13533_v9 = vld [vmem:[#allocation29_spill] sm:$0xff] }
 0x8ff   :  { %v5267_v40 = vld [vmem:[#allocation10 + $0x3e8] sm:$0xff] }
 0x900   :  { %8710 = vmatpush1.bf16.msra.mxu0 %v8709_v12  ;;  %v5233_v12 = vld [vmem:[#allocation10 + $0x2d8] sm:$0xff] }
 0x901   :  { %8774 = vmatpush1.bf16.msra.mxu1 %v8773_v53  ;;  %8712 = vmatprep.subr.bf16.mxu0 %v8711_v50  ;;  %v5237_v53 = vld [vmem:[#allocation10 + $0x2f8] sm:$0xff]  ;;  %v8729_v50 = vpack.c.bf16 %v5226_v27, %v5222_v44  ;;  %v8809_v44 = vpack.c.bf16 %v5260_v48, %v5256_v35  ;;  %v8747_v27 = vpack.c.bf16 %v5267_v40, %v5263_v22  ;;  %v5582_v48 = vld [vmem:[#allocation11 + $0xe0] sm:$0xff]  ;;  %v5580_v22 = vld [vmem:[#allocation11 + $0xd0] sm:$0xff] }
 0x902   :  { %8776 = vmatprep.subr.bf16.mxu1 %v8775_v5  ;;  %v5234_v5 = vld [vmem:[#allocation10 + $0x2e0] sm:$0xff]  ;;  %v8795_v32 = vpack.c.bf16 %v5237_v53, %v5233_v12  ;;  %v5555_v12 = vld [vmem:[#allocation11 + $0x8] sm:$0xff]  ;;  %v13534_v40 = vld [vmem:[#allocation26_spill] sm:$0xff] }
 0x903   :  { %v5559_v53 = vld [vmem:[#allocation11 + $0x28] sm:$0xff] }
 0x904   :  { %8714 = vmatpush1.bf16.msra.mxu0 %v8713_v57  ;;  %v5241_v57 = vld [vmem:[#allocation10 + $0x318] sm:$0xff] }
 0x905   :  { %8778 = vmatpush1.bf16.msra.mxu1 %v8777_v6  ;;  %8716 = vmatprep.subr.bf16.mxu0 %v8715_v60  ;;  %v5245_v6 = vld [vmem:[#allocation10 + $0x338] sm:$0xff]  ;;  %v8733_v60 = vpack.c.bf16 %v5234_v5, %v5230_v8  ;;  %v8813_v8 = vpack.c.bf16 %v5268_v23, %v5264_v41  ;;  %v12570_v5 = vpack.c.bf16 %v5559_v53, %v5555_v12  ;;  %v5586_v23 = vld [vmem:[#allocation11 + $0x100] sm:$0xff]  ;;  %v5588_v53 = vld [vmem:[#allocation11 + $0x110] sm:$0xff] }
 0x906   :  { %8780 = vmatprep.subr.bf16.mxu1 %v8779_v15  ;;  %v5242_v15 = vld [vmem:[#allocation10 + $0x320] sm:$0xff]  ;;  %v8799_v34 = vpack.c.bf16 %v5245_v6, %v5241_v57  ;;  %v5563_v57 = vld [vmem:[#allocation11 + $0x48] sm:$0xff] }
 0x907   :  { %v5567_v6 = vld [vmem:[#allocation11 + $0x68] sm:$0xff]  ;;  %v5590_v12 = vld [vmem:[#allocation11 + $0x120] sm:$0xff] }
 0x908   :  { %8718 = vmatpush1.bf16.msra.mxu0 %v8717_v49  ;;  %v5249_v49 = vld [vmem:[#allocation10 + $0x358] sm:$0xff] }
 0x909   :  { %8782 = vmatpush1.bf16.msra.mxu1 %v8781_v59  ;;  %8720 = vmatprep.subr.bf16.mxu0 %v8719_v36  ;;  %v5253_v59 = vld [vmem:[#allocation10 + $0x378] sm:$0xff]  ;;  %v8737_v36 = vpack.c.bf16 %v5242_v15, %v5238_v26  ;;  %v12578_v26 = vpack.c.bf16 %v5560_v4, %v5556_v61  ;;  %v12580_v15 = vpack.c.bf16 %v5567_v6, %v5563_v57 }
 0x90a   :  { %8784 = vmatprep.subr.bf16.mxu1 %v8783_v10  ;;  %v5250_v10 = vld [vmem:[#allocation10 + $0x360] sm:$0xff]  ;;  %v8803_v37 = vpack.c.bf16 %v5253_v59, %v5249_v49  ;;  %v5568_v49 = vld [vmem:[#allocation11 + $0x70] sm:$0xff]  ;;  %v5571_v59 = vld [vmem:[#allocation11 + $0x88] sm:$0xff]  ;;  %v12637_v57 = vpack.c.bf16 %v5590_v12, %v5586_v23 }
 0x90b   :  { %v5597_v61 = vld [vmem:[#allocation11 + $0x158] sm:$0xff]  ;;  %v5614_v23 = vld [vmem:[#allocation11 + $0x1e0] sm:$0xff] }
 0x90c   :  { %8722 = vmatpush1.bf16.msra.mxu0 %v8721_v13  ;;  %v5257_v13 = vld [vmem:[#allocation10 + $0x398] sm:$0xff] }
 0x90d   :  { %8786 = vmatpush1.bf16.msra.mxu1 %v8785_v24  ;;  %8724 = vmatprep.subr.bf16.mxu0 %v8723_v43  ;;  %v5261_v24 = vld [vmem:[#allocation10 + $0x3b8] sm:$0xff]  ;;  %v8741_v43 = vpack.c.bf16 %v5250_v10, %v5246_v3  ;;  %v12593_v10 = vpack.c.bf16 %v5568_v49, %v5564_v55  ;;  %v13538_v55 = vld [vmem:[#allocation28_spill] sm:$0xff]  ;;  %v5600_v49 = vld [vmem:[#allocation11 + $0x170] sm:$0xff] }
 0x90e   :  { %8788 = vmatprep.subr.bf16.mxu1 %v8787_v58  ;;  %v5258_v58 = vld [vmem:[#allocation10 + $0x3a0] sm:$0xff]  ;;  %v8807_v7 = vpack.c.bf16 %v5261_v24, %v5257_v13  ;;  %v5576_v13 = vld [vmem:[#allocation11 + $0xb0] sm:$0xff]  ;;  %v5579_v24 = vld [vmem:[#allocation11 + $0xc8] sm:$0xff] }
 0x90f   :  { %v5601_v4 = vld [vmem:[#allocation11 + $0x178] sm:$0xff] }
 0x910   :  { %8726 = vmatpush1.bf16.msra.mxu0 %v8725_v51  ;;  %v5265_v51 = vld [vmem:[#allocation10 + $0x3d8] sm:$0xff] }
 0x911   :  { %8790 = vmatpush1.bf16.msra.mxu1 %v8789_v30  ;;  %8728 = vmatprep.subr.bf16.mxu0 %v8727_v18  ;;  %v5269_v30 = vld [vmem:[#allocation10 + $0x3f8] sm:$0xff]  ;;  %v8745_v18 = vpack.c.bf16 %v5258_v58, %v5254_v16  ;;  %v12609_v58 = vpack.c.bf16 %v5576_v13, %v5572_v21  ;;  %v5602_v13 = vld [vmem:[#allocation11 + $0x180] sm:$0xff] }
 0x912   :  { %8792 = vmatprep.subr.bf16.mxu1 %v8791_v19  ;;  %v5266_v19 = vld [vmem:[#allocation10 + $0x3e0] sm:$0xff]  ;;  %v8811_v52 = vpack.c.bf16 %v5269_v30, %v5265_v51  ;;  %v5584_v51 = vld [vmem:[#allocation11 + $0xf0] sm:$0xff]  ;;  %v5587_v30 = vld [vmem:[#allocation11 + $0x108] sm:$0xff] }
 0x913   :  { %v12625_v41 = vpack.c.bf16 %v5584_v51, %v5580_v22  ;;  %v5615_v22 = vld [vmem:[#allocation11 + $0x1e8] sm:$0xff]  ;;  %v5613_v51 = vld [vmem:[#allocation11 + $0x1d8] sm:$0xff] }
 0x914   :  { %8730 = vmatpush1.bf16.msra.mxu0 %v8729_v50  ;;  %v5557_v50 = vld [vmem:[#allocation11 + $0x18] sm:$0xff] }
 0x915   :  { %8794 = vmatpush1.bf16.msra.mxu1 %v8793_v2  ;;  %8732 = vmatprep.subr.bf16.mxu0 %v8731_v45  ;;  %v5561_v2 = vld [vmem:[#allocation11 + $0x38] sm:$0xff]  ;;  %v8749_v45 = vpack.c.bf16 %v5266_v19, %v5262_v31 }
 0x916   :  { %8796 = vmatprep.subr.bf16.mxu1 %v8795_v32  ;;  %v12572_v1 = vpack.c.bf16 %v5561_v2, %v5557_v50  ;;  %v5554_v32 = vld [vmem:[#allocation11] sm:$0xff]  ;;  %v5593_v31 = vld [vmem:[#allocation11 + $0x138] sm:$0xff]  ;;  %v13536_v50 = vld [vmem:[#allocation32_spill] sm:$0xff] }
 0x918   :  { %8734 = vmatpush1.bf16.msra.mxu0 %v8733_v60  ;;  %v5565_v60 = vld [vmem:[#allocation11 + $0x58] sm:$0xff] }
 0x919   :  { %8798 = vmatpush1.bf16.msra.mxu1 %v8797_v0  ;;  %8736 = vmatprep.subr.bf16.mxu0 %v8735_v28  ;;  %v5569_v0 = vld [vmem:[#allocation11 + $0x78] sm:$0xff]  ;;  %v12575_v28 = vpack.c.bf16 %v5558_v39, %v5554_v32  ;;  %v5599_v32 = vld [vmem:[#allocation11 + $0x168] sm:$0xff]  ;;  %v13537_v39 = vld [vmem:[#allocation57_spill] sm:$0xff] }
 0x91a   :  { %8800 = vmatprep.subr.bf16.mxu1 %v8799_v34  ;;  %v5566_v34 = vld [vmem:[#allocation11 + $0x60] sm:$0xff]  ;;  %v12583_v25 = vpack.c.bf16 %v5569_v0, %v5565_v60 }
 0x91b   :  { %v12589_v3 = vpack.c.bf16 %v5566_v34, %v5562_v46  ;;  %v5594_v0 = vld [vmem:[#allocation11 + $0x140] sm:$0xff]  ;;  %v5596_v34 = vld [vmem:[#allocation11 + $0x150] sm:$0xff] }
 0x91c   :  { %8738 = vmatpush1.bf16.msra.mxu0 %v8737_v36  ;;  %v5575_v36 = vld [vmem:[#allocation11 + $0xa8] sm:$0xff]  ;;  %v5598_v46 = vld [vmem:[#allocation11 + $0x160] sm:$0xff]  ;;  %v12657_v21 = vpack.c.bf16 %v5600_v49, %v5596_v34 }
 0x91d   :  { %8802 = vmatpush1.bf16.msra.mxu1 %v8801_v38  ;;  %8740 = vmatprep.subr.bf16.mxu0 %v8739_v29  ;;  %v5573_v38 = vld [vmem:[#allocation11 + $0x98] sm:$0xff]  ;;  %v12595_v62 = vpack.c.bf16 %v5575_v36, %v5571_v59  ;;  %v5603_v59 = vld [vmem:[#allocation11 + $0x188] sm:$0xff] }
 0x91e   :  { %8804 = vmatprep.subr.bf16.mxu1 %v8803_v37  ;;  %v5577_v29 = vld [vmem:[#allocation11 + $0xb8] sm:$0xff]  ;;  %v5570_v37 = vld [vmem:[#allocation11 + $0x80] sm:$0xff]  ;;  %v5607_v36 = vld [vmem:[#allocation11 + $0x1a8] sm:$0xff] }
 0x91f   :  { %v12605_v16 = vpack.c.bf16 %v5574_v54, %v5570_v37  ;;  %v5609_v37 = vld [vmem:[#allocation11 + $0x1b8] sm:$0xff]  ;;  %v12653_v54 = vpack.c.bf16 %v5598_v46, %v5594_v0 }
 0x920   :  { %8742 = vmatpush1.bf16.msra.mxu0 %v8741_v43  ;;  %v5583_v43 = vld [vmem:[#allocation11 + $0xe8] sm:$0xff] }
 0x921   :  { %8806 = vmatpush1.bf16.msra.mxu1 %v8805_v42  ;;  %8744 = vmatprep.subr.bf16.mxu0 %v8743_v20  ;;  %v5581_v42 = vld [vmem:[#allocation11 + $0xd8] sm:$0xff]  ;;  %v12611_v35 = vpack.c.bf16 %v5583_v43, %v5579_v24  ;;  %v5606_v24 = vld [vmem:[#allocation11 + $0x1a0] sm:$0xff]  ;;  %v5604_v43 = vld [vmem:[#allocation11 + $0x190] sm:$0xff] }
 0x922   :  { %8808 = vmatprep.subr.bf16.mxu1 %v8807_v7  ;;  %v5585_v20 = vld [vmem:[#allocation11 + $0xf8] sm:$0xff]  ;;  %v5578_v7 = vld [vmem:[#allocation11 + $0xc0] sm:$0xff] }
 0x923   :  { %v12621_v19 = vpack.c.bf16 %v5582_v48, %v5578_v7  ;;  %v5608_v7 = vld [vmem:[#allocation11 + $0x1b0] sm:$0xff]  ;;  %v5611_v48 = vld [vmem:[#allocation11 + $0x1c8] sm:$0xff] }
 0x924   :  { %8746 = vmatpush1.bf16.msra.mxu0 %v8745_v18  ;;  %v5591_v18 = vld [vmem:[#allocation11 + $0x128] sm:$0xff] }
 0x925   :  { %8810 = vmatpush1.bf16.msra.mxu1 %v8809_v44  ;;  %8748 = vmatprep.subr.bf16.mxu0 %v8747_v27  ;;  %v13535_v44 = vld [vmem:[#allocation30_spill] sm:$0xff] }
 0x926   :  { %8812 = vmatprep.subr.bf16.mxu1 %v8811_v52  ;;  %v5589_v27 = vld [vmem:[#allocation11 + $0x118] sm:$0xff]  ;;  %v12627_v52 = vpack.c.bf16 %v5591_v18, %v5587_v30  ;;  %v12669_v18 = vpack.c.bf16 %v5606_v24, %v5602_v13 }
 0x927   :  { %v12631_v2 = vpack.c.bf16 %v5593_v31, %v5589_v27  ;;  %v5617_v30 = vld [vmem:[#allocation11 + $0x1f8] sm:$0xff]  ;;  %v12675_v27 = vpack.c.bf16 %v5615_v22, %v5611_v48  ;;  %v5610_v31 = vld [vmem:[#allocation11 + $0x1c0] sm:$0xff] }
 0x928   :  { %8750 = vmatpush1.bf16.msra.mxu0 %v8749_v45  ;;  %v5592_v45 = vld [vmem:[#allocation11 + $0x130] sm:$0xff]  ;;  %v12679_v12 = vpack.c.bf16 %v5617_v30, %v5613_v51 }
 0x929   :  { %8814 = vmatpush1.bf16.msra.mxu1 %v8813_v8  ;;  %8816 = vmatprep.subr.bf16.mxu0 %v12570_v5  ;;  %v5595_v8 = vld [vmem:[#allocation11 + $0x148] sm:$0xff]  ;;  %v12641_v6 = vpack.c.bf16 %v5592_v45, %v5588_v53  ;;  %v5612_v53 = vld [vmem:[#allocation11 + $0x1d0] sm:$0xff]  ;;  %v12685_v45 = vpack.c.bf16 %v5614_v23, %v5610_v31 }
 0x92a   :  { %8848 = vmatprep.subr.bf16.mxu1 %v12572_v1  ;;  %v12643_v60 = vpack.c.bf16 %v5599_v32, %v5595_v8  ;;  %v13543_v32 = vld [vmem:[#allocation36_spill] sm:$0xff] }
 0x92b   :  { %5357 = vmatmul.mubr.f32.vlgmr.msra.gmra.mrb[34].mxu0 %v13532_v63 }
 0x92c   :  { %5470 = vmatmul.mubr.f32.vlgmr.msra.gmra.mrb[34].mxu1 %v13532_v63  ;;  %5362 = vmatprep.mubr.f32.mxu0 %v12546_v14  ;;  %v12647_v63 = vpack.c.bf16 %v5601_v4, %v5597_v61 }
 0x92d   :  { %5475 = vmatprep.mubr.f32.mxu1 %v12546_v14  ;;  %8818 = vmatpush1.bf16.msra.mxu0 %v12575_v28  ;;  %v12599_v14 = vpack.c.bf16 %v5577_v29, %v5573_v38  ;;  %v13539_v38 = vld [vmem:[#allocation27_spill] sm:$0xff]  ;;  %v5605_v29 = vld [vmem:[#allocation11 + $0x198] sm:$0xff] }
 0x92e   :  { %8850 = vmatpush1.bf16.msra.mxu1 %v12578_v26  ;;  %8820 = vmatprep.subr.bf16.mxu0 %v12580_v15 }
 0x92f   :  { %5363 = vmatmul.mubr.f32.gmra.mrb[36].mxu0 %v13533_v9  ;;  %8852 = vmatprep.subr.bf16.mxu1 %v12583_v25 }
 0x930   :  { %5476 = vmatmul.mubr.f32.gmra.mrb[36].mxu1 %v13533_v9  ;;  %5368 = vmatprep.mubr.f32.mxu0 %v12454_v11  ;;  %v12659_v9 = vpack.c.bf16 %v5607_v36, %v5603_v59  ;;  %v13544_v36 = vld [vmem:[#allocation38_spill] sm:$0xff] }
 0x931   :  { %5481 = vmatprep.mubr.f32.mxu1 %v12454_v11  ;;  %8822 = vmatpush1.bf16.msra.mxu0 %v12589_v3  ;;  %v12615_v11 = vpack.c.bf16 %v5585_v20, %v5581_v42  ;;  %v13540_v42 = vld [vmem:[#allocation46_spill] sm:$0xff]  ;;  %v12663_v20 = vpack.c.bf16 %v5609_v37, %v5605_v29  ;;  %v13545_v37 = vld [vmem:[#allocation40_spill] sm:$0xff] }
 0x932   :  { %8854 = vmatpush1.bf16.msra.mxu1 %v12593_v10  ;;  %8824 = vmatprep.subr.bf16.mxu0 %v12595_v62 }
 0x933   :  { %5369 = vmatmul.mubr.f32.gmra.mrb[38].mxu0 %v13534_v40  ;;  %8856 = vmatprep.subr.bf16.mxu1 %v12599_v14 }
 0x934   :  { %5482 = vmatmul.mubr.f32.gmra.mrb[38].mxu1 %v13534_v40  ;;  %5374 = vmatprep.mubr.f32.mxu0 %v13535_v44  ;;  %v13541_v40 = vld [vmem:[#allocation53_spill] sm:$0xff] }
 0x935   :  { %5487 = vmatprep.mubr.f32.mxu1 %v13535_v44  ;;  %8826 = vmatpush1.bf16.msra.mxu0 %v12605_v16  ;;  %v12673_v44 = vpack.c.bf16 %v5608_v7, %v5604_v43 }
 0x936   :  { %8858 = vmatpush1.bf16.msra.mxu1 %v12609_v58  ;;  %8828 = vmatprep.subr.bf16.mxu0 %v12611_v35 }
 0x937   :  { %5375 = vmatmul.mubr.f32.gmra.mrb[40].mxu0 %v13536_v50  ;;  %8860 = vmatprep.subr.bf16.mxu1 %v12615_v11 }
 0x938   :  { %5488 = vmatmul.mubr.f32.gmra.mrb[40].mxu1 %v13536_v50  ;;  %5380 = vmatprep.mubr.f32.mxu0 %v13537_v39  ;;  %v5616_v50 = vld [vmem:[#allocation11 + $0x1f0] sm:$0xff] }
 0x939   :  { %5493 = vmatprep.mubr.f32.mxu1 %v13537_v39  ;;  %8830 = vmatpush1.bf16.msra.mxu0 %v12621_v19  ;;  %v12689_v8 = vpack.c.bf16 %v5616_v50, %v5612_v53 }
 0x93a   :  { %8862 = vmatpush1.bf16.msra.mxu1 %v12625_v41  ;;  %8832 = vmatprep.subr.bf16.mxu0 %v12627_v52 }
 0x93b   :  { %5381 = vmatmul.mubr.f32.gmra.mrb[42].mxu0 %v13538_v55  ;;  %8864 = vmatprep.subr.bf16.mxu1 %v12631_v2 }
 0x93c   :  { %5494 = vmatmul.mubr.f32.gmra.mrb[42].mxu1 %v13538_v55  ;;  %5386 = vmatprep.mubr.f32.mxu0 %v13539_v38 }
 0x93d   :  { %5499 = vmatprep.mubr.f32.mxu1 %v13539_v38  ;;  %8834 = vmatpush1.bf16.msra.mxu0 %v12637_v57 }
 0x93e   :  { %8866 = vmatpush1.bf16.msra.mxu1 %v12641_v6  ;;  %8836 = vmatprep.subr.bf16.mxu0 %v12643_v60 }
 0x93f   :  { %5387 = vmatmul.mubr.f32.gmra.mrb[44].mxu0 %v13540_v42  ;;  %8868 = vmatprep.subr.bf16.mxu1 %v12647_v63 }
 0x940   :  { %5500 = vmatmul.mubr.f32.gmra.mrb[44].mxu1 %v13540_v42  ;;  %5392 = vmatprep.mubr.f32.mxu0 %v13541_v40 }
 0x941   :  { %5505 = vmatprep.mubr.f32.mxu1 %v13541_v40  ;;  %8838 = vmatpush1.bf16.msra.mxu0 %v12653_v54 }
 0x942   :  { %8870 = vmatpush1.bf16.msra.mxu1 %v12657_v21  ;;  %8840 = vmatprep.subr.bf16.mxu0 %v12659_v9 }
 0x943   :  { %5393 = vmatmul.mubr.f32.gmra.mrb[46].mxu0 %v12506_v17  ;;  %8872 = vmatprep.subr.bf16.mxu1 %v12663_v20 }
 0x944   :  { %5506 = vmatmul.mubr.f32.gmra.mrb[46].mxu1 %v12506_v17  ;;  %5398 = vmatprep.mubr.f32.mxu0 %v13531_v33  ;;  %v4730_v17 = vld [vmem:[%s13258_s10] sm:$0xf] }
 0x945   :  { %5511 = vmatprep.mubr.f32.mxu1 %v13531_v33  ;;  %8842 = vmatpush1.bf16.msra.mxu0 %v12669_v18  ;;  %v13542_v33 = vld [vmem:[#allocation35_spill] sm:$0xff]  ;;  %v4739_v39 = vrot.slane %v4730_v17, %v13543_v32  ;;  %v4747_v38 = vrot.slane %v4730_v17, %v13544_v36  ;;  %v4743_v13 = vrot.slane %v4730_v17, %v13545_v37 }
 0x946   :  { %8874 = vmatpush1.bf16.msra.mxu1 %v12673_v44  ;;  %8844 = vmatprep.subr.bf16.mxu0 %v12675_v27 }
 0x947   :  { %5399 = vmatmul.mubr.f32.gmra.mrb[48].mxu0 %v12561_v56  ;;  %8876 = vmatprep.subr.bf16.mxu1 %v12679_v12 }
 0x948   :  { %5512 = vmatmul.mubr.f32.gmra.mrb[48].mxu1 %v12561_v56  ;;  %5682 = vmatprep.mubr.f32.mxu0 %v13391_v47  ;;  %v4735_v56 = vrot.slane %v4730_v17, %v13542_v33 }
 0x949   :  { %8846 = vmatpush1.bf16.msra.mxu0 %v12685_v45  ;;  %5753 = vmatprep.mubr.f32.mxu1 %v13391_v47 }
 0x94a   :  { %8878 = vmatpush1.bf16.msra.mxu1 %v12689_v8  ;;  %8880 = vmatprep.subr.bf16.mxu0 %v12570_v5 }
 0x94b   :  { %8912 = vmatprep.subr.bf16.mxu1 %v12572_v1 }
 0x94c   :  { %5683 = vmatmul.mubr.f32.vlgmr.msra.gmra.mrb[34].mxu0 %v13391_v47 }
 0x94d   :  { %5754 = vmatmul.mubr.f32.vlgmr.msra.gmra.mrb[34].mxu1 %v13391_v47  ;;  %8882 = vmatpush1.bf16.msra.mxu0 %v12575_v28 }
 0x94e   :  { %8914 = vmatpush1.bf16.msra.mxu1 %v12578_v26  ;;  %8884 = vmatprep.subr.bf16.mxu0 %v12580_v15 }
 0x94f   :  { %8916 = vmatprep.subr.bf16.mxu1 %v12583_v25  ;;  %5856 = vmatprep.mubr.f32.mxu0 %v13391_v47 }
 0x950   :  { %5927 = vmatprep.mubr.f32.mxu1 %v13391_v47 }
 0x951   :  { %8886 = vmatpush1.bf16.msra.mxu0 %v12589_v3 }
 0x952   :  { %8918 = vmatpush1.bf16.msra.mxu1 %v12593_v10  ;;  %8888 = vmatprep.subr.bf16.mxu0 %v12595_v62 }
 0x953   :  { %8920 = vmatprep.subr.bf16.mxu1 %v12599_v14 }
 0x955   :  { %8890 = vmatpush1.bf16.msra.mxu0 %v12605_v16 }
 0x956   :  { %8922 = vmatpush1.bf16.msra.mxu1 %v12609_v58  ;;  %8892 = vmatprep.subr.bf16.mxu0 %v12611_v35 }
 0x957   :  { %8924 = vmatprep.subr.bf16.mxu1 %v12615_v11 }
 0x959   :  { %8894 = vmatpush1.bf16.msra.mxu0 %v12621_v19 }
 0x95a   :  { %8926 = vmatpush1.bf16.msra.mxu1 %v12625_v41  ;;  %8896 = vmatprep.subr.bf16.mxu0 %v12627_v52 }
 0x95b   :  { %8928 = vmatprep.subr.bf16.mxu1 %v12631_v2 }
 0x95d   :  { %8898 = vmatpush1.bf16.msra.mxu0 %v12637_v57 }
 0x95e   :  { %8930 = vmatpush1.bf16.msra.mxu1 %v12641_v6  ;;  %8900 = vmatprep.subr.bf16.mxu0 %v12643_v60 }
 0x95f   :  { %8932 = vmatprep.subr.bf16.mxu1 %v12647_v63 }
 0x961   :  { %8902 = vmatpush1.bf16.msra.mxu0 %v12653_v54 }
 0x962   :  { %8934 = vmatpush1.bf16.msra.mxu1 %v12657_v21  ;;  %8904 = vmatprep.subr.bf16.mxu0 %v12659_v9 }
 0x963   :  { %8936 = vmatprep.subr.bf16.mxu1 %v12663_v20 }
 0x965   :  { %8906 = vmatpush1.bf16.msra.mxu0 %v12669_v18 }
 0x966   :  { %8938 = vmatpush1.bf16.msra.mxu1 %v12673_v44  ;;  %8908 = vmatprep.subr.bf16.mxu0 %v12675_v27 }
 0x967   :  { %8940 = vmatprep.subr.bf16.mxu1 %v12679_v12 }
 0x969   :  { %8910 = vmatpush1.bf16.msra.mxu0 %v12685_v45 }
 0x96a   :  { %8942 = vmatpush1.bf16.msra.mxu1 %v12689_v8  ;;  %8944 = vmatprep.subr.bf16.mxu0 %v12570_v5 }
 0x96b   :  { %8976 = vmatprep.subr.bf16.mxu1 %v12572_v1 }
 0x9be   :  { %v5024_v61 = vpop.f32.mrb[32].mxu0  ;;  %v5095_v4 = vpop.f32.mrb[32].mxu1 }
 0x9bf   :  { %v9455_v0 = vadd.f32 %v5024_v61, %v4735_v56  ;;  %v5026_v46 = vpop.f32.mrb[33].mxu0  ;;  %v5097_v34 = vpop.f32.mrb[33].mxu1  ;;  %v9457_v43 = vadd.f32 %v5095_v4, %v4743_v13  ;;  %v5270_v4 = vld [vmem:[%s13255_s7] sm:$0xf]  ;;  %s10207_s7 = smov [#allocation16]  }
 0x9c0   :  { %v9456_v55 = vadd.f32 %v5026_v46, %v4739_v39  ;;  %v9458_v29 = vadd.f32 %v5097_v34, %v4747_v38  ;;  %v12752_v46 = vrot.slane %v5270_v4, %v13543_v32  ;;  %v12761_v32 = vrot.slane %v5270_v4, %v13545_v37  ;;  %s7242_s26 = sshll.u32 %s10207_s7, 4  ;;  %s7243_s26 = int_to_ptr.vmem [resolvable:$true] %s7242_s26 }
 0x9c1   :  { %v7356_v49 = vmul.f32 -1.442695, %v9455_v0  ;;  %v12749_v0 = vrot.slane %v5270_v4, %v13542_v33  ;;  %s10140_s17 = scalar_lea.vmem %s7243_s26, 128  ;;  %p10145_p7 = scmp.lt.s32.totalorder %s7243_s26, %s7243_s26 }
 0x9c2   :  { %v7357_v59 = vmul.f32 -1.442695, %v9456_v55  ;;  %v7358_v24 = vmul.f32 -1.442695, %v9458_v29  ;;  %p10141_p6 = scmp.ne.s32.totalorder %s7243_s26, %s10140_s17  ;;  %p10146_p8 = scmp.lt.s32.totalorder %s10140_s17, %s10140_s17 }
 0x9c3   :  { %9860 = vpow2.f32 %v7356_v49 }
 0x9c4   :  { %9862 = vpow2.f32 %v7357_v59  ;;  %p10147_p9 = por %p10146_p8, %p10145_p7 }
 0x9c5   :  { %9864 = vpow2.f32 %v7358_v24 }
 0x9c6   :  { %9866 = vtanh.f32 %v9457_v43  ;;  %v12757_v43 = vrot.slane %v5270_v4, %v13544_v36  ;;  %p10148_p10 = pnand %p10147_p9, %p10141_p6 }
 0x9cd   :  { %v9861_v42 = vpop.eup %9860 }
 0x9ce   :  { %v9863_v7 = vpop.eup %9862  ;;  %v5107_v48 = vadd.f32 1.0, %v9861_v42 }
 0x9cf   :  { %v5113_v22 = vadd.f32 1.0, %v9863_v7  ;;  %v9865_v40 = vpop.eup %9864 }
 0x9d0   :  { %9868 = vrcp.f32 %v5107_v48  ;;  %v9867_v51 = vpop.eup %9866  ;;  %v5120_v53 = vadd.f32 1.0, %v9865_v40 }
 0x9d1   :  { %9870 = vrcp.f32 %v5113_v22 }
 0x9d2   :  { %9872 = vrcp.f32 %v5120_v53 }
 0x9da   :  { %v9869_v30 = vpop.eup %9868 }
 0x9db   :  { %v9871_v31 = vpop.eup %9870  ;;  %v5124_v23 = vmul.f32 %v9869_v30, %v9867_v51 }
 0x9dc   :  { %v5123_v50 = vmul.f32 0.0, %v9871_v31  ;;  %v9873_v17 = vpop.eup %9872 }
 0x9de   :  { %v5125_v56 = vadd.f32 %v5124_v23, %v5123_v50 }
 0x9e0   :  { %9874 = vtanh.f32 %v5125_v56 }
 0x9ea   :  { %v9875_v39 = vpop.eup %9874 }
 0x9eb   :  { %v12743_v61 = vmul.f32 %v9875_v39, %v9873_v17 }
 0xa1f   :  { %v5684_v34 = vpop.f32.mrb[34].mxu0 }
 0xa20   :  { %v9459_v55 = vadd.f32 %v5684_v34, %v12749_v0  ;;  %v5755_v49 = vpop.f32.mrb[34].mxu1  ;;  %v5686_v59 = vpop.f32.mrb[35].mxu0 }
 0xa21   :  { %v9460_v38 = vadd.f32 %v5686_v59, %v12752_v46  ;;  %v5757_v29 = vpop.f32.mrb[35].mxu1  ;;  %v9475_v7 = vadd.f32 %v5755_v49, %v12761_v32 }
 0xa22   :  { %v7359_v13 = vmul.f32 -1.442695, %v9459_v55  ;;  %v9476_v33 = vadd.f32 %v5757_v29, %v12757_v43 }
 0xa23   :  { %v7360_v24 = vmul.f32 -1.442695, %v9460_v38 }
 0xa24   :  { %9876 = vpow2.f32 %v7359_v13  ;;  %v7361_v42 = vmul.f32 -1.442695, %v9476_v33 }
 0xa25   :  { %9878 = vpow2.f32 %v7360_v24 }
 0xa26   :  { %9880 = vpow2.f32 %v7361_v42 }
 0xa27   :  { %9882 = vtanh.f32 %v9475_v7 }
 0xa2e   :  { %v9877_v48 = vpop.eup %9876 }
 0xa2f   :  { %v9879_v22 = vpop.eup %9878  ;;  %v5767_v40 = vadd.f32 1.0, %v9877_v48 }
 0xa30   :  { %v5773_v51 = vadd.f32 1.0, %v9879_v22  ;;  %v9881_v36 = vpop.eup %9880 }
 0xa31   :  { %9884 = vrcp.f32 %v5767_v40  ;;  %v9883_v30 = vpop.eup %9882  ;;  %v5780_v50 = vadd.f32 1.0, %v9881_v36 }
 0xa32   :  { %9886 = vrcp.f32 %v5773_v51 }
 0xa33   :  { %9888 = vrcp.f32 %v5780_v50 }
 0xa3b   :  { %v9885_v31 = vpop.eup %9884 }
 0xa3c   :  { %v9887_v23 = vpop.eup %9886  ;;  %v5784_v53 = vmul.f32 %v9885_v31, %v9883_v30 }
 0xa3d   :  { %v5783_v56 = vmul.f32 0.0, %v9887_v23  ;;  %v9889_v17 = vpop.eup %9888 }
 0xa3f   :  { %v12764_v37 = vadd.f32 %v5784_v53, %v5783_v56 }
 0xa41   :  { %9890 = vtanh.f32 %v12764_v37 }
 0xa4b   :  { %v9891_v39 = vpop.eup %9890 }
 0xa4c   :  { %v5787_v4 = vmul.f32 %v9891_v39, %v9889_v17 }
 0xa4e   :  { %5857 = vmatmul.mubr.f32.vlgmr.msra.gmra.mrb[36].mxu0 %v5787_v4  ;;  %5928 = vmatmul.mubr.f32.vlgmr.msra.gmra.mrb[36].mxu1 %v5787_v4 }
 0xa4f   :  { %8946 = vmatpush1.bf16.msra.mxu0 %v12575_v28  ;;  %8978 = vmatpush1.bf16.msra.mxu1 %v12578_v26 }
 0xa50   :  { %8948 = vmatprep.subr.bf16.mxu0 %v12580_v15  ;;  %8980 = vmatprep.subr.bf16.mxu1 %v12583_v25 }
 0xa51   :  { %6030 = vmatprep.mubr.f32.mxu0 %v13391_v47  ;;  %6101 = vmatprep.mubr.f32.mxu1 %v13391_v47 }
 0xa53   :  { %8950 = vmatpush1.bf16.msra.mxu0 %v12589_v3  ;;  %8982 = vmatpush1.bf16.msra.mxu1 %v12593_v10 }
 0xa54   :  { %8952 = vmatprep.subr.bf16.mxu0 %v12595_v62  ;;  %8984 = vmatprep.subr.bf16.mxu1 %v12599_v14 }
 0xa57   :  { %8954 = vmatpush1.bf16.msra.mxu0 %v12605_v16  ;;  %8986 = vmatpush1.bf16.msra.mxu1 %v12609_v58 }
 0xa58   :  { %8956 = vmatprep.subr.bf16.mxu0 %v12611_v35  ;;  %8988 = vmatprep.subr.bf16.mxu1 %v12615_v11 }
 0xa5b   :  { %8958 = vmatpush1.bf16.msra.mxu0 %v12621_v19  ;;  %8990 = vmatpush1.bf16.msra.mxu1 %v12625_v41 }
 0xa5c   :  { %8960 = vmatprep.subr.bf16.mxu0 %v12627_v52  ;;  %8992 = vmatprep.subr.bf16.mxu1 %v12631_v2 }
 0xa5f   :  { %8962 = vmatpush1.bf16.msra.mxu0 %v12637_v57  ;;  %8994 = vmatpush1.bf16.msra.mxu1 %v12641_v6 }
 0xa60   :  { %8964 = vmatprep.subr.bf16.mxu0 %v12643_v60  ;;  %8996 = vmatprep.subr.bf16.mxu1 %v12647_v63 }
 0xa63   :  { %8966 = vmatpush1.bf16.msra.mxu0 %v12653_v54  ;;  %8998 = vmatpush1.bf16.msra.mxu1 %v12657_v21 }
 0xa64   :  { %8968 = vmatprep.subr.bf16.mxu0 %v12659_v9  ;;  %9000 = vmatprep.subr.bf16.mxu1 %v12663_v20 }
 0xa67   :  { %8970 = vmatpush1.bf16.msra.mxu0 %v12669_v18  ;;  %9002 = vmatpush1.bf16.msra.mxu1 %v12673_v44 }
 0xa68   :  { %8972 = vmatprep.subr.bf16.mxu0 %v12675_v27  ;;  %9004 = vmatprep.subr.bf16.mxu1 %v12679_v12 }
 0xa6b   :  { %8974 = vmatpush1.bf16.msra.mxu0 %v12685_v45  ;;  %9006 = vmatpush1.bf16.msra.mxu1 %v12689_v8 }
 0xa6c   :  { %9008 = vmatprep.subr.bf16.mxu0 %v12570_v5  ;;  %9040 = vmatprep.subr.bf16.mxu1 %v12572_v1 }
 0xb21   :  { %v5858_v34 = vpop.f32.mrb[36].mxu0  ;;  %v5929_v55 = vpop.f32.mrb[36].mxu1 }
 0xb22   :  { %v9461_v49 = vadd.f32 %v5858_v34, %v12749_v0  ;;  %v5860_v59 = vpop.f32.mrb[37].mxu0  ;;  %v5931_v38 = vpop.f32.mrb[37].mxu1  ;;  %v9477_v7 = vadd.f32 %v5929_v55, %v12761_v32 }
 0xb23   :  { %v9462_v29 = vadd.f32 %v5860_v59, %v12752_v46  ;;  %v9478_v33 = vadd.f32 %v5931_v38, %v12757_v43 }
 0xb24   :  { %v7362_v13 = vmul.f32 -1.442695, %v9461_v49 }
 0xb25   :  { %v7363_v24 = vmul.f32 -1.442695, %v9462_v29  ;;  %v7364_v42 = vmul.f32 -1.442695, %v9478_v33 }
 0xb26   :  { %9892 = vpow2.f32 %v7362_v13 }
 0xb27   :  { %9894 = vpow2.f32 %v7363_v24 }
 0xb28   :  { %9896 = vpow2.f32 %v7364_v42 }
 0xb29   :  { %9898 = vtanh.f32 %v9477_v7 }
 0xb30   :  { %v9893_v48 = vpop.eup %9892 }
 0xb31   :  { %v9895_v22 = vpop.eup %9894  ;;  %v5941_v40 = vadd.f32 1.0, %v9893_v48 }
 0xb32   :  { %v5947_v51 = vadd.f32 1.0, %v9895_v22  ;;  %v9897_v36 = vpop.eup %9896 }
 0xb33   :  { %9900 = vrcp.f32 %v5941_v40  ;;  %v9899_v30 = vpop.eup %9898  ;;  %v5954_v50 = vadd.f32 1.0, %v9897_v36 }
 0xb34   :  { %9902 = vrcp.f32 %v5947_v51 }
 0xb35   :  { %9904 = vrcp.f32 %v5954_v50 }
 0xb3d   :  { %v9901_v31 = vpop.eup %9900 }
 0xb3e   :  { %v9903_v23 = vpop.eup %9902  ;;  %v5958_v53 = vmul.f32 %v9901_v31, %v9899_v30 }
 0xb3f   :  { %v5957_v56 = vmul.f32 %v9903_v23, %v12764_v37  ;;  %v9905_v39 = vpop.eup %9904 }
 0xb41   :  { %v12806_v17 = vadd.f32 %v5958_v53, %v5957_v56 }
 0xb43   :  { %9906 = vtanh.f32 %v12806_v17 }
 0xb4d   :  { %v9907_v4 = vpop.eup %9906 }
 0xb4e   :  { %v5961_v34 = vmul.f32 %v9907_v4, %v9905_v39 }
 0xb50   :  { %6031 = vmatmul.mubr.f32.vlgmr.msra.gmra.mrb[38].mxu0 %v5961_v34  ;;  %6102 = vmatmul.mubr.f32.vlgmr.msra.gmra.mrb[38].mxu1 %v5961_v34 }
 0xb51   :  { %9010 = vmatpush1.bf16.msra.mxu0 %v12575_v28  ;;  %9042 = vmatpush1.bf16.msra.mxu1 %v12578_v26 }
 0xb52   :  { %9012 = vmatprep.subr.bf16.mxu0 %v12580_v15  ;;  %9044 = vmatprep.subr.bf16.mxu1 %v12583_v25 }
 0xb53   :  { %6204 = vmatprep.mubr.f32.mxu0 %v13391_v47  ;;  %6275 = vmatprep.mubr.f32.mxu1 %v13391_v47 }
 0xb55   :  { %9014 = vmatpush1.bf16.msra.mxu0 %v12589_v3  ;;  %9046 = vmatpush1.bf16.msra.mxu1 %v12593_v10 }
 0xb56   :  { %9016 = vmatprep.subr.bf16.mxu0 %v12595_v62  ;;  %9048 = vmatprep.subr.bf16.mxu1 %v12599_v14 }
 0xb59   :  { %9018 = vmatpush1.bf16.msra.mxu0 %v12605_v16  ;;  %9050 = vmatpush1.bf16.msra.mxu1 %v12609_v58 }
 0xb5a   :  { %9020 = vmatprep.subr.bf16.mxu0 %v12611_v35  ;;  %9052 = vmatprep.subr.bf16.mxu1 %v12615_v11 }
 0xb5d   :  { %9022 = vmatpush1.bf16.msra.mxu0 %v12621_v19  ;;  %9054 = vmatpush1.bf16.msra.mxu1 %v12625_v41 }
 0xb5e   :  { %9024 = vmatprep.subr.bf16.mxu0 %v12627_v52  ;;  %9056 = vmatprep.subr.bf16.mxu1 %v12631_v2 }
 0xb61   :  { %9026 = vmatpush1.bf16.msra.mxu0 %v12637_v57  ;;  %9058 = vmatpush1.bf16.msra.mxu1 %v12641_v6 }
 0xb62   :  { %9028 = vmatprep.subr.bf16.mxu0 %v12643_v60  ;;  %9060 = vmatprep.subr.bf16.mxu1 %v12647_v63 }
 0xb65   :  { %9030 = vmatpush1.bf16.msra.mxu0 %v12653_v54  ;;  %9062 = vmatpush1.bf16.msra.mxu1 %v12657_v21 }
 0xb66   :  { %9032 = vmatprep.subr.bf16.mxu0 %v12659_v9  ;;  %9064 = vmatprep.subr.bf16.mxu1 %v12663_v20 }
 0xb69   :  { %9034 = vmatpush1.bf16.msra.mxu0 %v12669_v18  ;;  %9066 = vmatpush1.bf16.msra.mxu1 %v12673_v44 }
 0xb6a   :  { %9036 = vmatprep.subr.bf16.mxu0 %v12675_v27  ;;  %9068 = vmatprep.subr.bf16.mxu1 %v12679_v12 }
 0xb6d   :  { %9038 = vmatpush1.bf16.msra.mxu0 %v12685_v45  ;;  %9070 = vmatpush1.bf16.msra.mxu1 %v12689_v8 }
 0xb6e   :  { %9072 = vmatprep.subr.bf16.mxu0 %v12570_v5  ;;  %9104 = vmatprep.subr.bf16.mxu1 %v12572_v1 }
 0xc23   :  { %v6032_v37 = vpop.f32.mrb[38].mxu0  ;;  %v6103_v55 = vpop.f32.mrb[38].mxu1 }
 0xc24   :  { %v9463_v49 = vadd.f32 %v6032_v37, %v12749_v0  ;;  %v6034_v59 = vpop.f32.mrb[39].mxu0  ;;  %v6105_v38 = vpop.f32.mrb[39].mxu1  ;;  %v9479_v7 = vadd.f32 %v6103_v55, %v12761_v32 }
 0xc25   :  { %v9464_v29 = vadd.f32 %v6034_v59, %v12752_v46  ;;  %v9480_v33 = vadd.f32 %v6105_v38, %v12757_v43 }
 0xc26   :  { %v7365_v13 = vmul.f32 -1.442695, %v9463_v49 }
 0xc27   :  { %v7366_v24 = vmul.f32 -1.442695, %v9464_v29  ;;  %v7367_v42 = vmul.f32 -1.442695, %v9480_v33 }
 0xc28   :  { %9908 = vpow2.f32 %v7365_v13 }
 0xc29   :  { %9910 = vpow2.f32 %v7366_v24 }
 0xc2a   :  { %9912 = vpow2.f32 %v7367_v42 }
 0xc2b   :  { %9914 = vtanh.f32 %v9479_v7 }
 0xc32   :  { %v9909_v48 = vpop.eup %9908 }
 0xc33   :  { %v9911_v22 = vpop.eup %9910  ;;  %v6115_v40 = vadd.f32 1.0, %v9909_v48 }
 0xc34   :  { %v6121_v51 = vadd.f32 1.0, %v9911_v22  ;;  %v9913_v36 = vpop.eup %9912 }
 0xc35   :  { %9916 = vrcp.f32 %v6115_v40  ;;  %v9915_v30 = vpop.eup %9914  ;;  %v6128_v50 = vadd.f32 1.0, %v9913_v36 }
 0xc36   :  { %9918 = vrcp.f32 %v6121_v51 }
 0xc37   :  { %9920 = vrcp.f32 %v6128_v50 }
 0xc3f   :  { %v9917_v31 = vpop.eup %9916 }
 0xc40   :  { %v9919_v23 = vpop.eup %9918  ;;  %v6132_v53 = vmul.f32 %v9917_v31, %v9915_v30 }
 0xc41   :  { %v6131_v56 = vmul.f32 %v9919_v23, %v12806_v17  ;;  %v9921_v4 = vpop.eup %9920 }
 0xc43   :  { %v12848_v39 = vadd.f32 %v6132_v53, %v6131_v56 }
 0xc45   :  { %9922 = vtanh.f32 %v12848_v39 }
 0xc4f   :  { %v9923_v34 = vpop.eup %9922 }
 0xc50   :  { %v6135_v37 = vmul.f32 %v9923_v34, %v9921_v4 }
 0xc52   :  { %6205 = vmatmul.mubr.f32.vlgmr.msra.gmra.mrb[40].mxu0 %v6135_v37  ;;  %6276 = vmatmul.mubr.f32.vlgmr.msra.gmra.mrb[40].mxu1 %v6135_v37 }
 0xc53   :  { %9074 = vmatpush1.bf16.msra.mxu0 %v12575_v28  ;;  %9106 = vmatpush1.bf16.msra.mxu1 %v12578_v26 }
 0xc54   :  { %9076 = vmatprep.subr.bf16.mxu0 %v12580_v15  ;;  %9108 = vmatprep.subr.bf16.mxu1 %v12583_v25 }
 0xc55   :  { %6378 = vmatprep.mubr.f32.mxu0 %v13391_v47  ;;  %6449 = vmatprep.mubr.f32.mxu1 %v13391_v47 }
 0xc57   :  { %9078 = vmatpush1.bf16.msra.mxu0 %v12589_v3  ;;  %9110 = vmatpush1.bf16.msra.mxu1 %v12593_v10 }
 0xc58   :  { %9080 = vmatprep.subr.bf16.mxu0 %v12595_v62  ;;  %9112 = vmatprep.subr.bf16.mxu1 %v12599_v14 }
 0xc5b   :  { %9082 = vmatpush1.bf16.msra.mxu0 %v12605_v16  ;;  %9114 = vmatpush1.bf16.msra.mxu1 %v12609_v58 }
 0xc5c   :  { %9084 = vmatprep.subr.bf16.mxu0 %v12611_v35  ;;  %9116 = vmatprep.subr.bf16.mxu1 %v12615_v11 }
 0xc5f   :  { %9086 = vmatpush1.bf16.msra.mxu0 %v12621_v19  ;;  %9118 = vmatpush1.bf16.msra.mxu1 %v12625_v41 }
 0xc60   :  { %9088 = vmatprep.subr.bf16.mxu0 %v12627_v52  ;;  %9120 = vmatprep.subr.bf16.mxu1 %v12631_v2 }
 0xc63   :  { %9090 = vmatpush1.bf16.msra.mxu0 %v12637_v57  ;;  %9122 = vmatpush1.bf16.msra.mxu1 %v12641_v6 }
 0xc64   :  { %9092 = vmatprep.subr.bf16.mxu0 %v12643_v60  ;;  %9124 = vmatprep.subr.bf16.mxu1 %v12647_v63 }
 0xc67   :  { %9094 = vmatpush1.bf16.msra.mxu0 %v12653_v54  ;;  %9126 = vmatpush1.bf16.msra.mxu1 %v12657_v21 }
 0xc68   :  { %9096 = vmatprep.subr.bf16.mxu0 %v12659_v9  ;;  %9128 = vmatprep.subr.bf16.mxu1 %v12663_v20 }
 0xc6b   :  { %9098 = vmatpush1.bf16.msra.mxu0 %v12669_v18  ;;  %9130 = vmatpush1.bf16.msra.mxu1 %v12673_v44 }
 0xc6c   :  { %9100 = vmatprep.subr.bf16.mxu0 %v12675_v27  ;;  %9132 = vmatprep.subr.bf16.mxu1 %v12679_v12 }
 0xc6f   :  { %9102 = vmatpush1.bf16.msra.mxu0 %v12685_v45  ;;  %9134 = vmatpush1.bf16.msra.mxu1 %v12689_v8 }
 0xc70   :  { %9136 = vmatprep.subr.bf16.mxu0 %v12570_v5  ;;  %9168 = vmatprep.subr.bf16.mxu1 %v12572_v1 }
 0xd25   :  { %v6206_v17 = vpop.f32.mrb[40].mxu0  ;;  %v6277_v55 = vpop.f32.mrb[40].mxu1 }
 0xd26   :  { %v9465_v49 = vadd.f32 %v6206_v17, %v12749_v0  ;;  %v6208_v59 = vpop.f32.mrb[41].mxu0  ;;  %v6279_v38 = vpop.f32.mrb[41].mxu1  ;;  %v9481_v7 = vadd.f32 %v6277_v55, %v12761_v32 }
 0xd27   :  { %v9466_v29 = vadd.f32 %v6208_v59, %v12752_v46  ;;  %v9482_v33 = vadd.f32 %v6279_v38, %v12757_v43 }
 0xd28   :  { %v7368_v13 = vmul.f32 -1.442695, %v9465_v49 }
 0xd29   :  { %v7369_v24 = vmul.f32 -1.442695, %v9466_v29  ;;  %v7370_v42 = vmul.f32 -1.442695, %v9482_v33 }
 0xd2a   :  { %9924 = vpow2.f32 %v7368_v13 }
 0xd2b   :  { %9926 = vpow2.f32 %v7369_v24 }
 0xd2c   :  { %9928 = vpow2.f32 %v7370_v42 }
 0xd2d   :  { %9930 = vtanh.f32 %v9481_v7 }
 0xd34   :  { %v9925_v48 = vpop.eup %9924 }
 0xd35   :  { %v9927_v22 = vpop.eup %9926  ;;  %v6289_v40 = vadd.f32 1.0, %v9925_v48 }
 0xd36   :  { %v6295_v51 = vadd.f32 1.0, %v9927_v22  ;;  %v9929_v36 = vpop.eup %9928 }
 0xd37   :  { %9932 = vrcp.f32 %v6289_v40  ;;  %v9931_v30 = vpop.eup %9930  ;;  %v6302_v50 = vadd.f32 1.0, %v9929_v36 }
 0xd38   :  { %9934 = vrcp.f32 %v6295_v51 }
 0xd39   :  { %9936 = vrcp.f32 %v6302_v50 }
 0xd41   :  { %v9933_v31 = vpop.eup %9932 }
 0xd42   :  { %v9935_v23 = vpop.eup %9934  ;;  %v6306_v53 = vmul.f32 %v9933_v31, %v9931_v30 }
 0xd43   :  { %v6305_v56 = vmul.f32 %v9935_v23, %v12848_v39  ;;  %v9937_v34 = vpop.eup %9936 }
 0xd45   :  { %v12890_v4 = vadd.f32 %v6306_v53, %v6305_v56 }
 0xd47   :  { %9938 = vtanh.f32 %v12890_v4 }
 0xd51   :  { %v9939_v37 = vpop.eup %9938 }
 0xd52   :  { %v6309_v17 = vmul.f32 %v9939_v37, %v9937_v34 }
 0xd54   :  { %6379 = vmatmul.mubr.f32.vlgmr.msra.gmra.mrb[42].mxu0 %v6309_v17  ;;  %6450 = vmatmul.mubr.f32.vlgmr.msra.gmra.mrb[42].mxu1 %v6309_v17 }
 0xd55   :  { %9138 = vmatpush1.bf16.msra.mxu0 %v12575_v28  ;;  %9170 = vmatpush1.bf16.msra.mxu1 %v12578_v26 }
 0xd56   :  { %9140 = vmatprep.subr.bf16.mxu0 %v12580_v15  ;;  %9172 = vmatprep.subr.bf16.mxu1 %v12583_v25 }
 0xd57   :  { %6552 = vmatprep.mubr.f32.mxu0 %v13391_v47  ;;  %6623 = vmatprep.mubr.f32.mxu1 %v13391_v47 }
 0xd59   :  { %9142 = vmatpush1.bf16.msra.mxu0 %v12589_v3  ;;  %9174 = vmatpush1.bf16.msra.mxu1 %v12593_v10 }
 0xd5a   :  { %9144 = vmatprep.subr.bf16.mxu0 %v12595_v62  ;;  %9176 = vmatprep.subr.bf16.mxu1 %v12599_v14 }
 0xd5d   :  { %9146 = vmatpush1.bf16.msra.mxu0 %v12605_v16  ;;  %9178 = vmatpush1.bf16.msra.mxu1 %v12609_v58 }
 0xd5e   :  { %9148 = vmatprep.subr.bf16.mxu0 %v12611_v35  ;;  %9180 = vmatprep.subr.bf16.mxu1 %v12615_v11 }
 0xd61   :  { %9150 = vmatpush1.bf16.msra.mxu0 %v12621_v19  ;;  %9182 = vmatpush1.bf16.msra.mxu1 %v12625_v41 }
 0xd62   :  { %9152 = vmatprep.subr.bf16.mxu0 %v12627_v52  ;;  %9184 = vmatprep.subr.bf16.mxu1 %v12631_v2 }
 0xd65   :  { %9154 = vmatpush1.bf16.msra.mxu0 %v12637_v57  ;;  %9186 = vmatpush1.bf16.msra.mxu1 %v12641_v6 }
 0xd66   :  { %9156 = vmatprep.subr.bf16.mxu0 %v12643_v60  ;;  %9188 = vmatprep.subr.bf16.mxu1 %v12647_v63 }
 0xd69   :  { %9158 = vmatpush1.bf16.msra.mxu0 %v12653_v54  ;;  %9190 = vmatpush1.bf16.msra.mxu1 %v12657_v21 }
 0xd6a   :  { %9160 = vmatprep.subr.bf16.mxu0 %v12659_v9  ;;  %9192 = vmatprep.subr.bf16.mxu1 %v12663_v20 }
 0xd6d   :  { %9162 = vmatpush1.bf16.msra.mxu0 %v12669_v18  ;;  %9194 = vmatpush1.bf16.msra.mxu1 %v12673_v44 }
 0xd6e   :  { %9164 = vmatprep.subr.bf16.mxu0 %v12675_v27  ;;  %9196 = vmatprep.subr.bf16.mxu1 %v12679_v12 }
 0xd71   :  { %9166 = vmatpush1.bf16.msra.mxu0 %v12685_v45  ;;  %9198 = vmatpush1.bf16.msra.mxu1 %v12689_v8 }
 0xd72   :  { %9200 = vmatprep.subr.bf16.mxu0 %v12570_v5  ;;  %9232 = vmatprep.subr.bf16.mxu1 %v12572_v1 }
 0xe27   :  { %v6380_v39 = vpop.f32.mrb[42].mxu0  ;;  %v6451_v55 = vpop.f32.mrb[42].mxu1 }
 0xe28   :  { %v9467_v49 = vadd.f32 %v6380_v39, %v12749_v0  ;;  %v6382_v59 = vpop.f32.mrb[43].mxu0  ;;  %v6453_v38 = vpop.f32.mrb[43].mxu1  ;;  %v9483_v7 = vadd.f32 %v6451_v55, %v12761_v32 }
 0xe29   :  { %v9468_v29 = vadd.f32 %v6382_v59, %v12752_v46  ;;  %v9484_v33 = vadd.f32 %v6453_v38, %v12757_v43 }
 0xe2a   :  { %v7371_v13 = vmul.f32 -1.442695, %v9467_v49 }
 0xe2b   :  { %v7372_v24 = vmul.f32 -1.442695, %v9468_v29  ;;  %v7373_v42 = vmul.f32 -1.442695, %v9484_v33 }
 0xe2c   :  { %9940 = vpow2.f32 %v7371_v13 }
 0xe2d   :  { %9942 = vpow2.f32 %v7372_v24 }
 0xe2e   :  { %9944 = vpow2.f32 %v7373_v42 }
 0xe2f   :  { %9946 = vtanh.f32 %v9483_v7 }
 0xe36   :  { %v9941_v48 = vpop.eup %9940 }
 0xe37   :  { %v9943_v22 = vpop.eup %9942  ;;  %v6463_v40 = vadd.f32 1.0, %v9941_v48 }
 0xe38   :  { %v6469_v51 = vadd.f32 1.0, %v9943_v22  ;;  %v9945_v36 = vpop.eup %9944 }
 0xe39   :  { %9948 = vrcp.f32 %v6463_v40  ;;  %v9947_v30 = vpop.eup %9946  ;;  %v6476_v50 = vadd.f32 1.0, %v9945_v36 }
 0xe3a   :  { %9950 = vrcp.f32 %v6469_v51 }
 0xe3b   :  { %9952 = vrcp.f32 %v6476_v50 }
 0xe43   :  { %v9949_v31 = vpop.eup %9948 }
 0xe44   :  { %v9951_v23 = vpop.eup %9950  ;;  %v6480_v53 = vmul.f32 %v9949_v31, %v9947_v30 }
 0xe45   :  { %v6479_v56 = vmul.f32 %v9951_v23, %v12890_v4  ;;  %v9953_v37 = vpop.eup %9952 }
 0xe47   :  { %v12932_v34 = vadd.f32 %v6480_v53, %v6479_v56 }
 0xe49   :  { %9954 = vtanh.f32 %v12932_v34 }
 0xe53   :  { %v9955_v17 = vpop.eup %9954 }
 0xe54   :  { %v6483_v39 = vmul.f32 %v9955_v17, %v9953_v37 }
 0xe56   :  { %6553 = vmatmul.mubr.f32.vlgmr.msra.gmra.mrb[44].mxu0 %v6483_v39  ;;  %6624 = vmatmul.mubr.f32.vlgmr.msra.gmra.mrb[44].mxu1 %v6483_v39 }
 0xe57   :  { %9202 = vmatpush1.bf16.msra.mxu0 %v12575_v28  ;;  %9234 = vmatpush1.bf16.msra.mxu1 %v12578_v26 }
 0xe58   :  { %9204 = vmatprep.subr.bf16.mxu0 %v12580_v15  ;;  %9236 = vmatprep.subr.bf16.mxu1 %v12583_v25 }
 0xe59   :  { %6726 = vmatprep.mubr.f32.mxu0 %v13391_v47  ;;  %6797 = vmatprep.mubr.f32.mxu1 %v13391_v47 }
 0xe5b   :  { %9206 = vmatpush1.bf16.msra.mxu0 %v12589_v3  ;;  %9238 = vmatpush1.bf16.msra.mxu1 %v12593_v10 }
 0xe5c   :  { %9208 = vmatprep.subr.bf16.mxu0 %v12595_v62  ;;  %9240 = vmatprep.subr.bf16.mxu1 %v12599_v14 }
 0xe5f   :  { %9210 = vmatpush1.bf16.msra.mxu0 %v12605_v16  ;;  %9242 = vmatpush1.bf16.msra.mxu1 %v12609_v58 }
 0xe60   :  { %9212 = vmatprep.subr.bf16.mxu0 %v12611_v35  ;;  %9244 = vmatprep.subr.bf16.mxu1 %v12615_v11 }
 0xe63   :  { %9214 = vmatpush1.bf16.msra.mxu0 %v12621_v19  ;;  %9246 = vmatpush1.bf16.msra.mxu1 %v12625_v41 }
 0xe64   :  { %9216 = vmatprep.subr.bf16.mxu0 %v12627_v52  ;;  %9248 = vmatprep.subr.bf16.mxu1 %v12631_v2 }
 0xe67   :  { %9218 = vmatpush1.bf16.msra.mxu0 %v12637_v57  ;;  %9250 = vmatpush1.bf16.msra.mxu1 %v12641_v6 }
 0xe68   :  { %9220 = vmatprep.subr.bf16.mxu0 %v12643_v60  ;;  %9252 = vmatprep.subr.bf16.mxu1 %v12647_v63 }
 0xe6b   :  { %9222 = vmatpush1.bf16.msra.mxu0 %v12653_v54  ;;  %9254 = vmatpush1.bf16.msra.mxu1 %v12657_v21 }
 0xe6c   :  { %9224 = vmatprep.subr.bf16.mxu0 %v12659_v9  ;;  %9256 = vmatprep.subr.bf16.mxu1 %v12663_v20 }
 0xe6f   :  { %9226 = vmatpush1.bf16.msra.mxu0 %v12669_v18  ;;  %9258 = vmatpush1.bf16.msra.mxu1 %v12673_v44 }
 0xe70   :  { %9228 = vmatprep.subr.bf16.mxu0 %v12675_v27  ;;  %9260 = vmatprep.subr.bf16.mxu1 %v12679_v12 }
 0xe73   :  { %9230 = vmatpush1.bf16.msra.mxu0 %v12685_v45  ;;  %9262 = vmatpush1.bf16.msra.mxu1 %v12689_v8 }
 0xe74   :  { %9264 = vmatprep.subr.bf16.mxu0 %v12570_v5  ;;  %9296 = vmatprep.subr.bf16.mxu1 %v12572_v1 }
 0xf29   :  { %v6554_v4 = vpop.f32.mrb[44].mxu0  ;;  %v6625_v55 = vpop.f32.mrb[44].mxu1 }
 0xf2a   :  { %v9469_v49 = vadd.f32 %v6554_v4, %v12749_v0  ;;  %v6556_v59 = vpop.f32.mrb[45].mxu0  ;;  %v6627_v38 = vpop.f32.mrb[45].mxu1  ;;  %v9485_v7 = vadd.f32 %v6625_v55, %v12761_v32  ;;  %v7117_v55 = vld [vmem:[%s13261_s13] sm:$0xff] }
 0xf2b   :  { %v9470_v29 = vadd.f32 %v6556_v59, %v12752_v46  ;;  %v9486_v33 = vadd.f32 %v6627_v38, %v12757_v43  ;;  %v7024_v38 = vld [vmem:[%s13259_s11 + $0x90] sm:$0xff] }
 0xf2c   :  { %v7374_v13 = vmul.f32 -1.442695, %v9469_v49  ;;  %v7118_v49 = vld [vmem:[%s13261_s13 + $0x8] sm:$0xff] }
 0xf2d   :  { %v7375_v24 = vmul.f32 -1.442695, %v9470_v29  ;;  %v7376_v42 = vmul.f32 -1.442695, %v9486_v33  ;;  %v9361_v59 = vpack.c.bf16 %v7118_v49, %v7117_v55  ;;  %v7025_v29 = vld [vmem:[%s13259_s11 + $0x98] sm:$0xff]  ;;  %v7127_v49 = vld [vmem:[%s13261_s13 + $0x50] sm:$0xff] }
 0xf2e   :  { %9956 = vpow2.f32 %v7374_v13  ;;  %v7135_v13 = vld [vmem:[%s13261_s13 + $0x90] sm:$0xff]  ;;  %v7136_v33 = vld [vmem:[%s13261_s13 + $0x98] sm:$0xff] }
 0xf2f   :  { %9958 = vpow2.f32 %v7375_v24  ;;  %v9331_v24 = vpack.c.bf16 %v7025_v29, %v7024_v38  ;;  %v7034_v38 = vld [vmem:[%s13259_s11 + $0xe0] sm:$0xff] }
 0xf30   :  { %9960 = vpow2.f32 %v7376_v42  ;;  %v7008_v42 = vld [vmem:[%s13259_s11 + $0x10] sm:$0xff] }
 0xf31   :  { %9962 = vtanh.f32 %v9485_v7  ;;  %v7009_v7 = vld [vmem:[%s13259_s11 + $0x18] sm:$0xff] }
 0xf38   :  { %v9957_v5 = vpop.eup %9956 }
 0xf39   :  { %v9959_v48 = vpop.eup %9958  ;;  %v6637_v1 = vadd.f32 1.0, %v9957_v5  ;;  %v9363_v5 = vpack.c.bf16 %v7136_v33, %v7135_v13  ;;  %v7035_v13 = vld [vmem:[%s13259_s11 + $0xe8] sm:$0xff] }
 0xf3a   :  { %v6643_v22 = vadd.f32 1.0, %v9959_v48  ;;  %v9961_v40 = vpop.eup %9960  ;;  %v9333_v48 = vpack.c.bf16 %v7009_v7, %v7008_v42  ;;  %v7146_v33 = vld [vmem:[%s13261_s13 + $0xe8] sm:$0xff]  ;;  %v9351_v42 = vpack.c.bf16 %v7035_v13, %v7034_v38 }
 0xf3b   :  { %9964 = vrcp.f32 %v6637_v1  ;;  %v9963_v51 = vpop.eup %9962  ;;  %v6650_v23 = vadd.f32 1.0, %v9961_v40  ;;  %v7119_v1 = vld [vmem:[%s13261_s13 + $0x10] sm:$0xff] }
 0xf3c   :  { %9966 = vrcp.f32 %v6643_v22  ;;  %v7120_v22 = vld [vmem:[%s13261_s13 + $0x18] sm:$0xff] }
 0xf3d   :  { %9968 = vrcp.f32 %v6650_v23  ;;  %v9365_v40 = vpack.c.bf16 %v7120_v22, %v7119_v1  ;;  %v7138_v23 = vld [vmem:[%s13261_s13 + $0xa8] sm:$0xff]  ;;  %v7129_v1 = vld [vmem:[%s13261_s13 + $0x60] sm:$0xff] }
 0xf45   :  { %v9965_v36 = vpop.eup %9964 }
 0xf46   :  { %v9967_v30 = vpop.eup %9966  ;;  %v6654_v31 = vmul.f32 %v9965_v36, %v9963_v51  ;;  %v7026_v51 = vld [vmem:[%s13259_s11 + $0xa0] sm:$0xff]  ;;  %v7027_v36 = vld [vmem:[%s13259_s11 + $0xa8] sm:$0xff] }
 0xf47   :  { %v6653_v53 = vmul.f32 %v9967_v30, %v12932_v34  ;;  %v9969_v56 = vpop.eup %9968  ;;  %v7007_v34 = vld [vmem:[%s13259_s11 + $0x8] sm:$0xff]  ;;  %v7137_v30 = vld [vmem:[%s13261_s13 + $0xa0] sm:$0xff] }
 0xf49   :  { %v12974_v50 = vadd.f32 %v6654_v31, %v6653_v53  ;;  %v9335_v31 = vpack.c.bf16 %v7027_v36, %v7026_v51  ;;  %v7010_v53 = vld [vmem:[%s13259_s11 + $0x20] sm:$0xff]  ;;  %v7036_v51 = vld [vmem:[%s13259_s11 + $0xf0] sm:$0xff]  ;;  %v7037_v36 = vld [vmem:[%s13259_s11 + $0xf8] sm:$0xff] }
 0xf4b   :  { %9970 = vtanh.f32 %v12974_v50 }
 0xf55   :  { %v9971_v37 = vpop.eup %9970 }
 0xf56   :  { %v6657_v17 = vmul.f32 %v9971_v37, %v9969_v56  ;;  %v9367_v56 = vpack.c.bf16 %v7138_v23, %v7137_v30  ;;  %v7147_v23 = vld [vmem:[%s13261_s13 + $0xf0] sm:$0xff] }
 0xf58   :  { %6727 = vmatmul.mubr.f32.vlgmr.msra.gmra.mrb[46].mxu0 %v6657_v17  ;;  %6798 = vmatmul.mubr.f32.vlgmr.msra.gmra.mrb[46].mxu1 %v6657_v17  ;;  %v7121_v17 = vld [vmem:[%s13261_s13 + $0x20] sm:$0xff] }
 0xf59   :  { %9266 = vmatpush1.bf16.msra.mxu0 %v12575_v28  ;;  %9298 = vmatpush1.bf16.msra.mxu1 %v12578_v26 }
 0xf5a   :  { %9268 = vmatprep.subr.bf16.mxu0 %v12580_v15  ;;  %9300 = vmatprep.subr.bf16.mxu1 %v12583_v25 }
 0xf5b   :  { %6900 = vmatprep.mubr.f32.mxu0 %v13391_v47  ;;  %6971 = vmatprep.mubr.f32.mxu1 %v13391_v47 }
 0xf5d   :  { %9270 = vmatpush1.bf16.msra.mxu0 %v12589_v3  ;;  %9302 = vmatpush1.bf16.msra.mxu1 %v12593_v10 }
 0xf5e   :  { %9272 = vmatprep.subr.bf16.mxu0 %v12595_v62  ;;  %9304 = vmatprep.subr.bf16.mxu1 %v12599_v14 }
 0xf61   :  { %9274 = vmatpush1.bf16.msra.mxu0 %v12605_v16  ;;  %9306 = vmatpush1.bf16.msra.mxu1 %v12609_v58 }
 0xf62   :  { %9276 = vmatprep.subr.bf16.mxu0 %v12611_v35  ;;  %9308 = vmatprep.subr.bf16.mxu1 %v12615_v11 }
 0xf65   :  { %9278 = vmatpush1.bf16.msra.mxu0 %v12621_v19  ;;  %9310 = vmatpush1.bf16.msra.mxu1 %v12625_v41 }
 0xf66   :  { %9280 = vmatprep.subr.bf16.mxu0 %v12627_v52  ;;  %9312 = vmatprep.subr.bf16.mxu1 %v12631_v2 }
 0xf69   :  { %9282 = vmatpush1.bf16.msra.mxu0 %v12637_v57  ;;  %9314 = vmatpush1.bf16.msra.mxu1 %v12641_v6 }
 0xf6a   :  { %9284 = vmatprep.subr.bf16.mxu0 %v12643_v60  ;;  %9316 = vmatprep.subr.bf16.mxu1 %v12647_v63 }
 0xf6d   :  { %9286 = vmatpush1.bf16.msra.mxu0 %v12653_v54  ;;  %9318 = vmatpush1.bf16.msra.mxu1 %v12657_v21 }
 0xf6e   :  { %9288 = vmatprep.subr.bf16.mxu0 %v12659_v9  ;;  %9320 = vmatprep.subr.bf16.mxu1 %v12663_v20 }
 0xf71   :  { %9290 = vmatpush1.bf16.msra.mxu0 %v12669_v18  ;;  %9322 = vmatpush1.bf16.msra.mxu1 %v12673_v44  ;;  %v7022_v44 = vld [vmem:[%s13259_s11 + $0x80] sm:$0xff] }
 0xf72   :  { %9292 = vmatprep.subr.bf16.mxu0 %v12675_v27  ;;  %9324 = vmatprep.subr.bf16.mxu1 %v12679_v12  ;;  %v7023_v27 = vld [vmem:[%s13259_s11 + $0x88] sm:$0xff]  ;;  %v7133_v12 = vld [vmem:[%s13261_s13 + $0x80] sm:$0xff] }
 0xf75   :  { %9294 = vmatpush1.bf16.msra.mxu0 %v12685_v45  ;;  %9326 = vmatpush1.bf16.msra.mxu1 %v12689_v8  ;;  %v9327_v45 = vpack.c.bf16 %v7023_v27, %v7022_v44  ;;  %v7134_v8 = vld [vmem:[%s13261_s13 + $0x88] sm:$0xff]  ;;  %v7032_v27 = vld [vmem:[%s13259_s11 + $0xd0] sm:$0xff] }
 0xf76   :  { %v9359_v39 = vpack.c.bf16 %v7134_v8, %v7133_v12  ;;  %v7033_v12 = vld [vmem:[%s13259_s11 + $0xd8] sm:$0xff] }
 0xf77   :  { %9328 = vmatprep.subr.bf16.mxu0 %v9327_v45  ;;  %v7143_v45 = vld [vmem:[%s13261_s13 + $0xd0] sm:$0xff]  ;;  %v9347_v8 = vpack.c.bf16 %v7033_v12, %v7032_v27  ;;  %v7383_v12 = vld [vmem:[%s13260_s12] ss:$0 sm:$0xff] }
 0xf78   :  { %9360 = vmatprep.subr.bf16.mxu1 %v9359_v39  ;;  %v7017_v39 = vld [vmem:[%s13259_s11 + $0x58] sm:$0xff] }
0x102b   :  { %v6728_v47 = vpop.f32.mrb[46].mxu0  ;;  %v6799_v28 = vpop.f32.mrb[46].mxu1 }
0x102c   :  { %v9471_v26 = vadd.f32 %v6728_v47, %v12749_v0  ;;  %v6730_v15 = vpop.f32.mrb[47].mxu0  ;;  %v6801_v25 = vpop.f32.mrb[47].mxu1  ;;  %v9487_v58 = vadd.f32 %v6799_v28, %v12761_v32  ;;  %v7122_v47 = vld [vmem:[%s13261_s13 + $0x28] sm:$0xff] }
0x102d   :  { %v9472_v3 = vadd.f32 %v6730_v15, %v12752_v46  ;;  %v9488_v14 = vadd.f32 %v6801_v25, %v12757_v43  ;;  %v9369_v28 = vpack.c.bf16 %v7122_v47, %v7121_v17  ;;  %v7029_v15 = vld [vmem:[%s13259_s11 + $0xb8] sm:$0xff]  ;;  %v7139_v25 = vld [vmem:[%s13261_s13 + $0xb0] sm:$0xff] }
0x102e   :  { %v7377_v10 = vmul.f32 -1.442695, %v9471_v26  ;;  %v7028_v26 = vld [vmem:[%s13259_s11 + $0xb0] sm:$0xff]  ;;  %v7132_v47 = vld [vmem:[%s13261_s13 + $0x78] sm:$0xff] }
0x102f   :  { %v7378_v62 = vmul.f32 -1.442695, %v9472_v3  ;;  %v7379_v16 = vmul.f32 -1.442695, %v9488_v14  ;;  %v9339_v3 = vpack.c.bf16 %v7029_v15, %v7028_v26  ;;  %v7013_v14 = vld [vmem:[%s13259_s11 + $0x38] sm:$0xff]  ;;  %v7131_v17 = vld [vmem:[%s13261_s13 + $0x70] sm:$0xff] }
0x1030   :  { %9972 = vpow2.f32 %v7377_v10  ;;  %v7140_v10 = vld [vmem:[%s13261_s13 + $0xb8] sm:$0xff]  ;;  %v9389_v26 = vpack.c.bf16 %v7132_v47, %v7131_v17 }
0x1031   :  { %9974 = vpow2.f32 %v7378_v62  ;;  %v7012_v62 = vld [vmem:[%s13259_s11 + $0x30] sm:$0xff] }
0x1032   :  { %9976 = vpow2.f32 %v7379_v16  ;;  %v9371_v16 = vpack.c.bf16 %v7140_v10, %v7139_v25 }
0x1033   :  { %9978 = vtanh.f32 %v9487_v58  ;;  %v9341_v58 = vpack.c.bf16 %v7013_v14, %v7012_v62 }
0x103a   :  { %v9973_v35 = vpop.eup %9972 }
0x103b   :  { %v9975_v11 = vpop.eup %9974  ;;  %v6811_v19 = vadd.f32 1.0, %v9973_v35  ;;  %v7123_v35 = vld [vmem:[%s13261_s13 + $0x30] sm:$0xff] }
0x103c   :  { %v6817_v41 = vadd.f32 1.0, %v9975_v11  ;;  %v9977_v52 = vpop.eup %9976  ;;  %v7124_v11 = vld [vmem:[%s13261_s13 + $0x38] sm:$0xff] }
0x103d   :  { %9980 = vrcp.f32 %v6811_v19  ;;  %v9979_v2 = vpop.eup %9978  ;;  %v6824_v63 = vadd.f32 1.0, %v9977_v52  ;;  %v9373_v19 = vpack.c.bf16 %v7124_v11, %v7123_v35  ;;  %v7031_v52 = vld [vmem:[%s13259_s11 + $0xc8] sm:$0xff] }
0x103e   :  { %9982 = vrcp.f32 %v6817_v41  ;;  %v7030_v41 = vld [vmem:[%s13259_s11 + $0xc0] sm:$0xff] }
0x103f   :  { %9984 = vrcp.f32 %v6824_v63  ;;  %v7015_v63 = vld [vmem:[%s13259_s11 + $0x48] sm:$0xff] }
0x1047   :  { %v9981_v57 = vpop.eup %9980 }
0x1048   :  { %v9983_v6 = vpop.eup %9982  ;;  %v6828_v60 = vmul.f32 %v9981_v57, %v9979_v2  ;;  %v7141_v2 = vld [vmem:[%s13261_s13 + $0xc0] sm:$0xff]  ;;  %v9343_v57 = vpack.c.bf16 %v7031_v52, %v7030_v41 }
0x1049   :  { %v6827_v54 = vmul.f32 %v9983_v6, %v12974_v50  ;;  %v9985_v9 = vpop.eup %9984  ;;  %v7011_v50 = vld [vmem:[%s13259_s11 + $0x28] sm:$0xff] }
0x104a   :  { %v9337_v37 = vpack.c.bf16 %v7011_v50, %v7010_v53  ;;  %v7142_v6 = vld [vmem:[%s13261_s13 + $0xc8] sm:$0xff]  ;;  %v7148_v53 = vld [vmem:[%s13261_s13 + $0xf8] sm:$0xff]  ;;  %v7020_v50 = vld [vmem:[%s13259_s11 + $0x70] sm:$0xff] }
0x104b   :  { %v13014_v21 = vadd.f32 %v6828_v60, %v6827_v54  ;;  %v7014_v60 = vld [vmem:[%s13259_s11 + $0x40] sm:$0xff]  ;;  %v9375_v54 = vpack.c.bf16 %v7142_v6, %v7141_v2 }
0x104d   :  { %9986 = vtanh.f32 %v13014_v21 }
0x1057   :  { %v9987_v20 = vpop.eup %9986 }
0x1058   :  { %v6831_v18 = vmul.f32 %v9987_v20, %v9985_v9  ;;  %v9345_v9 = vpack.c.bf16 %v7015_v63, %v7014_v60  ;;  %v7125_v20 = vld [vmem:[%s13261_s13 + $0x40] sm:$0xff] }
0x105a   :  { %6901 = vmatmul.mubr.f32.vlgmr.msra.gmra.mrb[48].mxu0 %v6831_v18  ;;  %6972 = vmatmul.mubr.f32.vlgmr.msra.gmra.mrb[48].mxu1 %v6831_v18  ;;  %v7126_v18 = vld [vmem:[%s13261_s13 + $0x48] sm:$0xff] }
0x105b   :  { %7109 = vmatprep.mubr.f32.mxu0 %v12743_v61  ;;  %7220 = vmatprep.mubr.f32.mxu1 %v12743_v61  ;;  %v7006_v61 = vld [vmem:[%s13259_s11] sm:$0xff]  ;;  %v9377_v44 = vpack.c.bf16 %v7126_v18, %v7125_v20 }
0x105c   :  { %v9329_v4 = vpack.c.bf16 %v7007_v34, %v7006_v61  ;;  %9362 = vmatpush3.bf16.msra.mxu1 %v9361_v59  ;;  %v7144_v61 = vld [vmem:[%s13261_s13 + $0xd8] sm:$0xff]  ;;  %v7016_v34 = vld [vmem:[%s13259_s11 + $0x50] sm:$0xff] }
0x105d   :  { %9364 = vmatprep.subr.bf16.mxu1 %v9363_v5  ;;  %v9349_v55 = vpack.c.bf16 %v7017_v39, %v7016_v34  ;;  %v7128_v59 = vld [vmem:[%s13261_s13 + $0x58] sm:$0xff]  ;;  %v7018_v5 = vld [vmem:[%s13259_s11 + $0x60] sm:$0xff] }
0x105e   :  { %9330 = vmatpush3.bf16.msra.mxu0 %v9329_v4  ;;  %v9379_v4 = vpack.c.bf16 %v7144_v61, %v7143_v45  ;;  %v9381_v29 = vpack.c.bf16 %v7128_v59, %v7127_v49 }
0x105f   :  { %9332 = vmatprep.subr.bf16.mxu0 %v9331_v24  ;;  %v7145_v24 = vld [vmem:[%s13261_s13 + $0xe0] sm:$0xff] }
0x1060   :  { %9366 = vmatpush3.bf16.msra.mxu1 %v9365_v40  ;;  %v9383_v7 = vpack.c.bf16 %v7146_v33, %v7145_v24  ;;  %v7130_v40 = vld [vmem:[%s13261_s13 + $0x68] sm:$0xff] }
0x1061   :  { %9368 = vmatprep.subr.bf16.mxu1 %v9367_v56  ;;  %v9385_v30 = vpack.c.bf16 %v7130_v40, %v7129_v1  ;;  %v9387_v56 = vpack.c.bf16 %v7148_v53, %v7147_v23 }
0x1062   :  { %9334 = vmatpush3.bf16.msra.mxu0 %v9333_v48  ;;  %v7019_v48 = vld [vmem:[%s13259_s11 + $0x68] sm:$0xff] }
0x1063   :  { %9336 = vmatprep.subr.bf16.mxu0 %v9335_v31  ;;  %v9353_v22 = vpack.c.bf16 %v7019_v48, %v7018_v5  ;;  %v9355_v31 = vpack.c.bf16 %v7037_v36, %v7036_v51 }
0x1064   :  { %9370 = vmatpush3.bf16.msra.mxu1 %v9369_v28 }
0x1065   :  { %9372 = vmatprep.subr.bf16.mxu1 %v9371_v16 }
0x1066   :  { %9338 = vmatpush3.bf16.msra.mxu0 %v9337_v37  ;;  %v7021_v37 = vld [vmem:[%s13259_s11 + $0x78] sm:$0xff] }
0x1067   :  { %9340 = vmatprep.subr.bf16.mxu0 %v9339_v3  ;;  %v9357_v28 = vpack.c.bf16 %v7021_v37, %v7020_v50 }
0x1068   :  { %9374 = vmatpush3.bf16.msra.mxu1 %v9373_v19 }
0x1069   :  { %9376 = vmatprep.subr.bf16.mxu1 %v9375_v54 }
0x106a   :  { %9342 = vmatpush3.bf16.msra.mxu0 %v9341_v58 }
0x106b   :  { %9344 = vmatprep.subr.bf16.mxu0 %v9343_v57 }
0x106c   :  { %9378 = vmatpush3.bf16.msra.mxu1 %v9377_v44 }
0x106d   :  { %9380 = vmatprep.subr.bf16.mxu1 %v9379_v4 }
0x106e   :  { %9346 = vmatpush3.bf16.msra.mxu0 %v9345_v9 }
0x106f   :  { %9348 = vmatprep.subr.bf16.mxu0 %v9347_v8  ;;  %v7384_v8 = vld [vmem:[%s13262_s14] ss:$0 sm:$0xff] }
0x1070   :  { %9382 = vmatpush3.bf16.msra.mxu1 %v9381_v29 }
0x1071   :  { %9384 = vmatprep.subr.bf16.mxu1 %v9383_v7 }
0x1072   :  { %9350 = vmatpush3.bf16.msra.mxu0 %v9349_v55 }
0x1073   :  { %9352 = vmatprep.subr.bf16.mxu0 %v9351_v42 }
0x1074   :  { %9386 = vmatpush3.bf16.msra.mxu1 %v9385_v30 }
0x1075   :  { %9388 = vmatprep.subr.bf16.mxu1 %v9387_v56 }
0x1076   :  { %9354 = vmatpush3.bf16.msra.mxu0 %v9353_v22 }
0x1077   :  { %9356 = vmatprep.subr.bf16.mxu0 %v9355_v31 }
0x1078   :  { %9390 = vmatpush3.bf16.msra.mxu1 %v9389_v26 }
0x107a   :  { %9358 = vmatpush3.bf16.msra.mxu0 %v9357_v28 }
0x112d   :  { %v6902_v15 = vpop.f32.mrb[48].mxu0  ;;  %v6973_v25 = vpop.f32.mrb[48].mxu1 }
0x112e   :  { %v9473_v3 = vadd.f32 %v6902_v15, %v12749_v0  ;;  %v6904_v10 = vpop.f32.mrb[49].mxu0  ;;  %v6975_v62 = vpop.f32.mrb[49].mxu1  ;;  %v9489_v19 = vadd.f32 %v6973_v25, %v12761_v32 }
0x112f   :  { %v9474_v14 = vadd.f32 %v6904_v10, %v12752_v46  ;;  %v9490_v35 = vadd.f32 %v6975_v62, %v12757_v43 }
0x1130   :  { %v7380_v16 = vmul.f32 -1.442695, %v9473_v3 }
0x1131   :  { %v7381_v58 = vmul.f32 -1.442695, %v9474_v14  ;;  %v7382_v11 = vmul.f32 -1.442695, %v9490_v35 }
0x1132   :  { %9988 = vpow2.f32 %v7380_v16 }
0x1133   :  { %9990 = vpow2.f32 %v7381_v58 }
0x1134   :  { %9992 = vpow2.f32 %v7382_v11 }
0x1135   :  { %9994 = vtanh.f32 %v9489_v19 }
0x113c   :  { %v9989_v41 = vpop.eup %9988 }
0x113d   :  { %v9991_v52 = vpop.eup %9990  ;;  %v6985_v2 = vadd.f32 1.0, %v9989_v41 }
0x113e   :  { %v6991_v57 = vadd.f32 1.0, %v9991_v52  ;;  %v9993_v0 = vpop.eup %9992 }
0x113f   :  { %9996 = vrcp.f32 %v6985_v2  ;;  %v9995_v6 = vpop.eup %9994  ;;  %v6998_v54 = vadd.f32 1.0, %v9993_v0 }
0x1140   :  { %9998 = vrcp.f32 %v6991_v57 }
0x1141   :  { %10000 = vrcp.f32 %v6998_v54 }
0x1149   :  { %v9997_v46 = vpop.eup %9996 }
0x114a   :  { %v9999_v60 = vpop.eup %9998  ;;  %v7002_v63 = vmul.f32 %v9997_v46, %v9995_v6 }
0x114b   :  { %v7001_v9 = vmul.f32 %v9999_v60, %v13014_v21  ;;  %v10001_v32 = vpop.eup %10000 }
0x114d   :  { %v7003_v43 = vadd.f32 %v7002_v63, %v7001_v9 }
0x114f   :  { %10002 = vtanh.f32 %v7003_v43 }
0x1159   :  { %v10003_v20 = vpop.eup %10002 }
0x115a   :  { %v7005_v18 = vmul.f32 %v10003_v20, %v10001_v32 }
0x115c   :  { %7110 = vmatmul.mubr.f32.vlgmr.msra.gmra.mrb[50].mxu0 %v7005_v18  ;;  %7221 = vmatmul.mubr.f32.vlgmr.msra.gmra.mrb[50].mxu1 %v7005_v18 }
0x122f   :  { %v7417_v44 = vpop.f32.mrb[50].mxu0  ;;  %v7452_v27 = vpop.f32.mrb[50].mxu1 }
0x1230   :  { %v7418_v45 = vpop.f32.mrb[51].mxu0  ;;  %v7453_v21 = vpop.f32.mrb[51].mxu1 }
0x1231   :  { %v7419_v61 = vadd.f32 %v7418_v45, %v7417_v44  ;;  %v7454_v34 = vadd.f32 %v7453_v21, %v7452_v27 }
0x1233   :  { %v7112_v39 = vadd.f32 %v7419_v61, %v7383_v12  ;;  %v7223_v4 = vadd.f32 %v7454_v34, %v7384_v8 }
0x1235   :  { %v7227_v55 = vand.u32 2147483647, %v7223_v4  ;;  %7116 = vst.msk [vmem:[#allocation16] sm:$0xff] %vm7115_vm2, %v7112_v39 }
0x1236   :  { %10151 = shalt.err (!%p10148_p10)
}
0x1237   :  { %s10152_s27 = scalar_lea.hbm %s13263_s15, 128 }
0x1238   :  { %p10153_p11 = scmp.ne.s32.totalorder %s13263_s15, %s10152_s27  ;;  %p10156_p12 = scmp.lt.u32.totalorder %s10152_s27, %s13263_s15 }
0x123a   :  { %p10158_p13 = pnand %p10156_p12, %p10153_p11 }
0x123c   :  { %10161 = shalt.err (!%p10158_p13)
}
0x123d   :  { %7245 = dma.vmem_to_hbm [thread:$0]  %s7243_s26, 128, %s13263_s15, [#allocation7]   ;;  %v7228_v49 = vsub.f32 0.0, %v7227_v55  ;;  %v7226_v24 = vmax.f32 %v7223_v4, 0.0 }
0x123e   :  { %s10208_s29 = smov [#allocation17]  }
0x123f   :  { %v7229_v59 = vmul.f32 1.442695, %v7228_v49  ;;  %s7252_s30 = sshll.u32 %s10208_s29, 4  ;;  %s7253_s30 = int_to_ptr.vmem [resolvable:$true] %s7252_s30 }
0x1240   :  { %s10162_s8 = scalar_lea.vmem %s7253_s30, 128  ;;  %p10167_p1 = scmp.lt.s32.totalorder %s7253_s30, %s7253_s30 }
0x1241   :  { %10004 = vpow2.f32 %v7229_v59  ;;  %p10163_p0 = scmp.ne.s32.totalorder %s7253_s30, %s10162_s8  ;;  %p10168_p2 = scmp.lt.s32.totalorder %s10162_s8, %s10162_s8 }
0x1243   :  { %p10169_p3 = por %p10168_p2, %p10167_p1 }
0x1245   :  { %p10170_p4 = pnand %p10169_p3, %p10163_p0 }
0x124b   :  { %v10005_v38 = vpop.eup %10004 }
0x124c   :  { %v7231_v29 = vadd.f32 1.0, %v10005_v38 }
0x124e   :  { %10006 = vlog2.f32 %v7231_v29 }
0x1258   :  { %v10007_v13 = vpop.eup %10006 }
0x1259   :  { %v7233_v33 = vmul.f32 0.6931472, %v10007_v13 }
0x125b   :  { %v7234_v42 = vadd.f32 %v7233_v33, %v7226_v24 }
0x125d   :  { %7235 = vst.msk [vmem:[#allocation17] sm:$0xff] %vm7115_vm2, %v7234_v42 }
0x125e   :  { %10173 = shalt.err (!%p10170_p4)
}
0x125f   :  { %s13546_s9 = sld [smem:[#allocation62_spill]] }
0x1265   :  { %s10174_s0 = scalar_lea.hbm %s13546_s9, 128 }
0x1266   :  { %p10175_p5 = scmp.ne.s32.totalorder %s13546_s9, %s10174_s0  ;;  %p10178_p6 = scmp.lt.u32.totalorder %s10174_s0, %s13546_s9 }
0x1268   :  { %p10180_p7 = pnand %p10178_p6, %p10175_p5 }
0x126a   :  { %10183 = shalt.err (!%p10180_p7)
}
0x126b   :  { %7255 = dma.vmem_to_hbm [thread:$0]  %s7253_s30, 128, %s13546_s9, [#allocation18]  }
0x126c   :  { %10192 = dma.done.wait [#allocation7], 128  }
0x126d   :  { %10193 = vsyncadd [#allocation7], 4294967168 }
0x126e   :  { %10194 = dma.done.wait [#allocation18], 128  }
0x126f   :  { %10195 = vsyncadd [#allocation18], 4294967168 }
0x1270   :  { %7262 = vsyncpa [#allocation6], 1 }
0x1271   :  { %7263 = vsyncpa [#allocation9], 1 }
0x1272   :  { %7264 = vsyncpa [#allocation12], 1 }
0x1273   :  { %7265 = vsyncpa [#allocation15], 1 }
0x1274   :  { %7266 = vsyncpa [#allocation7], 1 }
0x1275   :  { %7267 = vsyncpa [#allocation18], 1 }

</bundles_post_ra>
